<compile_context>
chip_gen: v7x
topology: tpu7x:2x2x1
jax: 0.10.0
libtpu: 0.0.40
codegen_flags: <defaults>
</compile_context>

<pallas_src>
import functools

import numpy as np
import jax
import jax.numpy as jnp
from jax import lax
from jax.experimental import pallas as pl
from jax.experimental.pallas import tpu as pltpu


# ----------------------------- in-kernel helpers -----------------------------

def _erf(x):
    # Abramowitz & Stegun 7.1.26 rational approximation (|err| < ~1.5e-7).
    # Exact divide here (the ~12-bit EUP approx would cost ~1e-4 GELU error).
    sign = jnp.where(x >= 0.0, 1.0, -1.0)
    a = jnp.abs(x)
    t = 1.0 / (1.0 + 0.3275911 * a)
    poly = t * (0.254829592 + t * (-0.284496736 + t * (1.421413741
             + t * (-1.453152027 + t * 1.061405429))))
    return sign * (1.0 - poly * jnp.exp(-a * a))


def _gelu(x):
    # torch.nn.GELU() default ("exact"/erf form).
    # TODO(synk): on v6e/v7x (bf16 VPU+EUP) this could run in bf16; kept f32 for
    # v5e portability and precision.
    return 0.5 * x * (1.0 + _erf(x * 0.7071067811865476))


def _mm(x_f32, w_bf16):
    # MXU matmul: bf16 operands, f32 accumulation.
    return jnp.dot(x_f32.astype(jnp.bfloat16), w_bf16,
                   preferred_element_type=jnp.float32)


def _batchnorm(x, gamma, beta):
    # training-mode BatchNorm1d over the node axis (biased variance, eps=1e-5),
    # single sweep: var = E[x^2] - mean^2 (clamped; fine for normalized activations).
    mean = jnp.mean(x, axis=0, keepdims=True)
    msq = jnp.mean(x * x, axis=0, keepdims=True)
    var = jnp.maximum(msq - mean * mean, 0.0)
    return (x - mean) * lax.rsqrt(var + 1e-5) * gamma + beta


def _pairwise_d2(xl_h, xr_h, ones_row):
    """Per-head squared pairwise distances d2[i, j] = ||x_r[i] - x_l[j]||^2.
    Cross term via dot_general contracting last dims (no materialized transpose);
    source squared norms via a ones-row matmul (no (N,1)->(1,N) relayout)."""
    cross = lax.dot_general(                   # (N, N) <x_r[i], x_l[j]>
        xr_h.astype(jnp.bfloat16), xl_h.astype(jnp.bfloat16),
        (((1,), (1,)), ((), ())), preferred_element_type=jnp.float32)
    r2 = jnp.sum(xr_h * xr_h, axis=1, keepdims=True)             # (N, 1)
    l2 = lax.dot_general(                      # (1, N) source squared norms
        ones_row, xl_h * xl_h,
        (((1,), (1,)), ((), ())), preferred_element_type=jnp.float32)
    return jnp.maximum(r2 + l2 - 2.0 * cross, 0.0)


def _gat(xl, xr, mask, heads, ch, inv_cnt, inv_cnt_m1):
    """Gaussian graph attention (GraphAttention_layer.message + segment softmax +
    aggr='add'), dense masked form over incoming edges j -> i."""
    tau_inv = 4.0                               # 1 / Tau, Tau = 0.25
    n = xl.shape[0]
    ones_row = jnp.ones((1, ch), jnp.float32)
    ones_col = jnp.ones((n, 1), jnp.bfloat16)

    # ---- pass 1: single-sweep sigma statistics over all (E, heads) edges ----
    s1 = jnp.zeros((1, 1), jnp.float32)         # sum of masked d
    s2 = jnp.zeros((1, 1), jnp.float32)         # sum of masked d^2
    for h in range(heads):
        xl_h = xl[:, h * ch:(h + 1) * ch]
        xr_h = xr[:, h * ch:(h + 1) * ch]
        d2 = _pairwise_d2(xl_h, xr_h, ones_row)
        s1 = s1 + jnp.sum(mask * jnp.sqrt(d2), keepdims=True)
        s2 = s2 + jnp.sum(mask * d2, keepdims=True)
    # torch .std() (unbiased): var = (sum d^2 - (sum d)^2 / n) / (n - 1)
    sigma2 = jnp.maximum((s2 - s1 * s1 * inv_cnt) * inv_cnt_m1, 1e-12)
    scale = -0.5 / sigma2                       # (1, 1)

    # ---- pass 2: alpha -> softmax with normalization folded into the matmul ----
    # alpha = 1 - exp(-d^2/(2 sigma^2)) in [0,1); logits = alpha/Tau in [0,4)
    # => no max-stabilization / -inf masking needed.
    # out[i] = (sum_j e_ij * x_l[j]) / (sum_j e_ij); d^2 recomputed (MXU slack)
    # so no per-head (N, N) buffers persist across passes.
    # TODO(synk): per-edge attention weights (edge_index, alpha) are only stored as
    # module attributes in PyTorch (not returned); not materialized per edge here.
    outs = []
    for h in range(heads):
        xl_h = xl[:, h * ch:(h + 1) * ch]
        xr_h = xr[:, h * ch:(h + 1) * ch]
        d2 = _pairwise_d2(xl_h, xr_h, ones_row)
        alpha = 1.0 - jnp.exp(d2 * scale)
        e = (jnp.exp(alpha * tau_inv) * mask).astype(jnp.bfloat16)
        xl_bf = xl_h.astype(jnp.bfloat16)
        agg = jnp.dot(e, xl_bf, preferred_element_type=jnp.float32)      # (N, ch)
        denom = jnp.dot(e, ones_col, preferred_element_type=jnp.float32)  # (N, 1)
        inv = pl.reciprocal(jnp.maximum(denom, 1e-20), approx=True)
        outs.append(agg * inv)
    return jnp.concatenate(outs, axis=1)        # (N, heads*ch), lane-dense


# ------------------------------- fused kernel --------------------------------

def grn_encoder_kernel(*refs, heads, ch, num_layers, edge_cnt):
    x_ref, mask_ref, wi_ref, bi_ref = refs[:4]
    out_ref = refs[-1]
    mask = mask_ref[...].astype(jnp.float32)    # shipped bf16 (0/1 exact)

    inv_cnt = 1.0 / edge_cnt
    inv_cnt_m1 = 1.0 / max(edge_cnt - 1.0, 1.0)   # guard E*heads == 1

    # x = self.x_input(x)
    x = _mm(x_ref[...], wi_ref[...]) + bi_ref[...]

    idx = 4
    for _ in range(num_layers):
        (g_ref, be_ref, wlr_ref, bg_ref, wc_ref,
         wf1_ref, bf1_ref, wf2_ref, bf2_ref) = refs[idx:idx + 9]
        idx += 9
        # x = norm(x)
        xb = _batchnorm(x, g_ref[...], be_ref[...])
        # lin_l | lin_r merged into a single 2*heads*ch-wide matmul (no bias)
        xlr = _mm(xb, wlr_ref[...])
        hd = heads * ch
        xl, xr = xlr[:, :hd], xlr[:, hd:]
        # message + per-target softmax + scatter-add, + bias, @ weight_concat, GELU
        agg = _gat(xl, xr, mask, heads, ch, inv_cnt, inv_cnt_m1) + bg_ref[...]
        t = _gelu(_mm(agg, wc_ref[...]))
        # ffn: Linear -> GELU -> Dropout(p=0) -> Linear
        h1 = _gelu(_mm(t, wf1_ref[...]) + bf1_ref[...])
        x = _mm(h1, wf2_ref[...]) + bf2_ref[...]

    wp_ref, bp_ref = refs[idx:idx + 2]
    # self.project(x); weights zero-padded to a 128-lane multiple host-side so the
    # final store is lane-dense (unmasked vst).
    out_ref[...] = _mm(x, wp_ref[...]) + bp_ref[...]


# ------------------------------ pallas_call glue ------------------------------

def grn_encoder_forward(params, x, mask, *, num_edges, heads):
    n = x.shape[0]
    num_layers = len(params["layers"])
    ch = params["layers"][0]["gamma"].shape[0]        # per-head channels (= hidden_dim)
    out_dim = params["Wp"].shape[1]                   # output_dim * 4
    out_pad = ((out_dim + 127) // 128) * 128          # lane-dense output columns
    bf16 = jnp.bfloat16

    wp = jnp.pad(params["Wp"], ((0, 0), (0, out_pad - out_dim))).astype(bf16)
    bp = jnp.pad(params["bp"], (0, out_pad - out_dim)).reshape(1, -1)

    inputs = [x.astype(jnp.float32), mask.astype(bf16),
              params["Wi"].astype(bf16), params["bi"].reshape(1, -1)]
    for lp in params["layers"]:
        wlr = jnp.concatenate([lp["Wl"], lp["Wr"]], axis=1).astype(bf16)
        inputs += [lp["gamma"].reshape(1, -1), lp["beta"].reshape(1, -1),
                   wlr, lp["bias_gat"].reshape(1, -1), lp["Wc"].astype(bf16),
                   lp["Wf1"].astype(bf16), lp["bf1"].reshape(1, -1),
                   lp["Wf2"].astype(bf16), lp["bf2"].reshape(1, -1)]
    inputs += [wp, bp]

    kernel = functools.partial(
        grn_encoder_kernel, heads=heads, ch=ch, num_layers=num_layers,
        edge_cnt=float(num_edges * heads))

    # scoped VMEM sized from the resident set (defaults: 16 MiB v5e / 32 MiB v6e+v7x;
    # capped well under v7x's 64 MiB physical VMEM).
    in_bytes = sum(int(np.prod(a.shape)) * a.dtype.itemsize for a in inputs)
    hd = heads * ch
    out_bytes = 4 * n * out_pad
    act_bytes = 4 * (4 * n * n + 8 * n * hd + n * out_pad)
    vmem_bytes = int(min(max(2 * (in_bytes + out_bytes) + 4 * act_bytes,
                             16 * 2**20), 48 * 2**20))

    vmem = pl.BlockSpec(memory_space=pltpu.MemorySpace.VMEM)
    # TODO(synk): for large N, add a ("parallel",) target-row-block grid (uses the 2nd
    # TensorCore on v7x and bounds VMEM to O(TR*N)) with a leading "arbitrary" stats
    # pass for the cross-row BatchNorm sums; for small N, batch multiple graphs along
    # the row dimension so MXU operands reach >=128/256 rows.
    out = pl.pallas_call(
        kernel,
        out_shape=jax.ShapeDtypeStruct((n, out_pad), jnp.float32),
        in_specs=[vmem] * len(inputs),
        out_specs=vmem,
        compiler_params=pltpu.CompilerParams(vmem_limit_bytes=vmem_bytes),
    )(*inputs)
    return out[:, :out_dim]


# ------------------------------ model definition ------------------------------

def init_params(key, input_dim, hidden_dim, output_dim, heads):
    keys = iter(jax.random.split(key, 64))

    def glorot(shape):
        s = (6.0 / (shape[0] + shape[1])) ** 0.5
        return jax.random.uniform(next(keys), shape, jnp.float32, -s, s)

    params = {
        "Wi": glorot((input_dim, hidden_dim)),
        "bi": jnp.zeros((hidden_dim,), jnp.float32),
        "Wp": glorot((output_dim, output_dim * 4)),
        "bp": jnp.zeros((output_dim * 4,), jnp.float32),
        "layers": [],
    }
    dims = [hidden_dim, hidden_dim, hidden_dim]
    for l in range(len(dims)):
        d = dims[l]
        last_dim = hidden_dim if l < len(dims) - 1 else output_dim
        params["layers"].append(dict(
            gamma=jnp.ones((d,), jnp.float32),
            beta=jnp.zeros((d,), jnp.float32),
            Wl=glorot((d, heads * d)),                        # lin_l (no bias)
            Wr=glorot((d, heads * d)),                        # lin_r (no bias)
            bias_gat=jnp.zeros((heads * d,), jnp.float32),    # zeros(self.bias)
            Wc=glorot((heads * d, d)),                        # weight_concat
            Wf1=glorot((d, hidden_dim)),
            bf1=jnp.zeros((hidden_dim,), jnp.float32),
            Wf2=glorot((hidden_dim, last_dim)),
            bf2=jnp.zeros((last_dim,), jnp.float32),
        ))
    return params


# ------------------------------------ main ------------------------------------

if __name__ == "__main__":
    N, INPUT_DIM, HIDDEN_DIM, OUTPUT_DIM, HEADS = 16, 16, 32, 16, 4

    key = jax.random.PRNGKey(0)
    k_x, k_p = jax.random.split(key)
    x = jax.random.normal(k_x, (N, INPUT_DIM), jnp.float32)

    # deterministic graph: ring + skip-3 edges; no self loops / duplicates; every node
    # has incoming edges (matches remove_self_loops semantics).
    edges = [(j, (j + 1) % N) for j in range(N)] + [(j, (j + 3) % N) for j in range(N)]
    edge_index = np.asarray(edges, dtype=np.int32).T              # (2, E) [src; dst]
    mask_np = np.zeros((N, N), np.float32)
    mask_np[edge_index[1], edge_index[0]] = 1.0                   # mask[dst, src] = 1
    np.fill_diagonal(mask_np, 0.0)                                # remove_self_loops
    mask = jnp.asarray(mask_np)
    num_edges = int(mask_np.sum())

    params = init_params(k_p, INPUT_DIM, HIDDEN_DIM, OUTPUT_DIM, HEADS)

    fwd = jax.jit(functools.partial(grn_encoder_forward,
                                    num_edges=num_edges, heads=HEADS))
    out = jax.block_until_ready(fwd(params, x, mask))
    assert out.shape == (N, OUTPUT_DIM * 4)
    assert bool(jnp.all(jnp.isfinite(out)))
    print("KERNEL_OK")
</pallas_src>

<mosaic_0001>
module attributes {stable_mosaic.version = 11 : i64} {
  func.func @grn_encoder_kernel(%arg0: memref<16x16xf32, #tpu.memory_space<vmem>>, %arg1: memref<16x16xbf16, #tpu.memory_space<vmem>>, %arg2: memref<16x32xbf16, #tpu.memory_space<vmem>>, %arg3: memref<1x32xf32, #tpu.memory_space<vmem>>, %arg4: memref<1x32xf32, #tpu.memory_space<vmem>>, %arg5: memref<1x32xf32, #tpu.memory_space<vmem>>, %arg6: memref<32x256xbf16, #tpu.memory_space<vmem>>, %arg7: memref<1x128xf32, #tpu.memory_space<vmem>>, %arg8: memref<128x32xbf16, #tpu.memory_space<vmem>>, %arg9: memref<32x32xbf16, #tpu.memory_space<vmem>>, %arg10: memref<1x32xf32, #tpu.memory_space<vmem>>, %arg11: memref<32x32xbf16, #tpu.memory_space<vmem>>, %arg12: memref<1x32xf32, #tpu.memory_space<vmem>>, %arg13: memref<1x32xf32, #tpu.memory_space<vmem>>, %arg14: memref<1x32xf32, #tpu.memory_space<vmem>>, %arg15: memref<32x256xbf16, #tpu.memory_space<vmem>>, %arg16: memref<1x128xf32, #tpu.memory_space<vmem>>, %arg17: memref<128x32xbf16, #tpu.memory_space<vmem>>, %arg18: memref<32x32xbf16, #tpu.memory_space<vmem>>, %arg19: memref<1x32xf32, #tpu.memory_space<vmem>>, %arg20: memref<32x32xbf16, #tpu.memory_space<vmem>>, %arg21: memref<1x32xf32, #tpu.memory_space<vmem>>, %arg22: memref<1x32xf32, #tpu.memory_space<vmem>>, %arg23: memref<1x32xf32, #tpu.memory_space<vmem>>, %arg24: memref<32x256xbf16, #tpu.memory_space<vmem>>, %arg25: memref<1x128xf32, #tpu.memory_space<vmem>>, %arg26: memref<128x32xbf16, #tpu.memory_space<vmem>>, %arg27: memref<32x32xbf16, #tpu.memory_space<vmem>>, %arg28: memref<1x32xf32, #tpu.memory_space<vmem>>, %arg29: memref<32x16xbf16, #tpu.memory_space<vmem>>, %arg30: memref<1x16xf32, #tpu.memory_space<vmem>>, %arg31: memref<16x128xbf16, #tpu.memory_space<vmem>>, %arg32: memref<1x128xf32, #tpu.memory_space<vmem>>, %arg33: memref<16x128xf32, #tpu.memory_space<vmem>>) attributes {dimension_semantics = [], scalar_prefetch = 0 : i64, scratch_operands = 0 : i64, tpu.core_type = #tpu.core_type<tc>} {
    %c0 = arith.constant 0 : index
    %c0_0 = arith.constant 0 : index
    %0 = vector.load %arg1[%c0, %c0_0] : memref<16x16xbf16, #tpu.memory_space<vmem>>, vector<16x16xbf16>
    %1 = arith.extf %0 : vector<16x16xbf16> to vector<16x16xf32>
    %c0_1 = arith.constant 0 : index
    %c0_2 = arith.constant 0 : index
    %2 = vector.load %arg0[%c0_1, %c0_2] : memref<16x16xf32, #tpu.memory_space<vmem>>, vector<16x16xf32>
    %c0_3 = arith.constant 0 : index
    %c0_4 = arith.constant 0 : index
    %3 = vector.load %arg2[%c0_3, %c0_4] : memref<16x32xbf16, #tpu.memory_space<vmem>>, vector<16x32xbf16>
    %4 = arith.truncf %2 : vector<16x16xf32> to vector<16x16xbf16>
    %cst = arith.constant dense<0.000000e+00> : vector<16x32xf32>
    %5 = tpu.matmul %4, %3, %cst {dimension_numbers = #tpu.dot_dimension_numbers<[1], [0], [0], [1], [0, 0, 1, 1], [], []>} : vector<16x16xbf16>, vector<16x32xbf16>, vector<16x32xf32> -> vector<16x32xf32>
    %c0_5 = arith.constant 0 : index
    %c0_6 = arith.constant 0 : index
    %6 = vector.load %arg3[%c0_5, %c0_6] : memref<1x32xf32, #tpu.memory_space<vmem>>, vector<1x32xf32>
    %7 = vector.broadcast %6 : vector<1x32xf32> to vector<16x32xf32>
    %8 = arith.addf %5, %7 : vector<16x32xf32>
    %c0_7 = arith.constant 0 : index
    %c0_8 = arith.constant 0 : index
    %9 = vector.load %arg4[%c0_7, %c0_8] : memref<1x32xf32, #tpu.memory_space<vmem>>, vector<1x32xf32>
    %c0_9 = arith.constant 0 : index
    %c0_10 = arith.constant 0 : index
    %10 = vector.load %arg5[%c0_9, %c0_10] : memref<1x32xf32, #tpu.memory_space<vmem>>, vector<1x32xf32>
    %cst_11 = arith.constant dense<0.000000e+00> : vector<32xf32>
    %11 = vector.multi_reduction <add>, %8, %cst_11 [0] : vector<16x32xf32> to vector<32xf32>
    %12 = vector.shape_cast %11 : vector<32xf32> to vector<1x32xf32>
    %cst_12 = arith.constant 1.600000e+01 : f32
    %13 = vector.broadcast %cst_12 : f32 to vector<1x32xf32>
    %14 = arith.divf %12, %13 : vector<1x32xf32>
    %15 = arith.mulf %8, %8 : vector<16x32xf32>
    %cst_13 = arith.constant dense<0.000000e+00> : vector<32xf32>
    %16 = vector.multi_reduction <add>, %15, %cst_13 [0] : vector<16x32xf32> to vector<32xf32>
    %17 = vector.shape_cast %16 : vector<32xf32> to vector<1x32xf32>
    %cst_14 = arith.constant 1.600000e+01 : f32
    %18 = vector.broadcast %cst_14 : f32 to vector<1x32xf32>
    %19 = arith.divf %17, %18 : vector<1x32xf32>
    %20 = arith.mulf %14, %14 : vector<1x32xf32>
    %21 = arith.subf %19, %20 : vector<1x32xf32>
    %cst_15 = arith.constant 0.000000e+00 : f32
    %22 = vector.broadcast %cst_15 : f32 to vector<1x32xf32>
    %23 = arith.maximumf %21, %22 : vector<1x32xf32>
    %24 = vector.broadcast %14 : vector<1x32xf32> to vector<16x32xf32>
    %25 = arith.subf %8, %24 : vector<16x32xf32>
    %cst_16 = arith.constant 9.99999974E-6 : f32
    %26 = vector.broadcast %cst_16 : f32 to vector<1x32xf32>
    %27 = arith.addf %23, %26 : vector<1x32xf32>
    %28 = math.rsqrt %27 : vector<1x32xf32>
    %29 = vector.broadcast %28 : vector<1x32xf32> to vector<16x32xf32>
    %30 = arith.mulf %25, %29 : vector<16x32xf32>
    %31 = vector.broadcast %9 : vector<1x32xf32> to vector<16x32xf32>
    %32 = arith.mulf %30, %31 : vector<16x32xf32>
    %33 = vector.broadcast %10 : vector<1x32xf32> to vector<16x32xf32>
    %34 = arith.addf %32, %33 : vector<16x32xf32>
    %c0_17 = arith.constant 0 : index
    %c0_18 = arith.constant 0 : index
    %35 = vector.load %arg6[%c0_17, %c0_18] : memref<32x256xbf16, #tpu.memory_space<vmem>>, vector<32x256xbf16>
    %36 = arith.truncf %34 : vector<16x32xf32> to vector<16x32xbf16>
    %cst_19 = arith.constant dense<0.000000e+00> : vector<16x256xf32>
    %37 = tpu.matmul %36, %35, %cst_19 {dimension_numbers = #tpu.dot_dimension_numbers<[1], [0], [0], [1], [0, 0, 1, 1], [], []>} : vector<16x32xbf16>, vector<32x256xbf16>, vector<16x256xf32> -> vector<16x256xf32>
    %38 = vector.extract_strided_slice %37 {offsets = [0, 0], sizes = [16, 128], strides = [1, 1]} : vector<16x256xf32> to vector<16x128xf32>
    %39 = vector.extract_strided_slice %37 {offsets = [0, 128], sizes = [16, 128], strides = [1, 1]} : vector<16x256xf32> to vector<16x128xf32>
    %cst_20 = arith.constant 1.000000e+00 : f32
    %40 = vector.broadcast %cst_20 : f32 to vector<1x32xf32>
    %cst_21 = arith.constant 1.000000e+00 : bf16
    %41 = vector.broadcast %cst_21 : bf16 to vector<16x1xbf16>
    %cst_22 = arith.constant 0.000000e+00 : f32
    %42 = vector.broadcast %cst_22 : f32 to vector<1x1xf32>
    %cst_23 = arith.constant 0.000000e+00 : f32
    %43 = vector.broadcast %cst_23 : f32 to vector<1x1xf32>
    %44 = vector.extract_strided_slice %38 {offsets = [0, 0], sizes = [16, 32], strides = [1, 1]} : vector<16x128xf32> to vector<16x32xf32>
    %45 = vector.extract_strided_slice %39 {offsets = [0, 0], sizes = [16, 32], strides = [1, 1]} : vector<16x128xf32> to vector<16x32xf32>
    %46 = arith.truncf %45 : vector<16x32xf32> to vector<16x32xbf16>
    %47 = arith.truncf %44 : vector<16x32xf32> to vector<16x32xbf16>
    %cst_24 = arith.constant dense<0.000000e+00> : vector<16x16xf32>
    %48 = tpu.matmul %46, %47, %cst_24 {dimension_numbers = #tpu.dot_dimension_numbers<[1], [1], [0], [0], [0, 0, 1, 0], [], []>} : vector<16x32xbf16>, vector<16x32xbf16>, vector<16x16xf32> -> vector<16x16xf32>
    %49 = arith.mulf %45, %45 : vector<16x32xf32>
    %cst_25 = arith.constant dense<0.000000e+00> : vector<16xf32>
    %50 = vector.multi_reduction <add>, %49, %cst_25 [1] : vector<16x32xf32> to vector<16xf32>
    %51 = vector.shape_cast %50 : vector<16xf32> to vector<16x1xf32>
    %52 = arith.mulf %44, %44 : vector<16x32xf32>
    %cst_26 = arith.constant dense<0.000000e+00> : vector<1x16xf32>
    %53 = tpu.matmul %40, %52, %cst_26 {dimension_numbers = #tpu.dot_dimension_numbers<[1], [1], [0], [0], [0, 0, 1, 0], [], []>} : vector<1x32xf32>, vector<16x32xf32>, vector<1x16xf32> -> vector<1x16xf32>
    %54 = vector.broadcast %51 : vector<16x1xf32> to vector<16x16xf32>
    %55 = vector.broadcast %53 : vector<1x16xf32> to vector<16x16xf32>
    %56 = arith.addf %54, %55 : vector<16x16xf32>
    %cst_27 = arith.constant 2.000000e+00 : f32
    %57 = vector.broadcast %cst_27 : f32 to vector<16x16xf32>
    %58 = arith.mulf %57, %48 : vector<16x16xf32>
    %59 = arith.subf %56, %58 : vector<16x16xf32>
    %cst_28 = arith.constant 0.000000e+00 : f32
    %60 = vector.broadcast %cst_28 : f32 to vector<16x16xf32>
    %61 = arith.maximumf %59, %60 : vector<16x16xf32>
    %62 = math.sqrt %61 : vector<16x16xf32>
    %63 = arith.mulf %1, %62 : vector<16x16xf32>
    %64 = vector.shape_cast %63 : vector<16x16xf32> to vector<1x16x16xf32>
    %cst_29 = arith.constant dense<0.000000e+00> : vector<1xf32>
    %65 = vector.multi_reduction <add>, %64, %cst_29 [1, 2] : vector<1x16x16xf32> to vector<1xf32>
    %66 = vector.shape_cast %65 : vector<1xf32> to vector<1x1x1xf32>
    %67 = vector.extract %66[0, 0, 0] : f32 from vector<1x1x1xf32>
    %68 = vector.broadcast %67 : f32 to vector<1x1xf32>
    %69 = arith.addf %42, %68 : vector<1x1xf32>
    %70 = arith.mulf %1, %61 : vector<16x16xf32>
    %71 = vector.shape_cast %70 : vector<16x16xf32> to vector<1x16x16xf32>
    %cst_30 = arith.constant dense<0.000000e+00> : vector<1xf32>
    %72 = vector.multi_reduction <add>, %71, %cst_30 [1, 2] : vector<1x16x16xf32> to vector<1xf32>
    %73 = vector.shape_cast %72 : vector<1xf32> to vector<1x1x1xf32>
    %74 = vector.extract %73[0, 0, 0] : f32 from vector<1x1x1xf32>
    %75 = vector.broadcast %74 : f32 to vector<1x1xf32>
    %76 = arith.addf %43, %75 : vector<1x1xf32>
    %77 = vector.extract_strided_slice %38 {offsets = [0, 32], sizes = [16, 32], strides = [1, 1]} : vector<16x128xf32> to vector<16x32xf32>
    %78 = vector.extract_strided_slice %39 {offsets = [0, 32], sizes = [16, 32], strides = [1, 1]} : vector<16x128xf32> to vector<16x32xf32>
    %79 = arith.truncf %78 : vector<16x32xf32> to vector<16x32xbf16>
    %80 = arith.truncf %77 : vector<16x32xf32> to vector<16x32xbf16>
    %cst_31 = arith.constant dense<0.000000e+00> : vector<16x16xf32>
    %81 = tpu.matmul %79, %80, %cst_31 {dimension_numbers = #tpu.dot_dimension_numbers<[1], [1], [0], [0], [0, 0, 1, 0], [], []>} : vector<16x32xbf16>, vector<16x32xbf16>, vector<16x16xf32> -> vector<16x16xf32>
    %82 = arith.mulf %78, %78 : vector<16x32xf32>
    %cst_32 = arith.constant dense<0.000000e+00> : vector<16xf32>
    %83 = vector.multi_reduction <add>, %82, %cst_32 [1] : vector<16x32xf32> to vector<16xf32>
    %84 = vector.shape_cast %83 : vector<16xf32> to vector<16x1xf32>
    %85 = arith.mulf %77, %77 : vector<16x32xf32>
    %cst_33 = arith.constant dense<0.000000e+00> : vector<1x16xf32>
    %86 = tpu.matmul %40, %85, %cst_33 {dimension_numbers = #tpu.dot_dimension_numbers<[1], [1], [0], [0], [0, 0, 1, 0], [], []>} : vector<1x32xf32>, vector<16x32xf32>, vector<1x16xf32> -> vector<1x16xf32>
    %87 = vector.broadcast %84 : vector<16x1xf32> to vector<16x16xf32>
    %88 = vector.broadcast %86 : vector<1x16xf32> to vector<16x16xf32>
    %89 = arith.addf %87, %88 : vector<16x16xf32>
    %cst_34 = arith.constant 2.000000e+00 : f32
    %90 = vector.broadcast %cst_34 : f32 to vector<16x16xf32>
    %91 = arith.mulf %90, %81 : vector<16x16xf32>
    %92 = arith.subf %89, %91 : vector<16x16xf32>
    %cst_35 = arith.constant 0.000000e+00 : f32
    %93 = vector.broadcast %cst_35 : f32 to vector<16x16xf32>
    %94 = arith.maximumf %92, %93 : vector<16x16xf32>
    %95 = math.sqrt %94 : vector<16x16xf32>
    %96 = arith.mulf %1, %95 : vector<16x16xf32>
    %97 = vector.shape_cast %96 : vector<16x16xf32> to vector<1x16x16xf32>
    %cst_36 = arith.constant dense<0.000000e+00> : vector<1xf32>
    %98 = vector.multi_reduction <add>, %97, %cst_36 [1, 2] : vector<1x16x16xf32> to vector<1xf32>
    %99 = vector.shape_cast %98 : vector<1xf32> to vector<1x1x1xf32>
    %100 = vector.extract %99[0, 0, 0] : f32 from vector<1x1x1xf32>
    %101 = vector.broadcast %100 : f32 to vector<1x1xf32>
    %102 = arith.addf %69, %101 : vector<1x1xf32>
    %103 = arith.mulf %1, %94 : vector<16x16xf32>
    %104 = vector.shape_cast %103 : vector<16x16xf32> to vector<1x16x16xf32>
    %cst_37 = arith.constant dense<0.000000e+00> : vector<1xf32>
    %105 = vector.multi_reduction <add>, %104, %cst_37 [1, 2] : vector<1x16x16xf32> to vector<1xf32>
    %106 = vector.shape_cast %105 : vector<1xf32> to vector<1x1x1xf32>
    %107 = vector.extract %106[0, 0, 0] : f32 from vector<1x1x1xf32>
    %108 = vector.broadcast %107 : f32 to vector<1x1xf32>
    %109 = arith.addf %76, %108 : vector<1x1xf32>
    %110 = vector.extract_strided_slice %38 {offsets = [0, 64], sizes = [16, 32], strides = [1, 1]} : vector<16x128xf32> to vector<16x32xf32>
    %111 = vector.extract_strided_slice %39 {offsets = [0, 64], sizes = [16, 32], strides = [1, 1]} : vector<16x128xf32> to vector<16x32xf32>
    %112 = arith.truncf %111 : vector<16x32xf32> to vector<16x32xbf16>
    %113 = arith.truncf %110 : vector<16x32xf32> to vector<16x32xbf16>
    %cst_38 = arith.constant dense<0.000000e+00> : vector<16x16xf32>
    %114 = tpu.matmul %112, %113, %cst_38 {dimension_numbers = #tpu.dot_dimension_numbers<[1], [1], [0], [0], [0, 0, 1, 0], [], []>} : vector<16x32xbf16>, vector<16x32xbf16>, vector<16x16xf32> -> vector<16x16xf32>
    %115 = arith.mulf %111, %111 : vector<16x32xf32>
    %cst_39 = arith.constant dense<0.000000e+00> : vector<16xf32>
    %116 = vector.multi_reduction <add>, %115, %cst_39 [1] : vector<16x32xf32> to vector<16xf32>
    %117 = vector.shape_cast %116 : vector<16xf32> to vector<16x1xf32>
    %118 = arith.mulf %110, %110 : vector<16x32xf32>
    %cst_40 = arith.constant dense<0.000000e+00> : vector<1x16xf32>
    %119 = tpu.matmul %40, %118, %cst_40 {dimension_numbers = #tpu.dot_dimension_numbers<[1], [1], [0], [0], [0, 0, 1, 0], [], []>} : vector<1x32xf32>, vector<16x32xf32>, vector<1x16xf32> -> vector<1x16xf32>
    %120 = vector.broadcast %117 : vector<16x1xf32> to vector<16x16xf32>
    %121 = vector.broadcast %119 : vector<1x16xf32> to vector<16x16xf32>
    %122 = arith.addf %120, %121 : vector<16x16xf32>
    %cst_41 = arith.constant 2.000000e+00 : f32
    %123 = vector.broadcast %cst_41 : f32 to vector<16x16xf32>
    %124 = arith.mulf %123, %114 : vector<16x16xf32>
    %125 = arith.subf %122, %124 : vector<16x16xf32>
    %cst_42 = arith.constant 0.000000e+00 : f32
    %126 = vector.broadcast %cst_42 : f32 to vector<16x16xf32>
    %127 = arith.maximumf %125, %126 : vector<16x16xf32>
    %128 = math.sqrt %127 : vector<16x16xf32>
    %129 = arith.mulf %1, %128 : vector<16x16xf32>
    %130 = vector.shape_cast %129 : vector<16x16xf32> to vector<1x16x16xf32>
    %cst_43 = arith.constant dense<0.000000e+00> : vector<1xf32>
    %131 = vector.multi_reduction <add>, %130, %cst_43 [1, 2] : vector<1x16x16xf32> to vector<1xf32>
    %132 = vector.shape_cast %131 : vector<1xf32> to vector<1x1x1xf32>
    %133 = vector.extract %132[0, 0, 0] : f32 from vector<1x1x1xf32>
    %134 = vector.broadcast %133 : f32 to vector<1x1xf32>
    %135 = arith.addf %102, %134 : vector<1x1xf32>
    %136 = arith.mulf %1, %127 : vector<16x16xf32>
    %137 = vector.shape_cast %136 : vector<16x16xf32> to vector<1x16x16xf32>
    %cst_44 = arith.constant dense<0.000000e+00> : vector<1xf32>
    %138 = vector.multi_reduction <add>, %137, %cst_44 [1, 2] : vector<1x16x16xf32> to vector<1xf32>
    %139 = vector.shape_cast %138 : vector<1xf32> to vector<1x1x1xf32>
    %140 = vector.extract %139[0, 0, 0] : f32 from vector<1x1x1xf32>
    %141 = vector.broadcast %140 : f32 to vector<1x1xf32>
    %142 = arith.addf %109, %141 : vector<1x1xf32>
    %143 = vector.extract_strided_slice %38 {offsets = [0, 96], sizes = [16, 32], strides = [1, 1]} : vector<16x128xf32> to vector<16x32xf32>
    %144 = vector.extract_strided_slice %39 {offsets = [0, 96], sizes = [16, 32], strides = [1, 1]} : vector<16x128xf32> to vector<16x32xf32>
    %145 = arith.truncf %144 : vector<16x32xf32> to vector<16x32xbf16>
    %146 = arith.truncf %143 : vector<16x32xf32> to vector<16x32xbf16>
    %cst_45 = arith.constant dense<0.000000e+00> : vector<16x16xf32>
    %147 = tpu.matmul %145, %146, %cst_45 {dimension_numbers = #tpu.dot_dimension_numbers<[1], [1], [0], [0], [0, 0, 1, 0], [], []>} : vector<16x32xbf16>, vector<16x32xbf16>, vector<16x16xf32> -> vector<16x16xf32>
    %148 = arith.mulf %144, %144 : vector<16x32xf32>
    %cst_46 = arith.constant dense<0.000000e+00> : vector<16xf32>
    %149 = vector.multi_reduction <add>, %148, %cst_46 [1] : vector<16x32xf32> to vector<16xf32>
    %150 = vector.shape_cast %149 : vector<16xf32> to vector<16x1xf32>
    %151 = arith.mulf %143, %143 : vector<16x32xf32>
    %cst_47 = arith.constant dense<0.000000e+00> : vector<1x16xf32>
    %152 = tpu.matmul %40, %151, %cst_47 {dimension_numbers = #tpu.dot_dimension_numbers<[1], [1], [0], [0], [0, 0, 1, 0], [], []>} : vector<1x32xf32>, vector<16x32xf32>, vector<1x16xf32> -> vector<1x16xf32>
    %153 = vector.broadcast %150 : vector<16x1xf32> to vector<16x16xf32>
    %154 = vector.broadcast %152 : vector<1x16xf32> to vector<16x16xf32>
    %155 = arith.addf %153, %154 : vector<16x16xf32>
    %cst_48 = arith.constant 2.000000e+00 : f32
    %156 = vector.broadcast %cst_48 : f32 to vector<16x16xf32>
    %157 = arith.mulf %156, %147 : vector<16x16xf32>
    %158 = arith.subf %155, %157 : vector<16x16xf32>
    %cst_49 = arith.constant 0.000000e+00 : f32
    %159 = vector.broadcast %cst_49 : f32 to vector<16x16xf32>
    %160 = arith.maximumf %158, %159 : vector<16x16xf32>
    %161 = math.sqrt %160 : vector<16x16xf32>
    %162 = arith.mulf %1, %161 : vector<16x16xf32>
    %163 = vector.shape_cast %162 : vector<16x16xf32> to vector<1x16x16xf32>
    %cst_50 = arith.constant dense<0.000000e+00> : vector<1xf32>
    %164 = vector.multi_reduction <add>, %163, %cst_50 [1, 2] : vector<1x16x16xf32> to vector<1xf32>
    %165 = vector.shape_cast %164 : vector<1xf32> to vector<1x1x1xf32>
    %166 = vector.extract %165[0, 0, 0] : f32 from vector<1x1x1xf32>
    %167 = vector.broadcast %166 : f32 to vector<1x1xf32>
    %168 = arith.addf %135, %167 : vector<1x1xf32>
    %169 = arith.mulf %1, %160 : vector<16x16xf32>
    %170 = vector.shape_cast %169 : vector<16x16xf32> to vector<1x16x16xf32>
    %cst_51 = arith.constant dense<0.000000e+00> : vector<1xf32>
    %171 = vector.multi_reduction <add>, %170, %cst_51 [1, 2] : vector<1x16x16xf32> to vector<1xf32>
    %172 = vector.shape_cast %171 : vector<1xf32> to vector<1x1x1xf32>
    %173 = vector.extract %172[0, 0, 0] : f32 from vector<1x1x1xf32>
    %174 = vector.broadcast %173 : f32 to vector<1x1xf32>
    %175 = arith.addf %142, %174 : vector<1x1xf32>
    %176 = arith.mulf %168, %168 : vector<1x1xf32>
    %cst_52 = arith.constant 7.812500e-03 : f32
    %177 = vector.broadcast %cst_52 : f32 to vector<1x1xf32>
    %178 = arith.mulf %176, %177 : vector<1x1xf32>
    %179 = arith.subf %175, %178 : vector<1x1xf32>
    %cst_53 = arith.constant 0.00787401571 : f32
    %180 = vector.broadcast %cst_53 : f32 to vector<1x1xf32>
    %181 = arith.mulf %179, %180 : vector<1x1xf32>
    %cst_54 = arith.constant 9.99999996E-13 : f32
    %182 = vector.broadcast %cst_54 : f32 to vector<1x1xf32>
    %183 = arith.maximumf %181, %182 : vector<1x1xf32>
    %cst_55 = arith.constant -5.000000e-01 : f32
    %184 = vector.broadcast %cst_55 : f32 to vector<1x1xf32>
    %185 = arith.divf %184, %183 : vector<1x1xf32>
    %186 = vector.extract_strided_slice %38 {offsets = [0, 0], sizes = [16, 32], strides = [1, 1]} : vector<16x128xf32> to vector<16x32xf32>
    %187 = vector.extract_strided_slice %39 {offsets = [0, 0], sizes = [16, 32], strides = [1, 1]} : vector<16x128xf32> to vector<16x32xf32>
    %188 = arith.truncf %187 : vector<16x32xf32> to vector<16x32xbf16>
    %189 = arith.truncf %186 : vector<16x32xf32> to vector<16x32xbf16>
    %cst_56 = arith.constant dense<0.000000e+00> : vector<16x16xf32>
    %190 = tpu.matmul %188, %189, %cst_56 {dimension_numbers = #tpu.dot_dimension_numbers<[1], [1], [0], [0], [0, 0, 1, 0], [], []>} : vector<16x32xbf16>, vector<16x32xbf16>, vector<16x16xf32> -> vector<16x16xf32>
    %191 = arith.mulf %187, %187 : vector<16x32xf32>
    %cst_57 = arith.constant dense<0.000000e+00> : vector<16xf32>
    %192 = vector.multi_reduction <add>, %191, %cst_57 [1] : vector<16x32xf32> to vector<16xf32>
    %193 = vector.shape_cast %192 : vector<16xf32> to vector<16x1xf32>
    %194 = arith.mulf %186, %186 : vector<16x32xf32>
    %cst_58 = arith.constant dense<0.000000e+00> : vector<1x16xf32>
    %195 = tpu.matmul %40, %194, %cst_58 {dimension_numbers = #tpu.dot_dimension_numbers<[1], [1], [0], [0], [0, 0, 1, 0], [], []>} : vector<1x32xf32>, vector<16x32xf32>, vector<1x16xf32> -> vector<1x16xf32>
    %196 = vector.broadcast %193 : vector<16x1xf32> to vector<16x16xf32>
    %197 = vector.broadcast %195 : vector<1x16xf32> to vector<16x16xf32>
    %198 = arith.addf %196, %197 : vector<16x16xf32>
    %cst_59 = arith.constant 2.000000e+00 : f32
    %199 = vector.broadcast %cst_59 : f32 to vector<16x16xf32>
    %200 = arith.mulf %199, %190 : vector<16x16xf32>
    %201 = arith.subf %198, %200 : vector<16x16xf32>
    %cst_60 = arith.constant 0.000000e+00 : f32
    %202 = vector.broadcast %cst_60 : f32 to vector<16x16xf32>
    %203 = arith.maximumf %201, %202 : vector<16x16xf32>
    %204 = vector.broadcast %185 : vector<1x1xf32> to vector<16x16xf32>
    %205 = arith.mulf %203, %204 : vector<16x16xf32>
    %206 = math.exp %205 : vector<16x16xf32>
    %cst_61 = arith.constant 1.000000e+00 : f32
    %207 = vector.broadcast %cst_61 : f32 to vector<16x16xf32>
    %208 = arith.subf %207, %206 : vector<16x16xf32>
    %cst_62 = arith.constant 4.000000e+00 : f32
    %209 = vector.broadcast %cst_62 : f32 to vector<16x16xf32>
    %210 = arith.mulf %208, %209 : vector<16x16xf32>
    %211 = math.exp %210 : vector<16x16xf32>
    %212 = arith.mulf %211, %1 : vector<16x16xf32>
    %213 = arith.truncf %212 : vector<16x16xf32> to vector<16x16xbf16>
    %214 = arith.truncf %186 : vector<16x32xf32> to vector<16x32xbf16>
    %cst_63 = arith.constant dense<0.000000e+00> : vector<16x32xf32>
    %215 = tpu.matmul %213, %214, %cst_63 {dimension_numbers = #tpu.dot_dimension_numbers<[1], [0], [0], [1], [0, 0, 1, 1], [], []>} : vector<16x16xbf16>, vector<16x32xbf16>, vector<16x32xf32> -> vector<16x32xf32>
    %cst_64 = arith.constant dense<0.000000e+00> : vector<16x1xf32>
    %216 = tpu.matmul %213, %41, %cst_64 {dimension_numbers = #tpu.dot_dimension_numbers<[1], [0], [0], [1], [0, 0, 1, 1], [], []>} : vector<16x16xbf16>, vector<16x1xbf16>, vector<16x1xf32> -> vector<16x1xf32>
    %cst_65 = arith.constant 9.99999968E-21 : f32
    %217 = vector.broadcast %cst_65 : f32 to vector<16x1xf32>
    %218 = arith.maximumf %216, %217 : vector<16x1xf32>
    %219 = tpu.reciprocal %218 {approx = true} : vector<16x1xf32> -> vector<16x1xf32>
    %220 = vector.broadcast %219 : vector<16x1xf32> to vector<16x32xf32>
    %221 = arith.mulf %215, %220 : vector<16x32xf32>
    %222 = vector.extract_strided_slice %38 {offsets = [0, 32], sizes = [16, 32], strides = [1, 1]} : vector<16x128xf32> to vector<16x32xf32>
    %223 = vector.extract_strided_slice %39 {offsets = [0, 32], sizes = [16, 32], strides = [1, 1]} : vector<16x128xf32> to vector<16x32xf32>
    %224 = arith.truncf %223 : vector<16x32xf32> to vector<16x32xbf16>
    %225 = arith.truncf %222 : vector<16x32xf32> to vector<16x32xbf16>
    %cst_66 = arith.constant dense<0.000000e+00> : vector<16x16xf32>
    %226 = tpu.matmul %224, %225, %cst_66 {dimension_numbers = #tpu.dot_dimension_numbers<[1], [1], [0], [0], [0, 0, 1, 0], [], []>} : vector<16x32xbf16>, vector<16x32xbf16>, vector<16x16xf32> -> vector<16x16xf32>
    %227 = arith.mulf %223, %223 : vector<16x32xf32>
    %cst_67 = arith.constant dense<0.000000e+00> : vector<16xf32>
    %228 = vector.multi_reduction <add>, %227, %cst_67 [1] : vector<16x32xf32> to vector<16xf32>
    %229 = vector.shape_cast %228 : vector<16xf32> to vector<16x1xf32>
    %230 = arith.mulf %222, %222 : vector<16x32xf32>
    %cst_68 = arith.constant dense<0.000000e+00> : vector<1x16xf32>
    %231 = tpu.matmul %40, %230, %cst_68 {dimension_numbers = #tpu.dot_dimension_numbers<[1], [1], [0], [0], [0, 0, 1, 0], [], []>} : vector<1x32xf32>, vector<16x32xf32>, vector<1x16xf32> -> vector<1x16xf32>
    %232 = vector.broadcast %229 : vector<16x1xf32> to vector<16x16xf32>
    %233 = vector.broadcast %231 : vector<1x16xf32> to vector<16x16xf32>
    %234 = arith.addf %232, %233 : vector<16x16xf32>
    %cst_69 = arith.constant 2.000000e+00 : f32
    %235 = vector.broadcast %cst_69 : f32 to vector<16x16xf32>
    %236 = arith.mulf %235, %226 : vector<16x16xf32>
    %237 = arith.subf %234, %236 : vector<16x16xf32>
    %cst_70 = arith.constant 0.000000e+00 : f32
    %238 = vector.broadcast %cst_70 : f32 to vector<16x16xf32>
    %239 = arith.maximumf %237, %238 : vector<16x16xf32>
    %240 = vector.broadcast %185 : vector<1x1xf32> to vector<16x16xf32>
    %241 = arith.mulf %239, %240 : vector<16x16xf32>
    %242 = math.exp %241 : vector<16x16xf32>
    %cst_71 = arith.constant 1.000000e+00 : f32
    %243 = vector.broadcast %cst_71 : f32 to vector<16x16xf32>
    %244 = arith.subf %243, %242 : vector<16x16xf32>
    %cst_72 = arith.constant 4.000000e+00 : f32
    %245 = vector.broadcast %cst_72 : f32 to vector<16x16xf32>
    %246 = arith.mulf %244, %245 : vector<16x16xf32>
    %247 = math.exp %246 : vector<16x16xf32>
    %248 = arith.mulf %247, %1 : vector<16x16xf32>
    %249 = arith.truncf %248 : vector<16x16xf32> to vector<16x16xbf16>
    %250 = arith.truncf %222 : vector<16x32xf32> to vector<16x32xbf16>
    %cst_73 = arith.constant dense<0.000000e+00> : vector<16x32xf32>
    %251 = tpu.matmul %249, %250, %cst_73 {dimension_numbers = #tpu.dot_dimension_numbers<[1], [0], [0], [1], [0, 0, 1, 1], [], []>} : vector<16x16xbf16>, vector<16x32xbf16>, vector<16x32xf32> -> vector<16x32xf32>
    %cst_74 = arith.constant dense<0.000000e+00> : vector<16x1xf32>
    %252 = tpu.matmul %249, %41, %cst_74 {dimension_numbers = #tpu.dot_dimension_numbers<[1], [0], [0], [1], [0, 0, 1, 1], [], []>} : vector<16x16xbf16>, vector<16x1xbf16>, vector<16x1xf32> -> vector<16x1xf32>
    %cst_75 = arith.constant 9.99999968E-21 : f32
    %253 = vector.broadcast %cst_75 : f32 to vector<16x1xf32>
    %254 = arith.maximumf %252, %253 : vector<16x1xf32>
    %255 = tpu.reciprocal %254 {approx = true} : vector<16x1xf32> -> vector<16x1xf32>
    %256 = vector.broadcast %255 : vector<16x1xf32> to vector<16x32xf32>
    %257 = arith.mulf %251, %256 : vector<16x32xf32>
    %258 = vector.extract_strided_slice %38 {offsets = [0, 64], sizes = [16, 32], strides = [1, 1]} : vector<16x128xf32> to vector<16x32xf32>
    %259 = vector.extract_strided_slice %39 {offsets = [0, 64], sizes = [16, 32], strides = [1, 1]} : vector<16x128xf32> to vector<16x32xf32>
    %260 = arith.truncf %259 : vector<16x32xf32> to vector<16x32xbf16>
    %261 = arith.truncf %258 : vector<16x32xf32> to vector<16x32xbf16>
    %cst_76 = arith.constant dense<0.000000e+00> : vector<16x16xf32>
    %262 = tpu.matmul %260, %261, %cst_76 {dimension_numbers = #tpu.dot_dimension_numbers<[1], [1], [0], [0], [0, 0, 1, 0], [], []>} : vector<16x32xbf16>, vector<16x32xbf16>, vector<16x16xf32> -> vector<16x16xf32>
    %263 = arith.mulf %259, %259 : vector<16x32xf32>
    %cst_77 = arith.constant dense<0.000000e+00> : vector<16xf32>
    %264 = vector.multi_reduction <add>, %263, %cst_77 [1] : vector<16x32xf32> to vector<16xf32>
    %265 = vector.shape_cast %264 : vector<16xf32> to vector<16x1xf32>
    %266 = arith.mulf %258, %258 : vector<16x32xf32>
    %cst_78 = arith.constant dense<0.000000e+00> : vector<1x16xf32>
    %267 = tpu.matmul %40, %266, %cst_78 {dimension_numbers = #tpu.dot_dimension_numbers<[1], [1], [0], [0], [0, 0, 1, 0], [], []>} : vector<1x32xf32>, vector<16x32xf32>, vector<1x16xf32> -> vector<1x16xf32>
    %268 = vector.broadcast %265 : vector<16x1xf32> to vector<16x16xf32>
    %269 = vector.broadcast %267 : vector<1x16xf32> to vector<16x16xf32>
    %270 = arith.addf %268, %269 : vector<16x16xf32>
    %cst_79 = arith.constant 2.000000e+00 : f32
    %271 = vector.broadcast %cst_79 : f32 to vector<16x16xf32>
    %272 = arith.mulf %271, %262 : vector<16x16xf32>
    %273 = arith.subf %270, %272 : vector<16x16xf32>
    %cst_80 = arith.constant 0.000000e+00 : f32
    %274 = vector.broadcast %cst_80 : f32 to vector<16x16xf32>
    %275 = arith.maximumf %273, %274 : vector<16x16xf32>
    %276 = vector.broadcast %185 : vector<1x1xf32> to vector<16x16xf32>
    %277 = arith.mulf %275, %276 : vector<16x16xf32>
    %278 = math.exp %277 : vector<16x16xf32>
    %cst_81 = arith.constant 1.000000e+00 : f32
    %279 = vector.broadcast %cst_81 : f32 to vector<16x16xf32>
    %280 = arith.subf %279, %278 : vector<16x16xf32>
    %cst_82 = arith.constant 4.000000e+00 : f32
    %281 = vector.broadcast %cst_82 : f32 to vector<16x16xf32>
    %282 = arith.mulf %280, %281 : vector<16x16xf32>
    %283 = math.exp %282 : vector<16x16xf32>
    %284 = arith.mulf %283, %1 : vector<16x16xf32>
    %285 = arith.truncf %284 : vector<16x16xf32> to vector<16x16xbf16>
    %286 = arith.truncf %258 : vector<16x32xf32> to vector<16x32xbf16>
    %cst_83 = arith.constant dense<0.000000e+00> : vector<16x32xf32>
    %287 = tpu.matmul %285, %286, %cst_83 {dimension_numbers = #tpu.dot_dimension_numbers<[1], [0], [0], [1], [0, 0, 1, 1], [], []>} : vector<16x16xbf16>, vector<16x32xbf16>, vector<16x32xf32> -> vector<16x32xf32>
    %cst_84 = arith.constant dense<0.000000e+00> : vector<16x1xf32>
    %288 = tpu.matmul %285, %41, %cst_84 {dimension_numbers = #tpu.dot_dimension_numbers<[1], [0], [0], [1], [0, 0, 1, 1], [], []>} : vector<16x16xbf16>, vector<16x1xbf16>, vector<16x1xf32> -> vector<16x1xf32>
    %cst_85 = arith.constant 9.99999968E-21 : f32
    %289 = vector.broadcast %cst_85 : f32 to vector<16x1xf32>
    %290 = arith.maximumf %288, %289 : vector<16x1xf32>
    %291 = tpu.reciprocal %290 {approx = true} : vector<16x1xf32> -> vector<16x1xf32>
    %292 = vector.broadcast %291 : vector<16x1xf32> to vector<16x32xf32>
    %293 = arith.mulf %287, %292 : vector<16x32xf32>
    %294 = vector.extract_strided_slice %38 {offsets = [0, 96], sizes = [16, 32], strides = [1, 1]} : vector<16x128xf32> to vector<16x32xf32>
    %295 = vector.extract_strided_slice %39 {offsets = [0, 96], sizes = [16, 32], strides = [1, 1]} : vector<16x128xf32> to vector<16x32xf32>
    %296 = arith.truncf %295 : vector<16x32xf32> to vector<16x32xbf16>
    %297 = arith.truncf %294 : vector<16x32xf32> to vector<16x32xbf16>
    %cst_86 = arith.constant dense<0.000000e+00> : vector<16x16xf32>
    %298 = tpu.matmul %296, %297, %cst_86 {dimension_numbers = #tpu.dot_dimension_numbers<[1], [1], [0], [0], [0, 0, 1, 0], [], []>} : vector<16x32xbf16>, vector<16x32xbf16>, vector<16x16xf32> -> vector<16x16xf32>
    %299 = arith.mulf %295, %295 : vector<16x32xf32>
    %cst_87 = arith.constant dense<0.000000e+00> : vector<16xf32>
    %300 = vector.multi_reduction <add>, %299, %cst_87 [1] : vector<16x32xf32> to vector<16xf32>
    %301 = vector.shape_cast %300 : vector<16xf32> to vector<16x1xf32>
    %302 = arith.mulf %294, %294 : vector<16x32xf32>
    %cst_88 = arith.constant dense<0.000000e+00> : vector<1x16xf32>
    %303 = tpu.matmul %40, %302, %cst_88 {dimension_numbers = #tpu.dot_dimension_numbers<[1], [1], [0], [0], [0, 0, 1, 0], [], []>} : vector<1x32xf32>, vector<16x32xf32>, vector<1x16xf32> -> vector<1x16xf32>
    %304 = vector.broadcast %301 : vector<16x1xf32> to vector<16x16xf32>
    %305 = vector.broadcast %303 : vector<1x16xf32> to vector<16x16xf32>
    %306 = arith.addf %304, %305 : vector<16x16xf32>
    %cst_89 = arith.constant 2.000000e+00 : f32
    %307 = vector.broadcast %cst_89 : f32 to vector<16x16xf32>
    %308 = arith.mulf %307, %298 : vector<16x16xf32>
    %309 = arith.subf %306, %308 : vector<16x16xf32>
    %cst_90 = arith.constant 0.000000e+00 : f32
    %310 = vector.broadcast %cst_90 : f32 to vector<16x16xf32>
    %311 = arith.maximumf %309, %310 : vector<16x16xf32>
    %312 = vector.broadcast %185 : vector<1x1xf32> to vector<16x16xf32>
    %313 = arith.mulf %311, %312 : vector<16x16xf32>
    %314 = math.exp %313 : vector<16x16xf32>
    %cst_91 = arith.constant 1.000000e+00 : f32
    %315 = vector.broadcast %cst_91 : f32 to vector<16x16xf32>
    %316 = arith.subf %315, %314 : vector<16x16xf32>
    %cst_92 = arith.constant 4.000000e+00 : f32
    %317 = vector.broadcast %cst_92 : f32 to vector<16x16xf32>
    %318 = arith.mulf %316, %317 : vector<16x16xf32>
    %319 = math.exp %318 : vector<16x16xf32>
    %320 = arith.mulf %319, %1 : vector<16x16xf32>
    %321 = arith.truncf %320 : vector<16x16xf32> to vector<16x16xbf16>
    %322 = arith.truncf %294 : vector<16x32xf32> to vector<16x32xbf16>
    %cst_93 = arith.constant dense<0.000000e+00> : vector<16x32xf32>
    %323 = tpu.matmul %321, %322, %cst_93 {dimension_numbers = #tpu.dot_dimension_numbers<[1], [0], [0], [1], [0, 0, 1, 1], [], []>} : vector<16x16xbf16>, vector<16x32xbf16>, vector<16x32xf32> -> vector<16x32xf32>
    %cst_94 = arith.constant dense<0.000000e+00> : vector<16x1xf32>
    %324 = tpu.matmul %321, %41, %cst_94 {dimension_numbers = #tpu.dot_dimension_numbers<[1], [0], [0], [1], [0, 0, 1, 1], [], []>} : vector<16x16xbf16>, vector<16x1xbf16>, vector<16x1xf32> -> vector<16x1xf32>
    %cst_95 = arith.constant 9.99999968E-21 : f32
    %325 = vector.broadcast %cst_95 : f32 to vector<16x1xf32>
    %326 = arith.maximumf %324, %325 : vector<16x1xf32>
    %327 = tpu.reciprocal %326 {approx = true} : vector<16x1xf32> -> vector<16x1xf32>
    %328 = vector.broadcast %327 : vector<16x1xf32> to vector<16x32xf32>
    %329 = arith.mulf %323, %328 : vector<16x32xf32>
    %330 = tpu.concatenate %221, %257, %293, %329 in 1 : vector<16x32xf32>, vector<16x32xf32>, vector<16x32xf32>, vector<16x32xf32> -> vector<16x128xf32>
    %c0_96 = arith.constant 0 : index
    %c0_97 = arith.constant 0 : index
    %331 = vector.load %arg7[%c0_96, %c0_97] : memref<1x128xf32, #tpu.memory_space<vmem>>, vector<1x128xf32>
    %332 = vector.broadcast %331 : vector<1x128xf32> to vector<16x128xf32>
    %333 = arith.addf %330, %332 : vector<16x128xf32>
    %c0_98 = arith.constant 0 : index
    %c0_99 = arith.constant 0 : index
    %334 = vector.load %arg8[%c0_98, %c0_99] : memref<128x32xbf16, #tpu.memory_space<vmem>>, vector<128x32xbf16>
    %335 = arith.truncf %333 : vector<16x128xf32> to vector<16x128xbf16>
    %cst_100 = arith.constant dense<0.000000e+00> : vector<16x32xf32>
    %336 = tpu.matmul %335, %334, %cst_100 {dimension_numbers = #tpu.dot_dimension_numbers<[1], [0], [0], [1], [0, 0, 1, 1], [], []>} : vector<16x128xbf16>, vector<128x32xbf16>, vector<16x32xf32> -> vector<16x32xf32>
    %cst_101 = arith.constant 5.000000e-01 : f32
    %337 = vector.broadcast %cst_101 : f32 to vector<16x32xf32>
    %338 = arith.mulf %337, %336 : vector<16x32xf32>
    %cst_102 = arith.constant 0.707106769 : f32
    %339 = vector.broadcast %cst_102 : f32 to vector<16x32xf32>
    %340 = arith.mulf %336, %339 : vector<16x32xf32>
    %cst_103 = arith.constant 0.000000e+00 : f32
    %341 = vector.broadcast %cst_103 : f32 to vector<16x32xf32>
    %342 = arith.cmpf oge, %340, %341 : vector<16x32xf32>
    %cst_104 = arith.constant 1.000000e+00 : f32
    %cst_105 = arith.constant -1.000000e+00 : f32
    %343 = vector.broadcast %cst_104 : f32 to vector<16x32xf32>
    %344 = vector.broadcast %cst_105 : f32 to vector<16x32xf32>
    %345 = arith.select %342, %343, %344 : vector<16x32xi1>, vector<16x32xf32>
    %346 = math.absf %340 : vector<16x32xf32>
    %cst_106 = arith.constant 0.327591091 : f32
    %347 = vector.broadcast %cst_106 : f32 to vector<16x32xf32>
    %348 = arith.mulf %347, %346 : vector<16x32xf32>
    %cst_107 = arith.constant 1.000000e+00 : f32
    %349 = vector.broadcast %cst_107 : f32 to vector<16x32xf32>
    %350 = arith.addf %349, %348 : vector<16x32xf32>
    %cst_108 = arith.constant 1.000000e+00 : f32
    %351 = vector.broadcast %cst_108 : f32 to vector<16x32xf32>
    %352 = arith.divf %351, %350 : vector<16x32xf32>
    %cst_109 = arith.constant 1.06140542 : f32
    %353 = vector.broadcast %cst_109 : f32 to vector<16x32xf32>
    %354 = arith.mulf %352, %353 : vector<16x32xf32>
    %cst_110 = arith.constant -1.45315206 : f32
    %355 = vector.broadcast %cst_110 : f32 to vector<16x32xf32>
    %356 = arith.addf %355, %354 : vector<16x32xf32>
    %357 = arith.mulf %352, %356 : vector<16x32xf32>
    %cst_111 = arith.constant 1.42141378 : f32
    %358 = vector.broadcast %cst_111 : f32 to vector<16x32xf32>
    %359 = arith.addf %358, %357 : vector<16x32xf32>
    %360 = arith.mulf %352, %359 : vector<16x32xf32>
    %cst_112 = arith.constant -0.284496725 : f32
    %361 = vector.broadcast %cst_112 : f32 to vector<16x32xf32>
    %362 = arith.addf %361, %360 : vector<16x32xf32>
    %363 = arith.mulf %352, %362 : vector<16x32xf32>
    %cst_113 = arith.constant 0.254829586 : f32
    %364 = vector.broadcast %cst_113 : f32 to vector<16x32xf32>
    %365 = arith.addf %364, %363 : vector<16x32xf32>
    %366 = arith.mulf %352, %365 : vector<16x32xf32>
    %cst_114 = arith.constant 0.000000e+00 : f32
    %367 = vector.broadcast %cst_114 : f32 to vector<16x32xf32>
    %368 = arith.subf %367, %346 : vector<16x32xf32>
    %369 = arith.mulf %368, %346 : vector<16x32xf32>
    %370 = math.exp %369 : vector<16x32xf32>
    %371 = arith.mulf %366, %370 : vector<16x32xf32>
    %cst_115 = arith.constant 1.000000e+00 : f32
    %372 = vector.broadcast %cst_115 : f32 to vector<16x32xf32>
    %373 = arith.subf %372, %371 : vector<16x32xf32>
    %374 = arith.mulf %345, %373 : vector<16x32xf32>
    %cst_116 = arith.constant 1.000000e+00 : f32
    %375 = vector.broadcast %cst_116 : f32 to vector<16x32xf32>
    %376 = arith.addf %375, %374 : vector<16x32xf32>
    %377 = arith.mulf %338, %376 : vector<16x32xf32>
    %c0_117 = arith.constant 0 : index
    %c0_118 = arith.constant 0 : index
    %378 = vector.load %arg9[%c0_117, %c0_118] : memref<32x32xbf16, #tpu.memory_space<vmem>>, vector<32x32xbf16>
    %379 = arith.truncf %377 : vector<16x32xf32> to vector<16x32xbf16>
    %cst_119 = arith.constant dense<0.000000e+00> : vector<16x32xf32>
    %380 = tpu.matmul %379, %378, %cst_119 {dimension_numbers = #tpu.dot_dimension_numbers<[1], [0], [0], [1], [0, 0, 1, 1], [], []>} : vector<16x32xbf16>, vector<32x32xbf16>, vector<16x32xf32> -> vector<16x32xf32>
    %c0_120 = arith.constant 0 : index
    %c0_121 = arith.constant 0 : index
    %381 = vector.load %arg10[%c0_120, %c0_121] : memref<1x32xf32, #tpu.memory_space<vmem>>, vector<1x32xf32>
    %382 = vector.broadcast %381 : vector<1x32xf32> to vector<16x32xf32>
    %383 = arith.addf %380, %382 : vector<16x32xf32>
    %cst_122 = arith.constant 5.000000e-01 : f32
    %384 = vector.broadcast %cst_122 : f32 to vector<16x32xf32>
    %385 = arith.mulf %384, %383 : vector<16x32xf32>
    %cst_123 = arith.constant 0.707106769 : f32
    %386 = vector.broadcast %cst_123 : f32 to vector<16x32xf32>
    %387 = arith.mulf %383, %386 : vector<16x32xf32>
    %cst_124 = arith.constant 0.000000e+00 : f32
    %388 = vector.broadcast %cst_124 : f32 to vector<16x32xf32>
    %389 = arith.cmpf oge, %387, %388 : vector<16x32xf32>
    %cst_125 = arith.constant 1.000000e+00 : f32
    %cst_126 = arith.constant -1.000000e+00 : f32
    %390 = vector.broadcast %cst_125 : f32 to vector<16x32xf32>
    %391 = vector.broadcast %cst_126 : f32 to vector<16x32xf32>
    %392 = arith.select %389, %390, %391 : vector<16x32xi1>, vector<16x32xf32>
    %393 = math.absf %387 : vector<16x32xf32>
    %cst_127 = arith.constant 0.327591091 : f32
    %394 = vector.broadcast %cst_127 : f32 to vector<16x32xf32>
    %395 = arith.mulf %394, %393 : vector<16x32xf32>
    %cst_128 = arith.constant 1.000000e+00 : f32
    %396 = vector.broadcast %cst_128 : f32 to vector<16x32xf32>
    %397 = arith.addf %396, %395 : vector<16x32xf32>
    %cst_129 = arith.constant 1.000000e+00 : f32
    %398 = vector.broadcast %cst_129 : f32 to vector<16x32xf32>
    %399 = arith.divf %398, %397 : vector<16x32xf32>
    %cst_130 = arith.constant 1.06140542 : f32
    %400 = vector.broadcast %cst_130 : f32 to vector<16x32xf32>
    %401 = arith.mulf %399, %400 : vector<16x32xf32>
    %cst_131 = arith.constant -1.45315206 : f32
    %402 = vector.broadcast %cst_131 : f32 to vector<16x32xf32>
    %403 = arith.addf %402, %401 : vector<16x32xf32>
    %404 = arith.mulf %399, %403 : vector<16x32xf32>
    %cst_132 = arith.constant 1.42141378 : f32
    %405 = vector.broadcast %cst_132 : f32 to vector<16x32xf32>
    %406 = arith.addf %405, %404 : vector<16x32xf32>
    %407 = arith.mulf %399, %406 : vector<16x32xf32>
    %cst_133 = arith.constant -0.284496725 : f32
    %408 = vector.broadcast %cst_133 : f32 to vector<16x32xf32>
    %409 = arith.addf %408, %407 : vector<16x32xf32>
    %410 = arith.mulf %399, %409 : vector<16x32xf32>
    %cst_134 = arith.constant 0.254829586 : f32
    %411 = vector.broadcast %cst_134 : f32 to vector<16x32xf32>
    %412 = arith.addf %411, %410 : vector<16x32xf32>
    %413 = arith.mulf %399, %412 : vector<16x32xf32>
    %cst_135 = arith.constant 0.000000e+00 : f32
    %414 = vector.broadcast %cst_135 : f32 to vector<16x32xf32>
    %415 = arith.subf %414, %393 : vector<16x32xf32>
    %416 = arith.mulf %415, %393 : vector<16x32xf32>
    %417 = math.exp %416 : vector<16x32xf32>
    %418 = arith.mulf %413, %417 : vector<16x32xf32>
    %cst_136 = arith.constant 1.000000e+00 : f32
    %419 = vector.broadcast %cst_136 : f32 to vector<16x32xf32>
    %420 = arith.subf %419, %418 : vector<16x32xf32>
    %421 = arith.mulf %392, %420 : vector<16x32xf32>
    %cst_137 = arith.constant 1.000000e+00 : f32
    %422 = vector.broadcast %cst_137 : f32 to vector<16x32xf32>
    %423 = arith.addf %422, %421 : vector<16x32xf32>
    %424 = arith.mulf %385, %423 : vector<16x32xf32>
    %c0_138 = arith.constant 0 : index
    %c0_139 = arith.constant 0 : index
    %425 = vector.load %arg11[%c0_138, %c0_139] : memref<32x32xbf16, #tpu.memory_space<vmem>>, vector<32x32xbf16>
    %426 = arith.truncf %424 : vector<16x32xf32> to vector<16x32xbf16>
    %cst_140 = arith.constant dense<0.000000e+00> : vector<16x32xf32>
    %427 = tpu.matmul %426, %425, %cst_140 {dimension_numbers = #tpu.dot_dimension_numbers<[1], [0], [0], [1], [0, 0, 1, 1], [], []>} : vector<16x32xbf16>, vector<32x32xbf16>, vector<16x32xf32> -> vector<16x32xf32>
    %c0_141 = arith.constant 0 : index
    %c0_142 = arith.constant 0 : index
    %428 = vector.load %arg12[%c0_141, %c0_142] : memref<1x32xf32, #tpu.memory_space<vmem>>, vector<1x32xf32>
    %429 = vector.broadcast %428 : vector<1x32xf32> to vector<16x32xf32>
    %430 = arith.addf %427, %429 : vector<16x32xf32>
    %c0_143 = arith.constant 0 : index
    %c0_144 = arith.constant 0 : index
    %431 = vector.load %arg13[%c0_143, %c0_144] : memref<1x32xf32, #tpu.memory_space<vmem>>, vector<1x32xf32>
    %c0_145 = arith.constant 0 : index
    %c0_146 = arith.constant 0 : index
    %432 = vector.load %arg14[%c0_145, %c0_146] : memref<1x32xf32, #tpu.memory_space<vmem>>, vector<1x32xf32>
    %cst_147 = arith.constant dense<0.000000e+00> : vector<32xf32>
    %433 = vector.multi_reduction <add>, %430, %cst_147 [0] : vector<16x32xf32> to vector<32xf32>
    %434 = vector.shape_cast %433 : vector<32xf32> to vector<1x32xf32>
    %cst_148 = arith.constant 1.600000e+01 : f32
    %435 = vector.broadcast %cst_148 : f32 to vector<1x32xf32>
    %436 = arith.divf %434, %435 : vector<1x32xf32>
    %437 = arith.mulf %430, %430 : vector<16x32xf32>
    %cst_149 = arith.constant dense<0.000000e+00> : vector<32xf32>
    %438 = vector.multi_reduction <add>, %437, %cst_149 [0] : vector<16x32xf32> to vector<32xf32>
    %439 = vector.shape_cast %438 : vector<32xf32> to vector<1x32xf32>
    %cst_150 = arith.constant 1.600000e+01 : f32
    %440 = vector.broadcast %cst_150 : f32 to vector<1x32xf32>
    %441 = arith.divf %439, %440 : vector<1x32xf32>
    %442 = arith.mulf %436, %436 : vector<1x32xf32>
    %443 = arith.subf %441, %442 : vector<1x32xf32>
    %cst_151 = arith.constant 0.000000e+00 : f32
    %444 = vector.broadcast %cst_151 : f32 to vector<1x32xf32>
    %445 = arith.maximumf %443, %444 : vector<1x32xf32>
    %446 = vector.broadcast %436 : vector<1x32xf32> to vector<16x32xf32>
    %447 = arith.subf %430, %446 : vector<16x32xf32>
    %cst_152 = arith.constant 9.99999974E-6 : f32
    %448 = vector.broadcast %cst_152 : f32 to vector<1x32xf32>
    %449 = arith.addf %445, %448 : vector<1x32xf32>
    %450 = math.rsqrt %449 : vector<1x32xf32>
    %451 = vector.broadcast %450 : vector<1x32xf32> to vector<16x32xf32>
    %452 = arith.mulf %447, %451 : vector<16x32xf32>
    %453 = vector.broadcast %431 : vector<1x32xf32> to vector<16x32xf32>
    %454 = arith.mulf %452, %453 : vector<16x32xf32>
    %455 = vector.broadcast %432 : vector<1x32xf32> to vector<16x32xf32>
    %456 = arith.addf %454, %455 : vector<16x32xf32>
    %c0_153 = arith.constant 0 : index
    %c0_154 = arith.constant 0 : index
    %457 = vector.load %arg15[%c0_153, %c0_154] : memref<32x256xbf16, #tpu.memory_space<vmem>>, vector<32x256xbf16>
    %458 = arith.truncf %456 : vector<16x32xf32> to vector<16x32xbf16>
    %cst_155 = arith.constant dense<0.000000e+00> : vector<16x256xf32>
    %459 = tpu.matmul %458, %457, %cst_155 {dimension_numbers = #tpu.dot_dimension_numbers<[1], [0], [0], [1], [0, 0, 1, 1], [], []>} : vector<16x32xbf16>, vector<32x256xbf16>, vector<16x256xf32> -> vector<16x256xf32>
    %460 = vector.extract_strided_slice %459 {offsets = [0, 0], sizes = [16, 128], strides = [1, 1]} : vector<16x256xf32> to vector<16x128xf32>
    %461 = vector.extract_strided_slice %459 {offsets = [0, 128], sizes = [16, 128], strides = [1, 1]} : vector<16x256xf32> to vector<16x128xf32>
    %cst_156 = arith.constant 1.000000e+00 : f32
    %462 = vector.broadcast %cst_156 : f32 to vector<1x32xf32>
    %cst_157 = arith.constant 1.000000e+00 : bf16
    %463 = vector.broadcast %cst_157 : bf16 to vector<16x1xbf16>
    %cst_158 = arith.constant 0.000000e+00 : f32
    %464 = vector.broadcast %cst_158 : f32 to vector<1x1xf32>
    %cst_159 = arith.constant 0.000000e+00 : f32
    %465 = vector.broadcast %cst_159 : f32 to vector<1x1xf32>
    %466 = vector.extract_strided_slice %460 {offsets = [0, 0], sizes = [16, 32], strides = [1, 1]} : vector<16x128xf32> to vector<16x32xf32>
    %467 = vector.extract_strided_slice %461 {offsets = [0, 0], sizes = [16, 32], strides = [1, 1]} : vector<16x128xf32> to vector<16x32xf32>
    %468 = arith.truncf %467 : vector<16x32xf32> to vector<16x32xbf16>
    %469 = arith.truncf %466 : vector<16x32xf32> to vector<16x32xbf16>
    %cst_160 = arith.constant dense<0.000000e+00> : vector<16x16xf32>
    %470 = tpu.matmul %468, %469, %cst_160 {dimension_numbers = #tpu.dot_dimension_numbers<[1], [1], [0], [0], [0, 0, 1, 0], [], []>} : vector<16x32xbf16>, vector<16x32xbf16>, vector<16x16xf32> -> vector<16x16xf32>
    %471 = arith.mulf %467, %467 : vector<16x32xf32>
    %cst_161 = arith.constant dense<0.000000e+00> : vector<16xf32>
    %472 = vector.multi_reduction <add>, %471, %cst_161 [1] : vector<16x32xf32> to vector<16xf32>
    %473 = vector.shape_cast %472 : vector<16xf32> to vector<16x1xf32>
    %474 = arith.mulf %466, %466 : vector<16x32xf32>
    %cst_162 = arith.constant dense<0.000000e+00> : vector<1x16xf32>
    %475 = tpu.matmul %462, %474, %cst_162 {dimension_numbers = #tpu.dot_dimension_numbers<[1], [1], [0], [0], [0, 0, 1, 0], [], []>} : vector<1x32xf32>, vector<16x32xf32>, vector<1x16xf32> -> vector<1x16xf32>
    %476 = vector.broadcast %473 : vector<16x1xf32> to vector<16x16xf32>
    %477 = vector.broadcast %475 : vector<1x16xf32> to vector<16x16xf32>
    %478 = arith.addf %476, %477 : vector<16x16xf32>
    %cst_163 = arith.constant 2.000000e+00 : f32
    %479 = vector.broadcast %cst_163 : f32 to vector<16x16xf32>
    %480 = arith.mulf %479, %470 : vector<16x16xf32>
    %481 = arith.subf %478, %480 : vector<16x16xf32>
    %cst_164 = arith.constant 0.000000e+00 : f32
    %482 = vector.broadcast %cst_164 : f32 to vector<16x16xf32>
    %483 = arith.maximumf %481, %482 : vector<16x16xf32>
    %484 = math.sqrt %483 : vector<16x16xf32>
    %485 = arith.mulf %1, %484 : vector<16x16xf32>
    %486 = vector.shape_cast %485 : vector<16x16xf32> to vector<1x16x16xf32>
    %cst_165 = arith.constant dense<0.000000e+00> : vector<1xf32>
    %487 = vector.multi_reduction <add>, %486, %cst_165 [1, 2] : vector<1x16x16xf32> to vector<1xf32>
    %488 = vector.shape_cast %487 : vector<1xf32> to vector<1x1x1xf32>
    %489 = vector.extract %488[0, 0, 0] : f32 from vector<1x1x1xf32>
    %490 = vector.broadcast %489 : f32 to vector<1x1xf32>
    %491 = arith.addf %464, %490 : vector<1x1xf32>
    %492 = arith.mulf %1, %483 : vector<16x16xf32>
    %493 = vector.shape_cast %492 : vector<16x16xf32> to vector<1x16x16xf32>
    %cst_166 = arith.constant dense<0.000000e+00> : vector<1xf32>
    %494 = vector.multi_reduction <add>, %493, %cst_166 [1, 2] : vector<1x16x16xf32> to vector<1xf32>
    %495 = vector.shape_cast %494 : vector<1xf32> to vector<1x1x1xf32>
    %496 = vector.extract %495[0, 0, 0] : f32 from vector<1x1x1xf32>
    %497 = vector.broadcast %496 : f32 to vector<1x1xf32>
    %498 = arith.addf %465, %497 : vector<1x1xf32>
    %499 = vector.extract_strided_slice %460 {offsets = [0, 32], sizes = [16, 32], strides = [1, 1]} : vector<16x128xf32> to vector<16x32xf32>
    %500 = vector.extract_strided_slice %461 {offsets = [0, 32], sizes = [16, 32], strides = [1, 1]} : vector<16x128xf32> to vector<16x32xf32>
    %501 = arith.truncf %500 : vector<16x32xf32> to vector<16x32xbf16>
    %502 = arith.truncf %499 : vector<16x32xf32> to vector<16x32xbf16>
    %cst_167 = arith.constant dense<0.000000e+00> : vector<16x16xf32>
    %503 = tpu.matmul %501, %502, %cst_167 {dimension_numbers = #tpu.dot_dimension_numbers<[1], [1], [0], [0], [0, 0, 1, 0], [], []>} : vector<16x32xbf16>, vector<16x32xbf16>, vector<16x16xf32> -> vector<16x16xf32>
    %504 = arith.mulf %500, %500 : vector<16x32xf32>
    %cst_168 = arith.constant dense<0.000000e+00> : vector<16xf32>
    %505 = vector.multi_reduction <add>, %504, %cst_168 [1] : vector<16x32xf32> to vector<16xf32>
    %506 = vector.shape_cast %505 : vector<16xf32> to vector<16x1xf32>
    %507 = arith.mulf %499, %499 : vector<16x32xf32>
    %cst_169 = arith.constant dense<0.000000e+00> : vector<1x16xf32>
    %508 = tpu.matmul %462, %507, %cst_169 {dimension_numbers = #tpu.dot_dimension_numbers<[1], [1], [0], [0], [0, 0, 1, 0], [], []>} : vector<1x32xf32>, vector<16x32xf32>, vector<1x16xf32> -> vector<1x16xf32>
    %509 = vector.broadcast %506 : vector<16x1xf32> to vector<16x16xf32>
    %510 = vector.broadcast %508 : vector<1x16xf32> to vector<16x16xf32>
    %511 = arith.addf %509, %510 : vector<16x16xf32>
    %cst_170 = arith.constant 2.000000e+00 : f32
    %512 = vector.broadcast %cst_170 : f32 to vector<16x16xf32>
    %513 = arith.mulf %512, %503 : vector<16x16xf32>
    %514 = arith.subf %511, %513 : vector<16x16xf32>
    %cst_171 = arith.constant 0.000000e+00 : f32
    %515 = vector.broadcast %cst_171 : f32 to vector<16x16xf32>
    %516 = arith.maximumf %514, %515 : vector<16x16xf32>
    %517 = math.sqrt %516 : vector<16x16xf32>
    %518 = arith.mulf %1, %517 : vector<16x16xf32>
    %519 = vector.shape_cast %518 : vector<16x16xf32> to vector<1x16x16xf32>
    %cst_172 = arith.constant dense<0.000000e+00> : vector<1xf32>
    %520 = vector.multi_reduction <add>, %519, %cst_172 [1, 2] : vector<1x16x16xf32> to vector<1xf32>
    %521 = vector.shape_cast %520 : vector<1xf32> to vector<1x1x1xf32>
    %522 = vector.extract %521[0, 0, 0] : f32 from vector<1x1x1xf32>
    %523 = vector.broadcast %522 : f32 to vector<1x1xf32>
    %524 = arith.addf %491, %523 : vector<1x1xf32>
    %525 = arith.mulf %1, %516 : vector<16x16xf32>
    %526 = vector.shape_cast %525 : vector<16x16xf32> to vector<1x16x16xf32>
    %cst_173 = arith.constant dense<0.000000e+00> : vector<1xf32>
    %527 = vector.multi_reduction <add>, %526, %cst_173 [1, 2] : vector<1x16x16xf32> to vector<1xf32>
    %528 = vector.shape_cast %527 : vector<1xf32> to vector<1x1x1xf32>
    %529 = vector.extract %528[0, 0, 0] : f32 from vector<1x1x1xf32>
    %530 = vector.broadcast %529 : f32 to vector<1x1xf32>
    %531 = arith.addf %498, %530 : vector<1x1xf32>
    %532 = vector.extract_strided_slice %460 {offsets = [0, 64], sizes = [16, 32], strides = [1, 1]} : vector<16x128xf32> to vector<16x32xf32>
    %533 = vector.extract_strided_slice %461 {offsets = [0, 64], sizes = [16, 32], strides = [1, 1]} : vector<16x128xf32> to vector<16x32xf32>
    %534 = arith.truncf %533 : vector<16x32xf32> to vector<16x32xbf16>
    %535 = arith.truncf %532 : vector<16x32xf32> to vector<16x32xbf16>
    %cst_174 = arith.constant dense<0.000000e+00> : vector<16x16xf32>
    %536 = tpu.matmul %534, %535, %cst_174 {dimension_numbers = #tpu.dot_dimension_numbers<[1], [1], [0], [0], [0, 0, 1, 0], [], []>} : vector<16x32xbf16>, vector<16x32xbf16>, vector<16x16xf32> -> vector<16x16xf32>
    %537 = arith.mulf %533, %533 : vector<16x32xf32>
    %cst_175 = arith.constant dense<0.000000e+00> : vector<16xf32>
    %538 = vector.multi_reduction <add>, %537, %cst_175 [1] : vector<16x32xf32> to vector<16xf32>
    %539 = vector.shape_cast %538 : vector<16xf32> to vector<16x1xf32>
    %540 = arith.mulf %532, %532 : vector<16x32xf32>
    %cst_176 = arith.constant dense<0.000000e+00> : vector<1x16xf32>
    %541 = tpu.matmul %462, %540, %cst_176 {dimension_numbers = #tpu.dot_dimension_numbers<[1], [1], [0], [0], [0, 0, 1, 0], [], []>} : vector<1x32xf32>, vector<16x32xf32>, vector<1x16xf32> -> vector<1x16xf32>
    %542 = vector.broadcast %539 : vector<16x1xf32> to vector<16x16xf32>
    %543 = vector.broadcast %541 : vector<1x16xf32> to vector<16x16xf32>
    %544 = arith.addf %542, %543 : vector<16x16xf32>
    %cst_177 = arith.constant 2.000000e+00 : f32
    %545 = vector.broadcast %cst_177 : f32 to vector<16x16xf32>
    %546 = arith.mulf %545, %536 : vector<16x16xf32>
    %547 = arith.subf %544, %546 : vector<16x16xf32>
    %cst_178 = arith.constant 0.000000e+00 : f32
    %548 = vector.broadcast %cst_178 : f32 to vector<16x16xf32>
    %549 = arith.maximumf %547, %548 : vector<16x16xf32>
    %550 = math.sqrt %549 : vector<16x16xf32>
    %551 = arith.mulf %1, %550 : vector<16x16xf32>
    %552 = vector.shape_cast %551 : vector<16x16xf32> to vector<1x16x16xf32>
    %cst_179 = arith.constant dense<0.000000e+00> : vector<1xf32>
    %553 = vector.multi_reduction <add>, %552, %cst_179 [1, 2] : vector<1x16x16xf32> to vector<1xf32>
    %554 = vector.shape_cast %553 : vector<1xf32> to vector<1x1x1xf32>
    %555 = vector.extract %554[0, 0, 0] : f32 from vector<1x1x1xf32>
    %556 = vector.broadcast %555 : f32 to vector<1x1xf32>
    %557 = arith.addf %524, %556 : vector<1x1xf32>
    %558 = arith.mulf %1, %549 : vector<16x16xf32>
    %559 = vector.shape_cast %558 : vector<16x16xf32> to vector<1x16x16xf32>
    %cst_180 = arith.constant dense<0.000000e+00> : vector<1xf32>
    %560 = vector.multi_reduction <add>, %559, %cst_180 [1, 2] : vector<1x16x16xf32> to vector<1xf32>
    %561 = vector.shape_cast %560 : vector<1xf32> to vector<1x1x1xf32>
    %562 = vector.extract %561[0, 0, 0] : f32 from vector<1x1x1xf32>
    %563 = vector.broadcast %562 : f32 to vector<1x1xf32>
    %564 = arith.addf %531, %563 : vector<1x1xf32>
    %565 = vector.extract_strided_slice %460 {offsets = [0, 96], sizes = [16, 32], strides = [1, 1]} : vector<16x128xf32> to vector<16x32xf32>
    %566 = vector.extract_strided_slice %461 {offsets = [0, 96], sizes = [16, 32], strides = [1, 1]} : vector<16x128xf32> to vector<16x32xf32>
    %567 = arith.truncf %566 : vector<16x32xf32> to vector<16x32xbf16>
    %568 = arith.truncf %565 : vector<16x32xf32> to vector<16x32xbf16>
    %cst_181 = arith.constant dense<0.000000e+00> : vector<16x16xf32>
    %569 = tpu.matmul %567, %568, %cst_181 {dimension_numbers = #tpu.dot_dimension_numbers<[1], [1], [0], [0], [0, 0, 1, 0], [], []>} : vector<16x32xbf16>, vector<16x32xbf16>, vector<16x16xf32> -> vector<16x16xf32>
    %570 = arith.mulf %566, %566 : vector<16x32xf32>
    %cst_182 = arith.constant dense<0.000000e+00> : vector<16xf32>
    %571 = vector.multi_reduction <add>, %570, %cst_182 [1] : vector<16x32xf32> to vector<16xf32>
    %572 = vector.shape_cast %571 : vector<16xf32> to vector<16x1xf32>
    %573 = arith.mulf %565, %565 : vector<16x32xf32>
    %cst_183 = arith.constant dense<0.000000e+00> : vector<1x16xf32>
    %574 = tpu.matmul %462, %573, %cst_183 {dimension_numbers = #tpu.dot_dimension_numbers<[1], [1], [0], [0], [0, 0, 1, 0], [], []>} : vector<1x32xf32>, vector<16x32xf32>, vector<1x16xf32> -> vector<1x16xf32>
    %575 = vector.broadcast %572 : vector<16x1xf32> to vector<16x16xf32>
    %576 = vector.broadcast %574 : vector<1x16xf32> to vector<16x16xf32>
    %577 = arith.addf %575, %576 : vector<16x16xf32>
    %cst_184 = arith.constant 2.000000e+00 : f32
    %578 = vector.broadcast %cst_184 : f32 to vector<16x16xf32>
    %579 = arith.mulf %578, %569 : vector<16x16xf32>
    %580 = arith.subf %577, %579 : vector<16x16xf32>
    %cst_185 = arith.constant 0.000000e+00 : f32
    %581 = vector.broadcast %cst_185 : f32 to vector<16x16xf32>
    %582 = arith.maximumf %580, %581 : vector<16x16xf32>
    %583 = math.sqrt %582 : vector<16x16xf32>
    %584 = arith.mulf %1, %583 : vector<16x16xf32>
    %585 = vector.shape_cast %584 : vector<16x16xf32> to vector<1x16x16xf32>
    %cst_186 = arith.constant dense<0.000000e+00> : vector<1xf32>
    %586 = vector.multi_reduction <add>, %585, %cst_186 [1, 2] : vector<1x16x16xf32> to vector<1xf32>
    %587 = vector.shape_cast %586 : vector<1xf32> to vector<1x1x1xf32>
    %588 = vector.extract %587[0, 0, 0] : f32 from vector<1x1x1xf32>
    %589 = vector.broadcast %588 : f32 to vector<1x1xf32>
    %590 = arith.addf %557, %589 : vector<1x1xf32>
    %591 = arith.mulf %1, %582 : vector<16x16xf32>
    %592 = vector.shape_cast %591 : vector<16x16xf32> to vector<1x16x16xf32>
    %cst_187 = arith.constant dense<0.000000e+00> : vector<1xf32>
    %593 = vector.multi_reduction <add>, %592, %cst_187 [1, 2] : vector<1x16x16xf32> to vector<1xf32>
    %594 = vector.shape_cast %593 : vector<1xf32> to vector<1x1x1xf32>
    %595 = vector.extract %594[0, 0, 0] : f32 from vector<1x1x1xf32>
    %596 = vector.broadcast %595 : f32 to vector<1x1xf32>
    %597 = arith.addf %564, %596 : vector<1x1xf32>
    %598 = arith.mulf %590, %590 : vector<1x1xf32>
    %cst_188 = arith.constant 7.812500e-03 : f32
    %599 = vector.broadcast %cst_188 : f32 to vector<1x1xf32>
    %600 = arith.mulf %598, %599 : vector<1x1xf32>
    %601 = arith.subf %597, %600 : vector<1x1xf32>
    %cst_189 = arith.constant 0.00787401571 : f32
    %602 = vector.broadcast %cst_189 : f32 to vector<1x1xf32>
    %603 = arith.mulf %601, %602 : vector<1x1xf32>
    %cst_190 = arith.constant 9.99999996E-13 : f32
    %604 = vector.broadcast %cst_190 : f32 to vector<1x1xf32>
    %605 = arith.maximumf %603, %604 : vector<1x1xf32>
    %cst_191 = arith.constant -5.000000e-01 : f32
    %606 = vector.broadcast %cst_191 : f32 to vector<1x1xf32>
    %607 = arith.divf %606, %605 : vector<1x1xf32>
    %608 = vector.extract_strided_slice %460 {offsets = [0, 0], sizes = [16, 32], strides = [1, 1]} : vector<16x128xf32> to vector<16x32xf32>
    %609 = vector.extract_strided_slice %461 {offsets = [0, 0], sizes = [16, 32], strides = [1, 1]} : vector<16x128xf32> to vector<16x32xf32>
    %610 = arith.truncf %609 : vector<16x32xf32> to vector<16x32xbf16>
    %611 = arith.truncf %608 : vector<16x32xf32> to vector<16x32xbf16>
    %cst_192 = arith.constant dense<0.000000e+00> : vector<16x16xf32>
    %612 = tpu.matmul %610, %611, %cst_192 {dimension_numbers = #tpu.dot_dimension_numbers<[1], [1], [0], [0], [0, 0, 1, 0], [], []>} : vector<16x32xbf16>, vector<16x32xbf16>, vector<16x16xf32> -> vector<16x16xf32>
    %613 = arith.mulf %609, %609 : vector<16x32xf32>
    %cst_193 = arith.constant dense<0.000000e+00> : vector<16xf32>
    %614 = vector.multi_reduction <add>, %613, %cst_193 [1] : vector<16x32xf32> to vector<16xf32>
    %615 = vector.shape_cast %614 : vector<16xf32> to vector<16x1xf32>
    %616 = arith.mulf %608, %608 : vector<16x32xf32>
    %cst_194 = arith.constant dense<0.000000e+00> : vector<1x16xf32>
    %617 = tpu.matmul %462, %616, %cst_194 {dimension_numbers = #tpu.dot_dimension_numbers<[1], [1], [0], [0], [0, 0, 1, 0], [], []>} : vector<1x32xf32>, vector<16x32xf32>, vector<1x16xf32> -> vector<1x16xf32>
    %618 = vector.broadcast %615 : vector<16x1xf32> to vector<16x16xf32>
    %619 = vector.broadcast %617 : vector<1x16xf32> to vector<16x16xf32>
    %620 = arith.addf %618, %619 : vector<16x16xf32>
    %cst_195 = arith.constant 2.000000e+00 : f32
    %621 = vector.broadcast %cst_195 : f32 to vector<16x16xf32>
    %622 = arith.mulf %621, %612 : vector<16x16xf32>
    %623 = arith.subf %620, %622 : vector<16x16xf32>
    %cst_196 = arith.constant 0.000000e+00 : f32
    %624 = vector.broadcast %cst_196 : f32 to vector<16x16xf32>
    %625 = arith.maximumf %623, %624 : vector<16x16xf32>
    %626 = vector.broadcast %607 : vector<1x1xf32> to vector<16x16xf32>
    %627 = arith.mulf %625, %626 : vector<16x16xf32>
    %628 = math.exp %627 : vector<16x16xf32>
    %cst_197 = arith.constant 1.000000e+00 : f32
    %629 = vector.broadcast %cst_197 : f32 to vector<16x16xf32>
    %630 = arith.subf %629, %628 : vector<16x16xf32>
    %cst_198 = arith.constant 4.000000e+00 : f32
    %631 = vector.broadcast %cst_198 : f32 to vector<16x16xf32>
    %632 = arith.mulf %630, %631 : vector<16x16xf32>
    %633 = math.exp %632 : vector<16x16xf32>
    %634 = arith.mulf %633, %1 : vector<16x16xf32>
    %635 = arith.truncf %634 : vector<16x16xf32> to vector<16x16xbf16>
    %636 = arith.truncf %608 : vector<16x32xf32> to vector<16x32xbf16>
    %cst_199 = arith.constant dense<0.000000e+00> : vector<16x32xf32>
    %637 = tpu.matmul %635, %636, %cst_199 {dimension_numbers = #tpu.dot_dimension_numbers<[1], [0], [0], [1], [0, 0, 1, 1], [], []>} : vector<16x16xbf16>, vector<16x32xbf16>, vector<16x32xf32> -> vector<16x32xf32>
    %cst_200 = arith.constant dense<0.000000e+00> : vector<16x1xf32>
    %638 = tpu.matmul %635, %463, %cst_200 {dimension_numbers = #tpu.dot_dimension_numbers<[1], [0], [0], [1], [0, 0, 1, 1], [], []>} : vector<16x16xbf16>, vector<16x1xbf16>, vector<16x1xf32> -> vector<16x1xf32>
    %cst_201 = arith.constant 9.99999968E-21 : f32
    %639 = vector.broadcast %cst_201 : f32 to vector<16x1xf32>
    %640 = arith.maximumf %638, %639 : vector<16x1xf32>
    %641 = tpu.reciprocal %640 {approx = true} : vector<16x1xf32> -> vector<16x1xf32>
    %642 = vector.broadcast %641 : vector<16x1xf32> to vector<16x32xf32>
    %643 = arith.mulf %637, %642 : vector<16x32xf32>
    %644 = vector.extract_strided_slice %460 {offsets = [0, 32], sizes = [16, 32], strides = [1, 1]} : vector<16x128xf32> to vector<16x32xf32>
    %645 = vector.extract_strided_slice %461 {offsets = [0, 32], sizes = [16, 32], strides = [1, 1]} : vector<16x128xf32> to vector<16x32xf32>
    %646 = arith.truncf %645 : vector<16x32xf32> to vector<16x32xbf16>
    %647 = arith.truncf %644 : vector<16x32xf32> to vector<16x32xbf16>
    %cst_202 = arith.constant dense<0.000000e+00> : vector<16x16xf32>
    %648 = tpu.matmul %646, %647, %cst_202 {dimension_numbers = #tpu.dot_dimension_numbers<[1], [1], [0], [0], [0, 0, 1, 0], [], []>} : vector<16x32xbf16>, vector<16x32xbf16>, vector<16x16xf32> -> vector<16x16xf32>
    %649 = arith.mulf %645, %645 : vector<16x32xf32>
    %cst_203 = arith.constant dense<0.000000e+00> : vector<16xf32>
    %650 = vector.multi_reduction <add>, %649, %cst_203 [1] : vector<16x32xf32> to vector<16xf32>
    %651 = vector.shape_cast %650 : vector<16xf32> to vector<16x1xf32>
    %652 = arith.mulf %644, %644 : vector<16x32xf32>
    %cst_204 = arith.constant dense<0.000000e+00> : vector<1x16xf32>
    %653 = tpu.matmul %462, %652, %cst_204 {dimension_numbers = #tpu.dot_dimension_numbers<[1], [1], [0], [0], [0, 0, 1, 0], [], []>} : vector<1x32xf32>, vector<16x32xf32>, vector<1x16xf32> -> vector<1x16xf32>
    %654 = vector.broadcast %651 : vector<16x1xf32> to vector<16x16xf32>
    %655 = vector.broadcast %653 : vector<1x16xf32> to vector<16x16xf32>
    %656 = arith.addf %654, %655 : vector<16x16xf32>
    %cst_205 = arith.constant 2.000000e+00 : f32
    %657 = vector.broadcast %cst_205 : f32 to vector<16x16xf32>
    %658 = arith.mulf %657, %648 : vector<16x16xf32>
    %659 = arith.subf %656, %658 : vector<16x16xf32>
    %cst_206 = arith.constant 0.000000e+00 : f32
    %660 = vector.broadcast %cst_206 : f32 to vector<16x16xf32>
    %661 = arith.maximumf %659, %660 : vector<16x16xf32>
    %662 = vector.broadcast %607 : vector<1x1xf32> to vector<16x16xf32>
    %663 = arith.mulf %661, %662 : vector<16x16xf32>
    %664 = math.exp %663 : vector<16x16xf32>
    %cst_207 = arith.constant 1.000000e+00 : f32
    %665 = vector.broadcast %cst_207 : f32 to vector<16x16xf32>
    %666 = arith.subf %665, %664 : vector<16x16xf32>
    %cst_208 = arith.constant 4.000000e+00 : f32
    %667 = vector.broadcast %cst_208 : f32 to vector<16x16xf32>
    %668 = arith.mulf %666, %667 : vector<16x16xf32>
    %669 = math.exp %668 : vector<16x16xf32>
    %670 = arith.mulf %669, %1 : vector<16x16xf32>
    %671 = arith.truncf %670 : vector<16x16xf32> to vector<16x16xbf16>
    %672 = arith.truncf %644 : vector<16x32xf32> to vector<16x32xbf16>
    %cst_209 = arith.constant dense<0.000000e+00> : vector<16x32xf32>
    %673 = tpu.matmul %671, %672, %cst_209 {dimension_numbers = #tpu.dot_dimension_numbers<[1], [0], [0], [1], [0, 0, 1, 1], [], []>} : vector<16x16xbf16>, vector<16x32xbf16>, vector<16x32xf32> -> vector<16x32xf32>
    %cst_210 = arith.constant dense<0.000000e+00> : vector<16x1xf32>
    %674 = tpu.matmul %671, %463, %cst_210 {dimension_numbers = #tpu.dot_dimension_numbers<[1], [0], [0], [1], [0, 0, 1, 1], [], []>} : vector<16x16xbf16>, vector<16x1xbf16>, vector<16x1xf32> -> vector<16x1xf32>
    %cst_211 = arith.constant 9.99999968E-21 : f32
    %675 = vector.broadcast %cst_211 : f32 to vector<16x1xf32>
    %676 = arith.maximumf %674, %675 : vector<16x1xf32>
    %677 = tpu.reciprocal %676 {approx = true} : vector<16x1xf32> -> vector<16x1xf32>
    %678 = vector.broadcast %677 : vector<16x1xf32> to vector<16x32xf32>
    %679 = arith.mulf %673, %678 : vector<16x32xf32>
    %680 = vector.extract_strided_slice %460 {offsets = [0, 64], sizes = [16, 32], strides = [1, 1]} : vector<16x128xf32> to vector<16x32xf32>
    %681 = vector.extract_strided_slice %461 {offsets = [0, 64], sizes = [16, 32], strides = [1, 1]} : vector<16x128xf32> to vector<16x32xf32>
    %682 = arith.truncf %681 : vector<16x32xf32> to vector<16x32xbf16>
    %683 = arith.truncf %680 : vector<16x32xf32> to vector<16x32xbf16>
    %cst_212 = arith.constant dense<0.000000e+00> : vector<16x16xf32>
    %684 = tpu.matmul %682, %683, %cst_212 {dimension_numbers = #tpu.dot_dimension_numbers<[1], [1], [0], [0], [0, 0, 1, 0], [], []>} : vector<16x32xbf16>, vector<16x32xbf16>, vector<16x16xf32> -> vector<16x16xf32>
    %685 = arith.mulf %681, %681 : vector<16x32xf32>
    %cst_213 = arith.constant dense<0.000000e+00> : vector<16xf32>
    %686 = vector.multi_reduction <add>, %685, %cst_213 [1] : vector<16x32xf32> to vector<16xf32>
    %687 = vector.shape_cast %686 : vector<16xf32> to vector<16x1xf32>
    %688 = arith.mulf %680, %680 : vector<16x32xf32>
    %cst_214 = arith.constant dense<0.000000e+00> : vector<1x16xf32>
    %689 = tpu.matmul %462, %688, %cst_214 {dimension_numbers = #tpu.dot_dimension_numbers<[1], [1], [0], [0], [0, 0, 1, 0], [], []>} : vector<1x32xf32>, vector<16x32xf32>, vector<1x16xf32> -> vector<1x16xf32>
    %690 = vector.broadcast %687 : vector<16x1xf32> to vector<16x16xf32>
    %691 = vector.broadcast %689 : vector<1x16xf32> to vector<16x16xf32>
    %692 = arith.addf %690, %691 : vector<16x16xf32>
    %cst_215 = arith.constant 2.000000e+00 : f32
    %693 = vector.broadcast %cst_215 : f32 to vector<16x16xf32>
    %694 = arith.mulf %693, %684 : vector<16x16xf32>
    %695 = arith.subf %692, %694 : vector<16x16xf32>
    %cst_216 = arith.constant 0.000000e+00 : f32
    %696 = vector.broadcast %cst_216 : f32 to vector<16x16xf32>
    %697 = arith.maximumf %695, %696 : vector<16x16xf32>
    %698 = vector.broadcast %607 : vector<1x1xf32> to vector<16x16xf32>
    %699 = arith.mulf %697, %698 : vector<16x16xf32>
    %700 = math.exp %699 : vector<16x16xf32>
    %cst_217 = arith.constant 1.000000e+00 : f32
    %701 = vector.broadcast %cst_217 : f32 to vector<16x16xf32>
    %702 = arith.subf %701, %700 : vector<16x16xf32>
    %cst_218 = arith.constant 4.000000e+00 : f32
    %703 = vector.broadcast %cst_218 : f32 to vector<16x16xf32>
    %704 = arith.mulf %702, %703 : vector<16x16xf32>
    %705 = math.exp %704 : vector<16x16xf32>
    %706 = arith.mulf %705, %1 : vector<16x16xf32>
    %707 = arith.truncf %706 : vector<16x16xf32> to vector<16x16xbf16>
    %708 = arith.truncf %680 : vector<16x32xf32> to vector<16x32xbf16>
    %cst_219 = arith.constant dense<0.000000e+00> : vector<16x32xf32>
    %709 = tpu.matmul %707, %708, %cst_219 {dimension_numbers = #tpu.dot_dimension_numbers<[1], [0], [0], [1], [0, 0, 1, 1], [], []>} : vector<16x16xbf16>, vector<16x32xbf16>, vector<16x32xf32> -> vector<16x32xf32>
    %cst_220 = arith.constant dense<0.000000e+00> : vector<16x1xf32>
    %710 = tpu.matmul %707, %463, %cst_220 {dimension_numbers = #tpu.dot_dimension_numbers<[1], [0], [0], [1], [0, 0, 1, 1], [], []>} : vector<16x16xbf16>, vector<16x1xbf16>, vector<16x1xf32> -> vector<16x1xf32>
    %cst_221 = arith.constant 9.99999968E-21 : f32
    %711 = vector.broadcast %cst_221 : f32 to vector<16x1xf32>
    %712 = arith.maximumf %710, %711 : vector<16x1xf32>
    %713 = tpu.reciprocal %712 {approx = true} : vector<16x1xf32> -> vector<16x1xf32>
    %714 = vector.broadcast %713 : vector<16x1xf32> to vector<16x32xf32>
    %715 = arith.mulf %709, %714 : vector<16x32xf32>
    %716 = vector.extract_strided_slice %460 {offsets = [0, 96], sizes = [16, 32], strides = [1, 1]} : vector<16x128xf32> to vector<16x32xf32>
    %717 = vector.extract_strided_slice %461 {offsets = [0, 96], sizes = [16, 32], strides = [1, 1]} : vector<16x128xf32> to vector<16x32xf32>
    %718 = arith.truncf %717 : vector<16x32xf32> to vector<16x32xbf16>
    %719 = arith.truncf %716 : vector<16x32xf32> to vector<16x32xbf16>
    %cst_222 = arith.constant dense<0.000000e+00> : vector<16x16xf32>
    %720 = tpu.matmul %718, %719, %cst_222 {dimension_numbers = #tpu.dot_dimension_numbers<[1], [1], [0], [0], [0, 0, 1, 0], [], []>} : vector<16x32xbf16>, vector<16x32xbf16>, vector<16x16xf32> -> vector<16x16xf32>
    %721 = arith.mulf %717, %717 : vector<16x32xf32>
    %cst_223 = arith.constant dense<0.000000e+00> : vector<16xf32>
    %722 = vector.multi_reduction <add>, %721, %cst_223 [1] : vector<16x32xf32> to vector<16xf32>
    %723 = vector.shape_cast %722 : vector<16xf32> to vector<16x1xf32>
    %724 = arith.mulf %716, %716 : vector<16x32xf32>
    %cst_224 = arith.constant dense<0.000000e+00> : vector<1x16xf32>
    %725 = tpu.matmul %462, %724, %cst_224 {dimension_numbers = #tpu.dot_dimension_numbers<[1], [1], [0], [0], [0, 0, 1, 0], [], []>} : vector<1x32xf32>, vector<16x32xf32>, vector<1x16xf32> -> vector<1x16xf32>
    %726 = vector.broadcast %723 : vector<16x1xf32> to vector<16x16xf32>
    %727 = vector.broadcast %725 : vector<1x16xf32> to vector<16x16xf32>
    %728 = arith.addf %726, %727 : vector<16x16xf32>
    %cst_225 = arith.constant 2.000000e+00 : f32
    %729 = vector.broadcast %cst_225 : f32 to vector<16x16xf32>
    %730 = arith.mulf %729, %720 : vector<16x16xf32>
    %731 = arith.subf %728, %730 : vector<16x16xf32>
    %cst_226 = arith.constant 0.000000e+00 : f32
    %732 = vector.broadcast %cst_226 : f32 to vector<16x16xf32>
    %733 = arith.maximumf %731, %732 : vector<16x16xf32>
    %734 = vector.broadcast %607 : vector<1x1xf32> to vector<16x16xf32>
    %735 = arith.mulf %733, %734 : vector<16x16xf32>
    %736 = math.exp %735 : vector<16x16xf32>
    %cst_227 = arith.constant 1.000000e+00 : f32
    %737 = vector.broadcast %cst_227 : f32 to vector<16x16xf32>
    %738 = arith.subf %737, %736 : vector<16x16xf32>
    %cst_228 = arith.constant 4.000000e+00 : f32
    %739 = vector.broadcast %cst_228 : f32 to vector<16x16xf32>
    %740 = arith.mulf %738, %739 : vector<16x16xf32>
    %741 = math.exp %740 : vector<16x16xf32>
    %742 = arith.mulf %741, %1 : vector<16x16xf32>
    %743 = arith.truncf %742 : vector<16x16xf32> to vector<16x16xbf16>
    %744 = arith.truncf %716 : vector<16x32xf32> to vector<16x32xbf16>
    %cst_229 = arith.constant dense<0.000000e+00> : vector<16x32xf32>
    %745 = tpu.matmul %743, %744, %cst_229 {dimension_numbers = #tpu.dot_dimension_numbers<[1], [0], [0], [1], [0, 0, 1, 1], [], []>} : vector<16x16xbf16>, vector<16x32xbf16>, vector<16x32xf32> -> vector<16x32xf32>
    %cst_230 = arith.constant dense<0.000000e+00> : vector<16x1xf32>
    %746 = tpu.matmul %743, %463, %cst_230 {dimension_numbers = #tpu.dot_dimension_numbers<[1], [0], [0], [1], [0, 0, 1, 1], [], []>} : vector<16x16xbf16>, vector<16x1xbf16>, vector<16x1xf32> -> vector<16x1xf32>
    %cst_231 = arith.constant 9.99999968E-21 : f32
    %747 = vector.broadcast %cst_231 : f32 to vector<16x1xf32>
    %748 = arith.maximumf %746, %747 : vector<16x1xf32>
    %749 = tpu.reciprocal %748 {approx = true} : vector<16x1xf32> -> vector<16x1xf32>
    %750 = vector.broadcast %749 : vector<16x1xf32> to vector<16x32xf32>
    %751 = arith.mulf %745, %750 : vector<16x32xf32>
    %752 = tpu.concatenate %643, %679, %715, %751 in 1 : vector<16x32xf32>, vector<16x32xf32>, vector<16x32xf32>, vector<16x32xf32> -> vector<16x128xf32>
    %c0_232 = arith.constant 0 : index
    %c0_233 = arith.constant 0 : index
    %753 = vector.load %arg16[%c0_232, %c0_233] : memref<1x128xf32, #tpu.memory_space<vmem>>, vector<1x128xf32>
    %754 = vector.broadcast %753 : vector<1x128xf32> to vector<16x128xf32>
    %755 = arith.addf %752, %754 : vector<16x128xf32>
    %c0_234 = arith.constant 0 : index
    %c0_235 = arith.constant 0 : index
    %756 = vector.load %arg17[%c0_234, %c0_235] : memref<128x32xbf16, #tpu.memory_space<vmem>>, vector<128x32xbf16>
    %757 = arith.truncf %755 : vector<16x128xf32> to vector<16x128xbf16>
    %cst_236 = arith.constant dense<0.000000e+00> : vector<16x32xf32>
    %758 = tpu.matmul %757, %756, %cst_236 {dimension_numbers = #tpu.dot_dimension_numbers<[1], [0], [0], [1], [0, 0, 1, 1], [], []>} : vector<16x128xbf16>, vector<128x32xbf16>, vector<16x32xf32> -> vector<16x32xf32>
    %cst_237 = arith.constant 5.000000e-01 : f32
    %759 = vector.broadcast %cst_237 : f32 to vector<16x32xf32>
    %760 = arith.mulf %759, %758 : vector<16x32xf32>
    %cst_238 = arith.constant 0.707106769 : f32
    %761 = vector.broadcast %cst_238 : f32 to vector<16x32xf32>
    %762 = arith.mulf %758, %761 : vector<16x32xf32>
    %cst_239 = arith.constant 0.000000e+00 : f32
    %763 = vector.broadcast %cst_239 : f32 to vector<16x32xf32>
    %764 = arith.cmpf oge, %762, %763 : vector<16x32xf32>
    %cst_240 = arith.constant 1.000000e+00 : f32
    %cst_241 = arith.constant -1.000000e+00 : f32
    %765 = vector.broadcast %cst_240 : f32 to vector<16x32xf32>
    %766 = vector.broadcast %cst_241 : f32 to vector<16x32xf32>
    %767 = arith.select %764, %765, %766 : vector<16x32xi1>, vector<16x32xf32>
    %768 = math.absf %762 : vector<16x32xf32>
    %cst_242 = arith.constant 0.327591091 : f32
    %769 = vector.broadcast %cst_242 : f32 to vector<16x32xf32>
    %770 = arith.mulf %769, %768 : vector<16x32xf32>
    %cst_243 = arith.constant 1.000000e+00 : f32
    %771 = vector.broadcast %cst_243 : f32 to vector<16x32xf32>
    %772 = arith.addf %771, %770 : vector<16x32xf32>
    %cst_244 = arith.constant 1.000000e+00 : f32
    %773 = vector.broadcast %cst_244 : f32 to vector<16x32xf32>
    %774 = arith.divf %773, %772 : vector<16x32xf32>
    %cst_245 = arith.constant 1.06140542 : f32
    %775 = vector.broadcast %cst_245 : f32 to vector<16x32xf32>
    %776 = arith.mulf %774, %775 : vector<16x32xf32>
    %cst_246 = arith.constant -1.45315206 : f32
    %777 = vector.broadcast %cst_246 : f32 to vector<16x32xf32>
    %778 = arith.addf %777, %776 : vector<16x32xf32>
    %779 = arith.mulf %774, %778 : vector<16x32xf32>
    %cst_247 = arith.constant 1.42141378 : f32
    %780 = vector.broadcast %cst_247 : f32 to vector<16x32xf32>
    %781 = arith.addf %780, %779 : vector<16x32xf32>
    %782 = arith.mulf %774, %781 : vector<16x32xf32>
    %cst_248 = arith.constant -0.284496725 : f32
    %783 = vector.broadcast %cst_248 : f32 to vector<16x32xf32>
    %784 = arith.addf %783, %782 : vector<16x32xf32>
    %785 = arith.mulf %774, %784 : vector<16x32xf32>
    %cst_249 = arith.constant 0.254829586 : f32
    %786 = vector.broadcast %cst_249 : f32 to vector<16x32xf32>
    %787 = arith.addf %786, %785 : vector<16x32xf32>
    %788 = arith.mulf %774, %787 : vector<16x32xf32>
    %cst_250 = arith.constant 0.000000e+00 : f32
    %789 = vector.broadcast %cst_250 : f32 to vector<16x32xf32>
    %790 = arith.subf %789, %768 : vector<16x32xf32>
    %791 = arith.mulf %790, %768 : vector<16x32xf32>
    %792 = math.exp %791 : vector<16x32xf32>
    %793 = arith.mulf %788, %792 : vector<16x32xf32>
    %cst_251 = arith.constant 1.000000e+00 : f32
    %794 = vector.broadcast %cst_251 : f32 to vector<16x32xf32>
    %795 = arith.subf %794, %793 : vector<16x32xf32>
    %796 = arith.mulf %767, %795 : vector<16x32xf32>
    %cst_252 = arith.constant 1.000000e+00 : f32
    %797 = vector.broadcast %cst_252 : f32 to vector<16x32xf32>
    %798 = arith.addf %797, %796 : vector<16x32xf32>
    %799 = arith.mulf %760, %798 : vector<16x32xf32>
    %c0_253 = arith.constant 0 : index
    %c0_254 = arith.constant 0 : index
    %800 = vector.load %arg18[%c0_253, %c0_254] : memref<32x32xbf16, #tpu.memory_space<vmem>>, vector<32x32xbf16>
    %801 = arith.truncf %799 : vector<16x32xf32> to vector<16x32xbf16>
    %cst_255 = arith.constant dense<0.000000e+00> : vector<16x32xf32>
    %802 = tpu.matmul %801, %800, %cst_255 {dimension_numbers = #tpu.dot_dimension_numbers<[1], [0], [0], [1], [0, 0, 1, 1], [], []>} : vector<16x32xbf16>, vector<32x32xbf16>, vector<16x32xf32> -> vector<16x32xf32>
    %c0_256 = arith.constant 0 : index
    %c0_257 = arith.constant 0 : index
    %803 = vector.load %arg19[%c0_256, %c0_257] : memref<1x32xf32, #tpu.memory_space<vmem>>, vector<1x32xf32>
    %804 = vector.broadcast %803 : vector<1x32xf32> to vector<16x32xf32>
    %805 = arith.addf %802, %804 : vector<16x32xf32>
    %cst_258 = arith.constant 5.000000e-01 : f32
    %806 = vector.broadcast %cst_258 : f32 to vector<16x32xf32>
    %807 = arith.mulf %806, %805 : vector<16x32xf32>
    %cst_259 = arith.constant 0.707106769 : f32
    %808 = vector.broadcast %cst_259 : f32 to vector<16x32xf32>
    %809 = arith.mulf %805, %808 : vector<16x32xf32>
    %cst_260 = arith.constant 0.000000e+00 : f32
    %810 = vector.broadcast %cst_260 : f32 to vector<16x32xf32>
    %811 = arith.cmpf oge, %809, %810 : vector<16x32xf32>
    %cst_261 = arith.constant 1.000000e+00 : f32
    %cst_262 = arith.constant -1.000000e+00 : f32
    %812 = vector.broadcast %cst_261 : f32 to vector<16x32xf32>
    %813 = vector.broadcast %cst_262 : f32 to vector<16x32xf32>
    %814 = arith.select %811, %812, %813 : vector<16x32xi1>, vector<16x32xf32>
    %815 = math.absf %809 : vector<16x32xf32>
    %cst_263 = arith.constant 0.327591091 : f32
    %816 = vector.broadcast %cst_263 : f32 to vector<16x32xf32>
    %817 = arith.mulf %816, %815 : vector<16x32xf32>
    %cst_264 = arith.constant 1.000000e+00 : f32
    %818 = vector.broadcast %cst_264 : f32 to vector<16x32xf32>
    %819 = arith.addf %818, %817 : vector<16x32xf32>
    %cst_265 = arith.constant 1.000000e+00 : f32
    %820 = vector.broadcast %cst_265 : f32 to vector<16x32xf32>
    %821 = arith.divf %820, %819 : vector<16x32xf32>
    %cst_266 = arith.constant 1.06140542 : f32
    %822 = vector.broadcast %cst_266 : f32 to vector<16x32xf32>
    %823 = arith.mulf %821, %822 : vector<16x32xf32>
    %cst_267 = arith.constant -1.45315206 : f32
    %824 = vector.broadcast %cst_267 : f32 to vector<16x32xf32>
    %825 = arith.addf %824, %823 : vector<16x32xf32>
    %826 = arith.mulf %821, %825 : vector<16x32xf32>
    %cst_268 = arith.constant 1.42141378 : f32
    %827 = vector.broadcast %cst_268 : f32 to vector<16x32xf32>
    %828 = arith.addf %827, %826 : vector<16x32xf32>
    %829 = arith.mulf %821, %828 : vector<16x32xf32>
    %cst_269 = arith.constant -0.284496725 : f32
    %830 = vector.broadcast %cst_269 : f32 to vector<16x32xf32>
    %831 = arith.addf %830, %829 : vector<16x32xf32>
    %832 = arith.mulf %821, %831 : vector<16x32xf32>
    %cst_270 = arith.constant 0.254829586 : f32
    %833 = vector.broadcast %cst_270 : f32 to vector<16x32xf32>
    %834 = arith.addf %833, %832 : vector<16x32xf32>
    %835 = arith.mulf %821, %834 : vector<16x32xf32>
    %cst_271 = arith.constant 0.000000e+00 : f32
    %836 = vector.broadcast %cst_271 : f32 to vector<16x32xf32>
    %837 = arith.subf %836, %815 : vector<16x32xf32>
    %838 = arith.mulf %837, %815 : vector<16x32xf32>
    %839 = math.exp %838 : vector<16x32xf32>
    %840 = arith.mulf %835, %839 : vector<16x32xf32>
    %cst_272 = arith.constant 1.000000e+00 : f32
    %841 = vector.broadcast %cst_272 : f32 to vector<16x32xf32>
    %842 = arith.subf %841, %840 : vector<16x32xf32>
    %843 = arith.mulf %814, %842 : vector<16x32xf32>
    %cst_273 = arith.constant 1.000000e+00 : f32
    %844 = vector.broadcast %cst_273 : f32 to vector<16x32xf32>
    %845 = arith.addf %844, %843 : vector<16x32xf32>
    %846 = arith.mulf %807, %845 : vector<16x32xf32>
    %c0_274 = arith.constant 0 : index
    %c0_275 = arith.constant 0 : index
    %847 = vector.load %arg20[%c0_274, %c0_275] : memref<32x32xbf16, #tpu.memory_space<vmem>>, vector<32x32xbf16>
    %848 = arith.truncf %846 : vector<16x32xf32> to vector<16x32xbf16>
    %cst_276 = arith.constant dense<0.000000e+00> : vector<16x32xf32>
    %849 = tpu.matmul %848, %847, %cst_276 {dimension_numbers = #tpu.dot_dimension_numbers<[1], [0], [0], [1], [0, 0, 1, 1], [], []>} : vector<16x32xbf16>, vector<32x32xbf16>, vector<16x32xf32> -> vector<16x32xf32>
    %c0_277 = arith.constant 0 : index
    %c0_278 = arith.constant 0 : index
    %850 = vector.load %arg21[%c0_277, %c0_278] : memref<1x32xf32, #tpu.memory_space<vmem>>, vector<1x32xf32>
    %851 = vector.broadcast %850 : vector<1x32xf32> to vector<16x32xf32>
    %852 = arith.addf %849, %851 : vector<16x32xf32>
    %c0_279 = arith.constant 0 : index
    %c0_280 = arith.constant 0 : index
    %853 = vector.load %arg22[%c0_279, %c0_280] : memref<1x32xf32, #tpu.memory_space<vmem>>, vector<1x32xf32>
    %c0_281 = arith.constant 0 : index
    %c0_282 = arith.constant 0 : index
    %854 = vector.load %arg23[%c0_281, %c0_282] : memref<1x32xf32, #tpu.memory_space<vmem>>, vector<1x32xf32>
    %cst_283 = arith.constant dense<0.000000e+00> : vector<32xf32>
    %855 = vector.multi_reduction <add>, %852, %cst_283 [0] : vector<16x32xf32> to vector<32xf32>
    %856 = vector.shape_cast %855 : vector<32xf32> to vector<1x32xf32>
    %cst_284 = arith.constant 1.600000e+01 : f32
    %857 = vector.broadcast %cst_284 : f32 to vector<1x32xf32>
    %858 = arith.divf %856, %857 : vector<1x32xf32>
    %859 = arith.mulf %852, %852 : vector<16x32xf32>
    %cst_285 = arith.constant dense<0.000000e+00> : vector<32xf32>
    %860 = vector.multi_reduction <add>, %859, %cst_285 [0] : vector<16x32xf32> to vector<32xf32>
    %861 = vector.shape_cast %860 : vector<32xf32> to vector<1x32xf32>
    %cst_286 = arith.constant 1.600000e+01 : f32
    %862 = vector.broadcast %cst_286 : f32 to vector<1x32xf32>
    %863 = arith.divf %861, %862 : vector<1x32xf32>
    %864 = arith.mulf %858, %858 : vector<1x32xf32>
    %865 = arith.subf %863, %864 : vector<1x32xf32>
    %cst_287 = arith.constant 0.000000e+00 : f32
    %866 = vector.broadcast %cst_287 : f32 to vector<1x32xf32>
    %867 = arith.maximumf %865, %866 : vector<1x32xf32>
    %868 = vector.broadcast %858 : vector<1x32xf32> to vector<16x32xf32>
    %869 = arith.subf %852, %868 : vector<16x32xf32>
    %cst_288 = arith.constant 9.99999974E-6 : f32
    %870 = vector.broadcast %cst_288 : f32 to vector<1x32xf32>
    %871 = arith.addf %867, %870 : vector<1x32xf32>
    %872 = math.rsqrt %871 : vector<1x32xf32>
    %873 = vector.broadcast %872 : vector<1x32xf32> to vector<16x32xf32>
    %874 = arith.mulf %869, %873 : vector<16x32xf32>
    %875 = vector.broadcast %853 : vector<1x32xf32> to vector<16x32xf32>
    %876 = arith.mulf %874, %875 : vector<16x32xf32>
    %877 = vector.broadcast %854 : vector<1x32xf32> to vector<16x32xf32>
    %878 = arith.addf %876, %877 : vector<16x32xf32>
    %c0_289 = arith.constant 0 : index
    %c0_290 = arith.constant 0 : index
    %879 = vector.load %arg24[%c0_289, %c0_290] : memref<32x256xbf16, #tpu.memory_space<vmem>>, vector<32x256xbf16>
    %880 = arith.truncf %878 : vector<16x32xf32> to vector<16x32xbf16>
    %cst_291 = arith.constant dense<0.000000e+00> : vector<16x256xf32>
    %881 = tpu.matmul %880, %879, %cst_291 {dimension_numbers = #tpu.dot_dimension_numbers<[1], [0], [0], [1], [0, 0, 1, 1], [], []>} : vector<16x32xbf16>, vector<32x256xbf16>, vector<16x256xf32> -> vector<16x256xf32>
    %882 = vector.extract_strided_slice %881 {offsets = [0, 0], sizes = [16, 128], strides = [1, 1]} : vector<16x256xf32> to vector<16x128xf32>
    %883 = vector.extract_strided_slice %881 {offsets = [0, 128], sizes = [16, 128], strides = [1, 1]} : vector<16x256xf32> to vector<16x128xf32>
    %cst_292 = arith.constant 1.000000e+00 : f32
    %884 = vector.broadcast %cst_292 : f32 to vector<1x32xf32>
    %cst_293 = arith.constant 1.000000e+00 : bf16
    %885 = vector.broadcast %cst_293 : bf16 to vector<16x1xbf16>
    %cst_294 = arith.constant 0.000000e+00 : f32
    %886 = vector.broadcast %cst_294 : f32 to vector<1x1xf32>
    %cst_295 = arith.constant 0.000000e+00 : f32
    %887 = vector.broadcast %cst_295 : f32 to vector<1x1xf32>
    %888 = vector.extract_strided_slice %882 {offsets = [0, 0], sizes = [16, 32], strides = [1, 1]} : vector<16x128xf32> to vector<16x32xf32>
    %889 = vector.extract_strided_slice %883 {offsets = [0, 0], sizes = [16, 32], strides = [1, 1]} : vector<16x128xf32> to vector<16x32xf32>
    %890 = arith.truncf %889 : vector<16x32xf32> to vector<16x32xbf16>
    %891 = arith.truncf %888 : vector<16x32xf32> to vector<16x32xbf16>
    %cst_296 = arith.constant dense<0.000000e+00> : vector<16x16xf32>
    %892 = tpu.matmul %890, %891, %cst_296 {dimension_numbers = #tpu.dot_dimension_numbers<[1], [1], [0], [0], [0, 0, 1, 0], [], []>} : vector<16x32xbf16>, vector<16x32xbf16>, vector<16x16xf32> -> vector<16x16xf32>
    %893 = arith.mulf %889, %889 : vector<16x32xf32>
    %cst_297 = arith.constant dense<0.000000e+00> : vector<16xf32>
    %894 = vector.multi_reduction <add>, %893, %cst_297 [1] : vector<16x32xf32> to vector<16xf32>
    %895 = vector.shape_cast %894 : vector<16xf32> to vector<16x1xf32>
    %896 = arith.mulf %888, %888 : vector<16x32xf32>
    %cst_298 = arith.constant dense<0.000000e+00> : vector<1x16xf32>
    %897 = tpu.matmul %884, %896, %cst_298 {dimension_numbers = #tpu.dot_dimension_numbers<[1], [1], [0], [0], [0, 0, 1, 0], [], []>} : vector<1x32xf32>, vector<16x32xf32>, vector<1x16xf32> -> vector<1x16xf32>
    %898 = vector.broadcast %895 : vector<16x1xf32> to vector<16x16xf32>
    %899 = vector.broadcast %897 : vector<1x16xf32> to vector<16x16xf32>
    %900 = arith.addf %898, %899 : vector<16x16xf32>
    %cst_299 = arith.constant 2.000000e+00 : f32
    %901 = vector.broadcast %cst_299 : f32 to vector<16x16xf32>
    %902 = arith.mulf %901, %892 : vector<16x16xf32>
    %903 = arith.subf %900, %902 : vector<16x16xf32>
    %cst_300 = arith.constant 0.000000e+00 : f32
    %904 = vector.broadcast %cst_300 : f32 to vector<16x16xf32>
    %905 = arith.maximumf %903, %904 : vector<16x16xf32>
    %906 = math.sqrt %905 : vector<16x16xf32>
    %907 = arith.mulf %1, %906 : vector<16x16xf32>
    %908 = vector.shape_cast %907 : vector<16x16xf32> to vector<1x16x16xf32>
    %cst_301 = arith.constant dense<0.000000e+00> : vector<1xf32>
    %909 = vector.multi_reduction <add>, %908, %cst_301 [1, 2] : vector<1x16x16xf32> to vector<1xf32>
    %910 = vector.shape_cast %909 : vector<1xf32> to vector<1x1x1xf32>
    %911 = vector.extract %910[0, 0, 0] : f32 from vector<1x1x1xf32>
    %912 = vector.broadcast %911 : f32 to vector<1x1xf32>
    %913 = arith.addf %886, %912 : vector<1x1xf32>
    %914 = arith.mulf %1, %905 : vector<16x16xf32>
    %915 = vector.shape_cast %914 : vector<16x16xf32> to vector<1x16x16xf32>
    %cst_302 = arith.constant dense<0.000000e+00> : vector<1xf32>
    %916 = vector.multi_reduction <add>, %915, %cst_302 [1, 2] : vector<1x16x16xf32> to vector<1xf32>
    %917 = vector.shape_cast %916 : vector<1xf32> to vector<1x1x1xf32>
    %918 = vector.extract %917[0, 0, 0] : f32 from vector<1x1x1xf32>
    %919 = vector.broadcast %918 : f32 to vector<1x1xf32>
    %920 = arith.addf %887, %919 : vector<1x1xf32>
    %921 = vector.extract_strided_slice %882 {offsets = [0, 32], sizes = [16, 32], strides = [1, 1]} : vector<16x128xf32> to vector<16x32xf32>
    %922 = vector.extract_strided_slice %883 {offsets = [0, 32], sizes = [16, 32], strides = [1, 1]} : vector<16x128xf32> to vector<16x32xf32>
    %923 = arith.truncf %922 : vector<16x32xf32> to vector<16x32xbf16>
    %924 = arith.truncf %921 : vector<16x32xf32> to vector<16x32xbf16>
    %cst_303 = arith.constant dense<0.000000e+00> : vector<16x16xf32>
    %925 = tpu.matmul %923, %924, %cst_303 {dimension_numbers = #tpu.dot_dimension_numbers<[1], [1], [0], [0], [0, 0, 1, 0], [], []>} : vector<16x32xbf16>, vector<16x32xbf16>, vector<16x16xf32> -> vector<16x16xf32>
    %926 = arith.mulf %922, %922 : vector<16x32xf32>
    %cst_304 = arith.constant dense<0.000000e+00> : vector<16xf32>
    %927 = vector.multi_reduction <add>, %926, %cst_304 [1] : vector<16x32xf32> to vector<16xf32>
    %928 = vector.shape_cast %927 : vector<16xf32> to vector<16x1xf32>
    %929 = arith.mulf %921, %921 : vector<16x32xf32>
    %cst_305 = arith.constant dense<0.000000e+00> : vector<1x16xf32>
    %930 = tpu.matmul %884, %929, %cst_305 {dimension_numbers = #tpu.dot_dimension_numbers<[1], [1], [0], [0], [0, 0, 1, 0], [], []>} : vector<1x32xf32>, vector<16x32xf32>, vector<1x16xf32> -> vector<1x16xf32>
    %931 = vector.broadcast %928 : vector<16x1xf32> to vector<16x16xf32>
    %932 = vector.broadcast %930 : vector<1x16xf32> to vector<16x16xf32>
    %933 = arith.addf %931, %932 : vector<16x16xf32>
    %cst_306 = arith.constant 2.000000e+00 : f32
    %934 = vector.broadcast %cst_306 : f32 to vector<16x16xf32>
    %935 = arith.mulf %934, %925 : vector<16x16xf32>
    %936 = arith.subf %933, %935 : vector<16x16xf32>
    %cst_307 = arith.constant 0.000000e+00 : f32
    %937 = vector.broadcast %cst_307 : f32 to vector<16x16xf32>
    %938 = arith.maximumf %936, %937 : vector<16x16xf32>
    %939 = math.sqrt %938 : vector<16x16xf32>
    %940 = arith.mulf %1, %939 : vector<16x16xf32>
    %941 = vector.shape_cast %940 : vector<16x16xf32> to vector<1x16x16xf32>
    %cst_308 = arith.constant dense<0.000000e+00> : vector<1xf32>
    %942 = vector.multi_reduction <add>, %941, %cst_308 [1, 2] : vector<1x16x16xf32> to vector<1xf32>
    %943 = vector.shape_cast %942 : vector<1xf32> to vector<1x1x1xf32>
    %944 = vector.extract %943[0, 0, 0] : f32 from vector<1x1x1xf32>
    %945 = vector.broadcast %944 : f32 to vector<1x1xf32>
    %946 = arith.addf %913, %945 : vector<1x1xf32>
    %947 = arith.mulf %1, %938 : vector<16x16xf32>
    %948 = vector.shape_cast %947 : vector<16x16xf32> to vector<1x16x16xf32>
    %cst_309 = arith.constant dense<0.000000e+00> : vector<1xf32>
    %949 = vector.multi_reduction <add>, %948, %cst_309 [1, 2] : vector<1x16x16xf32> to vector<1xf32>
    %950 = vector.shape_cast %949 : vector<1xf32> to vector<1x1x1xf32>
    %951 = vector.extract %950[0, 0, 0] : f32 from vector<1x1x1xf32>
    %952 = vector.broadcast %951 : f32 to vector<1x1xf32>
    %953 = arith.addf %920, %952 : vector<1x1xf32>
    %954 = vector.extract_strided_slice %882 {offsets = [0, 64], sizes = [16, 32], strides = [1, 1]} : vector<16x128xf32> to vector<16x32xf32>
    %955 = vector.extract_strided_slice %883 {offsets = [0, 64], sizes = [16, 32], strides = [1, 1]} : vector<16x128xf32> to vector<16x32xf32>
    %956 = arith.truncf %955 : vector<16x32xf32> to vector<16x32xbf16>
    %957 = arith.truncf %954 : vector<16x32xf32> to vector<16x32xbf16>
    %cst_310 = arith.constant dense<0.000000e+00> : vector<16x16xf32>
    %958 = tpu.matmul %956, %957, %cst_310 {dimension_numbers = #tpu.dot_dimension_numbers<[1], [1], [0], [0], [0, 0, 1, 0], [], []>} : vector<16x32xbf16>, vector<16x32xbf16>, vector<16x16xf32> -> vector<16x16xf32>
    %959 = arith.mulf %955, %955 : vector<16x32xf32>
    %cst_311 = arith.constant dense<0.000000e+00> : vector<16xf32>
    %960 = vector.multi_reduction <add>, %959, %cst_311 [1] : vector<16x32xf32> to vector<16xf32>
    %961 = vector.shape_cast %960 : vector<16xf32> to vector<16x1xf32>
    %962 = arith.mulf %954, %954 : vector<16x32xf32>
    %cst_312 = arith.constant dense<0.000000e+00> : vector<1x16xf32>
    %963 = tpu.matmul %884, %962, %cst_312 {dimension_numbers = #tpu.dot_dimension_numbers<[1], [1], [0], [0], [0, 0, 1, 0], [], []>} : vector<1x32xf32>, vector<16x32xf32>, vector<1x16xf32> -> vector<1x16xf32>
    %964 = vector.broadcast %961 : vector<16x1xf32> to vector<16x16xf32>
    %965 = vector.broadcast %963 : vector<1x16xf32> to vector<16x16xf32>
    %966 = arith.addf %964, %965 : vector<16x16xf32>
    %cst_313 = arith.constant 2.000000e+00 : f32
    %967 = vector.broadcast %cst_313 : f32 to vector<16x16xf32>
    %968 = arith.mulf %967, %958 : vector<16x16xf32>
    %969 = arith.subf %966, %968 : vector<16x16xf32>
    %cst_314 = arith.constant 0.000000e+00 : f32
    %970 = vector.broadcast %cst_314 : f32 to vector<16x16xf32>
    %971 = arith.maximumf %969, %970 : vector<16x16xf32>
    %972 = math.sqrt %971 : vector<16x16xf32>
    %973 = arith.mulf %1, %972 : vector<16x16xf32>
    %974 = vector.shape_cast %973 : vector<16x16xf32> to vector<1x16x16xf32>
    %cst_315 = arith.constant dense<0.000000e+00> : vector<1xf32>
    %975 = vector.multi_reduction <add>, %974, %cst_315 [1, 2] : vector<1x16x16xf32> to vector<1xf32>
    %976 = vector.shape_cast %975 : vector<1xf32> to vector<1x1x1xf32>
    %977 = vector.extract %976[0, 0, 0] : f32 from vector<1x1x1xf32>
    %978 = vector.broadcast %977 : f32 to vector<1x1xf32>
    %979 = arith.addf %946, %978 : vector<1x1xf32>
    %980 = arith.mulf %1, %971 : vector<16x16xf32>
    %981 = vector.shape_cast %980 : vector<16x16xf32> to vector<1x16x16xf32>
    %cst_316 = arith.constant dense<0.000000e+00> : vector<1xf32>
    %982 = vector.multi_reduction <add>, %981, %cst_316 [1, 2] : vector<1x16x16xf32> to vector<1xf32>
    %983 = vector.shape_cast %982 : vector<1xf32> to vector<1x1x1xf32>
    %984 = vector.extract %983[0, 0, 0] : f32 from vector<1x1x1xf32>
    %985 = vector.broadcast %984 : f32 to vector<1x1xf32>
    %986 = arith.addf %953, %985 : vector<1x1xf32>
    %987 = vector.extract_strided_slice %882 {offsets = [0, 96], sizes = [16, 32], strides = [1, 1]} : vector<16x128xf32> to vector<16x32xf32>
    %988 = vector.extract_strided_slice %883 {offsets = [0, 96], sizes = [16, 32], strides = [1, 1]} : vector<16x128xf32> to vector<16x32xf32>
    %989 = arith.truncf %988 : vector<16x32xf32> to vector<16x32xbf16>
    %990 = arith.truncf %987 : vector<16x32xf32> to vector<16x32xbf16>
    %cst_317 = arith.constant dense<0.000000e+00> : vector<16x16xf32>
    %991 = tpu.matmul %989, %990, %cst_317 {dimension_numbers = #tpu.dot_dimension_numbers<[1], [1], [0], [0], [0, 0, 1, 0], [], []>} : vector<16x32xbf16>, vector<16x32xbf16>, vector<16x16xf32> -> vector<16x16xf32>
    %992 = arith.mulf %988, %988 : vector<16x32xf32>
    %cst_318 = arith.constant dense<0.000000e+00> : vector<16xf32>
    %993 = vector.multi_reduction <add>, %992, %cst_318 [1] : vector<16x32xf32> to vector<16xf32>
    %994 = vector.shape_cast %993 : vector<16xf32> to vector<16x1xf32>
    %995 = arith.mulf %987, %987 : vector<16x32xf32>
    %cst_319 = arith.constant dense<0.000000e+00> : vector<1x16xf32>
    %996 = tpu.matmul %884, %995, %cst_319 {dimension_numbers = #tpu.dot_dimension_numbers<[1], [1], [0], [0], [0, 0, 1, 0], [], []>} : vector<1x32xf32>, vector<16x32xf32>, vector<1x16xf32> -> vector<1x16xf32>
    %997 = vector.broadcast %994 : vector<16x1xf32> to vector<16x16xf32>
    %998 = vector.broadcast %996 : vector<1x16xf32> to vector<16x16xf32>
    %999 = arith.addf %997, %998 : vector<16x16xf32>
    %cst_320 = arith.constant 2.000000e+00 : f32
    %1000 = vector.broadcast %cst_320 : f32 to vector<16x16xf32>
    %1001 = arith.mulf %1000, %991 : vector<16x16xf32>
    %1002 = arith.subf %999, %1001 : vector<16x16xf32>
    %cst_321 = arith.constant 0.000000e+00 : f32
    %1003 = vector.broadcast %cst_321 : f32 to vector<16x16xf32>
    %1004 = arith.maximumf %1002, %1003 : vector<16x16xf32>
    %1005 = math.sqrt %1004 : vector<16x16xf32>
    %1006 = arith.mulf %1, %1005 : vector<16x16xf32>
    %1007 = vector.shape_cast %1006 : vector<16x16xf32> to vector<1x16x16xf32>
    %cst_322 = arith.constant dense<0.000000e+00> : vector<1xf32>
    %1008 = vector.multi_reduction <add>, %1007, %cst_322 [1, 2] : vector<1x16x16xf32> to vector<1xf32>
    %1009 = vector.shape_cast %1008 : vector<1xf32> to vector<1x1x1xf32>
    %1010 = vector.extract %1009[0, 0, 0] : f32 from vector<1x1x1xf32>
    %1011 = vector.broadcast %1010 : f32 to vector<1x1xf32>
    %1012 = arith.addf %979, %1011 : vector<1x1xf32>
    %1013 = arith.mulf %1, %1004 : vector<16x16xf32>
    %1014 = vector.shape_cast %1013 : vector<16x16xf32> to vector<1x16x16xf32>
    %cst_323 = arith.constant dense<0.000000e+00> : vector<1xf32>
    %1015 = vector.multi_reduction <add>, %1014, %cst_323 [1, 2] : vector<1x16x16xf32> to vector<1xf32>
    %1016 = vector.shape_cast %1015 : vector<1xf32> to vector<1x1x1xf32>
    %1017 = vector.extract %1016[0, 0, 0] : f32 from vector<1x1x1xf32>
    %1018 = vector.broadcast %1017 : f32 to vector<1x1xf32>
    %1019 = arith.addf %986, %1018 : vector<1x1xf32>
    %1020 = arith.mulf %1012, %1012 : vector<1x1xf32>
    %cst_324 = arith.constant 7.812500e-03 : f32
    %1021 = vector.broadcast %cst_324 : f32 to vector<1x1xf32>
    %1022 = arith.mulf %1020, %1021 : vector<1x1xf32>
    %1023 = arith.subf %1019, %1022 : vector<1x1xf32>
    %cst_325 = arith.constant 0.00787401571 : f32
    %1024 = vector.broadcast %cst_325 : f32 to vector<1x1xf32>
    %1025 = arith.mulf %1023, %1024 : vector<1x1xf32>
    %cst_326 = arith.constant 9.99999996E-13 : f32
    %1026 = vector.broadcast %cst_326 : f32 to vector<1x1xf32>
    %1027 = arith.maximumf %1025, %1026 : vector<1x1xf32>
    %cst_327 = arith.constant -5.000000e-01 : f32
    %1028 = vector.broadcast %cst_327 : f32 to vector<1x1xf32>
    %1029 = arith.divf %1028, %1027 : vector<1x1xf32>
    %1030 = vector.extract_strided_slice %882 {offsets = [0, 0], sizes = [16, 32], strides = [1, 1]} : vector<16x128xf32> to vector<16x32xf32>
    %1031 = vector.extract_strided_slice %883 {offsets = [0, 0], sizes = [16, 32], strides = [1, 1]} : vector<16x128xf32> to vector<16x32xf32>
    %1032 = arith.truncf %1031 : vector<16x32xf32> to vector<16x32xbf16>
    %1033 = arith.truncf %1030 : vector<16x32xf32> to vector<16x32xbf16>
    %cst_328 = arith.constant dense<0.000000e+00> : vector<16x16xf32>
    %1034 = tpu.matmul %1032, %1033, %cst_328 {dimension_numbers = #tpu.dot_dimension_numbers<[1], [1], [0], [0], [0, 0, 1, 0], [], []>} : vector<16x32xbf16>, vector<16x32xbf16>, vector<16x16xf32> -> vector<16x16xf32>
    %1035 = arith.mulf %1031, %1031 : vector<16x32xf32>
    %cst_329 = arith.constant dense<0.000000e+00> : vector<16xf32>
    %1036 = vector.multi_reduction <add>, %1035, %cst_329 [1] : vector<16x32xf32> to vector<16xf32>
    %1037 = vector.shape_cast %1036 : vector<16xf32> to vector<16x1xf32>
    %1038 = arith.mulf %1030, %1030 : vector<16x32xf32>
    %cst_330 = arith.constant dense<0.000000e+00> : vector<1x16xf32>
    %1039 = tpu.matmul %884, %1038, %cst_330 {dimension_numbers = #tpu.dot_dimension_numbers<[1], [1], [0], [0], [0, 0, 1, 0], [], []>} : vector<1x32xf32>, vector<16x32xf32>, vector<1x16xf32> -> vector<1x16xf32>
    %1040 = vector.broadcast %1037 : vector<16x1xf32> to vector<16x16xf32>
    %1041 = vector.broadcast %1039 : vector<1x16xf32> to vector<16x16xf32>
    %1042 = arith.addf %1040, %1041 : vector<16x16xf32>
    %cst_331 = arith.constant 2.000000e+00 : f32
    %1043 = vector.broadcast %cst_331 : f32 to vector<16x16xf32>
    %1044 = arith.mulf %1043, %1034 : vector<16x16xf32>
    %1045 = arith.subf %1042, %1044 : vector<16x16xf32>
    %cst_332 = arith.constant 0.000000e+00 : f32
    %1046 = vector.broadcast %cst_332 : f32 to vector<16x16xf32>
    %1047 = arith.maximumf %1045, %1046 : vector<16x16xf32>
    %1048 = vector.broadcast %1029 : vector<1x1xf32> to vector<16x16xf32>
    %1049 = arith.mulf %1047, %1048 : vector<16x16xf32>
    %1050 = math.exp %1049 : vector<16x16xf32>
    %cst_333 = arith.constant 1.000000e+00 : f32
    %1051 = vector.broadcast %cst_333 : f32 to vector<16x16xf32>
    %1052 = arith.subf %1051, %1050 : vector<16x16xf32>
    %cst_334 = arith.constant 4.000000e+00 : f32
    %1053 = vector.broadcast %cst_334 : f32 to vector<16x16xf32>
    %1054 = arith.mulf %1052, %1053 : vector<16x16xf32>
    %1055 = math.exp %1054 : vector<16x16xf32>
    %1056 = arith.mulf %1055, %1 : vector<16x16xf32>
    %1057 = arith.truncf %1056 : vector<16x16xf32> to vector<16x16xbf16>
    %1058 = arith.truncf %1030 : vector<16x32xf32> to vector<16x32xbf16>
    %cst_335 = arith.constant dense<0.000000e+00> : vector<16x32xf32>
    %1059 = tpu.matmul %1057, %1058, %cst_335 {dimension_numbers = #tpu.dot_dimension_numbers<[1], [0], [0], [1], [0, 0, 1, 1], [], []>} : vector<16x16xbf16>, vector<16x32xbf16>, vector<16x32xf32> -> vector<16x32xf32>
    %cst_336 = arith.constant dense<0.000000e+00> : vector<16x1xf32>
    %1060 = tpu.matmul %1057, %885, %cst_336 {dimension_numbers = #tpu.dot_dimension_numbers<[1], [0], [0], [1], [0, 0, 1, 1], [], []>} : vector<16x16xbf16>, vector<16x1xbf16>, vector<16x1xf32> -> vector<16x1xf32>
    %cst_337 = arith.constant 9.99999968E-21 : f32
    %1061 = vector.broadcast %cst_337 : f32 to vector<16x1xf32>
    %1062 = arith.maximumf %1060, %1061 : vector<16x1xf32>
    %1063 = tpu.reciprocal %1062 {approx = true} : vector<16x1xf32> -> vector<16x1xf32>
    %1064 = vector.broadcast %1063 : vector<16x1xf32> to vector<16x32xf32>
    %1065 = arith.mulf %1059, %1064 : vector<16x32xf32>
    %1066 = vector.extract_strided_slice %882 {offsets = [0, 32], sizes = [16, 32], strides = [1, 1]} : vector<16x128xf32> to vector<16x32xf32>
    %1067 = vector.extract_strided_slice %883 {offsets = [0, 32], sizes = [16, 32], strides = [1, 1]} : vector<16x128xf32> to vector<16x32xf32>
    %1068 = arith.truncf %1067 : vector<16x32xf32> to vector<16x32xbf16>
    %1069 = arith.truncf %1066 : vector<16x32xf32> to vector<16x32xbf16>
    %cst_338 = arith.constant dense<0.000000e+00> : vector<16x16xf32>
    %1070 = tpu.matmul %1068, %1069, %cst_338 {dimension_numbers = #tpu.dot_dimension_numbers<[1], [1], [0], [0], [0, 0, 1, 0], [], []>} : vector<16x32xbf16>, vector<16x32xbf16>, vector<16x16xf32> -> vector<16x16xf32>
    %1071 = arith.mulf %1067, %1067 : vector<16x32xf32>
    %cst_339 = arith.constant dense<0.000000e+00> : vector<16xf32>
    %1072 = vector.multi_reduction <add>, %1071, %cst_339 [1] : vector<16x32xf32> to vector<16xf32>
    %1073 = vector.shape_cast %1072 : vector<16xf32> to vector<16x1xf32>
    %1074 = arith.mulf %1066, %1066 : vector<16x32xf32>
    %cst_340 = arith.constant dense<0.000000e+00> : vector<1x16xf32>
    %1075 = tpu.matmul %884, %1074, %cst_340 {dimension_numbers = #tpu.dot_dimension_numbers<[1], [1], [0], [0], [0, 0, 1, 0], [], []>} : vector<1x32xf32>, vector<16x32xf32>, vector<1x16xf32> -> vector<1x16xf32>
    %1076 = vector.broadcast %1073 : vector<16x1xf32> to vector<16x16xf32>
    %1077 = vector.broadcast %1075 : vector<1x16xf32> to vector<16x16xf32>
    %1078 = arith.addf %1076, %1077 : vector<16x16xf32>
    %cst_341 = arith.constant 2.000000e+00 : f32
    %1079 = vector.broadcast %cst_341 : f32 to vector<16x16xf32>
    %1080 = arith.mulf %1079, %1070 : vector<16x16xf32>
    %1081 = arith.subf %1078, %1080 : vector<16x16xf32>
    %cst_342 = arith.constant 0.000000e+00 : f32
    %1082 = vector.broadcast %cst_342 : f32 to vector<16x16xf32>
    %1083 = arith.maximumf %1081, %1082 : vector<16x16xf32>
    %1084 = vector.broadcast %1029 : vector<1x1xf32> to vector<16x16xf32>
    %1085 = arith.mulf %1083, %1084 : vector<16x16xf32>
    %1086 = math.exp %1085 : vector<16x16xf32>
    %cst_343 = arith.constant 1.000000e+00 : f32
    %1087 = vector.broadcast %cst_343 : f32 to vector<16x16xf32>
    %1088 = arith.subf %1087, %1086 : vector<16x16xf32>
    %cst_344 = arith.constant 4.000000e+00 : f32
    %1089 = vector.broadcast %cst_344 : f32 to vector<16x16xf32>
    %1090 = arith.mulf %1088, %1089 : vector<16x16xf32>
    %1091 = math.exp %1090 : vector<16x16xf32>
    %1092 = arith.mulf %1091, %1 : vector<16x16xf32>
    %1093 = arith.truncf %1092 : vector<16x16xf32> to vector<16x16xbf16>
    %1094 = arith.truncf %1066 : vector<16x32xf32> to vector<16x32xbf16>
    %cst_345 = arith.constant dense<0.000000e+00> : vector<16x32xf32>
    %1095 = tpu.matmul %1093, %1094, %cst_345 {dimension_numbers = #tpu.dot_dimension_numbers<[1], [0], [0], [1], [0, 0, 1, 1], [], []>} : vector<16x16xbf16>, vector<16x32xbf16>, vector<16x32xf32> -> vector<16x32xf32>
    %cst_346 = arith.constant dense<0.000000e+00> : vector<16x1xf32>
    %1096 = tpu.matmul %1093, %885, %cst_346 {dimension_numbers = #tpu.dot_dimension_numbers<[1], [0], [0], [1], [0, 0, 1, 1], [], []>} : vector<16x16xbf16>, vector<16x1xbf16>, vector<16x1xf32> -> vector<16x1xf32>
    %cst_347 = arith.constant 9.99999968E-21 : f32
    %1097 = vector.broadcast %cst_347 : f32 to vector<16x1xf32>
    %1098 = arith.maximumf %1096, %1097 : vector<16x1xf32>
    %1099 = tpu.reciprocal %1098 {approx = true} : vector<16x1xf32> -> vector<16x1xf32>
    %1100 = vector.broadcast %1099 : vector<16x1xf32> to vector<16x32xf32>
    %1101 = arith.mulf %1095, %1100 : vector<16x32xf32>
    %1102 = vector.extract_strided_slice %882 {offsets = [0, 64], sizes = [16, 32], strides = [1, 1]} : vector<16x128xf32> to vector<16x32xf32>
    %1103 = vector.extract_strided_slice %883 {offsets = [0, 64], sizes = [16, 32], strides = [1, 1]} : vector<16x128xf32> to vector<16x32xf32>
    %1104 = arith.truncf %1103 : vector<16x32xf32> to vector<16x32xbf16>
    %1105 = arith.truncf %1102 : vector<16x32xf32> to vector<16x32xbf16>
    %cst_348 = arith.constant dense<0.000000e+00> : vector<16x16xf32>
    %1106 = tpu.matmul %1104, %1105, %cst_348 {dimension_numbers = #tpu.dot_dimension_numbers<[1], [1], [0], [0], [0, 0, 1, 0], [], []>} : vector<16x32xbf16>, vector<16x32xbf16>, vector<16x16xf32> -> vector<16x16xf32>
    %1107 = arith.mulf %1103, %1103 : vector<16x32xf32>
    %cst_349 = arith.constant dense<0.000000e+00> : vector<16xf32>
    %1108 = vector.multi_reduction <add>, %1107, %cst_349 [1] : vector<16x32xf32> to vector<16xf32>
    %1109 = vector.shape_cast %1108 : vector<16xf32> to vector<16x1xf32>
    %1110 = arith.mulf %1102, %1102 : vector<16x32xf32>
    %cst_350 = arith.constant dense<0.000000e+00> : vector<1x16xf32>
    %1111 = tpu.matmul %884, %1110, %cst_350 {dimension_numbers = #tpu.dot_dimension_numbers<[1], [1], [0], [0], [0, 0, 1, 0], [], []>} : vector<1x32xf32>, vector<16x32xf32>, vector<1x16xf32> -> vector<1x16xf32>
    %1112 = vector.broadcast %1109 : vector<16x1xf32> to vector<16x16xf32>
    %1113 = vector.broadcast %1111 : vector<1x16xf32> to vector<16x16xf32>
    %1114 = arith.addf %1112, %1113 : vector<16x16xf32>
    %cst_351 = arith.constant 2.000000e+00 : f32
    %1115 = vector.broadcast %cst_351 : f32 to vector<16x16xf32>
    %1116 = arith.mulf %1115, %1106 : vector<16x16xf32>
    %1117 = arith.subf %1114, %1116 : vector<16x16xf32>
    %cst_352 = arith.constant 0.000000e+00 : f32
    %1118 = vector.broadcast %cst_352 : f32 to vector<16x16xf32>
    %1119 = arith.maximumf %1117, %1118 : vector<16x16xf32>
    %1120 = vector.broadcast %1029 : vector<1x1xf32> to vector<16x16xf32>
    %1121 = arith.mulf %1119, %1120 : vector<16x16xf32>
    %1122 = math.exp %1121 : vector<16x16xf32>
    %cst_353 = arith.constant 1.000000e+00 : f32
    %1123 = vector.broadcast %cst_353 : f32 to vector<16x16xf32>
    %1124 = arith.subf %1123, %1122 : vector<16x16xf32>
    %cst_354 = arith.constant 4.000000e+00 : f32
    %1125 = vector.broadcast %cst_354 : f32 to vector<16x16xf32>
    %1126 = arith.mulf %1124, %1125 : vector<16x16xf32>
    %1127 = math.exp %1126 : vector<16x16xf32>
    %1128 = arith.mulf %1127, %1 : vector<16x16xf32>
    %1129 = arith.truncf %1128 : vector<16x16xf32> to vector<16x16xbf16>
    %1130 = arith.truncf %1102 : vector<16x32xf32> to vector<16x32xbf16>
    %cst_355 = arith.constant dense<0.000000e+00> : vector<16x32xf32>
    %1131 = tpu.matmul %1129, %1130, %cst_355 {dimension_numbers = #tpu.dot_dimension_numbers<[1], [0], [0], [1], [0, 0, 1, 1], [], []>} : vector<16x16xbf16>, vector<16x32xbf16>, vector<16x32xf32> -> vector<16x32xf32>
    %cst_356 = arith.constant dense<0.000000e+00> : vector<16x1xf32>
    %1132 = tpu.matmul %1129, %885, %cst_356 {dimension_numbers = #tpu.dot_dimension_numbers<[1], [0], [0], [1], [0, 0, 1, 1], [], []>} : vector<16x16xbf16>, vector<16x1xbf16>, vector<16x1xf32> -> vector<16x1xf32>
    %cst_357 = arith.constant 9.99999968E-21 : f32
    %1133 = vector.broadcast %cst_357 : f32 to vector<16x1xf32>
    %1134 = arith.maximumf %1132, %1133 : vector<16x1xf32>
    %1135 = tpu.reciprocal %1134 {approx = true} : vector<16x1xf32> -> vector<16x1xf32>
    %1136 = vector.broadcast %1135 : vector<16x1xf32> to vector<16x32xf32>
    %1137 = arith.mulf %1131, %1136 : vector<16x32xf32>
    %1138 = vector.extract_strided_slice %882 {offsets = [0, 96], sizes = [16, 32], strides = [1, 1]} : vector<16x128xf32> to vector<16x32xf32>
    %1139 = vector.extract_strided_slice %883 {offsets = [0, 96], sizes = [16, 32], strides = [1, 1]} : vector<16x128xf32> to vector<16x32xf32>
    %1140 = arith.truncf %1139 : vector<16x32xf32> to vector<16x32xbf16>
    %1141 = arith.truncf %1138 : vector<16x32xf32> to vector<16x32xbf16>
    %cst_358 = arith.constant dense<0.000000e+00> : vector<16x16xf32>
    %1142 = tpu.matmul %1140, %1141, %cst_358 {dimension_numbers = #tpu.dot_dimension_numbers<[1], [1], [0], [0], [0, 0, 1, 0], [], []>} : vector<16x32xbf16>, vector<16x32xbf16>, vector<16x16xf32> -> vector<16x16xf32>
    %1143 = arith.mulf %1139, %1139 : vector<16x32xf32>
    %cst_359 = arith.constant dense<0.000000e+00> : vector<16xf32>
    %1144 = vector.multi_reduction <add>, %1143, %cst_359 [1] : vector<16x32xf32> to vector<16xf32>
    %1145 = vector.shape_cast %1144 : vector<16xf32> to vector<16x1xf32>
    %1146 = arith.mulf %1138, %1138 : vector<16x32xf32>
    %cst_360 = arith.constant dense<0.000000e+00> : vector<1x16xf32>
    %1147 = tpu.matmul %884, %1146, %cst_360 {dimension_numbers = #tpu.dot_dimension_numbers<[1], [1], [0], [0], [0, 0, 1, 0], [], []>} : vector<1x32xf32>, vector<16x32xf32>, vector<1x16xf32> -> vector<1x16xf32>
    %1148 = vector.broadcast %1145 : vector<16x1xf32> to vector<16x16xf32>
    %1149 = vector.broadcast %1147 : vector<1x16xf32> to vector<16x16xf32>
    %1150 = arith.addf %1148, %1149 : vector<16x16xf32>
    %cst_361 = arith.constant 2.000000e+00 : f32
    %1151 = vector.broadcast %cst_361 : f32 to vector<16x16xf32>
    %1152 = arith.mulf %1151, %1142 : vector<16x16xf32>
    %1153 = arith.subf %1150, %1152 : vector<16x16xf32>
    %cst_362 = arith.constant 0.000000e+00 : f32
    %1154 = vector.broadcast %cst_362 : f32 to vector<16x16xf32>
    %1155 = arith.maximumf %1153, %1154 : vector<16x16xf32>
    %1156 = vector.broadcast %1029 : vector<1x1xf32> to vector<16x16xf32>
    %1157 = arith.mulf %1155, %1156 : vector<16x16xf32>
    %1158 = math.exp %1157 : vector<16x16xf32>
    %cst_363 = arith.constant 1.000000e+00 : f32
    %1159 = vector.broadcast %cst_363 : f32 to vector<16x16xf32>
    %1160 = arith.subf %1159, %1158 : vector<16x16xf32>
    %cst_364 = arith.constant 4.000000e+00 : f32
    %1161 = vector.broadcast %cst_364 : f32 to vector<16x16xf32>
    %1162 = arith.mulf %1160, %1161 : vector<16x16xf32>
    %1163 = math.exp %1162 : vector<16x16xf32>
    %1164 = arith.mulf %1163, %1 : vector<16x16xf32>
    %1165 = arith.truncf %1164 : vector<16x16xf32> to vector<16x16xbf16>
    %1166 = arith.truncf %1138 : vector<16x32xf32> to vector<16x32xbf16>
    %cst_365 = arith.constant dense<0.000000e+00> : vector<16x32xf32>
    %1167 = tpu.matmul %1165, %1166, %cst_365 {dimension_numbers = #tpu.dot_dimension_numbers<[1], [0], [0], [1], [0, 0, 1, 1], [], []>} : vector<16x16xbf16>, vector<16x32xbf16>, vector<16x32xf32> -> vector<16x32xf32>
    %cst_366 = arith.constant dense<0.000000e+00> : vector<16x1xf32>
    %1168 = tpu.matmul %1165, %885, %cst_366 {dimension_numbers = #tpu.dot_dimension_numbers<[1], [0], [0], [1], [0, 0, 1, 1], [], []>} : vector<16x16xbf16>, vector<16x1xbf16>, vector<16x1xf32> -> vector<16x1xf32>
    %cst_367 = arith.constant 9.99999968E-21 : f32
    %1169 = vector.broadcast %cst_367 : f32 to vector<16x1xf32>
    %1170 = arith.maximumf %1168, %1169 : vector<16x1xf32>
    %1171 = tpu.reciprocal %1170 {approx = true} : vector<16x1xf32> -> vector<16x1xf32>
    %1172 = vector.broadcast %1171 : vector<16x1xf32> to vector<16x32xf32>
    %1173 = arith.mulf %1167, %1172 : vector<16x32xf32>
    %1174 = tpu.concatenate %1065, %1101, %1137, %1173 in 1 : vector<16x32xf32>, vector<16x32xf32>, vector<16x32xf32>, vector<16x32xf32> -> vector<16x128xf32>
    %c0_368 = arith.constant 0 : index
    %c0_369 = arith.constant 0 : index
    %1175 = vector.load %arg25[%c0_368, %c0_369] : memref<1x128xf32, #tpu.memory_space<vmem>>, vector<1x128xf32>
    %1176 = vector.broadcast %1175 : vector<1x128xf32> to vector<16x128xf32>
    %1177 = arith.addf %1174, %1176 : vector<16x128xf32>
    %c0_370 = arith.constant 0 : index
    %c0_371 = arith.constant 0 : index
    %1178 = vector.load %arg26[%c0_370, %c0_371] : memref<128x32xbf16, #tpu.memory_space<vmem>>, vector<128x32xbf16>
    %1179 = arith.truncf %1177 : vector<16x128xf32> to vector<16x128xbf16>
    %cst_372 = arith.constant dense<0.000000e+00> : vector<16x32xf32>
    %1180 = tpu.matmul %1179, %1178, %cst_372 {dimension_numbers = #tpu.dot_dimension_numbers<[1], [0], [0], [1], [0, 0, 1, 1], [], []>} : vector<16x128xbf16>, vector<128x32xbf16>, vector<16x32xf32> -> vector<16x32xf32>
    %cst_373 = arith.constant 5.000000e-01 : f32
    %1181 = vector.broadcast %cst_373 : f32 to vector<16x32xf32>
    %1182 = arith.mulf %1181, %1180 : vector<16x32xf32>
    %cst_374 = arith.constant 0.707106769 : f32
    %1183 = vector.broadcast %cst_374 : f32 to vector<16x32xf32>
    %1184 = arith.mulf %1180, %1183 : vector<16x32xf32>
    %cst_375 = arith.constant 0.000000e+00 : f32
    %1185 = vector.broadcast %cst_375 : f32 to vector<16x32xf32>
    %1186 = arith.cmpf oge, %1184, %1185 : vector<16x32xf32>
    %cst_376 = arith.constant 1.000000e+00 : f32
    %cst_377 = arith.constant -1.000000e+00 : f32
    %1187 = vector.broadcast %cst_376 : f32 to vector<16x32xf32>
    %1188 = vector.broadcast %cst_377 : f32 to vector<16x32xf32>
    %1189 = arith.select %1186, %1187, %1188 : vector<16x32xi1>, vector<16x32xf32>
    %1190 = math.absf %1184 : vector<16x32xf32>
    %cst_378 = arith.constant 0.327591091 : f32
    %1191 = vector.broadcast %cst_378 : f32 to vector<16x32xf32>
    %1192 = arith.mulf %1191, %1190 : vector<16x32xf32>
    %cst_379 = arith.constant 1.000000e+00 : f32
    %1193 = vector.broadcast %cst_379 : f32 to vector<16x32xf32>
    %1194 = arith.addf %1193, %1192 : vector<16x32xf32>
    %cst_380 = arith.constant 1.000000e+00 : f32
    %1195 = vector.broadcast %cst_380 : f32 to vector<16x32xf32>
    %1196 = arith.divf %1195, %1194 : vector<16x32xf32>
    %cst_381 = arith.constant 1.06140542 : f32
    %1197 = vector.broadcast %cst_381 : f32 to vector<16x32xf32>
    %1198 = arith.mulf %1196, %1197 : vector<16x32xf32>
    %cst_382 = arith.constant -1.45315206 : f32
    %1199 = vector.broadcast %cst_382 : f32 to vector<16x32xf32>
    %1200 = arith.addf %1199, %1198 : vector<16x32xf32>
    %1201 = arith.mulf %1196, %1200 : vector<16x32xf32>
    %cst_383 = arith.constant 1.42141378 : f32
    %1202 = vector.broadcast %cst_383 : f32 to vector<16x32xf32>
    %1203 = arith.addf %1202, %1201 : vector<16x32xf32>
    %1204 = arith.mulf %1196, %1203 : vector<16x32xf32>
    %cst_384 = arith.constant -0.284496725 : f32
    %1205 = vector.broadcast %cst_384 : f32 to vector<16x32xf32>
    %1206 = arith.addf %1205, %1204 : vector<16x32xf32>
    %1207 = arith.mulf %1196, %1206 : vector<16x32xf32>
    %cst_385 = arith.constant 0.254829586 : f32
    %1208 = vector.broadcast %cst_385 : f32 to vector<16x32xf32>
    %1209 = arith.addf %1208, %1207 : vector<16x32xf32>
    %1210 = arith.mulf %1196, %1209 : vector<16x32xf32>
    %cst_386 = arith.constant 0.000000e+00 : f32
    %1211 = vector.broadcast %cst_386 : f32 to vector<16x32xf32>
    %1212 = arith.subf %1211, %1190 : vector<16x32xf32>
    %1213 = arith.mulf %1212, %1190 : vector<16x32xf32>
    %1214 = math.exp %1213 : vector<16x32xf32>
    %1215 = arith.mulf %1210, %1214 : vector<16x32xf32>
    %cst_387 = arith.constant 1.000000e+00 : f32
    %1216 = vector.broadcast %cst_387 : f32 to vector<16x32xf32>
    %1217 = arith.subf %1216, %1215 : vector<16x32xf32>
    %1218 = arith.mulf %1189, %1217 : vector<16x32xf32>
    %cst_388 = arith.constant 1.000000e+00 : f32
    %1219 = vector.broadcast %cst_388 : f32 to vector<16x32xf32>
    %1220 = arith.addf %1219, %1218 : vector<16x32xf32>
    %1221 = arith.mulf %1182, %1220 : vector<16x32xf32>
    %c0_389 = arith.constant 0 : index
    %c0_390 = arith.constant 0 : index
    %1222 = vector.load %arg27[%c0_389, %c0_390] : memref<32x32xbf16, #tpu.memory_space<vmem>>, vector<32x32xbf16>
    %1223 = arith.truncf %1221 : vector<16x32xf32> to vector<16x32xbf16>
    %cst_391 = arith.constant dense<0.000000e+00> : vector<16x32xf32>
    %1224 = tpu.matmul %1223, %1222, %cst_391 {dimension_numbers = #tpu.dot_dimension_numbers<[1], [0], [0], [1], [0, 0, 1, 1], [], []>} : vector<16x32xbf16>, vector<32x32xbf16>, vector<16x32xf32> -> vector<16x32xf32>
    %c0_392 = arith.constant 0 : index
    %c0_393 = arith.constant 0 : index
    %1225 = vector.load %arg28[%c0_392, %c0_393] : memref<1x32xf32, #tpu.memory_space<vmem>>, vector<1x32xf32>
    %1226 = vector.broadcast %1225 : vector<1x32xf32> to vector<16x32xf32>
    %1227 = arith.addf %1224, %1226 : vector<16x32xf32>
    %cst_394 = arith.constant 5.000000e-01 : f32
    %1228 = vector.broadcast %cst_394 : f32 to vector<16x32xf32>
    %1229 = arith.mulf %1228, %1227 : vector<16x32xf32>
    %cst_395 = arith.constant 0.707106769 : f32
    %1230 = vector.broadcast %cst_395 : f32 to vector<16x32xf32>
    %1231 = arith.mulf %1227, %1230 : vector<16x32xf32>
    %cst_396 = arith.constant 0.000000e+00 : f32
    %1232 = vector.broadcast %cst_396 : f32 to vector<16x32xf32>
    %1233 = arith.cmpf oge, %1231, %1232 : vector<16x32xf32>
    %cst_397 = arith.constant 1.000000e+00 : f32
    %cst_398 = arith.constant -1.000000e+00 : f32
    %1234 = vector.broadcast %cst_397 : f32 to vector<16x32xf32>
    %1235 = vector.broadcast %cst_398 : f32 to vector<16x32xf32>
    %1236 = arith.select %1233, %1234, %1235 : vector<16x32xi1>, vector<16x32xf32>
    %1237 = math.absf %1231 : vector<16x32xf32>
    %cst_399 = arith.constant 0.327591091 : f32
    %1238 = vector.broadcast %cst_399 : f32 to vector<16x32xf32>
    %1239 = arith.mulf %1238, %1237 : vector<16x32xf32>
    %cst_400 = arith.constant 1.000000e+00 : f32
    %1240 = vector.broadcast %cst_400 : f32 to vector<16x32xf32>
    %1241 = arith.addf %1240, %1239 : vector<16x32xf32>
    %cst_401 = arith.constant 1.000000e+00 : f32
    %1242 = vector.broadcast %cst_401 : f32 to vector<16x32xf32>
    %1243 = arith.divf %1242, %1241 : vector<16x32xf32>
    %cst_402 = arith.constant 1.06140542 : f32
    %1244 = vector.broadcast %cst_402 : f32 to vector<16x32xf32>
    %1245 = arith.mulf %1243, %1244 : vector<16x32xf32>
    %cst_403 = arith.constant -1.45315206 : f32
    %1246 = vector.broadcast %cst_403 : f32 to vector<16x32xf32>
    %1247 = arith.addf %1246, %1245 : vector<16x32xf32>
    %1248 = arith.mulf %1243, %1247 : vector<16x32xf32>
    %cst_404 = arith.constant 1.42141378 : f32
    %1249 = vector.broadcast %cst_404 : f32 to vector<16x32xf32>
    %1250 = arith.addf %1249, %1248 : vector<16x32xf32>
    %1251 = arith.mulf %1243, %1250 : vector<16x32xf32>
    %cst_405 = arith.constant -0.284496725 : f32
    %1252 = vector.broadcast %cst_405 : f32 to vector<16x32xf32>
    %1253 = arith.addf %1252, %1251 : vector<16x32xf32>
    %1254 = arith.mulf %1243, %1253 : vector<16x32xf32>
    %cst_406 = arith.constant 0.254829586 : f32
    %1255 = vector.broadcast %cst_406 : f32 to vector<16x32xf32>
    %1256 = arith.addf %1255, %1254 : vector<16x32xf32>
    %1257 = arith.mulf %1243, %1256 : vector<16x32xf32>
    %cst_407 = arith.constant 0.000000e+00 : f32
    %1258 = vector.broadcast %cst_407 : f32 to vector<16x32xf32>
    %1259 = arith.subf %1258, %1237 : vector<16x32xf32>
    %1260 = arith.mulf %1259, %1237 : vector<16x32xf32>
    %1261 = math.exp %1260 : vector<16x32xf32>
    %1262 = arith.mulf %1257, %1261 : vector<16x32xf32>
    %cst_408 = arith.constant 1.000000e+00 : f32
    %1263 = vector.broadcast %cst_408 : f32 to vector<16x32xf32>
    %1264 = arith.subf %1263, %1262 : vector<16x32xf32>
    %1265 = arith.mulf %1236, %1264 : vector<16x32xf32>
    %cst_409 = arith.constant 1.000000e+00 : f32
    %1266 = vector.broadcast %cst_409 : f32 to vector<16x32xf32>
    %1267 = arith.addf %1266, %1265 : vector<16x32xf32>
    %1268 = arith.mulf %1229, %1267 : vector<16x32xf32>
    %c0_410 = arith.constant 0 : index
    %c0_411 = arith.constant 0 : index
    %1269 = vector.load %arg29[%c0_410, %c0_411] : memref<32x16xbf16, #tpu.memory_space<vmem>>, vector<32x16xbf16>
    %1270 = arith.truncf %1268 : vector<16x32xf32> to vector<16x32xbf16>
    %cst_412 = arith.constant dense<0.000000e+00> : vector<16x16xf32>
    %1271 = tpu.matmul %1270, %1269, %cst_412 {dimension_numbers = #tpu.dot_dimension_numbers<[1], [0], [0], [1], [0, 0, 1, 1], [], []>} : vector<16x32xbf16>, vector<32x16xbf16>, vector<16x16xf32> -> vector<16x16xf32>
    %c0_413 = arith.constant 0 : index
    %c0_414 = arith.constant 0 : index
    %1272 = vector.load %arg30[%c0_413, %c0_414] : memref<1x16xf32, #tpu.memory_space<vmem>>, vector<1x16xf32>
    %1273 = vector.broadcast %1272 : vector<1x16xf32> to vector<16x16xf32>
    %1274 = arith.addf %1271, %1273 : vector<16x16xf32>
    %c0_415 = arith.constant 0 : index
    %c0_416 = arith.constant 0 : index
    %1275 = vector.load %arg31[%c0_415, %c0_416] : memref<16x128xbf16, #tpu.memory_space<vmem>>, vector<16x128xbf16>
    %1276 = arith.truncf %1274 : vector<16x16xf32> to vector<16x16xbf16>
    %cst_417 = arith.constant dense<0.000000e+00> : vector<16x128xf32>
    %1277 = tpu.matmul %1276, %1275, %cst_417 {dimension_numbers = #tpu.dot_dimension_numbers<[1], [0], [0], [1], [0, 0, 1, 1], [], []>} : vector<16x16xbf16>, vector<16x128xbf16>, vector<16x128xf32> -> vector<16x128xf32>
    %c0_418 = arith.constant 0 : index
    %c0_419 = arith.constant 0 : index
    %1278 = vector.load %arg32[%c0_418, %c0_419] : memref<1x128xf32, #tpu.memory_space<vmem>>, vector<1x128xf32>
    %1279 = vector.broadcast %1278 : vector<1x128xf32> to vector<16x128xf32>
    %1280 = arith.addf %1277, %1279 : vector<16x128xf32>
    %c0_420 = arith.constant 0 : index
    %c0_421 = arith.constant 0 : index
    %1281 = vector.load %arg33[%c0_420, %c0_421] : memref<16x128xf32, #tpu.memory_space<vmem>>, vector<16x128xf32>
    tpu.vector_store %arg33[%c0_420, %c0_421], %1280 {strides = array<i32>} : memref<16x128xf32, #tpu.memory_space<vmem>>, vector<16x128xf32>,
    return
  }
}

</mosaic_0001>

<bundles_post_ra>
// kernel: grn_encoder_forward.1
= control target key start
LH: loop header
LB: loop body
LE: loop exit
PB: predicated region body
PF: predicated region fallthrough
CT: control target
= control target key end

     0   :  { %s6933_s6 = smov 1   ;;  %s6934_s10 = smov 2   ;;  %s8192_s0 = inlined_call_operand.smem [shape: u32[34], index: -1, kind: input, shape index: {}] }
   0x1   :  { %s6987_s5 = sld [smem:[%s8192_s0]]   ;;  %s6935_s14 = smov 3  }
   0x2   :  { %s6992_s9 = sld [smem:[%s8192_s0 + %s6933_s6]]   ;;  %s6936_s18 = smov 4  }
   0x3   :  { %s6997_s13 = sld [smem:[%s8192_s0 + %s6934_s10]]   ;;  %s6937_s22 = smov 5  }
   0x4   :  { %s7002_s17 = sld [smem:[%s8192_s0 + %s6935_s14]]   ;;  %s6938_s26 = smov 6  }
   0x5   :  { %s7007_s21 = sld [smem:[%s8192_s0 + %s6936_s18]]   ;;  %s6939_s30 = smov 7  }
   0x6   :  { %s7012_s25 = sld [smem:[%s8192_s0 + %s6937_s22]]   ;;  %s6940_s4 = smov 8  }
   0x7   :  { %s7017_s29 = sld [smem:[%s8192_s0 + %s6938_s26]]   ;;  %s6941_s10 = smov 9  }
   0x8   :  { %s7022_s3 = sld [smem:[%s8192_s0 + %s6939_s30]]   ;;  %s6942_s15 = smov 10  }
   0x9   :  { %s7027_s8 = sld [smem:[%s8192_s0 + %s6940_s4]]   ;;  %s6943_s20 = smov 11  }
   0xa   :  { %s7032_s14 = sld [smem:[%s8192_s0 + %s6941_s10]]   ;;  %s6944_s26 = smov 12  }
   0xb   :  { %s7037_s19 = sld [smem:[%s8192_s0 + %s6942_s15]]   ;;  %s6945_s1 = smov 13  }
   0xc   :  { %s7042_s24 = sld [smem:[%s8192_s0 + %s6943_s20]]   ;;  %s6946_s7 = smov 14  }
   0xd   :  { %s7047_s30 = sld [smem:[%s8192_s0 + %s6944_s26]]   ;;  %s6947_s15 = smov 15  }
   0xe   :  { %s7052_s6 = sld [smem:[%s8192_s0 + %s6945_s1]]   ;;  %s6948_s22 = smov 16  }
   0xf   :  { %s7057_s12 = sld [smem:[%s8192_s0 + %s6946_s7]]   ;;  %s6949_s28 = smov 17  }
  0x10   :  { %s7062_s20 = sld [smem:[%s8192_s0 + %s6947_s15]]   ;;  %s6950_s7 = smov 18  }
  0x11   :  { %s7067_s27 = sld [smem:[%s8192_s0 + %s6948_s22]]   ;;  %s6951_s15 = smov 19  }
  0x12   :  { %s7072_s4 = sld [smem:[%s8192_s0 + %s6949_s28]]   ;;  %s6952_s22 = smov 20  }
  0x13   :  { %s6953_s28 = smov 21  }
  0x14   :  { %8200 = sst [smem:[#allocation5_spill]] %s7052_s6 }
  0x15   :  { %8201 = sst [smem:[#allocation6_spill]] %s7057_s12 }
  0x16   :  { %s7077_s12 = sld [smem:[%s8192_s0 + %s6950_s7]]   ;;  %s6954_s7 = smov 22  }
  0x17   :  { %8202 = sst [smem:[#allocation7_spill]] %s7067_s27 }
  0x18   :  { %8203 = sst [smem:[#allocation8_spill]] %s7072_s4 }
  0x19   :  { %s7082_s6 = sld [smem:[%s8192_s0 + %s6951_s15]]   ;;  %s6955_s15 = smov 23  }
  0x1a   :  { %s7087_s27 = sld [smem:[%s8192_s0 + %s6952_s22]]   ;;  %s6956_s22 = smov 24  }
  0x1b   :  { %s7092_s4 = sld [smem:[%s8192_s0 + %s6953_s28]]   ;;  %s6957_s28 = smov 25  }
  0x1c   :  { %8204 = sst [smem:[#allocation9_spill]] %s7077_s12 }
  0x1d   :  { %s7097_s12 = sld [smem:[%s8192_s0 + %s6954_s7]]   ;;  %s6958_s7 = smov 26  }
  0x1f   :  { %8205 = sst [smem:[#allocation10_spill]] %s7082_s6 }
  0x20   :  { %8206 = sst [smem:[#allocation11_spill]] %s7087_s27 }
  0x21   :  { %8207 = sst [smem:[#allocation12_spill]] %s7092_s4 }
  0x22   :  { %s7102_s6 = sld [smem:[%s8192_s0 + %s6955_s15]]   ;;  %s6959_s15 = smov 27  }
  0x23   :  { %8208 = sst [smem:[#allocation13_spill]] %s7097_s12 }
  0x24   :  { %s7107_s27 = sld [smem:[%s8192_s0 + %s6956_s22]]   ;;  %s6960_s22 = smov 28  }
  0x25   :  { %s7112_s4 = sld [smem:[%s8192_s0 + %s6957_s28]]   ;;  %s6961_s28 = smov 29  }
  0x26   :  { %s7117_s12 = sld [smem:[%s8192_s0 + %s6958_s7]]   ;;  %s6962_s7 = smov 30  }
  0x28   :  { %8209 = sst [smem:[#allocation14_spill]] %s7102_s6 }
  0x29   :  { %s7122_s6 = sld [smem:[%s8192_s0 + %s6959_s15]]   ;;  %s6963_s15 = smov 31  }
  0x2a   :  { %8210 = sst [smem:[#allocation15_spill]] %s7107_s27 }
  0x2b   :  { %8211 = sst [smem:[#allocation16_spill]] %s7112_s4 }
  0x2c   :  { %8212 = sst [smem:[#allocation17_spill]] %s7117_s12 }
  0x2d   :  { %s7127_s27 = sld [smem:[%s8192_s0 + %s6960_s22]]   ;;  %s6964_s22 = smov 32  }
  0x2e   :  { %s7132_s4 = sld [smem:[%s8192_s0 + %s6961_s28]]   ;;  %s6965_s28 = smov 33  }
  0x2f   :  { %8213 = sst [smem:[#allocation18_spill]] %s7122_s6 }
  0x30   :  { %s7137_s12 = sld [smem:[%s8192_s0 + %s6962_s7]]  }
  0x31   :  { %s7142_s6 = sld [smem:[%s8192_s0 + %s6963_s15]]  }
  0x33   :  { %8214 = sst [smem:[#allocation19_spill]] %s7127_s27 }
  0x34   :  { %8215 = sst [smem:[#allocation20_spill]] %s7132_s4 }
  0x35   :  { %s7147_s27 = sld [smem:[%s8192_s0 + %s6964_s22]]  }
  0x36   :  { %s7152_s4 = sld [smem:[%s8192_s0 + %s6965_s28]]  }
  0x37   :  { %v6601_v0 = vld [vmem:[%s6997_s13] sm:$0xff]   ;;  %v6966_v1 = vmov 0.0   ;;  %v146_v3 = vld [vmem:[%s6987_s5 + $0x8] sm:$0xff]  ;;  %vm6967_vm0 = vmmov 0   ;;  %vm163_vm1 = vcmask 130048  }
  0x38   :  { %5992 = vmatprep.subr.bf16.mxu1 %v6966_v1  ;;  %v145_v2 = vld [vmem:[%s6987_s5] sm:$0xff]  ;;  %5998 = vmatprep.subr.bf16.mxu0 %v6966_v1 }
  0x39   :  { %5993 = vmatpush3.bf16.msra.mxu1 %v6601_v0  ;;  %5994 = vmatprep.mubr.msk.bf16.mxu1 %vm6967_vm0, %v6966_v1  ;;  %v149_v4 = vpack.c.bf16 %v146_v3, %v145_v2 }
  0x3a   :  { %6000 = vmatprep.mubr.msk.bf16.mxu0 %vm6967_vm0, %v6966_v1 }
  0x3c   :  { %5995 = vmatmul.mubr.msk.bf16.vlgmr.msra.gmra.mrb[0].mxu1 %vm163_vm1, %v149_v4 }
  0x3d   :  { %72 = vsyncpa [#allocation3], 0  ;;  %v6604_v5 = vld [vmem:[%s7017_s29 + $0x4] ss:$8 sps:$4 sm:$0xff]   ;;  %v6602_v6 = vld [vmem:[%s7017_s29] ss:$8 sps:$4 sm:$0xff]  }
  0x3e   :  { %287 = vmatprep.subr.bf16.mxu1 %v6604_v5  ;;  %v6607_v7 = vld [vmem:[%s7017_s29 + $0x14] ss:$8 sps:$4 sm:$0xff]   ;;  %v6605_v8 = vld [vmem:[%s7017_s29 + $0x10] ss:$8 sps:$4 sm:$0xff]   ;;  %v6968_v9 = vmov 0   ;;  %vm210_vm2 = vcmask 261120  }
  0x3f   :  { %288 = vmatpush1.bf16.msra.mxu1 %v6602_v6  ;;  %319 = vmatprep.mubr.bf16.mxu1 %v6968_v9  ;;  %v5681_v10 = vld [vmem:[%s7002_s17] ss:$0 sm:$0xff]  ;;  %v6969_v55 = vmov 0.0|0.0   ;;  %vm7188_vm3 = vmpackc.low %vm210_vm2, %vm210_vm2  ;;  %s6970_s0 = smov 64   ;;  %s6971_s5 = smov 96   ;;  %v6972_v5 = vmov 1.0  }
  0x40   :  { %289 = vmatprep.subr.bf16.mxu1 %v6607_v7  ;;  %6569 = vset.pattern.permute.xlu0 %v6968_v9  ;;  %v5684_v46 = vld [vmem:[%s7007_s21] ss:$0 sm:$0xff]  ;;  %s6973_s13 = smov 32   ;;  %s8220_s22 = sld [smem:[#allocation8_spill]] }
  0x41   :  { %6570 = vset.pattern.permute.xlu1 %v6968_v9  ;;  %v5685_v49 = vld [vmem:[%s7012_s25] ss:$0 sm:$0xff]  ;;  %s8221_s23 = sld [smem:[#allocation7_spill]]  ;;  %s8222_s26 = sld [smem:[#allocation9_spill]] }
  0x42   :  { %s8223_s28 = sld [smem:[#allocation11_spill]]  ;;  %s8224_s1 = sld [smem:[#allocation10_spill]] }
  0x43   :  { %290 = vmatpush1.bf16.msra.mxu1 %v6605_v8  ;;  %s8225_s2 = sld [smem:[#allocation15_spill]] }
  0x44   :  { %6412 = vmatprep.subr.bf16.mxu1 %v6969_v55 }
 0x10f   :  { %v201_v11 = vpop.f32.mrb[0].mxu1 }
 0x110   :  { %v202_v12 = vadd.f32 %v5681_v10, %v201_v11  ;;  %v5996_v13 = vpop.f32.mrb[1].mxu1 }
 0x111   :  { %v204_v14 = vpop.f32.mrb[2].mxu1 }
 0x112   :  { %v222_v15 = vmul.f32 %v202_v12, %v202_v12  ;;  %v205_v16 = vadd.f32 %v5681_v10, %v204_v14  ;;  %v5997_v17 = vpop.f32.mrb[3].mxu1  ;;  %v211_v18 = vsel %vm210_vm2, %v202_v12, 0.0 }
 0x114   :  { %v212_v19 = vsel %vm210_vm2, %v205_v16, 0.0  ;;  %v223_v20 = vmul.f32 %v205_v16, %v205_v16  ;;  %v224_v22 = vsel %vm210_vm2, %v222_v15, 0.0 }
 0x115   :  { %v213_v21 = vadd.f32 %v212_v19, %v211_v18 }
 0x116   :  { %v225_v23 = vsel %vm210_vm2, %v223_v20, 0.0 }
 0x117   :  { %v214_v24 = vrot.slane %v213_v21, 4  ;;  %v226_v25 = vadd.f32 %v225_v23, %v224_v22 }
 0x119   :  { %v215_v26 = vadd.f32 %v214_v24, %v213_v21  ;;  %v227_v27 = vrot.slane %v226_v25, 4 }
 0x11b   :  { %v216_v28 = vrot.slane %v215_v26, 2  ;;  %v228_v29 = vadd.f32 %v227_v27, %v226_v25 }
 0x11d   :  { %v217_v30 = vadd.f32 %v216_v28, %v215_v26  ;;  %v229_v31 = vrot.slane %v228_v29, 2 }
 0x11f   :  { %v218_v32 = vrot.slane %v217_v30, 1  ;;  %v230_v33 = vadd.f32 %v229_v31, %v228_v29 }
 0x121   :  { %v219_v34 = vadd.f32 %v218_v32, %v217_v30  ;;  %v231_v35 = vrot.slane %v230_v33, 1 }
 0x123   :  { %v221_v36 = vmul.f32 0.0625, %v219_v34  ;;  %v232_v37 = vadd.f32 %v231_v35, %v230_v33 }
 0x125   :  { %v233_v38 = vmul.f32 0.0625, %v232_v37  ;;  %v234_v39 = vmul.f32 %v221_v36, %v221_v36  ;;  %v237_v40 = vsub.f32 %v202_v12, %v221_v36  ;;  %v238_v41 = vsub.f32 %v205_v16, %v221_v36 }
 0x127   :  { %v235_v42 = vsub.f32 %v233_v38, %v234_v39 }
 0x129   :  { %v236_v43 = vmax.f32 %v235_v42, 0.0 }
 0x12b   :  { %v239_v44 = vadd.f32 1e-05, %v236_v43 }
 0x12d   :  { %6657 = vrsqrt.f32 %v239_v44  ;;  %v468_v44 = vlaneseq }
 0x137   :  { %v6658_v45 = vpop.eup %6657 }
 0x138   :  { %v241_v47 = vmul.f32 %v6658_v45, %v237_v40  ;;  %v242_v48 = vmul.f32 %v6658_v45, %v238_v41  ;;  %v469_v45 = vshrl.u32 %v468_v44, 7 }
 0x13a   :  { %v249_v50 = vmul.f32 %v5684_v46, %v241_v47  ;;  %v250_v51 = vmul.f32 %v5684_v46, %v242_v48  ;;  %v7276_v46 = vsub.s32 0, %v469_v45 }
 0x13c   :  { %v257_v52 = vadd.f32 %v5685_v49, %v249_v50  ;;  %v258_v53 = vadd.f32 %v5685_v49, %v250_v51 }
 0x13e   :  { %v263_v54 = vpack.c.bf16 %v258_v53, %v257_v52 }
 0x140   :  { %5690 = vmatmul.mubr.msk.bf16.vlgmr.msra.gmra.mrb[4].mxu1 %vm210_vm2, %v263_v54 }
 0x141   :  { %6008 = vmatprep.mubr.msk.f32.mxu1 %vm6967_vm0, %v6966_v1 }
 0x213   :  { %v321_v56 = vpop.f32.mrb[4].mxu1 }
 0x214   :  { %v323_v57 = vpop.f32.mrb[5].mxu1  ;;  %v387_v59 = vmul.f32 %v321_v56, %v321_v56 }
 0x215   :  { %v325_v58 = vpop.f32.mrb[6].mxu1  ;;  %v379_v6 = vmul.f32 %v323_v57, %v323_v57 }
 0x216   :  { %v7182_v60 = vpack.c.bf16 %v325_v58, %v321_v56  ;;  %v388_v61 = vmul.f32 %v325_v58, %v325_v58  ;;  %v327_v62 = vpop.f32.mrb[7].mxu1  ;;  %v5832_v58 = vld [vmem:[%s6992_s9] sm:$0xff]  }
 0x217   :  { %v330_v63 = vpack.c.bf16 %v327_v62, %v323_v57  ;;  %v380_v7 = vmul.f32 %v327_v62, %v327_v62  ;;  %v381_v10 = vsel %vm210_vm2, %v379_v6, 0.0 }
 0x218   :  { %v6413_v0 = vpack.c.bf16 %v388_v61, %v387_v59  ;;  %v336_v2 = vsel %vm210_vm2, %v7182_v60, 0  ;;  %v6559_v3 = vpack.i.bf16 %v388_v61, %v387_v59 }
 0x219   :  { %5999 = vmatpush3.bf16.xpose.msra.mxu0 %v336_v2  ;;  %v384_v8 = vsel %vm210_vm2, %v380_v7, 0.0  ;;  %v7282_v2 = vunpack.c.h.bf16 %v5832_v58 }
 0x21a   :  { %6560 = vrot.lane.b32.xlu1 %v6559_v3, %s6970_s0  ;;  %6555 = vrot.lane.b32.xlu0 %v6559_v3, %s6971_s5 }
 0x21b   :  { %6415 = vmatpush3.bf16.xpose.msk.msra.mxu1 %vm7188_vm3, %v6413_v0  ;;  %6011 = vmatprep.subr.bf16.mxu0 %v6966_v1  ;;  %v7280_v0 = vunpack.c.l.bf16 %v5832_v58 }
 0x21c   :  { %6416 = vmatprep.subr.bf16.mxu1 %v6969_v55 }
 0x21e   :  { %530 = vrot.lane.b32.xlu0 %v7182_v60, %s6971_s5  ;;  %527 = vrot.lane.b32.xlu1 %v330_v63, %s6971_s5 }
 0x220   :  { %6001 = vmatmul.mubr.msk.bf16.vlgmr.msra.gmra.mrb[0].mxu0 %vm210_vm2, %v330_v63 }
 0x221   :  { %6013 = vmatprep.mubr.msk.bf16.mxu0 %vm6967_vm0, %v6966_v1 }
 0x222   :  { %6009 = vmatmul.mubr.msk.f32.vlgmr.msra.gmra.mrb[8].mxu1 %vm210_vm2, %v6972_v5  ;;  %731 = vrot.lane.b32.xlu0 %v7182_v60, %s6970_s0 }
 0x223   :  { %6565 = vrot.lane.b32.xlu1 %v6559_v3, %s6973_s13  ;;  %6021 = vmatprep.mubr.msk.f32.mxu1 %vm6967_vm0, %v6966_v1 }
 0x226   :  { %729 = vrot.lane.b32.xlu0 %v330_v63, %s6970_s0 }
 0x227   :  { %930 = vrot.lane.b32.xlu1 %v7182_v60, %s6973_s13 }
 0x22a   :  { %928 = vrot.lane.b32.xlu0 %v330_v63, %s6973_s13 }
 0x22b   :  { %581 = vrot.lane.b32.xlu1 %v379_v6, %s6971_s5 }
 0x22e   :  { %583 = vrot.lane.b32.xlu0 %v380_v7, %s6971_s5 }
 0x22f   :  { %780 = vrot.lane.b32.xlu1 %v379_v6, %s6970_s0 }
 0x232   :  { %782 = vrot.lane.b32.xlu0 %v380_v7, %s6970_s0 }
 0x233   :  { %979 = vrot.lane.b32.xlu1 %v379_v6, %s6973_s13 }
 0x236   :  { %981 = vrot.lane.b32.xlu0 %v380_v7, %s6973_s13 }
 0x255   :  { %385 = vadd.xlane.f32.xlu0 %v384_v8 }
 0x257   :  { %382 = vadd.xlane.f32.xlu1 %v381_v10 }
 0x28c   :  { %v6561_v11 = vpop.permute.xlu1 %6560  ;;  %v6556_v12 = vpop.permute.xlu0 %6555 }
 0x28d   :  { %v6558_v13 = vunpack.i.h.bf16 %v6556_v12  ;;  %v6557_v14 = vunpack.i.l.bf16 %v6556_v12  ;;  %v6563_v19 = vunpack.i.h.bf16 %v6561_v11  ;;  %v6562_v20 = vunpack.i.l.bf16 %v6561_v11 }
 0x28f   :  { %v6417_v15 = vpack.c.bf16 %v6558_v13, %v6557_v14  ;;  %v6421_v23 = vpack.c.bf16 %v6563_v19, %v6562_v20 }
 0x290   :  { %v7223_v16 = vpop.permute.xlu0 %530  ;;  %v528_v17 = vpop.permute.xlu1 %527 }
 0x291   :  { %6419 = vmatpush3.bf16.xpose.msk.msra.mxu1 %vm7188_vm3, %v6417_v15  ;;  %v536_v18 = vsel %vm210_vm2, %v7223_v16, 0 }
 0x292   :  { %6012 = vmatpush3.bf16.xpose.msra.mxu0 %v536_v18  ;;  %6420 = vmatprep.subr.bf16.mxu1 %v6969_v55 }
 0x293   :  { %6024 = vmatprep.subr.bf16.mxu0 %v6966_v1 }
 0x294   :  { %v7231_v21 = vpop.permute.xlu0 %731 }
 0x295   :  { %v6566_v22 = vpop.permute.xlu1 %6565  ;;  %v737_v26 = vsel %vm210_vm2, %v7231_v21, 0 }
 0x296   :  { %v6568_v27 = vunpack.i.h.bf16 %v6566_v22  ;;  %v6567_v28 = vunpack.i.l.bf16 %v6566_v22 }
 0x298   :  { %6022 = vmatmul.mubr.msk.f32.vlgmr.msra.gmra.mrb[10].mxu1 %vm210_vm2, %v6972_v5  ;;  %v730_v24 = vpop.permute.xlu0 %729  ;;  %v6425_v32 = vpack.c.bf16 %v6568_v27, %v6567_v28 }
 0x299   :  { %v7235_v25 = vpop.permute.xlu1 %930  ;;  %6014 = vmatmul.mubr.msk.bf16.vlgmr.msra.gmra.mrb[4].mxu0 %vm210_vm2, %v528_v17  ;;  %6423 = vmatpush3.bf16.xpose.msk.msra.mxu1 %vm7188_vm3, %v6421_v23 }
 0x29a   :  { %6025 = vmatpush3.bf16.xpose.msra.mxu0 %v737_v26  ;;  %6034 = vmatprep.mubr.msk.f32.mxu1 %vm6967_vm0, %v6966_v1  ;;  %v936_v36 = vsel %vm210_vm2, %v7235_v25, 0 }
 0x29b   :  { %6424 = vmatprep.subr.bf16.mxu1 %v6969_v55  ;;  %6026 = vmatprep.mubr.msk.bf16.mxu0 %vm6967_vm0, %v6966_v1 }
 0x29c   :  { %v929_v29 = vpop.permute.xlu0 %928  ;;  %6037 = vmatprep.subr.bf16.mxu0 %v6966_v1 }
 0x29d   :  { %v582_v30 = vpop.permute.xlu1 %581 }
 0x29e   :  { %v587_v31 = vsel %vm210_vm2, %v582_v30, 0.0 }
 0x29f   :  { %588 = vadd.xlane.f32.xlu0 %v587_v31 }
 0x2a0   :  { %6035 = vmatmul.mubr.msk.f32.vlgmr.msra.gmra.mrb[12].mxu1 %vm210_vm2, %v6972_v5  ;;  %v584_v33 = vpop.permute.xlu0 %583 }
 0x2a1   :  { %v781_v34 = vpop.permute.xlu1 %780  ;;  %6027 = vmatmul.mubr.msk.bf16.vlgmr.msra.gmra.mrb[8].mxu0 %vm210_vm2, %v730_v24  ;;  %6427 = vmatpush3.bf16.xpose.msk.msra.mxu1 %vm7188_vm3, %v6425_v32  ;;  %v590_v35 = vsel %vm210_vm2, %v584_v33, 0.0 }
 0x2a2   :  { %591 = vadd.xlane.f32.xlu1 %v590_v35  ;;  %v786_v37 = vsel %vm210_vm2, %v781_v34, 0.0  ;;  %6038 = vmatpush3.bf16.xpose.msra.mxu0 %v936_v36 }
 0x2a3   :  { %787 = vadd.xlane.f32.xlu0 %v786_v37  ;;  %6047 = vmatprep.mubr.msk.f32.mxu1 %vm6967_vm0, %v6966_v1 }
 0x2a4   :  { %v783_v38 = vpop.permute.xlu0 %782  ;;  %6039 = vmatprep.mubr.msk.bf16.mxu0 %vm6967_vm0, %v6966_v1  ;;  %6050 = vmatprep.subr.bf16.mxu0 %v6966_v1 }
 0x2a5   :  { %v980_v39 = vpop.permute.xlu1 %979  ;;  %v789_v40 = vsel %vm210_vm2, %v783_v38, 0.0  ;;  %6056 = vmatprep.subr.bf16.mxu1 %v6966_v1 }
 0x2a6   :  { %790 = vadd.xlane.f32.xlu1 %v789_v40  ;;  %v985_v41 = vsel %vm210_vm2, %v980_v39, 0.0 }
 0x2a7   :  { %986 = vadd.xlane.f32.xlu0 %v985_v41 }
 0x2a8   :  { %v982_v42 = vpop.permute.xlu0 %981  ;;  %6048 = vmatmul.mubr.msk.f32.vlgmr.msra.gmra.mrb[14].mxu1 %vm210_vm2, %v6972_v5 }
 0x2a9   :  { %6040 = vmatmul.mubr.msk.bf16.vlgmr.msra.gmra.mrb[12].mxu0 %vm210_vm2, %v929_v29  ;;  %v988_v43 = vsel %vm210_vm2, %v982_v42, 0.0  ;;  %6058 = vmatprep.mubr.msk.bf16.mxu1 %vm6967_vm0, %v6966_v1 }
 0x2aa   :  { %989 = vadd.xlane.f32.xlu1 %v988_v43  ;;  %6051 = vmatpush3.bf16.msra.mxu0 %v7182_v60 }
 0x2ab   :  { %6052 = vmatprep.mubr.msk.bf16.mxu0 %vm6967_vm0, %v6966_v1  ;;  %6062 = vmatprep.subr.bf16.mxu0 %v6966_v1 }
 0x2e2   :  { %v386_v56 = vpop.xlane.xlu0 %385 }
 0x2e4   :  { %v383_v57 = vpop.xlane.xlu1 %382 }
 0x2f3   :  { %v372_v47 = vpop.f32.mrb[0].mxu0 }
 0x2f4   :  { %v6002_v48 = vpop.f32.mrb[1].mxu0  ;;  %v474_v59 = vmul.f32 2.0, %v372_v47 }
 0x2f5   :  { %v464_v49 = vpop.f32.mrb[8].mxu1  ;;  %v375_v50 = vpop.f32.mrb[2].mxu0 }
 0x2f6   :  { %v471_v51 = vrot.slane %v464_v49, %v7276_v46  ;;  %v475_v52 = vmul.f32 2.0, %v375_v50  ;;  %v6003_v53 = vpop.f32.mrb[3].mxu0  ;;  %v6010_v54 = vpop.f32.mrb[9].mxu1 }
 0x2f8   :  { %v472_v60 = vadd.f32 %v471_v51, %v383_v57  ;;  %v473_v61 = vadd.f32 %v471_v51, %v386_v56 }
 0x2fa   :  { %v476_v62 = vsub.f32 %v472_v60, %v474_v59  ;;  %v477_v63 = vsub.f32 %v473_v61, %v475_v52 }
 0x2fc   :  { %v7284_v3 = vmax.f32 %v476_v62, 0.0  ;;  %v7286_v6 = vmax.f32 %v477_v63, 0.0 }
 0x2fe   :  { %v510_v7 = vmul.f32 %v7280_v0, %v7284_v3  ;;  %v511_v8 = vmul.f32 %v7282_v2, %v7286_v6  ;;  %6659 = vrsqrt.f32 %v7284_v3  ;;  %vm482_vm4 = vcmp.eq.f32.partialorder %v7284_v3, inf }
 0x2ff   :  { %6661 = vrsqrt.f32 %v7286_v6  ;;  %v485_v17 = vand.u32 2147483648, %v7284_v3  ;;  %vm484_vm5 = vcmp.eq.f32.partialorder %v7284_v3, 0.0  ;;  %vm489_vm6 = vcmp.eq.f32.partialorder %v7286_v6, inf }
 0x300   :  { %v512_v10 = vsel %vm163_vm1, %v510_v7, 0.0  ;;  %v513_v11 = vsel %vm163_vm1, %v511_v8, 0.0  ;;  %v492_v20 = vand.u32 2147483648, %v7286_v6  ;;  %vm491_vm7 = vcmp.eq.f32.partialorder %v7286_v6, 0.0 }
 0x301   :  { %v514_v12 = vadd.f32 %v513_v11, %v512_v10 }
 0x303   :  { %515 = vadd.xlane.f32.xlu1 %v514_v12 }
 0x308   :  { %v6660_v13 = vpop.eup %6659 }
 0x309   :  { %v6662_v14 = vpop.eup %6661  ;;  %v481_v15 = vmul.f32 %v6660_v13, %v7284_v3 }
 0x30a   :  { %v488_v18 = vmul.f32 %v6662_v14, %v7286_v6 }
 0x30b   :  { %v483_v19 = vsel %vm482_vm4, %v7284_v3, %v481_v15 }
 0x30c   :  { %v486_v22 = vsel %vm484_vm5, %v485_v17, %v483_v19  ;;  %v490_v23 = vsel %vm489_vm6, %v7286_v6, %v488_v18 }
 0x30d   :  { %v493_v24 = vsel %vm491_vm7, %v492_v20, %v490_v23  ;;  %v494_v26 = vmul.f32 %v7280_v0, %v486_v22 }
 0x30e   :  { %v495_v27 = vmul.f32 %v7282_v2, %v493_v24 }
 0x30f   :  { %v496_v28 = vsel %vm163_vm1, %v494_v26, 0.0 }
 0x310   :  { %v497_v29 = vsel %vm163_vm1, %v495_v27, 0.0 }
 0x311   :  { %v498_v30 = vadd.f32 %v497_v29, %v496_v28 }
 0x313   :  { %499 = vadd.xlane.f32.xlu0 %v498_v30 }
 0x32c   :  { %v589_v31 = vpop.xlane.xlu0 %588 }
 0x32f   :  { %v592_v36 = vpop.xlane.xlu1 %591 }
 0x330   :  { %v788_v48 = vpop.xlane.xlu0 %787 }
 0x333   :  { %v791_v56 = vpop.xlane.xlu1 %790 }
 0x334   :  { %v987_v15 = vpop.xlane.xlu0 %986 }
 0x337   :  { %v990_v24 = vpop.xlane.xlu1 %989 }
 0x36b   :  { %v667_v32 = vpop.f32.mrb[10].mxu1 }
 0x36c   :  { %v674_v33 = vrot.slane %v667_v32, %v7276_v46  ;;  %v572_v34 = vpop.f32.mrb[4].mxu0  ;;  %v6023_v35 = vpop.f32.mrb[11].mxu1 }
 0x36d   :  { %v677_v37 = vmul.f32 2.0, %v572_v34  ;;  %v6015_v38 = vpop.f32.mrb[5].mxu0 }
 0x36e   :  { %v675_v39 = vadd.f32 %v674_v33, %v589_v31  ;;  %v676_v40 = vadd.f32 %v674_v33, %v592_v36  ;;  %v575_v41 = vpop.f32.mrb[6].mxu0 }
 0x36f   :  { %v678_v42 = vmul.f32 2.0, %v575_v41  ;;  %v6016_v43 = vpop.f32.mrb[7].mxu0 }
 0x370   :  { %v679_v44 = vsub.f32 %v675_v39, %v677_v37 }
 0x371   :  { %v680_v45 = vsub.f32 %v676_v40, %v678_v42 }
 0x372   :  { %v7311_v47 = vmax.f32 %v679_v44, 0.0 }
 0x373   :  { %v7313_v49 = vmax.f32 %v680_v45, 0.0  ;;  %v866_v50 = vpop.f32.mrb[12].mxu1 }
 0x374   :  { %v873_v51 = vrot.slane %v866_v50, %v7276_v46  ;;  %v773_v52 = vpop.f32.mrb[8].mxu0  ;;  %v6036_v53 = vpop.f32.mrb[13].mxu1  ;;  %v713_v54 = vmul.f32 %v7280_v0, %v7311_v47  ;;  %6663 = vrsqrt.f32 %v7311_v47  ;;  %vm685_vm8 = vcmp.eq.f32.partialorder %v7311_v47, inf }
 0x375   :  { %v876_v57 = vmul.f32 2.0, %v773_v52  ;;  %v6028_v58 = vpop.f32.mrb[9].mxu0  ;;  %v714_v59 = vmul.f32 %v7282_v2, %v7313_v49  ;;  %6665 = vrsqrt.f32 %v7313_v49  ;;  %v688_v41 = vand.u32 2147483648, %v7311_v47 }
 0x376   :  { %v874_v60 = vadd.f32 %v873_v51, %v788_v48  ;;  %v875_v61 = vadd.f32 %v873_v51, %v791_v56  ;;  %v776_v62 = vpop.f32.mrb[10].mxu0  ;;  %v715_v63 = vsel %vm163_vm1, %v713_v54, 0.0  ;;  %vm687_vm9 = vcmp.eq.f32.partialorder %v7311_v47, 0.0 }
 0x377   :  { %v877_v7 = vmul.f32 2.0, %v776_v62  ;;  %v6029_v8 = vpop.f32.mrb[11].mxu0  ;;  %v716_v10 = vsel %vm163_vm1, %v714_v59, 0.0  ;;  %vm692_vm10 = vcmp.eq.f32.partialorder %v7313_v49, inf  ;;  %v695_v50 = vand.u32 2147483648, %v7313_v49 }
 0x378   :  { %v878_v11 = vsub.f32 %v874_v60, %v876_v57  ;;  %v717_v12 = vadd.f32 %v716_v10, %v715_v63  ;;  %vm694_vm11 = vcmp.eq.f32.partialorder %v7313_v49, 0.0 }
 0x379   :  { %v879_v13 = vsub.f32 %v875_v61, %v877_v7 }
 0x37a   :  { %v7324_v14 = vmax.f32 %v878_v11, 0.0  ;;  %718 = vadd.xlane.f32.xlu1 %v717_v12 }
 0x37b   :  { %v7326_v17 = vmax.f32 %v879_v13, 0.0  ;;  %v1065_v18 = vpop.f32.mrb[14].mxu1 }
 0x37c   :  { %v1072_v19 = vrot.slane %v1065_v18, %v7276_v46  ;;  %v972_v20 = vpop.f32.mrb[12].mxu0  ;;  %v6049_v22 = vpop.f32.mrb[15].mxu1  ;;  %v912_v23 = vmul.f32 %v7280_v0, %v7324_v14  ;;  %6667 = vrsqrt.f32 %v7324_v14  ;;  %vm884_vm12 = vcmp.eq.f32.partialorder %v7324_v14, inf }
 0x37d   :  { %v1075_v26 = vmul.f32 2.0, %v972_v20  ;;  %v6041_v27 = vpop.f32.mrb[13].mxu0  ;;  %v913_v28 = vmul.f32 %v7282_v2, %v7326_v17  ;;  %6669 = vrsqrt.f32 %v7326_v17  ;;  %v887_v12 = vand.u32 2147483648, %v7324_v14 }
 0x37e   :  { %v6664_v29 = vpop.eup %6663  ;;  %v1073_v30 = vadd.f32 %v1072_v19, %v987_v15  ;;  %v1074_v31 = vadd.f32 %v1072_v19, %v990_v24  ;;  %v975_v32 = vpop.f32.mrb[14].mxu0  ;;  %v914_v33 = vsel %vm163_vm1, %v912_v23, 0.0  ;;  %vm886_vm13 = vcmp.eq.f32.partialorder %v7324_v14, 0.0 }
 0x37f   :  { %v1076_v34 = vmul.f32 2.0, %v975_v32  ;;  %v6042_v35 = vpop.f32.mrb[15].mxu0  ;;  %v915_v36 = vsel %vm163_vm1, %v913_v28, 0.0  ;;  %v684_v37 = vmul.f32 %v6664_v29, %v7311_v47  ;;  %v6666_v38 = vpop.eup %6665  ;;  %vm891_vm14 = vcmp.eq.f32.partialorder %v7326_v17, inf }
 0x380   :  { %v1077_v39 = vsub.f32 %v1073_v30, %v1075_v26  ;;  %v916_v40 = vadd.f32 %v915_v36, %v914_v33  ;;  %v691_v44 = vmul.f32 %v6666_v38, %v7313_v49  ;;  %v894_v19 = vand.u32 2147483648, %v7326_v17 }
 0x381   :  { %v1078_v42 = vsub.f32 %v1074_v31, %v1076_v34  ;;  %v686_v43 = vsel %vm685_vm8, %v7311_v47, %v684_v37  ;;  %vm893_vm15 = vcmp.eq.f32.partialorder %v7326_v17, 0.0  ;;  %vm1635_vm8 = vcmask 523264  }
 0x382   :  { %v7343_v45 = vmax.f32 %v1077_v39, 0.0  ;;  %917 = vadd.xlane.f32.xlu1 %v916_v40  ;;  %v689_v48 = vsel %vm687_vm9, %v688_v41, %v686_v43  ;;  %v693_v52 = vsel %vm692_vm10, %v7313_v49, %v691_v44  ;;  %vm1638_vm9 = vcmask 785408  }
 0x383   :  { %v7347_v51 = vmax.f32 %v1078_v42, 0.0  ;;  %v697_v53 = vmul.f32 %v7280_v0, %v689_v48  ;;  %v696_v54 = vsel %vm694_vm11, %v695_v50, %v693_v52 }
 0x384   :  { %v1111_v56 = vmul.f32 %v7280_v0, %v7343_v45  ;;  %6671 = vrsqrt.f32 %v7343_v45  ;;  %v698_v57 = vmul.f32 %v7282_v2, %v696_v54  ;;  %vm1083_vm4 = vcmp.eq.f32.partialorder %v7343_v45, inf }
 0x385   :  { %v699_v58 = vsel %vm163_vm1, %v697_v53, 0.0  ;;  %v1112_v59 = vmul.f32 %v7282_v2, %v7347_v51  ;;  %6673 = vrsqrt.f32 %v7347_v51  ;;  %v1086_v32 = vand.u32 2147483648, %v7343_v45 }
 0x386   :  { %v6668_v60 = vpop.eup %6667  ;;  %v1113_v61 = vsel %vm163_vm1, %v1111_v56, 0.0  ;;  %v700_v62 = vsel %vm163_vm1, %v698_v57, 0.0  ;;  %vm1085_vm5 = vcmp.eq.f32.partialorder %v7343_v45, 0.0  ;;  %vm1090_vm6 = vcmp.eq.f32.partialorder %v7347_v51, inf }
 0x387   :  { %v1114_v63 = vsel %vm163_vm1, %v1112_v59, 0.0  ;;  %v883_v7 = vmul.f32 %v6668_v60, %v7324_v14  ;;  %v6670_v8 = vpop.eup %6669  ;;  %v701_v10 = vadd.f32 %v700_v62, %v699_v58  ;;  %v1093_v36 = vand.u32 2147483648, %v7347_v51 }
 0x388   :  { %v1115_v11 = vadd.f32 %v1114_v63, %v1113_v61  ;;  %v890_v15 = vmul.f32 %v6670_v8, %v7326_v17  ;;  %vm1092_vm7 = vcmp.eq.f32.partialorder %v7347_v51, 0.0 }
 0x389   :  { %v885_v13 = vsel %vm884_vm12, %v7324_v14, %v883_v7  ;;  %702 = vadd.xlane.f32.xlu0 %v701_v10  ;;  %v6974_v7 = vmov 1065369472  }
 0x38a   :  { %1116 = vadd.xlane.f32.xlu1 %v1115_v11  ;;  %v888_v18 = vsel %vm886_vm13, %v887_v12, %v885_v13  ;;  %v892_v20 = vsel %vm891_vm14, %v7326_v17, %v890_v15  ;;  %6057 = vmatpush3.bf16.msra.mxu1 %v6974_v7 }
 0x38b   :  { %v896_v22 = vmul.f32 %v7280_v0, %v888_v18  ;;  %v895_v23 = vsel %vm893_vm15, %v894_v19, %v892_v20  ;;  %6068 = vmatprep.subr.bf16.mxu1 %v6966_v1 }
 0x38c   :  { %v897_v24 = vmul.f32 %v7282_v2, %v895_v23 }
 0x38d   :  { %v898_v26 = vsel %vm163_vm1, %v896_v22, 0.0 }
 0x38e   :  { %v6672_v27 = vpop.eup %6671  ;;  %v899_v28 = vsel %vm163_vm1, %v897_v24, 0.0 }
 0x38f   :  { %v1082_v29 = vmul.f32 %v6672_v27, %v7343_v45  ;;  %v6674_v30 = vpop.eup %6673  ;;  %v900_v31 = vadd.f32 %v899_v28, %v898_v26 }
 0x390   :  { %v1089_v34 = vmul.f32 %v6674_v30, %v7347_v51  ;;  %v516_v40 = vpop.xlane.xlu1 %515 }
 0x391   :  { %v1084_v33 = vsel %vm1083_vm4, %v7343_v45, %v1082_v29  ;;  %901 = vadd.xlane.f32.xlu0 %v900_v31  ;;  %v517_v44 = vrot.slane %v516_v40, 4 }
 0x392   :  { %v1087_v35 = vsel %vm1085_vm5, %v1086_v32, %v1084_v33  ;;  %v1091_v37 = vsel %vm1090_vm6, %v7347_v51, %v1089_v34 }
 0x393   :  { %v1095_v38 = vmul.f32 %v7280_v0, %v1087_v35  ;;  %v1094_v39 = vsel %vm1092_vm7, %v1093_v36, %v1091_v37  ;;  %v518_v50 = vadd.f32 %v517_v44, %v516_v40 }
 0x394   :  { %v1096_v41 = vmul.f32 %v7282_v2, %v1094_v39 }
 0x395   :  { %v1097_v42 = vsel %vm163_vm1, %v1095_v38, 0.0  ;;  %v519_v53 = vrot.slane %v518_v50, 2 }
 0x396   :  { %v1098_v43 = vsel %vm163_vm1, %v1096_v41, 0.0 }
 0x397   :  { %v1099_v48 = vadd.f32 %v1098_v43, %v1097_v42  ;;  %v520_v57 = vadd.f32 %v519_v53, %v518_v50 }
 0x399   :  { %1100 = vadd.xlane.f32.xlu0 %v1099_v48  ;;  %v521_v60 = vrot.slane %v520_v57, 1 }
 0x39b   :  { %v522_v63 = vadd.f32 %v521_v60, %v520_v57 }
 0x3a0   :  { %v500_v52 = vpop.xlane.xlu0 %499 }
 0x3a1   :  { %v501_v54 = vrot.slane %v500_v52, 4 }
 0x3a3   :  { %v502_v56 = vadd.f32 %v501_v54, %v500_v52 }
 0x3a5   :  { %v503_v58 = vrot.slane %v502_v56, 2 }
 0x3a7   :  { %v504_v59 = vadd.f32 %v503_v58, %v502_v56 }
 0x3a9   :  { %v505_v61 = vrot.slane %v504_v59, 1 }
 0x3ab   :  { %v506_v62 = vadd.f32 %v505_v61, %v504_v59 }
 0x3ad   :  { %6460 = vpush %v506_v62 }
 0x3ae   :  { %6462 = vpush %v522_v63 }
 0x3de   :  { %s6461_s9 = spop %6460 }
 0x3df   :  { %s6463_s17 = spop %6462  ;;  %v508_v63 = vstv %s6461_s9  ;;  %s8226_s9 = sld [smem:[#allocation12_spill]] }
 0x407   :  { %v719_v8 = vpop.xlane.xlu1 %718 }
 0x408   :  { %v720_v10 = vrot.slane %v719_v8, 4 }
 0x40a   :  { %v721_v11 = vadd.f32 %v720_v10, %v719_v8 }
 0x40c   :  { %v722_v18 = vrot.slane %v721_v11, 2 }
 0x40e   :  { %v723_v23 = vadd.f32 %v722_v18, %v721_v11 }
 0x40f   :  { %v918_v12 = vpop.xlane.xlu1 %917 }
 0x410   :  { %v919_v13 = vrot.slane %v918_v12, 4  ;;  %v724_v30 = vrot.slane %v723_v23, 1 }
 0x412   :  { %v920_v22 = vadd.f32 %v919_v13, %v918_v12  ;;  %v725_v37 = vadd.f32 %v724_v30, %v723_v23  ;;  %v524_v13 = vstv %s6463_s17  ;;  %s8227_s17 = sld [smem:[#allocation13_spill]] }
 0x414   :  { %v921_v31 = vrot.slane %v920_v22, 2 }
 0x416   :  { %v703_v15 = vpop.xlane.xlu0 %702  ;;  %v922_v38 = vadd.f32 %v921_v31, %v920_v22 }
 0x417   :  { %v704_v19 = vrot.slane %v703_v15, 4  ;;  %v1117_v24 = vpop.xlane.xlu1 %1116 }
 0x418   :  { %v1118_v28 = vrot.slane %v1117_v24, 4  ;;  %v923_v42 = vrot.slane %v922_v38, 1 }
 0x419   :  { %v705_v20 = vadd.f32 %v704_v19, %v703_v15 }
 0x41a   :  { %v1119_v36 = vadd.f32 %v1118_v28, %v1117_v24  ;;  %v924_v53 = vadd.f32 %v923_v42, %v922_v38 }
 0x41b   :  { %v706_v26 = vrot.slane %v705_v20, 2 }
 0x41c   :  { %v1120_v43 = vrot.slane %v1119_v36, 2 }
 0x41d   :  { %v707_v27 = vadd.f32 %v706_v26, %v705_v20 }
 0x41e   :  { %v902_v29 = vpop.xlane.xlu0 %901  ;;  %v1121_v54 = vadd.f32 %v1120_v43, %v1119_v36 }
 0x41f   :  { %v903_v32 = vrot.slane %v902_v29, 4  ;;  %v708_v33 = vrot.slane %v707_v27, 1 }
 0x420   :  { %v1122_v58 = vrot.slane %v1121_v54, 1 }
 0x421   :  { %v904_v34 = vadd.f32 %v903_v32, %v902_v29  ;;  %v709_v35 = vadd.f32 %v708_v33, %v707_v27 }
 0x422   :  { %v1123_v61 = vadd.f32 %v1122_v58, %v1121_v54 }
 0x423   :  { %6464 = vpush %v709_v35  ;;  %v905_v39 = vrot.slane %v904_v34, 2 }
 0x424   :  { %6466 = vpush %v725_v37 }
 0x425   :  { %v906_v40 = vadd.f32 %v905_v39, %v904_v34 }
 0x426   :  { %v1101_v41 = vpop.xlane.xlu0 %1100 }
 0x427   :  { %v1102_v44 = vrot.slane %v1101_v41, 4  ;;  %v907_v48 = vrot.slane %v906_v40, 1 }
 0x429   :  { %v1103_v50 = vadd.f32 %v1102_v44, %v1101_v41  ;;  %v908_v52 = vadd.f32 %v907_v48, %v906_v40 }
 0x42b   :  { %6468 = vpush %v908_v52  ;;  %v1104_v56 = vrot.slane %v1103_v50, 2 }
 0x42c   :  { %6470 = vpush %v924_v53 }
 0x42d   :  { %v1105_v57 = vadd.f32 %v1104_v56, %v1103_v50 }
 0x42f   :  { %v1106_v59 = vrot.slane %v1105_v57, 1 }
 0x431   :  { %v1107_v60 = vadd.f32 %v1106_v59, %v1105_v57 }
 0x433   :  { %6472 = vpush %v1107_v60 }
 0x434   :  { %6474 = vpush %v1123_v61 }
 0x454   :  { %s6465_s21 = spop %6464 }
 0x455   :  { %s6467_s25 = spop %6466  ;;  %v711_v62 = vstv %s6465_s21  ;;  %s8228_s21 = sld [smem:[#allocation14_spill]] }
 0x456   :  { %v712_v10 = vadd.f32 %v711_v62, %v508_v63  ;;  %v727_v11 = vstv %s6467_s25 }
 0x457   :  { %v728_v19 = vadd.f32 %v727_v11, %v524_v13 }
 0x45c   :  { %s6469_s29 = spop %6468 }
 0x45d   :  { %v910_v8 = vstv %s6469_s29  ;;  %s6471_s7 = spop %6470 }
 0x45e   :  { %v911_v12 = vadd.f32 %v910_v8, %v712_v10  ;;  %v926_v15 = vstv %s6471_s7 }
 0x45f   :  { %v927_v23 = vadd.f32 %v926_v15, %v728_v19 }
 0x464   :  { %s6473_s10 = spop %6472 }
 0x465   :  { %v1109_v18 = vstv %s6473_s10  ;;  %s6475_s11 = spop %6474 }
 0x466   :  { %v1110_v20 = vadd.f32 %v1109_v18, %v911_v12  ;;  %v1125_v22 = vstv %s6475_s11 }
 0x467   :  { %v1126_v27 = vadd.f32 %v1125_v22, %v927_v23 }
 0x468   :  { %v1127_v24 = vmul.f32 %v1110_v20, %v1110_v20 }
 0x46a   :  { %v1128_v26 = vmul.f32 0.0078125, %v1127_v24 }
 0x46c   :  { %v1129_v28 = vsub.f32 %v1126_v27, %v1128_v26 }
 0x46e   :  { %v1130_v29 = vmul.f32 0.007874016, %v1129_v28 }
 0x470   :  { %v1131_v30 = vmax.f32 %v1130_v29, 1e-12 }
 0x472   :  { %6675 = vrcp.f32 %v1131_v30 }
 0x47c   :  { %v6676_v31 = vpop.eup %6675 }
 0x47d   :  { %v1133_v32 = vmul.f32 -0.5, %v6676_v31 }
 0x47f   :  { %v1134_v33 = vmul.f32 %v1133_v32, %v7284_v3  ;;  %v1135_v34 = vmul.f32 %v1133_v32, %v7286_v6  ;;  %v1252_v35 = vmul.f32 %v1133_v32, %v7311_v47  ;;  %v1253_v36 = vmul.f32 %v1133_v32, %v7313_v49 }
 0x480   :  { %v1371_v37 = vmul.f32 %v1133_v32, %v7324_v14  ;;  %v1372_v38 = vmul.f32 %v1133_v32, %v7326_v17  ;;  %v1490_v3 = vmul.f32 %v1133_v32, %v7343_v45  ;;  %v1491_v6 = vmul.f32 %v1133_v32, %v7347_v51 }
 0x481   :  { %v1136_v39 = vmul.f32 1.442695, %v1134_v33  ;;  %v1138_v40 = vmul.f32 1.442695, %v1135_v34  ;;  %v1254_v41 = vmul.f32 1.442695, %v1252_v35 }
 0x482   :  { %v1256_v42 = vmul.f32 1.442695, %v1253_v36  ;;  %v1373_v43 = vmul.f32 1.442695, %v1371_v37  ;;  %v1375_v44 = vmul.f32 1.442695, %v1372_v38 }
 0x483   :  { %6677 = vpow2.f32 %v1136_v39  ;;  %v1492_v47 = vmul.f32 1.442695, %v1490_v3  ;;  %v1494_v49 = vmul.f32 1.442695, %v1491_v6 }
 0x484   :  { %6679 = vpow2.f32 %v1138_v40 }
 0x485   :  { %6681 = vpow2.f32 %v1254_v41 }
 0x486   :  { %6683 = vpow2.f32 %v1256_v42 }
 0x487   :  { %6685 = vpow2.f32 %v1373_v43 }
 0x488   :  { %6687 = vpow2.f32 %v1375_v44 }
 0x489   :  { %6689 = vpow2.f32 %v1492_v47 }
 0x48a   :  { %6691 = vpow2.f32 %v1494_v49 }
 0x48d   :  { %v6678_v14 = vpop.eup %6677 }
 0x48e   :  { %v6680_v17 = vpop.eup %6679  ;;  %v1140_v48 = vsub.f32 1.0, %v6678_v14 }
 0x48f   :  { %v6682_v50 = vpop.eup %6681  ;;  %v1141_v52 = vsub.f32 1.0, %v6680_v17 }
 0x490   :  { %v6684_v53 = vpop.eup %6683  ;;  %v1142_v54 = vmul.f32 4.0, %v1140_v48  ;;  %v1258_v56 = vsub.f32 1.0, %v6682_v50 }
 0x491   :  { %v6686_v57 = vpop.eup %6685  ;;  %v1143_v58 = vmul.f32 4.0, %v1141_v52  ;;  %v1259_v59 = vsub.f32 1.0, %v6684_v53 }
 0x492   :  { %v6688_v60 = vpop.eup %6687  ;;  %v1144_v45 = vmul.f32 1.442695, %v1142_v54  ;;  %v1260_v61 = vmul.f32 4.0, %v1258_v56  ;;  %v1377_v8 = vsub.f32 1.0, %v6686_v57 }
 0x493   :  { %v1146_v62 = vmul.f32 1.442695, %v1143_v58  ;;  %v1261_v51 = vmul.f32 4.0, %v1259_v59  ;;  %v1378_v11 = vsub.f32 1.0, %v6688_v60  ;;  %v6690_v13 = vpop.eup %6689 }
 0x494   :  { %6693 = vpow2.f32 %v1144_v45  ;;  %v1262_v63 = vmul.f32 1.442695, %v1260_v61  ;;  %v1379_v12 = vmul.f32 4.0, %v1377_v8  ;;  %v6692_v18 = vpop.eup %6691  ;;  %v1496_v20 = vsub.f32 1.0, %v6690_v13 }
 0x495   :  { %6695 = vpow2.f32 %v1146_v62  ;;  %v1264_v10 = vmul.f32 1.442695, %v1261_v51  ;;  %v1380_v15 = vmul.f32 4.0, %v1378_v11  ;;  %v1497_v23 = vsub.f32 1.0, %v6692_v18 }
 0x496   :  { %6697 = vpow2.f32 %v1262_v63  ;;  %v1381_v19 = vmul.f32 1.442695, %v1379_v12  ;;  %v1498_v29 = vmul.f32 4.0, %v1496_v20 }
 0x497   :  { %6699 = vpow2.f32 %v1264_v10  ;;  %v1383_v22 = vmul.f32 1.442695, %v1380_v15  ;;  %v1499_v30 = vmul.f32 4.0, %v1497_v23 }
 0x498   :  { %6701 = vpow2.f32 %v1381_v19  ;;  %v1500_v34 = vmul.f32 1.442695, %v1498_v29 }
 0x499   :  { %6703 = vpow2.f32 %v1383_v22  ;;  %v1502_v35 = vmul.f32 1.442695, %v1499_v30 }
 0x49a   :  { %6705 = vpow2.f32 %v1500_v34 }
 0x49b   :  { %6707 = vpow2.f32 %v1502_v35 }
 0x49e   :  { %v6694_v24 = vpop.eup %6693 }
 0x49f   :  { %v6696_v26 = vpop.eup %6695  ;;  %v1148_v27 = vmul.f32 %v6694_v24, %v7280_v0 }
 0x4a0   :  { %v1149_v28 = vmul.f32 %v6696_v26, %v7282_v2  ;;  %v6698_v31 = vpop.eup %6697 }
 0x4a1   :  { %v6700_v33 = vpop.eup %6699  ;;  %v1266_v36 = vmul.f32 %v6698_v31, %v7280_v0 }
 0x4a2   :  { %v1150_v32 = vpack.c.bf16 %v1149_v28, %v1148_v27  ;;  %v1267_v37 = vmul.f32 %v6700_v33, %v7282_v2 }
 0x4a4   :  { %6053 = vmatmul.mubr.msk.bf16.vlgmr.msra.gmra.mrb[16].mxu0 %vm163_vm1, %v1150_v32  ;;  %6059 = vmatmul.mubr.msk.bf16.vlgmr.msra.gmra.mrb[16].mxu1 %vm163_vm1, %v1150_v32  ;;  %v1268_v38 = vpack.c.bf16 %v1267_v37, %v1266_v36 }
 0x4a5   :  { %6063 = vmatpush3.bf16.msra.mxu0 %v7223_v16  ;;  %6069 = vmatpush3.bf16.msra.mxu1 %v6974_v7  ;;  %v6702_v16 = vpop.eup %6701 }
 0x4a6   :  { %6064 = vmatprep.mubr.msk.bf16.mxu0 %vm6967_vm0, %v6966_v1  ;;  %6070 = vmatprep.mubr.msk.bf16.mxu1 %vm6967_vm0, %v6966_v1  ;;  %v6704_v39 = vpop.eup %6703  ;;  %v1385_v40 = vmul.f32 %v6702_v16, %v7280_v0 }
 0x4a7   :  { %6074 = vmatprep.subr.bf16.mxu0 %v6966_v1  ;;  %6080 = vmatprep.subr.bf16.mxu1 %v6966_v1  ;;  %v1386_v41 = vmul.f32 %v6704_v39, %v7282_v2  ;;  %v6706_v42 = vpop.eup %6705 }
 0x4a8   :  { %v6708_v44 = vpop.eup %6707 }
 0x4a9   :  { %v1387_v43 = vpack.c.bf16 %v1386_v41, %v1385_v40  ;;  %v1505_v3 = vmul.f32 %v6708_v44, %v7282_v2  ;;  %v6608_v41 = vld [vmem:[%s7027_s8] sm:$0xff]   ;;  %v6611_v44 = vld [vmem:[%s7027_s8 + $0x18] sm:$0xff]  }
 0x4ac   :  { %6065 = vmatmul.mubr.msk.bf16.vlgmr.msra.gmra.mrb[20].mxu0 %vm163_vm1, %v1268_v38  ;;  %6071 = vmatmul.mubr.msk.bf16.vlgmr.msra.gmra.mrb[20].mxu1 %vm163_vm1, %v1268_v38 }
 0x4ad   :  { %6075 = vmatpush3.bf16.msra.mxu0 %v7231_v21  ;;  %6081 = vmatpush3.bf16.msra.mxu1 %v6974_v7  ;;  %v1504_v21 = vmul.f32 %v6706_v42, %v7280_v0  ;;  %v6609_v42 = vld [vmem:[%s7027_s8 + $0x8] sm:$0xff]  }
 0x4ae   :  { %6076 = vmatprep.mubr.msk.bf16.mxu0 %vm6967_vm0, %v6966_v1  ;;  %6082 = vmatprep.mubr.msk.bf16.mxu1 %vm6967_vm0, %v6966_v1 }
 0x4af   :  { %6086 = vmatprep.subr.bf16.mxu0 %v6966_v1  ;;  %6092 = vmatprep.subr.bf16.mxu1 %v6966_v1  ;;  %v1506_v6 = vpack.c.bf16 %v1505_v3, %v1504_v21  ;;  %v6612_v21 = vld [vmem:[%s7027_s8 + $0x20] sm:$0xff]  }
 0x4b4   :  { %6077 = vmatmul.mubr.msk.bf16.vlgmr.msra.gmra.mrb[24].mxu0 %vm163_vm1, %v1387_v43  ;;  %6083 = vmatmul.mubr.msk.bf16.vlgmr.msra.gmra.mrb[24].mxu1 %vm163_vm1, %v1387_v43  ;;  %v6610_v43 = vld [vmem:[%s7027_s8 + $0x10] sm:$0xff]  }
 0x4b5   :  { %6087 = vmatpush3.bf16.msra.mxu0 %v7235_v25  ;;  %6093 = vmatpush3.bf16.msra.mxu1 %v6974_v7 }
 0x4b6   :  { %6088 = vmatprep.mubr.msk.bf16.mxu0 %vm6967_vm0, %v6966_v1  ;;  %6094 = vmatprep.mubr.msk.bf16.mxu1 %vm6967_vm0, %v6966_v1 }
 0x4b7   :  { %6098 = vmatprep.subr.bf16.mxu0 %v6966_v1  ;;  %6118 = vmatprep.subr.bf16.mxu1 %v6966_v1 }
 0x4bc   :  { %6089 = vmatmul.mubr.msk.bf16.vlgmr.msra.gmra.mrb[28].mxu0 %vm163_vm1, %v1506_v6  ;;  %6095 = vmatmul.mubr.msk.bf16.vlgmr.msra.gmra.mrb[28].mxu1 %vm163_vm1, %v1506_v6 }
 0x4bd   :  { %6114 = vmatprep.mubr.msk.bf16.mxu0 %vm6967_vm0, %v6966_v1  ;;  %6122 = vmatprep.mubr.msk.bf16.mxu1 %vm6967_vm0, %v6966_v1 }
 0x4be   :  { %6099 = vmatpush3.bf16.msra.mxu0 %v6608_v41 }
 0x4bf   :  { %6100 = vmatprep.subr.bf16.mxu0 %v6966_v1 }
 0x4c2   :  { %6101 = vmatpush3.bf16.msra.mxu0 %v6609_v42 }
 0x4c3   :  { %6102 = vmatprep.subr.bf16.mxu0 %v6966_v1 }
 0x4c6   :  { %6103 = vmatpush3.bf16.msra.mxu0 %v6610_v43 }
 0x4c7   :  { %6104 = vmatprep.subr.bf16.mxu0 %v6966_v1 }
 0x4ca   :  { %6105 = vmatpush3.bf16.msra.mxu0 %v6611_v44 }
 0x4cb   :  { %6106 = vmatprep.subr.bf16.mxu0 %v6966_v1 }
 0x4ce   :  { %6107 = vmatpush3.bf16.msra.mxu0 %v6612_v21 }
 0x4cf   :  { %6108 = vmatprep.subr.bf16.mxu0 %v6966_v1 }
 0x577   :  { %v7445_v25 = vpop.f32.mrb[16].mxu0  ;;  %v1229_v47 = vpop.f32.mrb[16].mxu1 }
 0x578   :  { %v6054_v49 = vpop.f32.mrb[17].mxu0  ;;  %v6060_v14 = vpop.f32.mrb[17].mxu1  ;;  %v1236_v35 = vmax.f32 %v1229_v47, 1e-20 }
 0x579   :  { %v7447_v17 = vpop.f32.mrb[18].mxu0  ;;  %v1232_v48 = vpop.f32.mrb[18].mxu1  ;;  %v6613_v49 = vld [vmem:[%s7027_s8 + $0x28] sm:$0xff]  }
 0x57a   :  { %v6055_v50 = vpop.f32.mrb[19].mxu0  ;;  %v6061_v52 = vpop.f32.mrb[19].mxu1  ;;  %v1237_v37 = vmax.f32 %v1232_v48, 1e-20  ;;  %6109 = vmatpush3.bf16.msra.mxu0 %v6613_v49  ;;  %v6614_v48 = vld [vmem:[%s7027_s8 + $0x30] sm:$0xff]  }
 0x57b   :  { %6110 = vmatprep.subr.bf16.mxu0 %v6966_v1 }
 0x57e   :  { %6111 = vmatpush3.bf16.msra.mxu0 %v6614_v48 }
 0x57f   :  { %v7449_v53 = vpop.f32.mrb[20].mxu0  ;;  %v1348_v54 = vpop.f32.mrb[20].mxu1  ;;  %6112 = vmatprep.subr.bf16.mxu0 %v6966_v1 }
 0x580   :  { %v1355_v56 = vmax.f32 %v1348_v54, 1e-20  ;;  %v6066_v57 = vpop.f32.mrb[21].mxu0  ;;  %v6072_v58 = vpop.f32.mrb[21].mxu1 }
 0x581   :  { %v7451_v59 = vpop.f32.mrb[22].mxu0  ;;  %v1351_v60 = vpop.f32.mrb[22].mxu1 }
 0x582   :  { %6709 = vrcp.f32 %v1355_v56  ;;  %v1356_v45 = vmax.f32 %v1351_v60, 1e-20  ;;  %v6067_v61 = vpop.f32.mrb[23].mxu0  ;;  %v6073_v62 = vpop.f32.mrb[23].mxu1  ;;  %v6615_v56 = vld [vmem:[%s7027_s8 + $0x38] sm:$0xff]   ;;  %s8219_s8 = sld [smem:[#allocation6_spill]] }
 0x583   :  { %6113 = vmatpush3.bf16.msra.mxu0 %v6615_v56 }
 0x584   :  { %6711 = vrcp.f32 %v1356_v45  ;;  %6428 = vmatprep.subr.bf16.mxu0 %v6969_v55 }
 0x587   :  { %v7453_v51 = vpop.f32.mrb[24].mxu0  ;;  %v1467_v63 = vpop.f32.mrb[24].mxu1 }
 0x588   :  { %v1474_v8 = vmax.f32 %v1467_v63, 1e-20  ;;  %v6078_v10 = vpop.f32.mrb[25].mxu0  ;;  %v6084_v11 = vpop.f32.mrb[25].mxu1 }
 0x589   :  { %v7455_v12 = vpop.f32.mrb[26].mxu0  ;;  %v1470_v13 = vpop.f32.mrb[26].mxu1 }
 0x58a   :  { %6713 = vrcp.f32 %v1474_v8  ;;  %v1475_v15 = vmax.f32 %v1470_v13, 1e-20  ;;  %v6079_v18 = vpop.f32.mrb[27].mxu0  ;;  %v6085_v19 = vpop.f32.mrb[27].mxu1 }
 0x58b   :  { %v5715_v19 = vld [vmem:[%s7022_s3] ss:$0 sm:$0xff]  ;;  %s8218_s3 = sld [smem:[#allocation5_spill]] }
 0x58c   :  { %v6710_v20 = vpop.eup %6709  ;;  %6715 = vrcp.f32 %v1475_v15 }
 0x58d   :  { %1361 = vperm.xlu0 %6569, %v6710_v20  }
 0x58e   :  { %v6712_v22 = vpop.eup %6711 }
 0x58f   :  { %1366 = vperm.xlu1 %6570, %v6712_v22   ;;  %v7457_v23 = vpop.f32.mrb[28].mxu0  ;;  %v1586_v24 = vpop.f32.mrb[28].mxu1 }
 0x590   :  { %v1593_v26 = vmax.f32 %v1586_v24, 1e-20  ;;  %v6090_v27 = vpop.f32.mrb[29].mxu0  ;;  %v6096_v28 = vpop.f32.mrb[29].mxu1 }
 0x591   :  { %v7459_v29 = vpop.f32.mrb[30].mxu0  ;;  %v1589_v30 = vpop.f32.mrb[30].mxu1  ;;  %v6617_v28 = vld [vmem:[%s7032_s14 + $0x8] sm:$0xff]  }
 0x592   :  { %6717 = vrcp.f32 %v1593_v26  ;;  %v1594_v31 = vmax.f32 %v1589_v30, 1e-20  ;;  %v6091_v32 = vpop.f32.mrb[31].mxu0  ;;  %v6097_v33 = vpop.f32.mrb[31].mxu1 }
 0x594   :  { %v6714_v34 = vpop.eup %6713  ;;  %6719 = vrcp.f32 %v1594_v31 }
 0x595   :  { %1480 = vperm.xlu1 %6570, %v6714_v34   ;;  %6721 = vrcp.f32 %v1236_v35 }
 0x596   :  { %v6716_v36 = vpop.eup %6715  ;;  %6723 = vrcp.f32 %v1237_v37 }
 0x599   :  { %1485 = vperm.xlu1 %6570, %v6716_v36  }
 0x59c   :  { %v6718_v16 = vpop.eup %6717 }
 0x59d   :  { %1599 = vperm.xlu1 %6570, %v6718_v16  }
 0x59e   :  { %v6720_v38 = vpop.eup %6719 }
 0x59f   :  { %v6722_v39 = vpop.eup %6721 }
 0x5a0   :  { %v6724_v40 = vpop.eup %6723 }
 0x5a1   :  { %1604 = vperm.xlu1 %6570, %v6720_v38  }
 0x5a5   :  { %1242 = vperm.xlu1 %6570, %v6722_v39  }
 0x5a9   :  { %1247 = vperm.xlu1 %6570, %v6724_v40  }
 0x60c   :  { %v1362_v3 = vpop.permute.xlu0 %1361 }
 0x60d   :  { %v1369_v6 = vmul.f32 %v1362_v3, %v7449_v53 }
 0x60e   :  { %v1367_v47 = vpop.permute.xlu1 %1366 }
 0x60f   :  { %v1370_v14 = vmul.f32 %v1367_v47, %v7451_v59  ;;  %1611 = vrot.lane.b32.xlu1 %v1369_v6, %s6973_s13 }
 0x611   :  { %1613 = vrot.lane.b32.xlu0 %v1370_v14, %s6973_s13 }
 0x614   :  { %v1481_v50 = vpop.permute.xlu1 %1480 }
 0x615   :  { %v1488_v52 = vmul.f32 %v1481_v50, %v7453_v51 }
 0x617   :  { %1619 = vrot.lane.b32.xlu1 %v1488_v52, %s6970_s0 }
 0x618   :  { %v1486_v53 = vpop.permute.xlu1 %1485 }
 0x619   :  { %v1489_v54 = vmul.f32 %v1486_v53, %v7455_v12 }
 0x61b   :  { %1621 = vrot.lane.b32.xlu0 %v1489_v54, %s6970_s0 }
 0x61c   :  { %v1600_v57 = vpop.permute.xlu1 %1599 }
 0x61d   :  { %v1607_v58 = vmul.f32 %v1600_v57, %v7457_v23 }
 0x61f   :  { %1627 = vrot.lane.b32.xlu1 %v1607_v58, %s6971_s5 }
 0x620   :  { %v1605_v59 = vpop.permute.xlu1 %1604 }
 0x621   :  { %v1608_v60 = vmul.f32 %v1605_v59, %v7459_v29 }
 0x623   :  { %1629 = vrot.lane.b32.xlu0 %v1608_v60, %s6971_s5 }
 0x624   :  { %v1243_v45 = vpop.permute.xlu1 %1242 }
 0x625   :  { %v1250_v8 = vmul.f32 %v1243_v45, %v7445_v25 }
 0x628   :  { %v1248_v61 = vpop.permute.xlu1 %1247 }
 0x629   :  { %v1251_v12 = vmul.f32 %v1248_v61, %v7447_v17  ;;  %v6616_v17 = vld [vmem:[%s7032_s14] sm:$0xff]  }
 0x62a   :  { %6119 = vmatpush3.bf16.msra.mxu1 %v6616_v17 }
 0x62b   :  { %6120 = vmatprep.subr.bf16.mxu1 %v6966_v1 }
 0x62e   :  { %6121 = vmatpush3.bf16.msra.mxu1 %v6617_v28 }
 0x62f   :  { %6126 = vmatprep.subr.bf16.mxu1 %v6966_v1 }
 0x681   :  { %v1612_v62 = vpop.permute.xlu1 %1611 }
 0x682   :  { %v1633_v13 = vsel %vm210_vm2, %v1250_v8, %v1612_v62 }
 0x683   :  { %v1614_v51 = vpop.permute.xlu0 %1613 }
 0x684   :  { %v1634_v18 = vsel %vm210_vm2, %v1251_v12, %v1614_v51 }
 0x689   :  { %v1620_v63 = vpop.permute.xlu1 %1619 }
 0x68a   :  { %v1636_v15 = vsel %vm1635_vm8, %v1633_v13, %v1620_v63  ;;  %v6975_v13 = vmov -1.0  }
 0x68d   :  { %v1622_v10 = vpop.permute.xlu0 %1621 }
 0x68e   :  { %v1637_v22 = vsel %vm1635_vm8, %v1634_v18, %v1622_v10 }
 0x691   :  { %v1628_v11 = vpop.permute.xlu1 %1627 }
 0x692   :  { %v1639_v20 = vsel %vm1638_vm9, %v1636_v15, %v1628_v11 }
 0x693   :  { %v1648_v24 = vadd.f32 %v5715_v19, %v1639_v20 }
 0x695   :  { %v1630_v25 = vpop.permute.xlu0 %1629 }
 0x696   :  { %v1640_v23 = vsel %vm1638_vm9, %v1637_v22, %v1630_v25 }
 0x697   :  { %v1649_v26 = vadd.f32 %v5715_v19, %v1640_v23 }
 0x699   :  { %v1666_v27 = vpack.c.bf16 %v1649_v26, %v1648_v24 }
 0x69b   :  { %6115 = vmatmul.mubr.bf16.vlgmr.msra.gmra.mrb[32].mxu0 %v1666_v27 }
 0x69c   :  { %6144 = vmatprep.mubr.msk.f32.mxu0 %vm6967_vm0, %v6966_v1 }
 0x76e   :  { %v1749_v29 = vpop.f32.mrb[32].mxu0 }
 0x76f   :  { %v1758_v30 = vmul.f32 0.70710677, %v1749_v29  ;;  %v6116_v31 = vpop.f32.mrb[33].mxu0  ;;  %v1756_v24 = vmul.f32 0.5, %v1749_v29 }
 0x770   :  { %v1752_v32 = vpop.f32.mrb[34].mxu0  ;;  %v6618_v31 = vld [vmem:[%s7042_s24] sm:$0xff]  }
 0x771   :  { %v1764_v33 = vand.u32 2147483647, %v1758_v30  ;;  %v1759_v34 = vmul.f32 0.70710677, %v1752_v32  ;;  %v6117_v35 = vpop.f32.mrb[35].mxu0  ;;  %vm1760_vm10 = vcmp.ge.f32.partialorder %v1758_v30, 0.0 }
 0x772   :  { %v1762_v15 = vsel %vm1760_vm10, 1.0, %v6975_v13  ;;  %v1757_v26 = vmul.f32 0.5, %v1752_v32 }
 0x773   :  { %v1766_v36 = vmul.f32 0.3275911, %v1764_v33  ;;  %v1765_v37 = vand.u32 2147483647, %v1759_v34  ;;  %v1792_v40 = vsub.f32 0.0, %v1764_v33  ;;  %vm1761_vm11 = vcmp.ge.f32.partialorder %v1759_v34, 0.0 }
 0x774   :  { %v1763_v22 = vsel %vm1761_vm11, 1.0, %v6975_v13  ;;  %v5724_v34 = vld [vmem:[%s7037_s19] ss:$0 sm:$0xff] }
 0x775   :  { %v1768_v16 = vadd.f32 1.0, %v1766_v36  ;;  %v1767_v38 = vmul.f32 0.3275911, %v1765_v37  ;;  %v1793_v41 = vsub.f32 0.0, %v1765_v37  ;;  %v1794_v43 = vmul.f32 %v1792_v40, %v1764_v33  ;;  %v6619_v33 = vld [vmem:[%s7042_s24 + $0x8] sm:$0xff]  }
 0x777   :  { %6725 = vrcp.f32 %v1768_v16  ;;  %v1769_v39 = vadd.f32 1.0, %v1767_v38  ;;  %v1795_v6 = vmul.f32 %v1793_v41, %v1765_v37  ;;  %v1796_v47 = vmul.f32 1.442695, %v1794_v43 }
 0x779   :  { %6727 = vrcp.f32 %v1769_v39  ;;  %v1798_v52 = vmul.f32 1.442695, %v1795_v6 }
 0x77a   :  { %6729 = vpow2.f32 %v1796_v47 }
 0x77b   :  { %6731 = vpow2.f32 %v1798_v52 }
 0x781   :  { %v6726_v42 = vpop.eup %6725 }
 0x782   :  { %v1774_v44 = vmul.f32 1.0614054, %v6726_v42 }
 0x783   :  { %v6728_v21 = vpop.eup %6727 }
 0x784   :  { %v1776_v3 = vadd.f32 -1.4531521, %v1774_v44  ;;  %v1775_v49 = vmul.f32 1.0614054, %v6728_v21  ;;  %v6730_v51 = vpop.eup %6729 }
 0x785   :  { %v6732_v11 = vpop.eup %6731 }
 0x786   :  { %v1778_v14 = vmul.f32 %v6726_v42, %v1776_v3  ;;  %v1777_v48 = vadd.f32 -1.4531521, %v1775_v49 }
 0x788   :  { %v1780_v50 = vadd.f32 1.4214138, %v1778_v14  ;;  %v1779_v53 = vmul.f32 %v6728_v21, %v1777_v48 }
 0x78a   :  { %v1782_v54 = vmul.f32 %v6726_v42, %v1780_v50  ;;  %v1781_v56 = vadd.f32 1.4214138, %v1779_v53 }
 0x78c   :  { %v1784_v57 = vadd.f32 -0.28449672, %v1782_v54  ;;  %v1783_v58 = vmul.f32 %v6728_v21, %v1781_v56 }
 0x78e   :  { %v1786_v59 = vmul.f32 %v6726_v42, %v1784_v57  ;;  %v1785_v60 = vadd.f32 -0.28449672, %v1783_v58 }
 0x790   :  { %v1788_v45 = vadd.f32 0.2548296, %v1786_v59  ;;  %v1787_v61 = vmul.f32 %v6728_v21, %v1785_v60 }
 0x792   :  { %v1790_v62 = vmul.f32 %v6726_v42, %v1788_v45  ;;  %v1789_v63 = vadd.f32 0.2548296, %v1787_v61 }
 0x794   :  { %v1800_v8 = vmul.f32 %v6730_v51, %v1790_v62  ;;  %v1791_v10 = vmul.f32 %v6728_v21, %v1789_v63 }
 0x796   :  { %v1802_v12 = vsub.f32 1.0, %v1800_v8  ;;  %v1801_v18 = vmul.f32 %v6732_v11, %v1791_v10 }
 0x798   :  { %v1804_v19 = vmul.f32 %v1802_v12, %v1762_v15  ;;  %v1803_v20 = vsub.f32 1.0, %v1801_v18 }
 0x79a   :  { %v1806_v25 = vadd.f32 1.0, %v1804_v19  ;;  %v1805_v23 = vmul.f32 %v1803_v20, %v1763_v22 }
 0x79c   :  { %v1807_v27 = vadd.f32 1.0, %v1805_v23  ;;  %v1808_v17 = vmul.f32 %v1806_v25, %v1756_v24 }
 0x79e   :  { %v1809_v28 = vmul.f32 %v1807_v27, %v1757_v26 }
 0x7a0   :  { %v1814_v30 = vpack.c.bf16 %v1809_v28, %v1808_v17 }
 0x7a2   :  { %6123 = vmatmul.mubr.msk.bf16.vlgmr.msra.gmra.mrb[32].mxu1 %vm210_vm2, %v1814_v30 }
 0x7a3   :  { %6130 = vmatprep.mubr.msk.bf16.mxu1 %vm6967_vm0, %v6966_v1  ;;  %6127 = vmatpush3.bf16.msra.mxu1 %v6618_v31 }
 0x7a4   :  { %6128 = vmatprep.subr.bf16.mxu1 %v6966_v1 }
 0x7a7   :  { %6129 = vmatpush3.bf16.msra.mxu1 %v6619_v33 }
 0x875   :  { %v1871_v35 = vpop.f32.mrb[32].mxu1 }
 0x876   :  { %v1872_v36 = vadd.f32 %v5724_v34, %v1871_v35  ;;  %v6124_v29 = vpop.f32.mrb[33].mxu1 }
 0x877   :  { %v1874_v32 = vpop.f32.mrb[34].mxu1 }
 0x878   :  { %v1880_v37 = vmul.f32 0.70710677, %v1872_v36  ;;  %v1875_v16 = vadd.f32 %v5724_v34, %v1874_v32  ;;  %v6125_v38 = vpop.f32.mrb[35].mxu1  ;;  %v1878_v31 = vmul.f32 0.5, %v1872_v36  ;;  %v5728_v36 = vld [vmem:[%s7047_s30] ss:$0 sm:$0xff] }
 0x879   :  { %v6620_v38 = vld [vmem:[%s7062_s20] ss:$8 sps:$4 sm:$0xff]  }
 0x87a   :  { %v1886_v39 = vand.u32 2147483647, %v1880_v37  ;;  %v1881_v40 = vmul.f32 0.70710677, %v1875_v16  ;;  %vm1882_vm12 = vcmp.ge.f32.partialorder %v1880_v37, 0.0  ;;  %v1879_v33 = vmul.f32 0.5, %v1875_v16 }
 0x87b   :  { %v1884_v23 = vsel %vm1882_vm12, 1.0, %v6975_v13  ;;  %v6622_v37 = vld [vmem:[%s7062_s20 + $0x4] ss:$8 sps:$4 sm:$0xff]  }
 0x87c   :  { %v1888_v41 = vmul.f32 0.3275911, %v1886_v39  ;;  %v1887_v42 = vand.u32 2147483647, %v1881_v40  ;;  %v1914_v3 = vsub.f32 0.0, %v1886_v39  ;;  %vm1883_vm13 = vcmp.ge.f32.partialorder %v1881_v40, 0.0  ;;  %2077 = vmatprep.subr.bf16.mxu1 %v6622_v37 }
 0x87d   :  { %v1885_v17 = vsel %vm1883_vm13, 1.0, %v6975_v13  ;;  %v6623_v40 = vld [vmem:[%s7062_s20 + $0x10] ss:$8 sps:$4 sm:$0xff]  }
 0x87e   :  { %v1890_v43 = vadd.f32 1.0, %v1888_v41  ;;  %v1889_v44 = vmul.f32 0.3275911, %v1887_v42  ;;  %v1915_v6 = vsub.f32 0.0, %v1887_v42  ;;  %v1916_v49 = vmul.f32 %v1914_v3, %v1886_v39  ;;  %v6625_v39 = vld [vmem:[%s7062_s20 + $0x14] ss:$8 sps:$4 sm:$0xff]  }
 0x880   :  { %6733 = vrcp.f32 %v1890_v43  ;;  %v1891_v21 = vadd.f32 1.0, %v1889_v44  ;;  %v1917_v52 = vmul.f32 %v1915_v6, %v1887_v42  ;;  %v1918_v53 = vmul.f32 1.442695, %v1916_v49 }
 0x882   :  { %6735 = vrcp.f32 %v1891_v21  ;;  %v1920_v59 = vmul.f32 1.442695, %v1917_v52 }
 0x883   :  { %6737 = vpow2.f32 %v1918_v53 }
 0x884   :  { %6739 = vpow2.f32 %v1920_v59 }
 0x88a   :  { %v6734_v47 = vpop.eup %6733 }
 0x88b   :  { %v1896_v14 = vmul.f32 1.0614054, %v6734_v47 }
 0x88c   :  { %v6736_v48 = vpop.eup %6735 }
 0x88d   :  { %v1898_v50 = vadd.f32 -1.4531521, %v1896_v14  ;;  %v1897_v54 = vmul.f32 1.0614054, %v6736_v48  ;;  %v6738_v15 = vpop.eup %6737 }
 0x88e   :  { %v6740_v22 = vpop.eup %6739 }
 0x88f   :  { %v1900_v56 = vmul.f32 %v6734_v47, %v1898_v50  ;;  %v1899_v57 = vadd.f32 -1.4531521, %v1897_v54 }
 0x891   :  { %v1902_v58 = vadd.f32 1.4214138, %v1900_v56  ;;  %v1901_v60 = vmul.f32 %v6736_v48, %v1899_v57 }
 0x893   :  { %v1904_v45 = vmul.f32 %v6734_v47, %v1902_v58  ;;  %v1903_v61 = vadd.f32 1.4214138, %v1901_v60 }
 0x895   :  { %v1906_v62 = vadd.f32 -0.28449672, %v1904_v45  ;;  %v1905_v51 = vmul.f32 %v6736_v48, %v1903_v61 }
 0x897   :  { %v1908_v63 = vmul.f32 %v6734_v47, %v1906_v62  ;;  %v1907_v8 = vadd.f32 -0.28449672, %v1905_v51 }
 0x899   :  { %v1910_v10 = vadd.f32 0.2548296, %v1908_v63  ;;  %v1909_v11 = vmul.f32 %v6736_v48, %v1907_v8 }
 0x89b   :  { %v1912_v12 = vmul.f32 %v6734_v47, %v1910_v10  ;;  %v1911_v18 = vadd.f32 0.2548296, %v1909_v11 }
 0x89d   :  { %v1922_v19 = vmul.f32 %v6738_v15, %v1912_v12  ;;  %v1913_v20 = vmul.f32 %v6736_v48, %v1911_v18 }
 0x89f   :  { %v1924_v25 = vsub.f32 1.0, %v1922_v19  ;;  %v1923_v24 = vmul.f32 %v6740_v22, %v1913_v20 }
 0x8a1   :  { %v1926_v26 = vmul.f32 %v1924_v25, %v1884_v23  ;;  %v1925_v27 = vsub.f32 1.0, %v1923_v24  ;;  %v5732_v25 = vld [vmem:[%s8218_s3] ss:$0 sm:$0xff] }
 0x8a3   :  { %v1928_v28 = vadd.f32 1.0, %v1926_v26  ;;  %v1927_v30 = vmul.f32 %v1925_v27, %v1885_v17  ;;  %v5733_v26 = vld [vmem:[%s8219_s8] ss:$0 sm:$0xff] }
 0x8a5   :  { %v1929_v34 = vadd.f32 1.0, %v1927_v30  ;;  %v1930_v35 = vmul.f32 %v1928_v28, %v1878_v31 }
 0x8a7   :  { %v1931_v29 = vmul.f32 %v1929_v34, %v1879_v33 }
 0x8a9   :  { %v1936_v32 = vpack.c.bf16 %v1931_v29, %v1930_v35 }
 0x8ab   :  { %6131 = vmatmul.mubr.msk.bf16.vlgmr.msra.gmra.mrb[36].mxu1 %vm210_vm2, %v1936_v32 }
 0x8ac   :  { %2109 = vmatprep.mubr.bf16.mxu1 %v6968_v9  ;;  %2078 = vmatpush1.bf16.msra.mxu1 %v6620_v38 }
 0x8ad   :  { %2079 = vmatprep.subr.bf16.mxu1 %v6625_v39 }
 0x8b0   :  { %2080 = vmatpush1.bf16.msra.mxu1 %v6623_v40 }
 0x8b1   :  { %6134 = vmatprep.subr.bf16.mxu1 %v6966_v1 }
 0x97e   :  { %v1993_v16 = vpop.f32.mrb[36].mxu1 }
 0x97f   :  { %v1994_v41 = vadd.f32 %v5728_v36, %v1993_v16  ;;  %v6132_v42 = vpop.f32.mrb[37].mxu1 }
 0x980   :  { %v1996_v43 = vpop.f32.mrb[38].mxu1 }
 0x981   :  { %v2012_v44 = vmul.f32 %v1994_v41, %v1994_v41  ;;  %v1997_v21 = vadd.f32 %v5728_v36, %v1996_v43  ;;  %v6133_v3 = vpop.f32.mrb[39].mxu1  ;;  %v2002_v6 = vsel %vm210_vm2, %v1994_v41, 0.0 }
 0x983   :  { %v2003_v47 = vsel %vm210_vm2, %v1997_v21, 0.0  ;;  %v2013_v49 = vmul.f32 %v1997_v21, %v1997_v21  ;;  %v2014_v48 = vsel %vm210_vm2, %v2012_v44, 0.0 }
 0x984   :  { %v2004_v14 = vadd.f32 %v2003_v47, %v2002_v6 }
 0x985   :  { %v2015_v50 = vsel %vm210_vm2, %v2013_v49, 0.0 }
 0x986   :  { %v2005_v52 = vrot.slane %v2004_v14, 4  ;;  %v2016_v53 = vadd.f32 %v2015_v50, %v2014_v48 }
 0x988   :  { %v2006_v54 = vadd.f32 %v2005_v52, %v2004_v14  ;;  %v2017_v56 = vrot.slane %v2016_v53, 4 }
 0x98a   :  { %v2007_v57 = vrot.slane %v2006_v54, 2  ;;  %v2018_v58 = vadd.f32 %v2017_v56, %v2016_v53 }
 0x98c   :  { %v2008_v59 = vadd.f32 %v2007_v57, %v2006_v54  ;;  %v2019_v60 = vrot.slane %v2018_v58, 2 }
 0x98e   :  { %v2009_v45 = vrot.slane %v2008_v59, 1  ;;  %v2020_v61 = vadd.f32 %v2019_v60, %v2018_v58 }
 0x990   :  { %v2010_v62 = vadd.f32 %v2009_v45, %v2008_v59  ;;  %v2021_v51 = vrot.slane %v2020_v61, 1 }
 0x992   :  { %v2011_v63 = vmul.f32 0.0625, %v2010_v62  ;;  %v2022_v8 = vadd.f32 %v2021_v51, %v2020_v61 }
 0x994   :  { %v2023_v10 = vmul.f32 0.0625, %v2022_v8  ;;  %v2024_v11 = vmul.f32 %v2011_v63, %v2011_v63  ;;  %v2027_v12 = vsub.f32 %v1994_v41, %v2011_v63  ;;  %v2028_v15 = vsub.f32 %v1997_v21, %v2011_v63 }
 0x996   :  { %v2025_v18 = vsub.f32 %v2023_v10, %v2024_v11 }
 0x998   :  { %v2026_v19 = vmax.f32 %v2025_v18, 0.0 }
 0x99a   :  { %v2029_v20 = vadd.f32 1e-05, %v2026_v19 }
 0x99c   :  { %6741 = vrsqrt.f32 %v2029_v20 }
 0x9a6   :  { %v6742_v22 = vpop.eup %6741 }
 0x9a7   :  { %v2031_v23 = vmul.f32 %v6742_v22, %v2027_v12  ;;  %v2032_v24 = vmul.f32 %v6742_v22, %v2028_v15 }
 0x9a9   :  { %v2039_v27 = vmul.f32 %v5732_v25, %v2031_v23  ;;  %v2040_v17 = vmul.f32 %v5732_v25, %v2032_v24 }
 0x9ab   :  { %v2047_v28 = vadd.f32 %v5733_v26, %v2039_v27  ;;  %v2048_v30 = vadd.f32 %v5733_v26, %v2040_v17 }
 0x9ad   :  { %v2053_v31 = vpack.c.bf16 %v2048_v30, %v2047_v28 }
 0x9af   :  { %5738 = vmatmul.mubr.msk.bf16.vlgmr.msra.gmra.mrb[40].mxu1 %vm210_vm2, %v2053_v31 }
 0x9b0   :  { %6136 = vmatprep.mubr.msk.bf16.mxu1 %vm6967_vm0, %v6966_v1 }
 0xa82   :  { %v2111_v33 = vpop.f32.mrb[40].mxu1 }
 0xa83   :  { %v2113_v34 = vpop.f32.mrb[41].mxu1  ;;  %v2177_v29 = vmul.f32 %v2111_v33, %v2111_v33 }
 0xa84   :  { %v2115_v35 = vpop.f32.mrb[42].mxu1  ;;  %v2169_v41 = vmul.f32 %v2113_v34, %v2113_v34 }
 0xa85   :  { %v7532_v32 = vpack.c.bf16 %v2115_v35, %v2111_v33  ;;  %v2178_v37 = vmul.f32 %v2115_v35, %v2115_v35  ;;  %v2117_v38 = vpop.f32.mrb[43].mxu1 }
 0xa86   :  { %v2120_v39 = vpack.c.bf16 %v2117_v38, %v2113_v34  ;;  %v2170_v42 = vmul.f32 %v2117_v38, %v2117_v38  ;;  %v2171_v43 = vsel %vm210_vm2, %v2169_v41, 0.0 }
 0xa87   :  { %v6429_v40 = vpack.c.bf16 %v2178_v37, %v2177_v29  ;;  %2317 = vrot.lane.b32.xlu0 %v7532_v32, %s6971_s5  ;;  %v2126_v36 = vsel %vm210_vm2, %v7532_v32, 0  ;;  %v6571_v16 = vpack.i.bf16 %v2178_v37, %v2177_v29 }
 0xa88   :  { %6135 = vmatpush3.bf16.xpose.msra.mxu1 %v2126_v36  ;;  %v2174_v44 = vsel %vm210_vm2, %v2170_v42, 0.0 }
 0xa89   :  { %6572 = vrot.lane.b32.xlu1 %v6571_v16, %s6971_s5  ;;  %6431 = vmatpush3.bf16.xpose.msk.msra.mxu0 %vm7188_vm3, %v6429_v40 }
 0xa8a   :  { %6147 = vmatprep.subr.bf16.mxu1 %v6966_v1  ;;  %6432 = vmatprep.subr.bf16.mxu0 %v6969_v55 }
 0xa8b   :  { %2314 = vrot.lane.b32.xlu0 %v2120_v39, %s6971_s5 }
 0xa8d   :  { %6577 = vrot.lane.b32.xlu1 %v6571_v16, %s6970_s0 }
 0xa8f   :  { %6582 = vrot.lane.b32.xlu0 %v6571_v16, %s6973_s13  ;;  %6137 = vmatmul.mubr.msk.bf16.vlgmr.msra.gmra.mrb[44].mxu1 %vm210_vm2, %v2120_v39 }
 0xa90   :  { %6145 = vmatmul.mubr.msk.f32.vlgmr.msra.gmra.mrb[36].mxu0 %vm210_vm2, %v6972_v5  ;;  %6149 = vmatprep.mubr.msk.bf16.mxu1 %vm6967_vm0, %v6966_v1 }
 0xa91   :  { %2518 = vrot.lane.b32.xlu1 %v7532_v32, %s6970_s0  ;;  %6157 = vmatprep.mubr.msk.f32.mxu0 %vm6967_vm0, %v6966_v1 }
 0xa93   :  { %2717 = vrot.lane.b32.xlu0 %v7532_v32, %s6973_s13 }
 0xa95   :  { %2516 = vrot.lane.b32.xlu1 %v2120_v39, %s6970_s0 }
 0xa97   :  { %2368 = vrot.lane.b32.xlu0 %v2169_v41, %s6971_s5 }
 0xa99   :  { %2715 = vrot.lane.b32.xlu1 %v2120_v39, %s6973_s13 }
 0xa9b   :  { %2567 = vrot.lane.b32.xlu0 %v2169_v41, %s6970_s0 }
 0xa9d   :  { %2370 = vrot.lane.b32.xlu1 %v2170_v42, %s6971_s5 }
 0xa9f   :  { %2766 = vrot.lane.b32.xlu0 %v2169_v41, %s6973_s13 }
 0xaa1   :  { %2569 = vrot.lane.b32.xlu1 %v2170_v42, %s6970_s0 }
 0xaa5   :  { %2768 = vrot.lane.b32.xlu1 %v2170_v42, %s6973_s13 }
 0xabe   :  { %2172 = vadd.xlane.f32.xlu0 %v2171_v43 }
 0xac9   :  { %2175 = vadd.xlane.f32.xlu1 %v2174_v44 }
 0xaf9   :  { %v7567_v21 = vpop.permute.xlu0 %2317 }
 0xafa   :  { %v2323_v3 = vsel %vm210_vm2, %v7567_v21, 0 }
 0xafb   :  { %v6573_v6 = vpop.permute.xlu1 %6572  ;;  %6148 = vmatpush3.bf16.xpose.msra.mxu1 %v2323_v3 }
 0xafc   :  { %v6575_v47 = vunpack.i.h.bf16 %v6573_v6  ;;  %v6574_v49 = vunpack.i.l.bf16 %v6573_v6  ;;  %6160 = vmatprep.subr.bf16.mxu1 %v6966_v1 }
 0xafd   :  { %v2315_v14 = vpop.permute.xlu0 %2314 }
 0xafe   :  { %v6433_v48 = vpack.c.bf16 %v6575_v47, %v6574_v49 }
 0xaff   :  { %v6578_v50 = vpop.permute.xlu1 %6577 }
 0xb00   :  { %6435 = vmatpush3.bf16.xpose.msk.msra.mxu0 %vm7188_vm3, %v6433_v48  ;;  %v6580_v53 = vunpack.i.h.bf16 %v6578_v50  ;;  %v6579_v54 = vunpack.i.l.bf16 %v6578_v50 }
 0xb01   :  { %v6583_v52 = vpop.permute.xlu0 %6582  ;;  %6436 = vmatprep.subr.bf16.mxu0 %v6969_v55 }
 0xb02   :  { %6150 = vmatmul.mubr.msk.bf16.vlgmr.msra.gmra.mrb[48].mxu1 %vm210_vm2, %v2315_v14  ;;  %v6437_v59 = vpack.c.bf16 %v6580_v53, %v6579_v54  ;;  %v6585_v61 = vunpack.i.h.bf16 %v6583_v52  ;;  %v6584_v62 = vunpack.i.l.bf16 %v6583_v52 }
 0xb03   :  { %v7576_v56 = vpop.permute.xlu1 %2518  ;;  %6162 = vmatprep.mubr.msk.bf16.mxu1 %vm6967_vm0, %v6966_v1 }
 0xb04   :  { %v2524_v57 = vsel %vm210_vm2, %v7576_v56, 0  ;;  %v6441_v11 = vpack.c.bf16 %v6585_v61, %v6584_v62 }
 0xb05   :  { %v7582_v58 = vpop.permute.xlu0 %2717  ;;  %6161 = vmatpush3.bf16.xpose.msra.mxu1 %v2524_v57 }
 0xb06   :  { %6173 = vmatprep.subr.bf16.mxu1 %v6966_v1  ;;  %v2723_v8 = vsel %vm210_vm2, %v7582_v58, 0 }
 0xb07   :  { %6158 = vmatmul.mubr.msk.f32.vlgmr.msra.gmra.mrb[38].mxu0 %vm210_vm2, %v6972_v5  ;;  %v2517_v60 = vpop.permute.xlu1 %2516 }
 0xb08   :  { %6439 = vmatpush3.bf16.xpose.msk.msra.mxu0 %vm7188_vm3, %v6437_v59  ;;  %6170 = vmatprep.mubr.msk.f32.mxu0 %vm6967_vm0, %v6966_v1 }
 0xb09   :  { %v2369_v45 = vpop.permute.xlu0 %2368  ;;  %6440 = vmatprep.subr.bf16.mxu0 %v6969_v55 }
 0xb0a   :  { %v2374_v51 = vsel %vm210_vm2, %v2369_v45, 0.0 }
 0xb0b   :  { %v2716_v63 = vpop.permute.xlu1 %2715  ;;  %2375 = vadd.xlane.f32.xlu0 %v2374_v51 }
 0xb0c   :  { %6163 = vmatmul.mubr.msk.bf16.vlgmr.msra.gmra.mrb[52].mxu1 %vm210_vm2, %v2517_v60 }
 0xb0d   :  { %v2568_v10 = vpop.permute.xlu0 %2567  ;;  %6174 = vmatpush3.bf16.xpose.msra.mxu1 %v2723_v8  ;;  %6175 = vmatprep.mubr.msk.bf16.mxu1 %vm6967_vm0, %v6966_v1 }
 0xb0e   :  { %v2573_v12 = vsel %vm210_vm2, %v2568_v10, 0.0  ;;  %6186 = vmatprep.subr.bf16.mxu1 %v6966_v1 }
 0xb0f   :  { %6171 = vmatmul.mubr.msk.f32.vlgmr.msra.gmra.mrb[40].mxu0 %vm210_vm2, %v6972_v5  ;;  %v2371_v15 = vpop.permute.xlu1 %2370  ;;  %2574 = vadd.xlane.f32.xlu1 %v2573_v12 }
 0xb10   :  { %6443 = vmatpush3.bf16.xpose.msk.msra.mxu0 %vm7188_vm3, %v6441_v11  ;;  %v2377_v18 = vsel %vm210_vm2, %v2371_v15, 0.0  ;;  %6183 = vmatprep.mubr.msk.f32.mxu0 %vm6967_vm0, %v6966_v1 }
 0xb11   :  { %2378 = vadd.xlane.f32.xlu0 %v2377_v18  ;;  %v2767_v19 = vpop.permute.xlu0 %2766  ;;  %6192 = vmatprep.subr.bf16.mxu0 %v6966_v1 }
 0xb12   :  { %v2772_v20 = vsel %vm210_vm2, %v2767_v19, 0.0 }
 0xb13   :  { %v2570_v22 = vpop.permute.xlu1 %2569  ;;  %2773 = vadd.xlane.f32.xlu1 %v2772_v20 }
 0xb14   :  { %6176 = vmatmul.mubr.msk.bf16.vlgmr.msra.gmra.mrb[56].mxu1 %vm210_vm2, %v2716_v63  ;;  %v2576_v25 = vsel %vm210_vm2, %v2570_v22, 0.0 }
 0xb15   :  { %2577 = vadd.xlane.f32.xlu0 %v2576_v25  ;;  %6187 = vmatpush3.bf16.msra.mxu1 %v7532_v32 }
 0xb16   :  { %6188 = vmatprep.mubr.msk.bf16.mxu1 %vm6967_vm0, %v6966_v1  ;;  %6198 = vmatprep.subr.bf16.mxu1 %v6966_v1 }
 0xb17   :  { %v2769_v23 = vpop.permute.xlu1 %2768  ;;  %6184 = vmatmul.mubr.msk.f32.vlgmr.msra.gmra.mrb[42].mxu0 %vm210_vm2, %v6972_v5 }
 0xb18   :  { %v2775_v24 = vsel %vm210_vm2, %v2769_v23, 0.0  ;;  %6193 = vmatpush3.bf16.msra.mxu0 %v6974_v7  ;;  %6194 = vmatprep.mubr.msk.bf16.mxu0 %vm6967_vm0, %v6966_v1 }
 0xb19   :  { %2776 = vadd.xlane.f32.xlu0 %v2775_v24  ;;  %6204 = vmatprep.subr.bf16.mxu0 %v6966_v1 }
 0xb4b   :  { %v2173_v26 = vpop.xlane.xlu0 %2172 }
 0xb56   :  { %v2176_v34 = vpop.xlane.xlu1 %2175 }
 0xb62   :  { %v2162_v27 = vpop.f32.mrb[44].mxu1 }
 0xb63   :  { %v6138_v17 = vpop.f32.mrb[45].mxu1  ;;  %v2251_v28 = vpop.f32.mrb[36].mxu0  ;;  %v2261_v32 = vmul.f32 2.0, %v2162_v27 }
 0xb64   :  { %v2258_v30 = vrot.slane %v2251_v28, %v7276_v46  ;;  %v2165_v31 = vpop.f32.mrb[46].mxu1  ;;  %v6146_v33 = vpop.f32.mrb[37].mxu0 }
 0xb65   :  { %v2262_v35 = vmul.f32 2.0, %v2165_v31  ;;  %v6139_v29 = vpop.f32.mrb[47].mxu1 }
 0xb66   :  { %v2259_v37 = vadd.f32 %v2258_v30, %v2173_v26  ;;  %v2260_v38 = vadd.f32 %v2258_v30, %v2176_v34 }
 0xb68   :  { %v2263_v39 = vsub.f32 %v2259_v37, %v2261_v32  ;;  %v2264_v40 = vsub.f32 %v2260_v38, %v2262_v35 }
 0xb6a   :  { %v7623_v36 = vmax.f32 %v2263_v39, 0.0  ;;  %v7625_v16 = vmax.f32 %v2264_v40, 0.0 }
 0xb6c   :  { %v2297_v41 = vmul.f32 %v7280_v0, %v7623_v36  ;;  %v2298_v42 = vmul.f32 %v7282_v2, %v7625_v16  ;;  %6743 = vrsqrt.f32 %v7623_v36  ;;  %vm2269_vm14 = vcmp.eq.f32.partialorder %v7623_v36, inf }
 0xb6d   :  { %6745 = vrsqrt.f32 %v7625_v16  ;;  %v2272_v14 = vand.u32 2147483648, %v7623_v36  ;;  %vm2271_vm15 = vcmp.eq.f32.partialorder %v7623_v36, 0.0  ;;  %vm2276_vm4 = vcmp.eq.f32.partialorder %v7625_v16, inf }
 0xb6e   :  { %v2299_v43 = vsel %vm163_vm1, %v2297_v41, 0.0  ;;  %v2300_v44 = vsel %vm163_vm1, %v2298_v42, 0.0  ;;  %v2279_v52 = vand.u32 2147483648, %v7625_v16  ;;  %vm2278_vm5 = vcmp.eq.f32.partialorder %v7625_v16, 0.0 }
 0xb6f   :  { %v2301_v3 = vadd.f32 %v2300_v44, %v2299_v43 }
 0xb71   :  { %2302 = vadd.xlane.f32.xlu0 %v2301_v3 }
 0xb76   :  { %v6744_v6 = vpop.eup %6743 }
 0xb77   :  { %v6746_v47 = vpop.eup %6745  ;;  %v2268_v49 = vmul.f32 %v6744_v6, %v7623_v36 }
 0xb78   :  { %v2275_v48 = vmul.f32 %v6746_v47, %v7625_v16 }
 0xb79   :  { %v2270_v50 = vsel %vm2269_vm14, %v7623_v36, %v2268_v49 }
 0xb7a   :  { %v2273_v53 = vsel %vm2271_vm15, %v2272_v14, %v2270_v50  ;;  %v2277_v54 = vsel %vm2276_vm4, %v7625_v16, %v2275_v48 }
 0xb7b   :  { %v2280_v57 = vsel %vm2278_vm5, %v2279_v52, %v2277_v54  ;;  %v2281_v59 = vmul.f32 %v7280_v0, %v2273_v53 }
 0xb7c   :  { %v2282_v60 = vmul.f32 %v7282_v2, %v2280_v57 }
 0xb7d   :  { %v2283_v45 = vsel %vm163_vm1, %v2281_v59, 0.0 }
 0xb7e   :  { %v2284_v61 = vsel %vm163_vm1, %v2282_v60, 0.0 }
 0xb7f   :  { %v2285_v62 = vadd.f32 %v2284_v61, %v2283_v45 }
 0xb81   :  { %2286 = vadd.xlane.f32.xlu1 %v2285_v62 }
 0xb98   :  { %v2376_v10 = vpop.xlane.xlu0 %2375 }
 0xb9c   :  { %v2575_v38 = vpop.xlane.xlu1 %2574 }
 0xb9e   :  { %v2379_v19 = vpop.xlane.xlu0 %2378 }
 0xba0   :  { %v2774_v62 = vpop.xlane.xlu1 %2773 }
 0xba2   :  { %v2578_v39 = vpop.xlane.xlu0 %2577 }
 0xbd5   :  { %v2359_v51 = vpop.f32.mrb[48].mxu1 }
 0xbd6   :  { %v6151_v63 = vpop.f32.mrb[49].mxu1  ;;  %v2464_v20 = vmul.f32 2.0, %v2359_v51  ;;  %v2777_v51 = vpop.xlane.xlu0 %2776 }
 0xbd7   :  { %v2362_v8 = vpop.f32.mrb[50].mxu1 }
 0xbd8   :  { %v6152_v11 = vpop.f32.mrb[51].mxu1  ;;  %v2465_v22 = vmul.f32 2.0, %v2362_v8 }
 0xbda   :  { %v2454_v12 = vpop.f32.mrb[38].mxu0 }
 0xbdb   :  { %v2461_v15 = vrot.slane %v2454_v12, %v7276_v46  ;;  %v6159_v18 = vpop.f32.mrb[39].mxu0 }
 0xbdd   :  { %v2462_v25 = vadd.f32 %v2461_v15, %v2376_v10  ;;  %v2463_v23 = vadd.f32 %v2461_v15, %v2379_v19 }
 0xbdf   :  { %v2466_v24 = vsub.f32 %v2462_v25, %v2464_v20  ;;  %v2467_v26 = vsub.f32 %v2463_v23, %v2465_v22  ;;  %v2560_v27 = vpop.f32.mrb[52].mxu1 }
 0xbe0   :  { %v6164_v17 = vpop.f32.mrb[53].mxu1  ;;  %v2663_v40 = vmul.f32 2.0, %v2560_v27 }
 0xbe1   :  { %v7650_v28 = vmax.f32 %v2466_v24, 0.0  ;;  %v7652_v30 = vmax.f32 %v2467_v26, 0.0  ;;  %v2563_v31 = vpop.f32.mrb[54].mxu1 }
 0xbe2   :  { %v6165_v33 = vpop.f32.mrb[55].mxu1  ;;  %v2653_v34 = vpop.f32.mrb[40].mxu0  ;;  %v2664_v41 = vmul.f32 2.0, %v2563_v31 }
 0xbe3   :  { %v2660_v35 = vrot.slane %v2653_v34, %v7276_v46  ;;  %v6172_v29 = vpop.f32.mrb[41].mxu0  ;;  %v2500_v32 = vmul.f32 %v7280_v0, %v7650_v28  ;;  %v2501_v37 = vmul.f32 %v7282_v2, %v7652_v30  ;;  %6747 = vrsqrt.f32 %v7650_v28 }
 0xbe4   :  { %6749 = vrsqrt.f32 %v7652_v30  ;;  %vm2472_vm6 = vcmp.eq.f32.partialorder %v7650_v28, inf  ;;  %vm2474_vm7 = vcmp.eq.f32.partialorder %v7650_v28, 0.0  ;;  %v2475_v24 = vand.u32 2147483648, %v7650_v28 }
 0xbe5   :  { %v2661_v42 = vadd.f32 %v2660_v35, %v2575_v38  ;;  %v2662_v43 = vadd.f32 %v2660_v35, %v2578_v39  ;;  %v2502_v44 = vsel %vm163_vm1, %v2500_v32, 0.0  ;;  %v2503_v3 = vsel %vm163_vm1, %v2501_v37, 0.0 }
 0xbe6   :  { %v2504_v6 = vadd.f32 %v2503_v3, %v2502_v44  ;;  %vm2479_vm10 = vcmp.eq.f32.partialorder %v7652_v30, inf  ;;  %vm2481_vm11 = vcmp.eq.f32.partialorder %v7652_v30, 0.0  ;;  %v2482_v17 = vand.u32 2147483648, %v7652_v30 }
 0xbe7   :  { %v2665_v47 = vsub.f32 %v2661_v42, %v2663_v40  ;;  %v2666_v49 = vsub.f32 %v2662_v43, %v2664_v41  ;;  %v2759_v14 = vpop.f32.mrb[56].mxu1 }
 0xbe8   :  { %v6177_v48 = vpop.f32.mrb[57].mxu1  ;;  %2505 = vadd.xlane.f32.xlu0 %v2504_v6  ;;  %v2862_v63 = vmul.f32 2.0, %v2759_v14 }
 0xbe9   :  { %v7663_v50 = vmax.f32 %v2665_v47, 0.0  ;;  %v7665_v52 = vmax.f32 %v2666_v49, 0.0  ;;  %v2762_v53 = vpop.f32.mrb[58].mxu1 }
 0xbea   :  { %v6178_v54 = vpop.f32.mrb[59].mxu1  ;;  %v2852_v57 = vpop.f32.mrb[42].mxu0  ;;  %v2863_v8 = vmul.f32 2.0, %v2762_v53 }
 0xbeb   :  { %v2859_v59 = vrot.slane %v2852_v57, %v7276_v46  ;;  %v6185_v60 = vpop.f32.mrb[43].mxu0  ;;  %v2699_v45 = vmul.f32 %v7280_v0, %v7663_v50  ;;  %v2700_v61 = vmul.f32 %v7282_v2, %v7665_v52  ;;  %6751 = vrsqrt.f32 %v7663_v50 }
 0xbec   :  { %6753 = vrsqrt.f32 %v7665_v52  ;;  %vm2671_vm12 = vcmp.eq.f32.partialorder %v7663_v50, inf  ;;  %v2674_v14 = vand.u32 2147483648, %v7663_v50  ;;  %vm2673_vm13 = vcmp.eq.f32.partialorder %v7663_v50, 0.0 }
 0xbed   :  { %v6748_v10 = vpop.eup %6747  ;;  %v2860_v11 = vadd.f32 %v2859_v59, %v2774_v62  ;;  %v2861_v12 = vadd.f32 %v2859_v59, %v2777_v51  ;;  %v2701_v15 = vsel %vm163_vm1, %v2699_v45, 0.0  ;;  %v2702_v18 = vsel %vm163_vm1, %v2700_v61, 0.0 }
 0xbee   :  { %v6750_v19 = vpop.eup %6749  ;;  %v2703_v20 = vadd.f32 %v2702_v18, %v2701_v15  ;;  %v2471_v22 = vmul.f32 %v6748_v10, %v7650_v28  ;;  %vm2678_vm14 = vcmp.eq.f32.partialorder %v7665_v52, inf  ;;  %v2681_v54 = vand.u32 2147483648, %v7665_v52 }
 0xbef   :  { %v2864_v25 = vsub.f32 %v2860_v11, %v2862_v63  ;;  %v2865_v23 = vsub.f32 %v2861_v12, %v2863_v8  ;;  %v2478_v26 = vmul.f32 %v6750_v19, %v7652_v30  ;;  %vm2680_vm15 = vcmp.eq.f32.partialorder %v7665_v52, 0.0 }
 0xbf0   :  { %2704 = vadd.xlane.f32.xlu0 %v2703_v20  ;;  %v2473_v27 = vsel %vm2472_vm6, %v7650_v28, %v2471_v22 }
 0xbf1   :  { %v7685_v31 = vmax.f32 %v2864_v25, 0.0  ;;  %v7687_v33 = vmax.f32 %v2865_v23, 0.0  ;;  %v2476_v34 = vsel %vm2474_vm7, %v2475_v24, %v2473_v27  ;;  %v2480_v35 = vsel %vm2479_vm10, %v7652_v30, %v2478_v26 }
 0xbf2   :  { %v2483_v29 = vsel %vm2481_vm11, %v2482_v17, %v2480_v35  ;;  %v2484_v32 = vmul.f32 %v7280_v0, %v2476_v34 }
 0xbf3   :  { %v2485_v37 = vmul.f32 %v7282_v2, %v2483_v29  ;;  %v2898_v38 = vmul.f32 %v7280_v0, %v7685_v31  ;;  %v2899_v39 = vmul.f32 %v7282_v2, %v7687_v33  ;;  %6755 = vrsqrt.f32 %v7685_v31 }
 0xbf4   :  { %v2486_v40 = vsel %vm163_vm1, %v2484_v32, 0.0  ;;  %6757 = vrsqrt.f32 %v7687_v33  ;;  %vm2870_vm4 = vcmp.eq.f32.partialorder %v7685_v31, inf  ;;  %v2873_v12 = vand.u32 2147483648, %v7685_v31 }
 0xbf5   :  { %v6752_v41 = vpop.eup %6751  ;;  %v2487_v42 = vsel %vm163_vm1, %v2485_v37, 0.0  ;;  %v2900_v43 = vsel %vm163_vm1, %v2898_v38, 0.0  ;;  %v2901_v44 = vsel %vm163_vm1, %v2899_v39, 0.0  ;;  %vm2872_vm5 = vcmp.eq.f32.partialorder %v7685_v31, 0.0 }
 0xbf6   :  { %v6754_v3 = vpop.eup %6753  ;;  %v2488_v6 = vadd.f32 %v2487_v42, %v2486_v40  ;;  %v2902_v47 = vadd.f32 %v2901_v44, %v2900_v43  ;;  %v2670_v49 = vmul.f32 %v6752_v41, %v7663_v50  ;;  %vm2877_vm6 = vcmp.eq.f32.partialorder %v7687_v33, inf }
 0xbf7   :  { %v2677_v48 = vmul.f32 %v6754_v3, %v7665_v52  ;;  %v2880_v20 = vand.u32 2147483648, %v7687_v33  ;;  %vm2879_vm7 = vcmp.eq.f32.partialorder %v7687_v33, 0.0 }
 0xbf8   :  { %2489 = vadd.xlane.f32.xlu1 %v2488_v6  ;;  %2903 = vadd.xlane.f32.xlu0 %v2902_v47  ;;  %v2672_v53 = vsel %vm2671_vm12, %v7663_v50, %v2670_v49 }
 0xbf9   :  { %v2675_v57 = vsel %vm2673_vm13, %v2674_v14, %v2672_v53  ;;  %v2679_v59 = vsel %vm2678_vm14, %v7665_v52, %v2677_v48 }
 0xbfa   :  { %v2682_v60 = vsel %vm2680_vm15, %v2681_v54, %v2679_v59  ;;  %v2683_v45 = vmul.f32 %v7280_v0, %v2675_v57 }
 0xbfb   :  { %v2684_v61 = vmul.f32 %v7282_v2, %v2682_v60 }
 0xbfc   :  { %v2685_v62 = vsel %vm163_vm1, %v2683_v45, 0.0 }
 0xbfd   :  { %v6756_v51 = vpop.eup %6755  ;;  %v2686_v63 = vsel %vm163_vm1, %v2684_v61, 0.0 }
 0xbfe   :  { %v2687_v8 = vadd.f32 %v2686_v63, %v2685_v62  ;;  %v2869_v10 = vmul.f32 %v6756_v51, %v7685_v31  ;;  %v6758_v11 = vpop.eup %6757  ;;  %v2303_v23 = vpop.xlane.xlu0 %2302 }
 0xbff   :  { %v2876_v18 = vmul.f32 %v6758_v11, %v7687_v33  ;;  %v2304_v17 = vrot.slane %v2303_v23, 4 }
 0xc00   :  { %2688 = vadd.xlane.f32.xlu1 %v2687_v8  ;;  %v2871_v15 = vsel %vm2870_vm4, %v7685_v31, %v2869_v10 }
 0xc01   :  { %v2874_v19 = vsel %vm2872_vm5, %v2873_v12, %v2871_v15  ;;  %v2878_v22 = vsel %vm2877_vm6, %v7687_v33, %v2876_v18  ;;  %v2305_v29 = vadd.f32 %v2304_v17, %v2303_v23 }
 0xc02   :  { %v2882_v25 = vmul.f32 %v7280_v0, %v2874_v19  ;;  %v2881_v24 = vsel %vm2879_vm7, %v2880_v20, %v2878_v22 }
 0xc03   :  { %v2883_v26 = vmul.f32 %v7282_v2, %v2881_v24  ;;  %v2306_v32 = vrot.slane %v2305_v29, 2 }
 0xc04   :  { %v2884_v27 = vsel %vm163_vm1, %v2882_v25, 0.0 }
 0xc05   :  { %v2885_v34 = vsel %vm163_vm1, %v2883_v26, 0.0  ;;  %v2307_v40 = vadd.f32 %v2306_v32, %v2305_v29 }
 0xc06   :  { %v2886_v35 = vadd.f32 %v2885_v34, %v2884_v27 }
 0xc07   :  { %v2308_v43 = vrot.slane %v2307_v40, 1 }
 0xc08   :  { %2887 = vadd.xlane.f32.xlu1 %v2886_v35 }
 0xc09   :  { %v2309_v6 = vadd.f32 %v2308_v43, %v2307_v40 }
 0xc0e   :  { %v2287_v37 = vpop.xlane.xlu1 %2286 }
 0xc0f   :  { %v2288_v38 = vrot.slane %v2287_v37, 4 }
 0xc11   :  { %v2289_v39 = vadd.f32 %v2288_v38, %v2287_v37 }
 0xc13   :  { %v2290_v41 = vrot.slane %v2289_v39, 2 }
 0xc15   :  { %v2291_v42 = vadd.f32 %v2290_v41, %v2289_v39 }
 0xc17   :  { %v2292_v44 = vrot.slane %v2291_v42, 1 }
 0xc19   :  { %v2293_v3 = vadd.f32 %v2292_v44, %v2291_v42 }
 0xc1b   :  { %6476 = vpush %v2293_v3 }
 0xc1c   :  { %6478 = vpush %v2309_v6 }
 0xc4c   :  { %s6477_s14 = spop %6476 }
 0xc4d   :  { %s6479_s19 = spop %6478 }
 0xc75   :  { %v2506_v47 = vpop.xlane.xlu0 %2505 }
 0xc76   :  { %v2507_v49 = vrot.slane %v2506_v47, 4 }
 0xc78   :  { %v2508_v14 = vadd.f32 %v2507_v49, %v2506_v47  ;;  %v2295_v47 = vstv %s6477_s14 }
 0xc7a   :  { %v2509_v53 = vrot.slane %v2508_v14, 2 }
 0xc7c   :  { %v2510_v61 = vadd.f32 %v2509_v53, %v2508_v14 }
 0xc7d   :  { %v2705_v48 = vpop.xlane.xlu0 %2704 }
 0xc7e   :  { %v2706_v54 = vrot.slane %v2705_v48, 4  ;;  %v2511_v11 = vrot.slane %v2510_v61, 1 }
 0xc80   :  { %v2707_v45 = vadd.f32 %v2706_v54, %v2705_v48  ;;  %v2512_v22 = vadd.f32 %v2511_v11, %v2510_v61  ;;  %v2311_v54 = vstv %s6479_s19  ;;  %s8229_s19 = sld [smem:[#allocation17_spill]] }
 0xc82   :  { %v2708_v8 = vrot.slane %v2707_v45, 2 }
 0xc84   :  { %v2709_v25 = vadd.f32 %v2708_v8, %v2707_v45 }
 0xc85   :  { %v2490_v57 = vpop.xlane.xlu1 %2489  ;;  %v2904_v51 = vpop.xlane.xlu0 %2903 }
 0xc86   :  { %v2491_v59 = vrot.slane %v2490_v57, 4  ;;  %v2905_v12 = vrot.slane %v2904_v51, 4  ;;  %v2710_v27 = vrot.slane %v2709_v25, 1 }
 0xc88   :  { %v2492_v60 = vadd.f32 %v2491_v59, %v2490_v57  ;;  %v2906_v23 = vadd.f32 %v2905_v12, %v2904_v51  ;;  %v2711_v38 = vadd.f32 %v2710_v27, %v2709_v25 }
 0xc8a   :  { %v2493_v62 = vrot.slane %v2492_v60, 2  ;;  %v2907_v17 = vrot.slane %v2906_v23, 2 }
 0xc8c   :  { %v2494_v63 = vadd.f32 %v2493_v62, %v2492_v60  ;;  %v2908_v39 = vadd.f32 %v2907_v17, %v2906_v23 }
 0xc8d   :  { %v2689_v10 = vpop.xlane.xlu1 %2688 }
 0xc8e   :  { %v2690_v15 = vrot.slane %v2689_v10, 4  ;;  %v2495_v18 = vrot.slane %v2494_v63, 1  ;;  %v2909_v42 = vrot.slane %v2908_v39, 1 }
 0xc90   :  { %v2691_v19 = vadd.f32 %v2690_v15, %v2689_v10  ;;  %v2496_v20 = vadd.f32 %v2495_v18, %v2494_v63  ;;  %v2910_v3 = vadd.f32 %v2909_v42, %v2908_v39 }
 0xc92   :  { %v2692_v24 = vrot.slane %v2691_v19, 2  ;;  %6480 = vpush %v2496_v20 }
 0xc93   :  { %6482 = vpush %v2512_v22 }
 0xc94   :  { %v2693_v26 = vadd.f32 %v2692_v24, %v2691_v19 }
 0xc95   :  { %v2888_v34 = vpop.xlane.xlu1 %2887 }
 0xc96   :  { %v2694_v35 = vrot.slane %v2693_v26, 1  ;;  %v2889_v29 = vrot.slane %v2888_v34, 4 }
 0xc98   :  { %v2695_v32 = vadd.f32 %v2694_v35, %v2693_v26  ;;  %v2890_v37 = vadd.f32 %v2889_v29, %v2888_v34 }
 0xc9a   :  { %6484 = vpush %v2695_v32  ;;  %v2891_v40 = vrot.slane %v2890_v37, 2 }
 0xc9b   :  { %6486 = vpush %v2711_v38 }
 0xc9c   :  { %v2892_v41 = vadd.f32 %v2891_v40, %v2890_v37 }
 0xc9e   :  { %v2893_v43 = vrot.slane %v2892_v41, 1 }
 0xca0   :  { %v2894_v44 = vadd.f32 %v2893_v43, %v2892_v41 }
 0xca2   :  { %6488 = vpush %v2894_v44 }
 0xca3   :  { %6490 = vpush %v2910_v3 }
 0xcc3   :  { %s6481_s24 = spop %6480 }
 0xcc4   :  { %s6483_s30 = spop %6482  ;;  %v2498_v6 = vstv %s6481_s24  ;;  %s8231_s24 = sld [smem:[#allocation18_spill]] }
 0xcc5   :  { %v2499_v14 = vadd.f32 %v2498_v6, %v2295_v47  ;;  %v2514_v48 = vstv %s6483_s30  ;;  %s6976_s30 = smov [#allocation2]  }
 0xcc6   :  { %v2515_v60 = vadd.f32 %v2514_v48, %v2311_v54 }
 0xccb   :  { %s6485_s20 = spop %6484 }
 0xccc   :  { %v2697_v49 = vstv %s6485_s20  ;;  %s6487_s15 = spop %6486  ;;  %s5637_s20 = sshll.u32 %s6976_s30, 4  ;;  %s5638_s20 = int_to_ptr.vmem [resolvable:$true] %s5637_s20 }
 0xccd   :  { %v2698_v53 = vadd.f32 %v2697_v49, %v2499_v14  ;;  %v2713_v57 = vstv %s6487_s15  ;;  %p6914_p1 = scmp.lt.s32.totalorder %s5638_s20, %s5638_s20 }
 0xcce   :  { %v2714_v62 = vadd.f32 %v2713_v57, %v2515_v60 }
 0xcd3   :  { %s6489_s16 = spop %6488 }
 0xcd4   :  { %v2896_v59 = vstv %s6489_s16  ;;  %s6491_s18 = spop %6490 }
 0xcd5   :  { %v2897_v45 = vadd.f32 %v2896_v59, %v2698_v53  ;;  %v2912_v61 = vstv %s6491_s18 }
 0xcd6   :  { %v2913_v8 = vadd.f32 %v2912_v61, %v2714_v62 }
 0xcd7   :  { %v2914_v51 = vmul.f32 %v2897_v45, %v2897_v45 }
 0xcd9   :  { %v2915_v63 = vmul.f32 0.0078125, %v2914_v51 }
 0xcdb   :  { %v2916_v10 = vsub.f32 %v2913_v8, %v2915_v63 }
 0xcdd   :  { %v2917_v11 = vmul.f32 0.007874016, %v2916_v10 }
 0xcdf   :  { %v2918_v12 = vmax.f32 %v2917_v11, 1e-12 }
 0xce1   :  { %6759 = vrcp.f32 %v2918_v12 }
 0xceb   :  { %v6760_v15 = vpop.eup %6759 }
 0xcec   :  { %v2920_v18 = vmul.f32 -0.5, %v6760_v15 }
 0xcee   :  { %v2921_v19 = vmul.f32 %v2920_v18, %v7623_v36  ;;  %v2922_v20 = vmul.f32 %v2920_v18, %v7625_v16  ;;  %v3039_v22 = vmul.f32 %v2920_v18, %v7650_v28  ;;  %v3040_v25 = vmul.f32 %v2920_v18, %v7652_v30 }
 0xcef   :  { %v3158_v23 = vmul.f32 %v2920_v18, %v7663_v50  ;;  %v3159_v24 = vmul.f32 %v2920_v18, %v7665_v52  ;;  %v3277_v36 = vmul.f32 %v2920_v18, %v7685_v31  ;;  %v3278_v16 = vmul.f32 %v2920_v18, %v7687_v33 }
 0xcf0   :  { %v2923_v26 = vmul.f32 1.442695, %v2921_v19  ;;  %v2925_v27 = vmul.f32 1.442695, %v2922_v20  ;;  %v3041_v17 = vmul.f32 1.442695, %v3039_v22 }
 0xcf1   :  { %v3043_v34 = vmul.f32 1.442695, %v3040_v25  ;;  %v3160_v35 = vmul.f32 1.442695, %v3158_v23  ;;  %v3162_v29 = vmul.f32 1.442695, %v3159_v24 }
 0xcf2   :  { %6761 = vpow2.f32 %v2923_v26  ;;  %v3279_v28 = vmul.f32 1.442695, %v3277_v36  ;;  %v3281_v30 = vmul.f32 1.442695, %v3278_v16 }
 0xcf3   :  { %6763 = vpow2.f32 %v2925_v27 }
 0xcf4   :  { %6765 = vpow2.f32 %v3041_v17 }
 0xcf5   :  { %6767 = vpow2.f32 %v3043_v34 }
 0xcf6   :  { %6769 = vpow2.f32 %v3160_v35 }
 0xcf7   :  { %6771 = vpow2.f32 %v3162_v29 }
 0xcf8   :  { %6773 = vpow2.f32 %v3279_v28 }
 0xcf9   :  { %6775 = vpow2.f32 %v3281_v30 }
 0xcfc   :  { %v6762_v50 = vpop.eup %6761 }
 0xcfd   :  { %v6764_v52 = vpop.eup %6763  ;;  %v2927_v32 = vsub.f32 1.0, %v6762_v50 }
 0xcfe   :  { %v6766_v37 = vpop.eup %6765  ;;  %v2928_v38 = vsub.f32 1.0, %v6764_v52 }
 0xcff   :  { %v6768_v39 = vpop.eup %6767  ;;  %v2929_v40 = vmul.f32 4.0, %v2927_v32  ;;  %v3045_v41 = vsub.f32 1.0, %v6766_v37 }
 0xd00   :  { %v6770_v42 = vpop.eup %6769  ;;  %v2930_v43 = vmul.f32 4.0, %v2928_v38  ;;  %v3046_v44 = vsub.f32 1.0, %v6768_v39 }
 0xd01   :  { %v6772_v3 = vpop.eup %6771  ;;  %v2931_v31 = vmul.f32 1.442695, %v2929_v40  ;;  %v3047_v6 = vmul.f32 4.0, %v3045_v41  ;;  %v3164_v14 = vsub.f32 1.0, %v6770_v42 }
 0xd02   :  { %v2933_v47 = vmul.f32 1.442695, %v2930_v43  ;;  %v3048_v33 = vmul.f32 4.0, %v3046_v44  ;;  %v3165_v53 = vsub.f32 1.0, %v6772_v3  ;;  %v6774_v57 = vpop.eup %6773 }
 0xd03   :  { %6777 = vpow2.f32 %v2931_v31  ;;  %v3049_v49 = vmul.f32 1.442695, %v3047_v6  ;;  %v3166_v54 = vmul.f32 4.0, %v3164_v14  ;;  %v6776_v60 = vpop.eup %6775  ;;  %v3283_v61 = vsub.f32 1.0, %v6774_v57 }
 0xd04   :  { %6779 = vpow2.f32 %v2933_v47  ;;  %v3051_v48 = vmul.f32 1.442695, %v3048_v33  ;;  %v3167_v59 = vmul.f32 4.0, %v3165_v53  ;;  %v3284_v51 = vsub.f32 1.0, %v6776_v60 }
 0xd05   :  { %6781 = vpow2.f32 %v3049_v49  ;;  %v3168_v45 = vmul.f32 1.442695, %v3166_v54  ;;  %v3285_v12 = vmul.f32 4.0, %v3283_v61 }
 0xd06   :  { %6783 = vpow2.f32 %v3051_v48  ;;  %v3170_v62 = vmul.f32 1.442695, %v3167_v59  ;;  %v3286_v15 = vmul.f32 4.0, %v3284_v51 }
 0xd07   :  { %6785 = vpow2.f32 %v3168_v45  ;;  %v3287_v22 = vmul.f32 1.442695, %v3285_v12 }
 0xd08   :  { %6787 = vpow2.f32 %v3170_v62  ;;  %v3289_v25 = vmul.f32 1.442695, %v3286_v15 }
 0xd09   :  { %6789 = vpow2.f32 %v3287_v22 }
 0xd0a   :  { %6791 = vpow2.f32 %v3289_v25 }
 0xd0d   :  { %v6778_v63 = vpop.eup %6777 }
 0xd0e   :  { %v6780_v8 = vpop.eup %6779  ;;  %v2935_v10 = vmul.f32 %v6778_v63, %v7280_v0 }
 0xd0f   :  { %v2936_v11 = vmul.f32 %v6780_v8, %v7282_v2  ;;  %v6782_v18 = vpop.eup %6781 }
 0xd10   :  { %v6784_v20 = vpop.eup %6783  ;;  %v3053_v23 = vmul.f32 %v6782_v18, %v7280_v0 }
 0xd11   :  { %v2937_v19 = vpack.c.bf16 %v2936_v11, %v2935_v10  ;;  %v3054_v24 = vmul.f32 %v6784_v20, %v7282_v2 }
 0xd13   :  { %6189 = vmatmul.mubr.msk.bf16.vlgmr.msra.gmra.mrb[60].mxu1 %vm163_vm1, %v2937_v19  ;;  %6195 = vmatmul.mubr.msk.bf16.vlgmr.msra.gmra.mrb[44].mxu0 %vm163_vm1, %v2937_v19  ;;  %v3055_v26 = vpack.c.bf16 %v3054_v24, %v3053_v23 }
 0xd14   :  { %6199 = vmatpush3.bf16.msra.mxu1 %v7567_v21  ;;  %6205 = vmatpush3.bf16.msra.mxu0 %v6974_v7  ;;  %v6786_v21 = vpop.eup %6785 }
 0xd15   :  { %6200 = vmatprep.mubr.msk.bf16.mxu1 %vm6967_vm0, %v6966_v1  ;;  %6206 = vmatprep.mubr.msk.bf16.mxu0 %vm6967_vm0, %v6966_v1  ;;  %v6788_v27 = vpop.eup %6787  ;;  %v3172_v17 = vmul.f32 %v6786_v21, %v7280_v0 }
 0xd16   :  { %6210 = vmatprep.subr.bf16.mxu1 %v6966_v1  ;;  %6216 = vmatprep.subr.bf16.mxu0 %v6966_v1  ;;  %v3173_v34 = vmul.f32 %v6788_v27, %v7282_v2  ;;  %v6790_v35 = vpop.eup %6789 }
 0xd17   :  { %v6792_v36 = vpop.eup %6791 }
 0xd18   :  { %v3174_v29 = vpack.c.bf16 %v3173_v34, %v3172_v17  ;;  %v3292_v16 = vmul.f32 %v6792_v36, %v7282_v2  ;;  %v6628_v36 = vld [vmem:[%s8220_s22 + $0x10] sm:$0xff]  }
 0xd1b   :  { %6201 = vmatmul.mubr.msk.bf16.vlgmr.msra.gmra.mrb[64].mxu1 %vm163_vm1, %v3055_v26  ;;  %6207 = vmatmul.mubr.msk.bf16.vlgmr.msra.gmra.mrb[48].mxu0 %vm163_vm1, %v3055_v26 }
 0xd1c   :  { %6211 = vmatpush3.bf16.msra.mxu1 %v7576_v56  ;;  %6217 = vmatpush3.bf16.msra.mxu0 %v6974_v7  ;;  %v3291_v56 = vmul.f32 %v6790_v35, %v7280_v0  ;;  %v6626_v35 = vld [vmem:[%s8220_s22] sm:$0xff]  }
 0xd1d   :  { %6212 = vmatprep.mubr.msk.bf16.mxu1 %vm6967_vm0, %v6966_v1  ;;  %6218 = vmatprep.mubr.msk.bf16.mxu0 %vm6967_vm0, %v6966_v1 }
 0xd1e   :  { %6222 = vmatprep.subr.bf16.mxu1 %v6966_v1  ;;  %6228 = vmatprep.subr.bf16.mxu0 %v6966_v1  ;;  %v3293_v28 = vpack.c.bf16 %v3292_v16, %v3291_v56  ;;  %v6629_v56 = vld [vmem:[%s8220_s22 + $0x18] sm:$0xff]   ;;  %v6630_v16 = vld [vmem:[%s8220_s22 + $0x20] sm:$0xff]  }
 0xd23   :  { %6213 = vmatmul.mubr.msk.bf16.vlgmr.msra.gmra.mrb[68].mxu1 %vm163_vm1, %v3174_v29  ;;  %6219 = vmatmul.mubr.msk.bf16.vlgmr.msra.gmra.mrb[52].mxu0 %vm163_vm1, %v3174_v29  ;;  %v6627_v29 = vld [vmem:[%s8220_s22 + $0x8] sm:$0xff]  }
 0xd24   :  { %6223 = vmatpush3.bf16.msra.mxu1 %v7582_v58  ;;  %6229 = vmatpush3.bf16.msra.mxu0 %v6974_v7 }
 0xd25   :  { %6224 = vmatprep.mubr.msk.bf16.mxu1 %vm6967_vm0, %v6966_v1  ;;  %6230 = vmatprep.mubr.msk.bf16.mxu0 %vm6967_vm0, %v6966_v1 }
 0xd26   :  { %6234 = vmatprep.subr.bf16.mxu1 %v6966_v1  ;;  %6254 = vmatprep.subr.bf16.mxu0 %v6966_v1 }
 0xd2b   :  { %6225 = vmatmul.mubr.msk.bf16.vlgmr.msra.gmra.mrb[72].mxu1 %vm163_vm1, %v3293_v28  ;;  %6231 = vmatmul.mubr.msk.bf16.vlgmr.msra.gmra.mrb[56].mxu0 %vm163_vm1, %v3293_v28 }
 0xd2c   :  { %6250 = vmatprep.mubr.msk.bf16.mxu1 %vm6967_vm0, %v6966_v1  ;;  %6258 = vmatprep.mubr.msk.bf16.mxu0 %vm6967_vm0, %v6966_v1 }
 0xd2d   :  { %6235 = vmatpush3.bf16.msra.mxu1 %v6626_v35 }
 0xd2e   :  { %6236 = vmatprep.subr.bf16.mxu1 %v6966_v1 }
 0xd31   :  { %6237 = vmatpush3.bf16.msra.mxu1 %v6627_v29 }
 0xd32   :  { %6238 = vmatprep.subr.bf16.mxu1 %v6966_v1 }
 0xd35   :  { %6239 = vmatpush3.bf16.msra.mxu1 %v6628_v36 }
 0xd36   :  { %6240 = vmatprep.subr.bf16.mxu1 %v6966_v1 }
 0xd39   :  { %6241 = vmatpush3.bf16.msra.mxu1 %v6629_v56 }
 0xd3a   :  { %6242 = vmatprep.subr.bf16.mxu1 %v6966_v1 }
 0xd3d   :  { %6243 = vmatpush3.bf16.msra.mxu1 %v6630_v16 }
 0xd3e   :  { %6244 = vmatprep.subr.bf16.mxu1 %v6966_v1 }
 0xde6   :  { %v7782_v58 = vpop.f32.mrb[60].mxu1  ;;  %v3016_v30 = vpop.f32.mrb[44].mxu0 }
 0xde7   :  { %v6190_v50 = vpop.f32.mrb[61].mxu1  ;;  %v6196_v52 = vpop.f32.mrb[45].mxu0  ;;  %v3023_v19 = vmax.f32 %v3016_v30, 1e-20 }
 0xde8   :  { %v7784_v32 = vpop.f32.mrb[62].mxu1  ;;  %v3019_v37 = vpop.f32.mrb[46].mxu0  ;;  %v6631_v52 = vld [vmem:[%s8220_s22 + $0x28] sm:$0xff]  }
 0xde9   :  { %v6191_v38 = vpop.f32.mrb[63].mxu1  ;;  %v6197_v39 = vpop.f32.mrb[47].mxu0  ;;  %v3024_v24 = vmax.f32 %v3019_v37, 1e-20  ;;  %6245 = vmatpush3.bf16.msra.mxu1 %v6631_v52 }
 0xdea   :  { %6246 = vmatprep.subr.bf16.mxu1 %v6966_v1  ;;  %v6632_v38 = vld [vmem:[%s8220_s22 + $0x30] sm:$0xff]  }
 0xded   :  { %6247 = vmatpush3.bf16.msra.mxu1 %v6632_v38 }
 0xdee   :  { %v7786_v40 = vpop.f32.mrb[64].mxu1  ;;  %v3135_v41 = vpop.f32.mrb[48].mxu0  ;;  %6248 = vmatprep.subr.bf16.mxu1 %v6966_v1 }
 0xdef   :  { %v3142_v42 = vmax.f32 %v3135_v41, 1e-20  ;;  %v6202_v43 = vpop.f32.mrb[65].mxu1  ;;  %v6208_v44 = vpop.f32.mrb[49].mxu0 }
 0xdf0   :  { %v7788_v3 = vpop.f32.mrb[66].mxu1  ;;  %v3138_v31 = vpop.f32.mrb[50].mxu0 }
 0xdf1   :  { %6793 = vrcp.f32 %v3142_v42  ;;  %v3143_v6 = vmax.f32 %v3138_v31, 1e-20  ;;  %v6203_v47 = vpop.f32.mrb[67].mxu1  ;;  %v6209_v33 = vpop.f32.mrb[51].mxu0 }
 0xdf3   :  { %6795 = vrcp.f32 %v3143_v6 }
 0xdf6   :  { %v7790_v49 = vpop.f32.mrb[68].mxu1  ;;  %v3254_v14 = vpop.f32.mrb[52].mxu0 }
 0xdf7   :  { %v3261_v48 = vmax.f32 %v3254_v14, 1e-20  ;;  %v6214_v53 = vpop.f32.mrb[69].mxu1  ;;  %v6220_v54 = vpop.f32.mrb[53].mxu0 }
 0xdf8   :  { %v7792_v57 = vpop.f32.mrb[70].mxu1  ;;  %v3257_v59 = vpop.f32.mrb[54].mxu0 }
 0xdf9   :  { %6797 = vrcp.f32 %v3261_v48  ;;  %v3262_v60 = vmax.f32 %v3257_v59, 1e-20  ;;  %v6215_v45 = vpop.f32.mrb[71].mxu1  ;;  %v6221_v61 = vpop.f32.mrb[55].mxu0 }
 0xdfb   :  { %v6794_v62 = vpop.eup %6793  ;;  %6799 = vrcp.f32 %v3262_v60 }
 0xdfc   :  { %3148 = vperm.xlu1 %6570, %v6794_v62   ;;  %v5763_v62 = vld [vmem:[%s8221_s23] ss:$0 sm:$0xff] }
 0xdfd   :  { %v6796_v51 = vpop.eup %6795 }
 0xdfe   :  { %v7794_v63 = vpop.f32.mrb[72].mxu1  ;;  %3153 = vperm.xlu0 %6569, %v6796_v51   ;;  %v3373_v8 = vpop.f32.mrb[56].mxu0 }
 0xdff   :  { %v3380_v10 = vmax.f32 %v3373_v8, 1e-20  ;;  %v6226_v11 = vpop.f32.mrb[73].mxu1  ;;  %v6232_v12 = vpop.f32.mrb[57].mxu0 }
 0xe00   :  { %v3335_v15 = vpop.f32.mrb[74].mxu1  ;;  %v3376_v18 = vpop.f32.mrb[58].mxu0 }
 0xe01   :  { %6801 = vrcp.f32 %v3380_v10  ;;  %v3381_v20 = vmax.f32 %v3376_v18, 1e-20  ;;  %v6227_v22 = vpop.f32.mrb[75].mxu1  ;;  %v6233_v25 = vpop.f32.mrb[59].mxu0 }
 0xe03   :  { %v6798_v23 = vpop.eup %6797  ;;  %6803 = vrcp.f32 %v3381_v20 }
 0xe04   :  { %3267 = vperm.xlu1 %6570, %v6798_v23   ;;  %6805 = vrcp.f32 %v3023_v19 }
 0xe05   :  { %v6800_v21 = vpop.eup %6799  ;;  %6807 = vrcp.f32 %v3024_v24 }
 0xe08   :  { %3272 = vperm.xlu1 %6570, %v6800_v21  }
 0xe0b   :  { %v6802_v26 = vpop.eup %6801 }
 0xe0c   :  { %3386 = vperm.xlu0 %6569, %v6802_v26  }
 0xe0d   :  { %v6804_v27 = vpop.eup %6803 }
 0xe0e   :  { %3391 = vperm.xlu1 %6570, %v6804_v27   ;;  %v6806_v17 = vpop.eup %6805 }
 0xe0f   :  { %v6808_v34 = vpop.eup %6807 }
 0xe10   :  { %3029 = vperm.xlu0 %6569, %v6806_v17  }
 0xe12   :  { %3034 = vperm.xlu1 %6570, %v6808_v34  }
 0xe7b   :  { %v3149_v28 = vpop.permute.xlu1 %3148 }
 0xe7c   :  { %v3156_v30 = vmul.f32 %v3149_v28, %v7786_v40  ;;  %v6633_v40 = vld [vmem:[%s8220_s22 + $0x38] sm:$0xff]  }
 0xe7d   :  { %v3154_v50 = vpop.permute.xlu0 %3153  ;;  %6249 = vmatpush3.bf16.msra.mxu1 %v6633_v40 }
 0xe7e   :  { %v3157_v37 = vmul.f32 %v3154_v50, %v7788_v3  ;;  %3398 = vrot.lane.b32.xlu0 %v3156_v30, %s6973_s13  ;;  %6444 = vmatprep.subr.bf16.mxu1 %v6969_v55 }
 0xe80   :  { %3400 = vrot.lane.b32.xlu1 %v3157_v37, %s6973_s13 }
 0xe83   :  { %v3268_v39 = vpop.permute.xlu1 %3267 }
 0xe84   :  { %v3275_v41 = vmul.f32 %v3268_v39, %v7790_v49 }
 0xe86   :  { %3406 = vrot.lane.b32.xlu0 %v3275_v41, %s6970_s0 }
 0xe87   :  { %v3273_v42 = vpop.permute.xlu1 %3272 }
 0xe88   :  { %v3276_v43 = vmul.f32 %v3273_v42, %v7792_v57 }
 0xe8a   :  { %3408 = vrot.lane.b32.xlu1 %v3276_v43, %s6970_s0 }
 0xe8b   :  { %v3387_v44 = vpop.permute.xlu0 %3386 }
 0xe8c   :  { %v3394_v3 = vmul.f32 %v3387_v44, %v7794_v63 }
 0xe8d   :  { %v3392_v31 = vpop.permute.xlu1 %3391 }
 0xe8e   :  { %v3395_v6 = vmul.f32 %v3392_v31, %v3335_v15  ;;  %3414 = vrot.lane.b32.xlu0 %v3394_v3, %s6971_s5  ;;  %v6635_v15 = vld [vmem:[%s8222_s26 + $0x8] sm:$0xff]  }
 0xe8f   :  { %v3030_v47 = vpop.permute.xlu0 %3029 }
 0xe90   :  { %3416 = vrot.lane.b32.xlu1 %v3395_v6, %s6971_s5  ;;  %v3037_v53 = vmul.f32 %v3030_v47, %v7782_v58 }
 0xe91   :  { %v3035_v33 = vpop.permute.xlu1 %3034 }
 0xe92   :  { %v3038_v57 = vmul.f32 %v3035_v33, %v7784_v32  ;;  %v6634_v32 = vld [vmem:[%s8222_s26] sm:$0xff]  }
 0xe93   :  { %6255 = vmatpush3.bf16.msra.mxu0 %v6634_v32 }
 0xe94   :  { %6256 = vmatprep.subr.bf16.mxu0 %v6966_v1 }
 0xe97   :  { %6257 = vmatpush3.bf16.msra.mxu0 %v6635_v15 }
 0xe98   :  { %6262 = vmatprep.subr.bf16.mxu0 %v6966_v1 }
 0xef0   :  { %v3399_v49 = vpop.permute.xlu0 %3398 }
 0xef1   :  { %v3420_v59 = vsel %vm210_vm2, %v3037_v53, %v3399_v49 }
 0xef2   :  { %v3401_v14 = vpop.permute.xlu1 %3400 }
 0xef3   :  { %v3421_v61 = vsel %vm210_vm2, %v3038_v57, %v3401_v14 }
 0xef8   :  { %v3407_v48 = vpop.permute.xlu0 %3406 }
 0xef9   :  { %v3422_v60 = vsel %vm1635_vm8, %v3420_v59, %v3407_v48 }
 0xefc   :  { %v3409_v54 = vpop.permute.xlu1 %3408 }
 0xefd   :  { %v3423_v63 = vsel %vm1635_vm8, %v3421_v61, %v3409_v54 }
 0xf00   :  { %v3415_v45 = vpop.permute.xlu0 %3414 }
 0xf01   :  { %v3424_v51 = vsel %vm1638_vm9, %v3422_v60, %v3415_v45 }
 0xf02   :  { %v3417_v8 = vpop.permute.xlu1 %3416  ;;  %v3433_v10 = vadd.f32 %v5763_v62, %v3424_v51 }
 0xf03   :  { %v3425_v58 = vsel %vm1638_vm9, %v3423_v63, %v3417_v8 }
 0xf04   :  { %v3434_v11 = vadd.f32 %v5763_v62, %v3425_v58 }
 0xf06   :  { %v3451_v12 = vpack.c.bf16 %v3434_v11, %v3433_v10 }
 0xf08   :  { %6251 = vmatmul.mubr.bf16.vlgmr.msra.gmra.mrb[76].mxu1 %v3451_v12 }
 0xf09   :  { %6280 = vmatprep.mubr.msk.f32.mxu1 %vm6967_vm0, %v6966_v1 }
 0xfdb   :  { %v3534_v18 = vpop.f32.mrb[76].mxu1 }
 0xfdc   :  { %v3543_v19 = vmul.f32 0.70710677, %v3534_v18  ;;  %v6252_v20 = vpop.f32.mrb[77].mxu1  ;;  %v3541_v10 = vmul.f32 0.5, %v3534_v18 }
 0xfdd   :  { %v3537_v22 = vpop.f32.mrb[78].mxu1  ;;  %v6636_v20 = vld [vmem:[%s8223_s28] sm:$0xff]  }
 0xfde   :  { %v3549_v25 = vand.u32 2147483647, %v3543_v19  ;;  %v3544_v23 = vmul.f32 0.70710677, %v3537_v22  ;;  %v6253_v24 = vpop.f32.mrb[79].mxu1  ;;  %vm3545_vm10 = vcmp.ge.f32.partialorder %v3543_v19, 0.0 }
 0xfdf   :  { %v3547_v45 = vsel %vm3545_vm10, 1.0, %v6975_v13  ;;  %v3542_v11 = vmul.f32 0.5, %v3537_v22 }
 0xfe0   :  { %v3551_v21 = vmul.f32 0.3275911, %v3549_v25  ;;  %v3550_v26 = vand.u32 2147483647, %v3544_v23  ;;  %v3577_v35 = vsub.f32 0.0, %v3549_v25  ;;  %vm3546_vm11 = vcmp.ge.f32.partialorder %v3544_v23, 0.0 }
 0xfe1   :  { %v3548_v63 = vsel %vm3546_vm11, 1.0, %v6975_v13  ;;  %v5772_v23 = vld [vmem:[%s8224_s1] ss:$0 sm:$0xff] }
 0xfe2   :  { %v3553_v27 = vadd.f32 1.0, %v3551_v21  ;;  %v3552_v17 = vmul.f32 0.3275911, %v3550_v26  ;;  %v3578_v29 = vsub.f32 0.0, %v3550_v26  ;;  %v3579_v56 = vmul.f32 %v3577_v35, %v3549_v25  ;;  %v6637_v25 = vld [vmem:[%s8223_s28 + $0x8] sm:$0xff]  }
 0xfe4   :  { %6809 = vrcp.f32 %v3553_v27  ;;  %v3554_v34 = vadd.f32 1.0, %v3552_v17  ;;  %v3580_v50 = vmul.f32 %v3578_v29, %v3550_v26  ;;  %v3581_v52 = vmul.f32 1.442695, %v3579_v56 }
 0xfe6   :  { %6811 = vrcp.f32 %v3554_v34  ;;  %v3583_v40 = vmul.f32 1.442695, %v3580_v50 }
 0xfe7   :  { %6813 = vpow2.f32 %v3581_v52 }
 0xfe8   :  { %6815 = vpow2.f32 %v3583_v40 }
 0xfee   :  { %v6810_v36 = vpop.eup %6809 }
 0xfef   :  { %v3559_v16 = vmul.f32 1.0614054, %v6810_v36 }
 0xff0   :  { %v6812_v28 = vpop.eup %6811 }
 0xff1   :  { %v3561_v30 = vadd.f32 -1.4531521, %v3559_v16  ;;  %v3560_v37 = vmul.f32 1.0614054, %v6812_v28  ;;  %v6814_v48 = vpop.eup %6813 }
 0xff2   :  { %v6816_v59 = vpop.eup %6815 }
 0xff3   :  { %v3563_v38 = vmul.f32 %v6810_v36, %v3561_v30  ;;  %v3562_v39 = vadd.f32 -1.4531521, %v3560_v37 }
 0xff5   :  { %v3565_v41 = vadd.f32 1.4214138, %v3563_v38  ;;  %v3564_v42 = vmul.f32 %v6812_v28, %v3562_v39 }
 0xff7   :  { %v3567_v43 = vmul.f32 %v6810_v36, %v3565_v41  ;;  %v3566_v44 = vadd.f32 1.4214138, %v3564_v42 }
 0xff9   :  { %v3569_v3 = vadd.f32 -0.28449672, %v3567_v43  ;;  %v3568_v31 = vmul.f32 %v6812_v28, %v3566_v44 }
 0xffb   :  { %v3571_v6 = vmul.f32 %v6810_v36, %v3569_v3  ;;  %v3570_v47 = vadd.f32 -0.28449672, %v3568_v31 }
 0xffd   :  { %v3573_v33 = vadd.f32 0.2548296, %v3571_v6  ;;  %v3572_v49 = vmul.f32 %v6812_v28, %v3570_v47 }
 0xfff   :  { %v3575_v14 = vmul.f32 %v6810_v36, %v3573_v33  ;;  %v3574_v53 = vadd.f32 0.2548296, %v3572_v49 }
0x1001   :  { %v3585_v54 = vmul.f32 %v6814_v48, %v3575_v14  ;;  %v3576_v57 = vmul.f32 %v6812_v28, %v3574_v53 }
0x1003   :  { %v3587_v60 = vsub.f32 1.0, %v3585_v54  ;;  %v3586_v61 = vmul.f32 %v6816_v59, %v3576_v57 }
0x1005   :  { %v3589_v62 = vmul.f32 %v3587_v60, %v3547_v45  ;;  %v3588_v51 = vsub.f32 1.0, %v3586_v61 }
0x1007   :  { %v3591_v8 = vadd.f32 1.0, %v3589_v62  ;;  %v3590_v58 = vmul.f32 %v3588_v51, %v3548_v63 }
0x1009   :  { %v3592_v12 = vadd.f32 1.0, %v3590_v58  ;;  %v3593_v32 = vmul.f32 %v3591_v8, %v3541_v10 }
0x100b   :  { %v3594_v15 = vmul.f32 %v3592_v12, %v3542_v11 }
0x100d   :  { %v3599_v19 = vpack.c.bf16 %v3594_v15, %v3593_v32 }
0x100f   :  { %6259 = vmatmul.mubr.msk.bf16.vlgmr.msra.gmra.mrb[60].mxu0 %vm210_vm2, %v3599_v19 }
0x1010   :  { %6266 = vmatprep.mubr.msk.bf16.mxu0 %vm6967_vm0, %v6966_v1  ;;  %6263 = vmatpush3.bf16.msra.mxu0 %v6636_v20 }
0x1011   :  { %6264 = vmatprep.subr.bf16.mxu0 %v6966_v1 }
0x1014   :  { %6265 = vmatpush3.bf16.msra.mxu0 %v6637_v25 }
0x10e2   :  { %v3656_v24 = vpop.f32.mrb[60].mxu0 }
0x10e3   :  { %v3657_v21 = vadd.f32 %v5772_v23, %v3656_v24  ;;  %v6260_v18 = vpop.f32.mrb[61].mxu0 }
0x10e4   :  { %v3659_v22 = vpop.f32.mrb[62].mxu0 }
0x10e5   :  { %v3665_v26 = vmul.f32 0.70710677, %v3657_v21  ;;  %v3660_v27 = vadd.f32 %v5772_v23, %v3659_v22  ;;  %v6261_v17 = vpop.f32.mrb[63].mxu0  ;;  %v3663_v20 = vmul.f32 0.5, %v3657_v21  ;;  %v5776_v21 = vld [vmem:[%s8226_s9] ss:$0 sm:$0xff] }
0x10e6   :  { %v6638_v17 = vld [vmem:[%s8225_s2] ss:$8 sps:$4 sm:$0xff]  }
0x10e7   :  { %v3671_v34 = vand.u32 2147483647, %v3665_v26  ;;  %v3666_v35 = vmul.f32 0.70710677, %v3660_v27  ;;  %vm3667_vm12 = vcmp.ge.f32.partialorder %v3665_v26, 0.0  ;;  %v3664_v25 = vmul.f32 0.5, %v3660_v27 }
0x10e8   :  { %v3669_v58 = vsel %vm3667_vm12, 1.0, %v6975_v13  ;;  %v6640_v26 = vld [vmem:[%s8225_s2 + $0x4] ss:$8 sps:$4 sm:$0xff]  }
0x10e9   :  { %v3673_v29 = vmul.f32 0.3275911, %v3671_v34  ;;  %v3672_v36 = vand.u32 2147483647, %v3666_v35  ;;  %v3699_v30 = vsub.f32 0.0, %v3671_v34  ;;  %vm3668_vm13 = vcmp.ge.f32.partialorder %v3666_v35, 0.0  ;;  %3862 = vmatprep.subr.bf16.mxu0 %v6640_v26 }
0x10ea   :  { %v3670_v32 = vsel %vm3668_vm13, 1.0, %v6975_v13  ;;  %v6641_v35 = vld [vmem:[%s8225_s2 + $0x10] ss:$8 sps:$4 sm:$0xff]  }
0x10eb   :  { %v3675_v56 = vadd.f32 1.0, %v3673_v29  ;;  %v3674_v16 = vmul.f32 0.3275911, %v3672_v36  ;;  %v3700_v50 = vsub.f32 0.0, %v3672_v36  ;;  %v3701_v37 = vmul.f32 %v3699_v30, %v3671_v34  ;;  %v6643_v34 = vld [vmem:[%s8225_s2 + $0x14] ss:$8 sps:$4 sm:$0xff]  }
0x10ed   :  { %6817 = vrcp.f32 %v3675_v56  ;;  %v3676_v28 = vadd.f32 1.0, %v3674_v16  ;;  %v3702_v40 = vmul.f32 %v3700_v50, %v3672_v36  ;;  %v3703_v42 = vmul.f32 1.442695, %v3701_v37 }
0x10ef   :  { %6819 = vrcp.f32 %v3676_v28  ;;  %v3705_v6 = vmul.f32 1.442695, %v3702_v40 }
0x10f0   :  { %6821 = vpow2.f32 %v3703_v42 }
0x10f1   :  { %6823 = vpow2.f32 %v3705_v6 }
0x10f7   :  { %v6818_v52 = vpop.eup %6817 }
0x10f8   :  { %v3681_v38 = vmul.f32 1.0614054, %v6818_v52 }
0x10f9   :  { %v6820_v39 = vpop.eup %6819 }
0x10fa   :  { %v3683_v41 = vadd.f32 -1.4531521, %v3681_v38  ;;  %v3682_v43 = vmul.f32 1.0614054, %v6820_v39  ;;  %v6822_v45 = vpop.eup %6821 }
0x10fb   :  { %v6824_v63 = vpop.eup %6823 }
0x10fc   :  { %v3685_v44 = vmul.f32 %v6818_v52, %v3683_v41  ;;  %v3684_v3 = vadd.f32 -1.4531521, %v3682_v43 }
0x10fe   :  { %v3687_v31 = vadd.f32 1.4214138, %v3685_v44  ;;  %v3686_v47 = vmul.f32 %v6820_v39, %v3684_v3 }
0x1100   :  { %v3689_v33 = vmul.f32 %v6818_v52, %v3687_v31  ;;  %v3688_v49 = vadd.f32 1.4214138, %v3686_v47 }
0x1102   :  { %v3691_v14 = vadd.f32 -0.28449672, %v3689_v33  ;;  %v3690_v48 = vmul.f32 %v6820_v39, %v3688_v49 }
0x1104   :  { %v3693_v53 = vmul.f32 %v6818_v52, %v3691_v14  ;;  %v3692_v54 = vadd.f32 -0.28449672, %v3690_v48 }
0x1106   :  { %v3695_v57 = vadd.f32 0.2548296, %v3693_v53  ;;  %v3694_v59 = vmul.f32 %v6820_v39, %v3692_v54 }
0x1108   :  { %v3697_v60 = vmul.f32 %v6818_v52, %v3695_v57  ;;  %v3696_v61 = vadd.f32 0.2548296, %v3694_v59 }
0x110a   :  { %v3707_v62 = vmul.f32 %v6822_v45, %v3697_v60  ;;  %v3698_v51 = vmul.f32 %v6820_v39, %v3696_v61 }
0x110c   :  { %v3709_v8 = vsub.f32 1.0, %v3707_v62  ;;  %v3708_v10 = vmul.f32 %v6824_v63, %v3698_v51  ;;  %v5780_v63 = vld [vmem:[%s8227_s17] ss:$0 sm:$0xff] }
0x110e   :  { %v3711_v11 = vmul.f32 %v3709_v8, %v3669_v58  ;;  %v3710_v12 = vsub.f32 1.0, %v3708_v10  ;;  %v5781_v10 = vld [vmem:[%s8228_s21] ss:$0 sm:$0xff] }
0x1110   :  { %v3713_v15 = vadd.f32 1.0, %v3711_v11  ;;  %v3712_v19 = vmul.f32 %v3710_v12, %v3670_v32 }
0x1112   :  { %v3714_v23 = vadd.f32 1.0, %v3712_v19  ;;  %v3715_v24 = vmul.f32 %v3713_v15, %v3663_v20 }
0x1114   :  { %v3716_v18 = vmul.f32 %v3714_v23, %v3664_v25 }
0x1116   :  { %v3721_v22 = vpack.c.bf16 %v3716_v18, %v3715_v24 }
0x1118   :  { %6267 = vmatmul.mubr.msk.bf16.vlgmr.msra.gmra.mrb[64].mxu0 %vm210_vm2, %v3721_v22 }
0x1119   :  { %3894 = vmatprep.mubr.bf16.mxu0 %v6968_v9  ;;  %3863 = vmatpush1.bf16.msra.mxu0 %v6638_v17 }
0x111a   :  { %3864 = vmatprep.subr.bf16.mxu0 %v6643_v34 }
0x111d   :  { %3865 = vmatpush1.bf16.msra.mxu0 %v6641_v35 }
0x111e   :  { %6270 = vmatprep.subr.bf16.mxu0 %v6966_v1 }
0x11eb   :  { %v3778_v27 = vpop.f32.mrb[64].mxu0 }
0x11ec   :  { %v3779_v29 = vadd.f32 %v5776_v21, %v3778_v27  ;;  %v6268_v36 = vpop.f32.mrb[65].mxu0 }
0x11ed   :  { %v3781_v56 = vpop.f32.mrb[66].mxu0 }
0x11ee   :  { %v3797_v16 = vmul.f32 %v3779_v29, %v3779_v29  ;;  %v3782_v28 = vadd.f32 %v5776_v21, %v3781_v56  ;;  %v6269_v30 = vpop.f32.mrb[67].mxu0  ;;  %v3787_v9 = vsel %vm210_vm2, %v3779_v29, 0.0 }
0x11f0   :  { %v3788_v50 = vsel %vm210_vm2, %v3782_v28, 0.0  ;;  %v3798_v52 = vmul.f32 %v3782_v28, %v3782_v28  ;;  %v3799_v38 = vsel %vm210_vm2, %v3797_v16, 0.0 }
0x11f1   :  { %v3789_v37 = vadd.f32 %v3788_v50, %v3787_v9 }
0x11f2   :  { %v3800_v39 = vsel %vm210_vm2, %v3798_v52, 0.0 }
0x11f3   :  { %v3790_v41 = vrot.slane %v3789_v37, 4  ;;  %v3801_v40 = vadd.f32 %v3800_v39, %v3799_v38 }
0x11f5   :  { %v3791_v42 = vadd.f32 %v3790_v41, %v3789_v37  ;;  %v3802_v43 = vrot.slane %v3801_v40, 4 }
0x11f7   :  { %v3792_v44 = vrot.slane %v3791_v42, 2  ;;  %v3803_v3 = vadd.f32 %v3802_v43, %v3801_v40 }
0x11f9   :  { %v3793_v31 = vadd.f32 %v3792_v44, %v3791_v42  ;;  %v3804_v6 = vrot.slane %v3803_v3, 2 }
0x11fb   :  { %v3794_v47 = vrot.slane %v3793_v31, 1  ;;  %v3805_v33 = vadd.f32 %v3804_v6, %v3803_v3 }
0x11fd   :  { %v3795_v49 = vadd.f32 %v3794_v47, %v3793_v31  ;;  %v3806_v14 = vrot.slane %v3805_v33, 1 }
0x11ff   :  { %v3796_v48 = vmul.f32 0.0625, %v3795_v49  ;;  %v3807_v53 = vadd.f32 %v3806_v14, %v3805_v33 }
0x1201   :  { %v3808_v54 = vmul.f32 0.0625, %v3807_v53  ;;  %v3809_v57 = vmul.f32 %v3796_v48, %v3796_v48  ;;  %v3812_v59 = vsub.f32 %v3779_v29, %v3796_v48  ;;  %v3813_v60 = vsub.f32 %v3782_v28, %v3796_v48 }
0x1203   :  { %v3810_v45 = vsub.f32 %v3808_v54, %v3809_v57 }
0x1205   :  { %v3811_v61 = vmax.f32 %v3810_v45, 0.0 }
0x1207   :  { %v3814_v62 = vadd.f32 1e-05, %v3811_v61 }
0x1209   :  { %6825 = vrsqrt.f32 %v3814_v62 }
0x1213   :  { %v6826_v51 = vpop.eup %6825 }
0x1214   :  { %v3816_v8 = vmul.f32 %v6826_v51, %v3812_v59  ;;  %v3817_v58 = vmul.f32 %v6826_v51, %v3813_v60 }
0x1216   :  { %v3824_v11 = vmul.f32 %v5780_v63, %v3816_v8  ;;  %v3825_v12 = vmul.f32 %v5780_v63, %v3817_v58 }
0x1218   :  { %v3832_v32 = vadd.f32 %v5781_v10, %v3824_v11  ;;  %v3833_v15 = vadd.f32 %v5781_v10, %v3825_v12 }
0x121a   :  { %v3838_v19 = vpack.c.bf16 %v3833_v15, %v3832_v32 }
0x121c   :  { %5786 = vmatmul.mubr.msk.bf16.vlgmr.msra.gmra.mrb[68].mxu0 %vm210_vm2, %v3838_v19 }
0x121d   :  { %6272 = vmatprep.mubr.msk.bf16.mxu0 %vm6967_vm0, %v6966_v1 }
0x12ef   :  { %v3896_v20 = vpop.f32.mrb[68].mxu0 }
0x12f0   :  { %v3898_v25 = vpop.f32.mrb[69].mxu0  ;;  %v3962_v24 = vmul.f32 %v3896_v20, %v3896_v20 }
0x12f1   :  { %v3900_v23 = vpop.f32.mrb[70].mxu0  ;;  %v3954_v27 = vmul.f32 %v3898_v25, %v3898_v25 }
0x12f2   :  { %v7866_v18 = vpack.c.bf16 %v3900_v23, %v3896_v20  ;;  %v3963_v22 = vmul.f32 %v3900_v23, %v3900_v23  ;;  %v3902_v26 = vpop.f32.mrb[71].mxu0 }
0x12f3   :  { %v3905_v17 = vpack.c.bf16 %v3902_v26, %v3898_v25  ;;  %v3955_v29 = vmul.f32 %v3902_v26, %v3902_v26  ;;  %v3956_v36 = vsel %vm210_vm2, %v3954_v27, 0.0 }
0x12f4   :  { %v6445_v34 = vpack.c.bf16 %v3963_v22, %v3962_v24  ;;  %4102 = vrot.lane.b32.xlu1 %v7866_v18, %s6971_s5  ;;  %v3911_v35 = vsel %vm210_vm2, %v7866_v18, 0  ;;  %v6586_v21 = vpack.i.bf16 %v3963_v22, %v3962_v24 }
0x12f5   :  { %6271 = vmatpush3.bf16.xpose.msra.mxu0 %v3911_v35  ;;  %v3959_v56 = vsel %vm210_vm2, %v3955_v29, 0.0 }
0x12f6   :  { %6587 = vrot.lane.b32.xlu0 %v6586_v21, %s6971_s5  ;;  %6447 = vmatpush3.bf16.xpose.msk.msra.mxu1 %vm7188_vm3, %v6445_v34 }
0x12f7   :  { %6283 = vmatprep.subr.bf16.mxu0 %v6966_v1  ;;  %6448 = vmatprep.subr.bf16.mxu1 %v6969_v55 }
0x12f8   :  { %4099 = vrot.lane.b32.xlu1 %v3905_v17, %s6971_s5 }
0x12fa   :  { %6592 = vrot.lane.b32.xlu0 %v6586_v21, %s6970_s0 }
0x12fc   :  { %6597 = vrot.lane.b32.xlu1 %v6586_v21, %s6973_s13  ;;  %6273 = vmatmul.mubr.msk.bf16.vlgmr.msra.gmra.mrb[72].mxu0 %vm210_vm2, %v3905_v17 }
0x12fd   :  { %6281 = vmatmul.mubr.msk.f32.vlgmr.msra.gmra.mrb[80].mxu1 %vm210_vm2, %v6972_v5  ;;  %6285 = vmatprep.mubr.msk.bf16.mxu0 %vm6967_vm0, %v6966_v1 }
0x12fe   :  { %4303 = vrot.lane.b32.xlu0 %v7866_v18, %s6970_s0  ;;  %6293 = vmatprep.mubr.msk.f32.mxu1 %vm6967_vm0, %v6966_v1 }
0x1300   :  { %4502 = vrot.lane.b32.xlu1 %v7866_v18, %s6973_s13 }
0x1302   :  { %4301 = vrot.lane.b32.xlu0 %v3905_v17, %s6970_s0 }
0x1304   :  { %4153 = vrot.lane.b32.xlu1 %v3954_v27, %s6971_s5 }
0x1306   :  { %4500 = vrot.lane.b32.xlu0 %v3905_v17, %s6973_s13 }
0x1308   :  { %4352 = vrot.lane.b32.xlu1 %v3954_v27, %s6970_s0 }
0x130a   :  { %4155 = vrot.lane.b32.xlu0 %v3955_v29, %s6971_s5 }
0x130c   :  { %4551 = vrot.lane.b32.xlu1 %v3954_v27, %s6973_s13 }
0x130e   :  { %4354 = vrot.lane.b32.xlu0 %v3955_v29, %s6970_s0 }
0x1312   :  { %4553 = vrot.lane.b32.xlu0 %v3955_v29, %s6973_s13 }
0x1330   :  { %3957 = vadd.xlane.f32.xlu1 %v3956_v36 }
0x1331   :  { %3960 = vadd.xlane.f32.xlu0 %v3959_v56 }
0x1366   :  { %v7901_v16 = vpop.permute.xlu1 %4102 }
0x1367   :  { %v4108_v28 = vsel %vm210_vm2, %v7901_v16, 0 }
0x1368   :  { %v6588_v30 = vpop.permute.xlu0 %6587  ;;  %6284 = vmatpush3.bf16.xpose.msra.mxu0 %v4108_v28 }
0x1369   :  { %v6590_v9 = vunpack.i.h.bf16 %v6588_v30  ;;  %v6589_v50 = vunpack.i.l.bf16 %v6588_v30  ;;  %6296 = vmatprep.subr.bf16.mxu0 %v6966_v1 }
0x136a   :  { %v4100_v52 = vpop.permute.xlu1 %4099 }
0x136b   :  { %v6449_v37 = vpack.c.bf16 %v6590_v9, %v6589_v50 }
0x136c   :  { %v6593_v38 = vpop.permute.xlu0 %6592 }
0x136d   :  { %6451 = vmatpush3.bf16.xpose.msk.msra.mxu1 %vm7188_vm3, %v6449_v37  ;;  %v6595_v41 = vunpack.i.h.bf16 %v6593_v38  ;;  %v6594_v40 = vunpack.i.l.bf16 %v6593_v38 }
0x136e   :  { %v6598_v39 = vpop.permute.xlu1 %6597  ;;  %6452 = vmatprep.subr.bf16.mxu1 %v6969_v55 }
0x136f   :  { %6286 = vmatmul.mubr.msk.bf16.vlgmr.msra.gmra.mrb[76].mxu0 %vm210_vm2, %v4100_v52  ;;  %v6453_v3 = vpack.c.bf16 %v6595_v41, %v6594_v40  ;;  %v6600_v47 = vunpack.i.h.bf16 %v6598_v39  ;;  %v6599_v33 = vunpack.i.l.bf16 %v6598_v39 }
0x1370   :  { %v7910_v42 = vpop.permute.xlu0 %4303  ;;  %6298 = vmatprep.mubr.msk.bf16.mxu0 %vm6967_vm0, %v6966_v1 }
0x1371   :  { %v4309_v43 = vsel %vm210_vm2, %v7910_v42, 0  ;;  %v6457_v54 = vpack.c.bf16 %v6600_v47, %v6599_v33 }
0x1372   :  { %v7916_v44 = vpop.permute.xlu1 %4502  ;;  %6297 = vmatpush3.bf16.xpose.msra.mxu0 %v4309_v43 }
0x1373   :  { %6309 = vmatprep.subr.bf16.mxu0 %v6966_v1  ;;  %v4508_v48 = vsel %vm210_vm2, %v7916_v44, 0 }
0x1374   :  { %6294 = vmatmul.mubr.msk.f32.vlgmr.msra.gmra.mrb[82].mxu1 %vm210_vm2, %v6972_v5  ;;  %v4302_v31 = vpop.permute.xlu0 %4301 }
0x1375   :  { %6455 = vmatpush3.bf16.xpose.msk.msra.mxu1 %vm7188_vm3, %v6453_v3  ;;  %6306 = vmatprep.mubr.msk.f32.mxu1 %vm6967_vm0, %v6966_v1 }
0x1376   :  { %v4154_v6 = vpop.permute.xlu1 %4153  ;;  %6456 = vmatprep.subr.bf16.mxu1 %v6969_v55 }
0x1377   :  { %v4159_v49 = vsel %vm210_vm2, %v4154_v6, 0.0 }
0x1378   :  { %v4501_v14 = vpop.permute.xlu0 %4500  ;;  %4160 = vadd.xlane.f32.xlu0 %v4159_v49 }
0x1379   :  { %6299 = vmatmul.mubr.msk.bf16.vlgmr.msra.gmra.mrb[80].mxu0 %vm210_vm2, %v4302_v31 }
0x137a   :  { %v4353_v53 = vpop.permute.xlu1 %4352  ;;  %6310 = vmatpush3.bf16.xpose.msra.mxu0 %v4508_v48  ;;  %6311 = vmatprep.mubr.msk.bf16.mxu0 %vm6967_vm0, %v6966_v1 }
0x137b   :  { %v4358_v57 = vsel %vm210_vm2, %v4353_v53, 0.0  ;;  %6322 = vmatprep.subr.bf16.mxu0 %v6966_v1 }
0x137c   :  { %6307 = vmatmul.mubr.msk.f32.vlgmr.msra.gmra.mrb[84].mxu1 %vm210_vm2, %v6972_v5  ;;  %v4156_v55 = vpop.permute.xlu0 %4155  ;;  %4359 = vadd.xlane.f32.xlu0 %v4358_v57 }
0x137d   :  { %v4162_v59 = vsel %vm210_vm2, %v4156_v55, 0.0  ;;  %6459 = vmatpush3.bf16.xpose.msk.msra.mxu1 %vm7188_vm3, %v6457_v54  ;;  %6319 = vmatprep.mubr.msk.f32.mxu1 %vm6967_vm0, %v6966_v1 }
0x137e   :  { %4163 = vadd.xlane.f32.xlu1 %v4162_v59  ;;  %v4552_v60 = vpop.permute.xlu1 %4551  ;;  %6328 = vmatprep.subr.bf16.mxu1 %v6966_v1 }
0x137f   :  { %v4557_v45 = vsel %vm210_vm2, %v4552_v60, 0.0 }
0x1380   :  { %v4355_v61 = vpop.permute.xlu0 %4354  ;;  %4558 = vadd.xlane.f32.xlu0 %v4557_v45 }
0x1381   :  { %v4361_v62 = vsel %vm210_vm2, %v4355_v61, 0.0  ;;  %6312 = vmatmul.mubr.msk.bf16.vlgmr.msra.gmra.mrb[84].mxu0 %vm210_vm2, %v4501_v14 }
0x1382   :  { %4362 = vadd.xlane.f32.xlu1 %v4361_v62  ;;  %6323 = vmatpush3.bf16.msra.mxu0 %v7866_v18 }
0x1383   :  { %6324 = vmatprep.mubr.msk.bf16.mxu0 %vm6967_vm0, %v6966_v1  ;;  %6334 = vmatprep.subr.bf16.mxu0 %v6966_v1 }
0x1384   :  { %v4554_v4 = vpop.permute.xlu0 %4553  ;;  %6320 = vmatmul.mubr.msk.f32.vlgmr.msra.gmra.mrb[86].mxu1 %vm210_vm2, %v6972_v5 }
0x1385   :  { %v4560_v51 = vsel %vm210_vm2, %v4554_v4, 0.0  ;;  %6329 = vmatpush3.bf16.msra.mxu1 %v6974_v7  ;;  %6330 = vmatprep.mubr.msk.bf16.mxu1 %vm6967_vm0, %v6966_v1 }
0x1386   :  { %4561 = vadd.xlane.f32.xlu1 %v4560_v51  ;;  %6340 = vmatprep.subr.bf16.mxu1 %v6966_v1 }
0x13bd   :  { %v3958_v63 = vpop.xlane.xlu1 %3957 }
0x13be   :  { %v3961_v15 = vpop.xlane.xlu0 %3960 }
0x13cf   :  { %v3947_v8 = vpop.f32.mrb[72].mxu0 }
0x13d0   :  { %v6274_v58 = vpop.f32.mrb[73].mxu0  ;;  %v4036_v10 = vpop.f32.mrb[80].mxu1  ;;  %v4046_v20 = vmul.f32 2.0, %v3947_v8 }
0x13d1   :  { %v4043_v11 = vrot.slane %v4036_v10, %v7276_v46  ;;  %v3950_v12 = vpop.f32.mrb[74].mxu0  ;;  %v6282_v32 = vpop.f32.mrb[81].mxu1 }
0x13d2   :  { %v4047_v5 = vmul.f32 2.0, %v3950_v12  ;;  %v6275_v19 = vpop.f32.mrb[75].mxu0 }
0x13d3   :  { %v4044_v25 = vadd.f32 %v4043_v11, %v3958_v63  ;;  %v4045_v23 = vadd.f32 %v4043_v11, %v3961_v15 }
0x13d5   :  { %v4048_v24 = vsub.f32 %v4044_v25, %v4046_v20  ;;  %v4049_v18 = vsub.f32 %v4045_v23, %v4047_v5 }
0x13d7   :  { %v7957_v22 = vmax.f32 %v4048_v24, 0.0  ;;  %v7959_v26 = vmax.f32 %v4049_v18, 0.0 }
0x13d9   :  { %v4082_v17 = vmul.f32 %v7280_v0, %v7957_v22  ;;  %v4083_v34 = vmul.f32 %v7282_v2, %v7959_v26  ;;  %6827 = vrsqrt.f32 %v7957_v22  ;;  %vm4054_vm3 = vcmp.eq.f32.partialorder %v7957_v22, inf }
0x13da   :  { %6829 = vrsqrt.f32 %v7959_v26  ;;  %v4057_v28 = vand.u32 2147483648, %v7957_v22  ;;  %vm4056_vm14 = vcmp.eq.f32.partialorder %v7957_v22, 0.0  ;;  %vm4061_vm15 = vcmp.eq.f32.partialorder %v7959_v26, inf }
0x13db   :  { %v4084_v35 = vsel %vm163_vm1, %v4082_v17, 0.0  ;;  %v4085_v21 = vsel %vm163_vm1, %v4083_v34, 0.0  ;;  %v4064_v50 = vand.u32 2147483648, %v7959_v26  ;;  %vm4063_vm4 = vcmp.eq.f32.partialorder %v7959_v26, 0.0 }
0x13dc   :  { %v4086_v27 = vadd.f32 %v4085_v21, %v4084_v35 }
0x13de   :  { %4087 = vadd.xlane.f32.xlu1 %v4086_v27 }
0x13e3   :  { %v6828_v29 = vpop.eup %6827 }
0x13e4   :  { %v6830_v36 = vpop.eup %6829  ;;  %v4053_v56 = vmul.f32 %v6828_v29, %v7957_v22 }
0x13e5   :  { %v4060_v30 = vmul.f32 %v6830_v36, %v7959_v26 }
0x13e6   :  { %v4055_v9 = vsel %vm4054_vm3, %v7957_v22, %v4053_v56 }
0x13e7   :  { %v4058_v52 = vsel %vm4056_vm14, %v4057_v28, %v4055_v9  ;;  %v4062_v37 = vsel %vm4061_vm15, %v7959_v26, %v4060_v30 }
0x13e8   :  { %v4065_v38 = vsel %vm4063_vm4, %v4064_v50, %v4062_v37  ;;  %v4066_v39 = vmul.f32 %v7280_v0, %v4058_v52 }
0x13e9   :  { %v4067_v41 = vmul.f32 %v7282_v2, %v4065_v38 }
0x13ea   :  { %v4068_v40 = vsel %vm163_vm1, %v4066_v39, 0.0 }
0x13eb   :  { %v4069_v43 = vsel %vm163_vm1, %v4067_v41, 0.0 }
0x13ec   :  { %v4070_v3 = vadd.f32 %v4069_v43, %v4068_v40 }
0x13ee   :  { %4071 = vadd.xlane.f32.xlu0 %v4070_v3 }
0x1405   :  { %v4161_v53 = vpop.xlane.xlu0 %4160 }
0x1409   :  { %v4360_v5 = vpop.xlane.xlu0 %4359 }
0x140b   :  { %v4164_v54 = vpop.xlane.xlu1 %4163 }
0x140d   :  { %v4559_v39 = vpop.xlane.xlu0 %4558 }
0x140f   :  { %v4363_v19 = vpop.xlane.xlu1 %4362 }
0x1413   :  { %v4562_v41 = vpop.xlane.xlu1 %4561 }
0x1442   :  { %v4144_v31 = vpop.f32.mrb[76].mxu0 }
0x1443   :  { %v6287_v6 = vpop.f32.mrb[77].mxu0  ;;  %v4249_v57 = vmul.f32 2.0, %v4144_v31 }
0x1444   :  { %v4147_v47 = vpop.f32.mrb[78].mxu0 }
0x1445   :  { %v6288_v33 = vpop.f32.mrb[79].mxu0  ;;  %v4250_v55 = vmul.f32 2.0, %v4147_v47 }
0x1447   :  { %v4239_v49 = vpop.f32.mrb[82].mxu1 }
0x1448   :  { %v4246_v14 = vrot.slane %v4239_v49, %v7276_v46  ;;  %v6295_v48 = vpop.f32.mrb[83].mxu1 }
0x144a   :  { %v4247_v59 = vadd.f32 %v4246_v14, %v4161_v53  ;;  %v4248_v60 = vadd.f32 %v4246_v14, %v4164_v54 }
0x144c   :  { %v4251_v45 = vsub.f32 %v4247_v59, %v4249_v57  ;;  %v4252_v61 = vsub.f32 %v4248_v60, %v4250_v55  ;;  %v4345_v62 = vpop.f32.mrb[80].mxu0 }
0x144d   :  { %v6300_v4 = vpop.f32.mrb[81].mxu0  ;;  %v4448_v20 = vmul.f32 2.0, %v4345_v62 }
0x144e   :  { %v7984_v51 = vmax.f32 %v4251_v45, 0.0  ;;  %v7986_v63 = vmax.f32 %v4252_v61, 0.0  ;;  %v4348_v8 = vpop.f32.mrb[82].mxu0 }
0x144f   :  { %v6301_v58 = vpop.f32.mrb[83].mxu0  ;;  %v4438_v10 = vpop.f32.mrb[84].mxu1  ;;  %v4449_v25 = vmul.f32 2.0, %v4348_v8 }
0x1450   :  { %v4445_v11 = vrot.slane %v4438_v10, %v7276_v46  ;;  %v6308_v12 = vpop.f32.mrb[85].mxu1  ;;  %v4285_v32 = vmul.f32 %v7280_v0, %v7984_v51  ;;  %v4286_v15 = vmul.f32 %v7282_v2, %v7986_v63  ;;  %6831 = vrsqrt.f32 %v7984_v51 }
0x1451   :  { %6833 = vrsqrt.f32 %v7986_v63  ;;  %vm4257_vm5 = vcmp.eq.f32.partialorder %v7984_v51, inf  ;;  %vm4259_vm6 = vcmp.eq.f32.partialorder %v7984_v51, 0.0  ;;  %v4260_v54 = vand.u32 2147483648, %v7984_v51 }
0x1452   :  { %v4446_v23 = vadd.f32 %v4445_v11, %v4360_v5  ;;  %v4447_v24 = vadd.f32 %v4445_v11, %v4363_v19  ;;  %v4287_v18 = vsel %vm163_vm1, %v4285_v32, 0.0  ;;  %v4288_v17 = vsel %vm163_vm1, %v4286_v15, 0.0 }
0x1453   :  { %v4289_v34 = vadd.f32 %v4288_v17, %v4287_v18  ;;  %vm4264_vm7 = vcmp.eq.f32.partialorder %v7986_v63, inf  ;;  %vm4266_vm10 = vcmp.eq.f32.partialorder %v7986_v63, 0.0  ;;  %v4267_v59 = vand.u32 2147483648, %v7986_v63 }
0x1454   :  { %v4450_v35 = vsub.f32 %v4446_v23, %v4448_v20  ;;  %v4451_v21 = vsub.f32 %v4447_v24, %v4449_v25  ;;  %v4544_v27 = vpop.f32.mrb[84].mxu0 }
0x1455   :  { %4290 = vadd.xlane.f32.xlu1 %v4289_v34  ;;  %v6313_v29 = vpop.f32.mrb[85].mxu0  ;;  %v4647_v40 = vmul.f32 2.0, %v4544_v27 }
0x1456   :  { %v7997_v36 = vmax.f32 %v4450_v35, 0.0  ;;  %v7999_v56 = vmax.f32 %v4451_v21, 0.0  ;;  %v4547_v28 = vpop.f32.mrb[86].mxu0 }
0x1457   :  { %v6314_v30 = vpop.f32.mrb[87].mxu0  ;;  %v4637_v9 = vpop.f32.mrb[86].mxu1  ;;  %v4648_v43 = vmul.f32 2.0, %v4547_v28 }
0x1458   :  { %v4644_v50 = vrot.slane %v4637_v9, %v7276_v46  ;;  %v6321_v52 = vpop.f32.mrb[87].mxu1  ;;  %v4484_v37 = vmul.f32 %v7280_v0, %v7997_v36  ;;  %v4485_v38 = vmul.f32 %v7282_v2, %v7999_v56  ;;  %6835 = vrsqrt.f32 %v7997_v36 }
0x1459   :  { %6837 = vrsqrt.f32 %v7999_v56  ;;  %vm4456_vm11 = vcmp.eq.f32.partialorder %v7997_v36, inf  ;;  %v4459_v18 = vand.u32 2147483648, %v7997_v36  ;;  %vm4458_vm12 = vcmp.eq.f32.partialorder %v7997_v36, 0.0 }
0x145a   :  { %v6832_v3 = vpop.eup %6831  ;;  %v4645_v31 = vadd.f32 %v4644_v50, %v4559_v39  ;;  %v4646_v6 = vadd.f32 %v4644_v50, %v4562_v41  ;;  %v4486_v46 = vsel %vm163_vm1, %v4484_v37, 0.0  ;;  %v4487_v47 = vsel %vm163_vm1, %v4485_v38, 0.0 }
0x145b   :  { %v6834_v33 = vpop.eup %6833  ;;  %v4488_v49 = vadd.f32 %v4487_v47, %v4486_v46  ;;  %v4256_v14 = vmul.f32 %v6832_v3, %v7984_v51  ;;  %vm4463_vm13 = vcmp.eq.f32.partialorder %v7999_v56, inf  ;;  %v4466_v35 = vand.u32 2147483648, %v7999_v56 }
0x145c   :  { %v4649_v48 = vsub.f32 %v4645_v31, %v4647_v40  ;;  %v4650_v53 = vsub.f32 %v4646_v6, %v4648_v43  ;;  %v4263_v57 = vmul.f32 %v6834_v33, %v7986_v63  ;;  %vm4465_vm3 = vcmp.eq.f32.partialorder %v7999_v56, 0.0 }
0x145d   :  { %4489 = vadd.xlane.f32.xlu1 %v4488_v49  ;;  %v4258_v55 = vsel %vm4257_vm5, %v7984_v51, %v4256_v14 }
0x145e   :  { %v8019_v60 = vmax.f32 %v4649_v48, 0.0  ;;  %v8021_v45 = vmax.f32 %v4650_v53, 0.0  ;;  %v4261_v61 = vsel %vm4259_vm6, %v4260_v54, %v4258_v55  ;;  %v4265_v62 = vsel %vm4264_vm7, %v7986_v63, %v4263_v57 }
0x145f   :  { %v4268_v4 = vsel %vm4266_vm10, %v4267_v59, %v4265_v62  ;;  %v4269_v8 = vmul.f32 %v7280_v0, %v4261_v61 }
0x1460   :  { %v4270_v58 = vmul.f32 %v7282_v2, %v4268_v4  ;;  %v4683_v10 = vmul.f32 %v7280_v0, %v8019_v60  ;;  %v4684_v11 = vmul.f32 %v7282_v2, %v8021_v45  ;;  %6839 = vrsqrt.f32 %v8019_v60 }
0x1461   :  { %v4271_v12 = vsel %vm163_vm1, %v4269_v8, 0.0  ;;  %6841 = vrsqrt.f32 %v8021_v45  ;;  %vm4655_vm14 = vcmp.eq.f32.partialorder %v8019_v60, inf  ;;  %v4658_v41 = vand.u32 2147483648, %v8019_v60 }
0x1462   :  { %v6836_v32 = vpop.eup %6835  ;;  %v4272_v15 = vsel %vm163_vm1, %v4270_v58, 0.0  ;;  %v4685_v5 = vsel %vm163_vm1, %v4683_v10, 0.0  ;;  %v4686_v19 = vsel %vm163_vm1, %v4684_v11, 0.0  ;;  %vm4657_vm15 = vcmp.eq.f32.partialorder %v8019_v60, 0.0 }
0x1463   :  { %v6838_v20 = vpop.eup %6837  ;;  %v4273_v25 = vadd.f32 %v4272_v15, %v4271_v12  ;;  %v4687_v23 = vadd.f32 %v4686_v19, %v4685_v5  ;;  %v4455_v24 = vmul.f32 %v6836_v32, %v7997_v36  ;;  %vm4662_vm4 = vcmp.eq.f32.partialorder %v8021_v45, inf }
0x1464   :  { %v4462_v17 = vmul.f32 %v6838_v20, %v7999_v56  ;;  %v4665_v31 = vand.u32 2147483648, %v8021_v45  ;;  %vm4664_vm5 = vcmp.eq.f32.partialorder %v8021_v45, 0.0 }
0x1465   :  { %4274 = vadd.xlane.f32.xlu0 %v4273_v25  ;;  %4688 = vadd.xlane.f32.xlu1 %v4687_v23  ;;  %v4457_v34 = vsel %vm4456_vm11, %v7997_v36, %v4455_v24 }
0x1466   :  { %v4460_v21 = vsel %vm4458_vm12, %v4459_v18, %v4457_v34  ;;  %v4464_v27 = vsel %vm4463_vm13, %v7999_v56, %v4462_v17 }
0x1467   :  { %v4467_v29 = vsel %vm4465_vm3, %v4466_v35, %v4464_v27  ;;  %v4468_v28 = vmul.f32 %v7280_v0, %v4460_v21 }
0x1468   :  { %v4469_v30 = vmul.f32 %v7282_v2, %v4467_v29 }
0x1469   :  { %v4470_v9 = vsel %vm163_vm1, %v4468_v28, 0.0 }
0x146a   :  { %v6840_v50 = vpop.eup %6839  ;;  %v4471_v52 = vsel %vm163_vm1, %v4469_v30, 0.0 }
0x146b   :  { %v4472_v37 = vadd.f32 %v4471_v52, %v4470_v9  ;;  %v4654_v38 = vmul.f32 %v6840_v50, %v8019_v60  ;;  %v6842_v39 = vpop.eup %6841  ;;  %v4088_v47 = vpop.xlane.xlu1 %4087 }
0x146c   :  { %v4661_v43 = vmul.f32 %v6842_v39, %v8021_v45  ;;  %v4089_v48 = vrot.slane %v4088_v47, 4 }
0x146d   :  { %4473 = vadd.xlane.f32.xlu0 %v4472_v37  ;;  %v4656_v40 = vsel %vm4655_vm14, %v8019_v60, %v4654_v38 }
0x146e   :  { %v4659_v3 = vsel %vm4657_vm15, %v4658_v41, %v4656_v40  ;;  %v4663_v6 = vsel %vm4662_vm4, %v8021_v45, %v4661_v43  ;;  %v4090_v57 = vadd.f32 %v4089_v48, %v4088_v47 }
0x146f   :  { %v4667_v46 = vmul.f32 %v7280_v0, %v4659_v3  ;;  %v4666_v33 = vsel %vm4664_vm5, %v4665_v31, %v4663_v6 }
0x1470   :  { %v4668_v49 = vmul.f32 %v7282_v2, %v4666_v33  ;;  %v4091_v55 = vrot.slane %v4090_v57, 2 }
0x1471   :  { %v4669_v14 = vsel %vm163_vm1, %v4667_v46, 0.0 }
0x1472   :  { %v4670_v53 = vsel %vm163_vm1, %v4668_v49, 0.0  ;;  %v4092_v4 = vadd.f32 %v4091_v55, %v4090_v57 }
0x1473   :  { %v4671_v54 = vadd.f32 %v4670_v53, %v4669_v14 }
0x1474   :  { %v4093_v10 = vrot.slane %v4092_v4, 1 }
0x1475   :  { %4672 = vadd.xlane.f32.xlu0 %v4671_v54 }
0x1476   :  { %v4094_v32 = vadd.f32 %v4093_v10, %v4092_v4 }
0x147b   :  { %v4072_v59 = vpop.xlane.xlu0 %4071 }
0x147c   :  { %v4073_v61 = vrot.slane %v4072_v59, 4 }
0x147e   :  { %v4074_v62 = vadd.f32 %v4073_v61, %v4072_v59 }
0x1480   :  { %v4075_v8 = vrot.slane %v4074_v62, 2 }
0x1482   :  { %v4076_v58 = vadd.f32 %v4075_v8, %v4074_v62 }
0x1484   :  { %v4077_v11 = vrot.slane %v4076_v58, 1 }
0x1486   :  { %v4078_v12 = vadd.f32 %v4077_v11, %v4076_v58 }
0x1488   :  { %6492 = vpush %v4078_v12 }
0x1489   :  { %6494 = vpush %v4094_v32 }
0x14b9   :  { %s6493_s25 = spop %6492 }
0x14ba   :  { %s6495_s29 = spop %6494  ;;  %v4080_v58 = vstv %s6493_s25 }
0x14e2   :  { %v4291_v15 = vpop.xlane.xlu1 %4290 }
0x14e3   :  { %v4292_v5 = vrot.slane %v4291_v15, 4 }
0x14e5   :  { %v4293_v19 = vadd.f32 %v4292_v5, %v4291_v15  ;;  %v4096_v15 = vstv %s6495_s29 }
0x14e7   :  { %v4294_v25 = vrot.slane %v4293_v19, 2 }
0x14e9   :  { %v4295_v35 = vadd.f32 %v4294_v25, %v4293_v19 }
0x14ea   :  { %v4490_v20 = vpop.xlane.xlu1 %4489 }
0x14eb   :  { %v4491_v23 = vrot.slane %v4490_v20, 4  ;;  %v4296_v9 = vrot.slane %v4295_v35, 1 }
0x14ed   :  { %v4492_v34 = vadd.f32 %v4491_v23, %v4490_v20  ;;  %v4297_v41 = vadd.f32 %v4296_v9, %v4295_v35 }
0x14ef   :  { %v4493_v28 = vrot.slane %v4492_v34, 2 }
0x14f1   :  { %v4494_v40 = vadd.f32 %v4493_v28, %v4492_v34 }
0x14f2   :  { %v4275_v24 = vpop.xlane.xlu0 %4274  ;;  %v4689_v27 = vpop.xlane.xlu1 %4688 }
0x14f3   :  { %v4276_v18 = vrot.slane %v4275_v24, 4  ;;  %v4690_v50 = vrot.slane %v4689_v27, 4  ;;  %v4495_v6 = vrot.slane %v4494_v40, 1 }
0x14f5   :  { %v4277_v17 = vadd.f32 %v4276_v18, %v4275_v24  ;;  %v4691_v43 = vadd.f32 %v4690_v50, %v4689_v27  ;;  %v4496_v53 = vadd.f32 %v4495_v6, %v4494_v40 }
0x14f7   :  { %v4278_v21 = vrot.slane %v4277_v17, 2  ;;  %v4692_v46 = vrot.slane %v4691_v43, 2 }
0x14f9   :  { %v4279_v29 = vadd.f32 %v4278_v21, %v4277_v17  ;;  %v4693_v54 = vadd.f32 %v4692_v46, %v4691_v43 }
0x14fa   :  { %v4474_v30 = vpop.xlane.xlu0 %4473 }
0x14fb   :  { %v4475_v52 = vrot.slane %v4474_v30, 4  ;;  %v4280_v37 = vrot.slane %v4279_v29, 1  ;;  %v4694_v59 = vrot.slane %v4693_v54, 1 }
0x14fd   :  { %v4476_v38 = vadd.f32 %v4475_v52, %v4474_v30  ;;  %v4281_v39 = vadd.f32 %v4280_v37, %v4279_v29  ;;  %v4695_v4 = vadd.f32 %v4694_v59, %v4693_v54 }
0x14ff   :  { %v4477_v3 = vrot.slane %v4476_v38, 2  ;;  %6496 = vpush %v4281_v39 }
0x1500   :  { %6498 = vpush %v4297_v41 }
0x1501   :  { %v4478_v31 = vadd.f32 %v4477_v3, %v4476_v38 }
0x1502   :  { %v4673_v47 = vpop.xlane.xlu0 %4672 }
0x1503   :  { %v4479_v33 = vrot.slane %v4478_v31, 1  ;;  %v4674_v49 = vrot.slane %v4673_v47, 4 }
0x1505   :  { %v4480_v14 = vadd.f32 %v4479_v33, %v4478_v31  ;;  %v4675_v48 = vadd.f32 %v4674_v49, %v4673_v47 }
0x1507   :  { %6500 = vpush %v4480_v14  ;;  %v4676_v57 = vrot.slane %v4675_v48, 2 }
0x1508   :  { %6502 = vpush %v4496_v53 }
0x1509   :  { %v4677_v55 = vadd.f32 %v4676_v57, %v4675_v48 }
0x150b   :  { %v4678_v61 = vrot.slane %v4677_v55, 1 }
0x150d   :  { %v4679_v62 = vadd.f32 %v4678_v61, %v4677_v55 }
0x150f   :  { %6504 = vpush %v4679_v62 }
0x1510   :  { %6506 = vpush %v4695_v4 }
0x1530   :  { %s6497_s7 = spop %6496 }
0x1531   :  { %s6499_s10 = spop %6498  ;;  %v4283_v8 = vstv %s6497_s7 }
0x1532   :  { %v4284_v11 = vadd.f32 %v4283_v8, %v4080_v58  ;;  %v4299_v12 = vstv %s6499_s10 }
0x1533   :  { %v4300_v20 = vadd.f32 %v4299_v12, %v4096_v15 }
0x1538   :  { %s6501_s11 = spop %6500 }
0x1539   :  { %v4482_v10 = vstv %s6501_s11  ;;  %s6503_s3 = spop %6502 }
0x153a   :  { %v4483_v32 = vadd.f32 %v4482_v10, %v4284_v11  ;;  %v4498_v5 = vstv %s6503_s3 }
0x153b   :  { %v4499_v24 = vadd.f32 %v4498_v5, %v4300_v20 }
0x1540   :  { %s6505_s8 = spop %6504 }
0x1541   :  { %v4681_v19 = vstv %s6505_s8  ;;  %s6507_s14 = spop %6506 }
0x1542   :  { %v4682_v25 = vadd.f32 %v4681_v19, %v4483_v32  ;;  %v4697_v23 = vstv %s6507_s14 }
0x1543   :  { %v4698_v34 = vadd.f32 %v4697_v23, %v4499_v24 }
0x1544   :  { %v4699_v18 = vmul.f32 %v4682_v25, %v4682_v25 }
0x1546   :  { %v4700_v17 = vmul.f32 0.0078125, %v4699_v18 }
0x1548   :  { %v4701_v35 = vsub.f32 %v4698_v34, %v4700_v17 }
0x154a   :  { %v4702_v21 = vmul.f32 0.007874016, %v4701_v35 }
0x154c   :  { %v4703_v27 = vmax.f32 %v4702_v21, 1e-12 }
0x154e   :  { %6843 = vrcp.f32 %v4703_v27 }
0x1558   :  { %v6844_v29 = vpop.eup %6843 }
0x1559   :  { %v4705_v28 = vmul.f32 -0.5, %v6844_v29 }
0x155b   :  { %v4706_v30 = vmul.f32 %v4705_v28, %v7957_v22  ;;  %v4707_v9 = vmul.f32 %v4705_v28, %v7959_v26  ;;  %v4824_v50 = vmul.f32 %v4705_v28, %v7984_v51  ;;  %v4825_v52 = vmul.f32 %v4705_v28, %v7986_v63 }
0x155c   :  { %v4943_v37 = vmul.f32 %v4705_v28, %v7997_v36  ;;  %v4944_v38 = vmul.f32 %v4705_v28, %v7999_v56  ;;  %v5062_v22 = vmul.f32 %v4705_v28, %v8019_v60  ;;  %v5063_v26 = vmul.f32 %v4705_v28, %v8021_v45 }
0x155d   :  { %v4708_v39 = vmul.f32 1.442695, %v4706_v30  ;;  %v4710_v41 = vmul.f32 1.442695, %v4707_v9  ;;  %v4826_v40 = vmul.f32 1.442695, %v4824_v50 }
0x155e   :  { %v4828_v43 = vmul.f32 1.442695, %v4825_v52  ;;  %v4945_v3 = vmul.f32 1.442695, %v4943_v37  ;;  %v4947_v31 = vmul.f32 1.442695, %v4944_v38 }
0x155f   :  { %6845 = vpow2.f32 %v4708_v39  ;;  %v5064_v51 = vmul.f32 1.442695, %v5062_v22  ;;  %v5066_v63 = vmul.f32 1.442695, %v5063_v26 }
0x1560   :  { %6847 = vpow2.f32 %v4710_v41 }
0x1561   :  { %6849 = vpow2.f32 %v4826_v40 }
0x1562   :  { %6851 = vpow2.f32 %v4828_v43 }
0x1563   :  { %6853 = vpow2.f32 %v4945_v3 }
0x1564   :  { %6855 = vpow2.f32 %v4947_v31 }
0x1565   :  { %6857 = vpow2.f32 %v5064_v51 }
0x1566   :  { %6859 = vpow2.f32 %v5066_v63 }
0x1569   :  { %v6846_v36 = vpop.eup %6845 }
0x156a   :  { %v6848_v56 = vpop.eup %6847  ;;  %v4712_v6 = vsub.f32 1.0, %v6846_v36 }
0x156b   :  { %v6850_v46 = vpop.eup %6849  ;;  %v4713_v47 = vsub.f32 1.0, %v6848_v56 }
0x156c   :  { %v6852_v33 = vpop.eup %6851  ;;  %v4714_v49 = vmul.f32 4.0, %v4712_v6  ;;  %v4830_v14 = vsub.f32 1.0, %v6850_v46 }
0x156d   :  { %v6854_v48 = vpop.eup %6853  ;;  %v4715_v53 = vmul.f32 4.0, %v4713_v47  ;;  %v4831_v54 = vsub.f32 1.0, %v6852_v33 }
0x156e   :  { %v6856_v57 = vpop.eup %6855  ;;  %v4716_v60 = vmul.f32 1.442695, %v4714_v49  ;;  %v4832_v55 = vmul.f32 4.0, %v4830_v14  ;;  %v4949_v62 = vsub.f32 1.0, %v6854_v48 }
0x156f   :  { %v4718_v59 = vmul.f32 1.442695, %v4715_v53  ;;  %v4833_v45 = vmul.f32 4.0, %v4831_v54  ;;  %v4950_v8 = vsub.f32 1.0, %v6856_v57  ;;  %v6858_v10 = vpop.eup %6857 }
0x1570   :  { %6861 = vpow2.f32 %v4716_v60  ;;  %v4834_v61 = vmul.f32 1.442695, %v4832_v55  ;;  %v4951_v58 = vmul.f32 4.0, %v4949_v62  ;;  %v6860_v12 = vpop.eup %6859  ;;  %v5068_v15 = vsub.f32 1.0, %v6858_v10 }
0x1571   :  { %6863 = vpow2.f32 %v4718_v59  ;;  %v4836_v4 = vmul.f32 1.442695, %v4833_v45  ;;  %v4952_v11 = vmul.f32 4.0, %v4950_v8  ;;  %v5069_v19 = vsub.f32 1.0, %v6860_v12 }
0x1572   :  { %6865 = vpow2.f32 %v4834_v61  ;;  %v4953_v32 = vmul.f32 1.442695, %v4951_v58  ;;  %v5070_v18 = vmul.f32 4.0, %v5068_v15 }
0x1573   :  { %6867 = vpow2.f32 %v4836_v4  ;;  %v4955_v5 = vmul.f32 1.442695, %v4952_v11  ;;  %v5071_v17 = vmul.f32 4.0, %v5069_v19 }
0x1574   :  { %6869 = vpow2.f32 %v4953_v32  ;;  %v5072_v27 = vmul.f32 1.442695, %v5070_v18 }
0x1575   :  { %6871 = vpow2.f32 %v4955_v5  ;;  %v5074_v29 = vmul.f32 1.442695, %v5071_v17 }
0x1576   :  { %6873 = vpow2.f32 %v5072_v27 }
0x1577   :  { %6875 = vpow2.f32 %v5074_v29  ;;  %v6644_v29 = vld [vmem:[%s8229_s19] sm:$0xff]  }
0x157a   :  { %v6862_v20 = vpop.eup %6861 }
0x157b   :  { %v6864_v25 = vpop.eup %6863  ;;  %v4720_v23 = vmul.f32 %v6862_v20, %v7280_v0 }
0x157c   :  { %v4721_v24 = vmul.f32 %v6864_v25, %v7282_v2  ;;  %v6866_v34 = vpop.eup %6865 }
0x157d   :  { %v6868_v21 = vpop.eup %6867  ;;  %v4838_v28 = vmul.f32 %v6866_v34, %v7280_v0 }
0x157e   :  { %v4722_v35 = vpack.c.bf16 %v4721_v24, %v4720_v23  ;;  %v4839_v30 = vmul.f32 %v6868_v21, %v7282_v2 }
0x1580   :  { %6325 = vmatmul.mubr.msk.bf16.vlgmr.msra.gmra.mrb[88].mxu0 %vm163_vm1, %v4722_v35  ;;  %6331 = vmatmul.mubr.msk.bf16.vlgmr.msra.gmra.mrb[88].mxu1 %vm163_vm1, %v4722_v35  ;;  %v4840_v9 = vpack.c.bf16 %v4839_v30, %v4838_v28  ;;  %v6645_v28 = vld [vmem:[%s8229_s19 + $0x8] sm:$0xff]   ;;  %v6646_v30 = vld [vmem:[%s8229_s19 + $0x10] sm:$0xff]  }
0x1581   :  { %6335 = vmatpush3.bf16.msra.mxu0 %v7901_v16  ;;  %6341 = vmatpush3.bf16.msra.mxu1 %v6974_v7  ;;  %v6870_v16 = vpop.eup %6869 }
0x1582   :  { %6336 = vmatprep.mubr.msk.bf16.mxu0 %vm6967_vm0, %v6966_v1  ;;  %6342 = vmatprep.mubr.msk.bf16.mxu1 %vm6967_vm0, %v6966_v1  ;;  %v6872_v50 = vpop.eup %6871  ;;  %v4957_v52 = vmul.f32 %v6870_v16, %v7280_v0  ;;  %v6647_v16 = vld [vmem:[%s8229_s19 + $0x18] sm:$0xff]  }
0x1583   :  { %6346 = vmatprep.subr.bf16.mxu0 %v6966_v1  ;;  %6352 = vmatprep.subr.bf16.mxu1 %v6966_v1  ;;  %v4958_v37 = vmul.f32 %v6872_v50, %v7282_v2  ;;  %v6874_v38 = vpop.eup %6873 }
0x1584   :  { %v6876_v41 = vpop.eup %6875 }
0x1585   :  { %v4959_v39 = vpack.c.bf16 %v4958_v37, %v4957_v52  ;;  %v5077_v40 = vmul.f32 %v6876_v41, %v7282_v2  ;;  %v6649_v52 = vld [vmem:[%s8229_s19 + $0x28] sm:$0xff]   ;;  %v6650_v41 = vld [vmem:[%s8229_s19 + $0x30] sm:$0xff]  }
0x1588   :  { %6337 = vmatmul.mubr.msk.bf16.vlgmr.msra.gmra.mrb[92].mxu0 %vm163_vm1, %v4840_v9  ;;  %6343 = vmatmul.mubr.msk.bf16.vlgmr.msra.gmra.mrb[92].mxu1 %vm163_vm1, %v4840_v9  ;;  %v6648_v9 = vld [vmem:[%s8229_s19 + $0x20] sm:$0xff]  }
0x1589   :  { %6347 = vmatpush3.bf16.msra.mxu0 %v7910_v42  ;;  %6353 = vmatpush3.bf16.msra.mxu1 %v6974_v7  ;;  %v5076_v42 = vmul.f32 %v6874_v38, %v7280_v0 }
0x158a   :  { %6348 = vmatprep.mubr.msk.bf16.mxu0 %vm6967_vm0, %v6966_v1  ;;  %6354 = vmatprep.mubr.msk.bf16.mxu1 %vm6967_vm0, %v6966_v1 }
0x158b   :  { %6358 = vmatprep.subr.bf16.mxu0 %v6966_v1  ;;  %6364 = vmatprep.subr.bf16.mxu1 %v6966_v1  ;;  %v5078_v43 = vpack.c.bf16 %v5077_v40, %v5076_v42 }
0x1590   :  { %6349 = vmatmul.mubr.msk.bf16.vlgmr.msra.gmra.mrb[96].mxu0 %vm163_vm1, %v4959_v39  ;;  %6355 = vmatmul.mubr.msk.bf16.vlgmr.msra.gmra.mrb[96].mxu1 %vm163_vm1, %v4959_v39 }
0x1591   :  { %6359 = vmatpush3.bf16.msra.mxu0 %v7916_v44  ;;  %6365 = vmatpush3.bf16.msra.mxu1 %v6974_v7 }
0x1592   :  { %6360 = vmatprep.mubr.msk.bf16.mxu0 %vm6967_vm0, %v6966_v1  ;;  %6366 = vmatprep.mubr.msk.bf16.mxu1 %vm6967_vm0, %v6966_v1 }
0x1593   :  { %6370 = vmatprep.subr.bf16.mxu0 %v6966_v1  ;;  %6390 = vmatprep.subr.bf16.mxu1 %v6966_v1 }
0x1598   :  { %6361 = vmatmul.mubr.msk.bf16.vlgmr.msra.gmra.mrb[100].mxu0 %vm163_vm1, %v5078_v43  ;;  %6367 = vmatmul.mubr.msk.bf16.vlgmr.msra.gmra.mrb[100].mxu1 %vm163_vm1, %v5078_v43 }
0x1599   :  { %6386 = vmatprep.mubr.msk.bf16.mxu0 %vm6967_vm0, %v6966_v1  ;;  %6394 = vmatprep.mubr.msk.bf16.mxu1 %vm6967_vm0, %v6966_v1 }
0x159a   :  { %6371 = vmatpush3.bf16.msra.mxu0 %v6644_v29 }
0x159b   :  { %6372 = vmatprep.subr.bf16.mxu0 %v6966_v1 }
0x159e   :  { %6373 = vmatpush3.bf16.msra.mxu0 %v6645_v28 }
0x159f   :  { %6374 = vmatprep.subr.bf16.mxu0 %v6966_v1 }
0x15a2   :  { %6375 = vmatpush3.bf16.msra.mxu0 %v6646_v30 }
0x15a3   :  { %6376 = vmatprep.subr.bf16.mxu0 %v6966_v1 }
0x15a6   :  { %6377 = vmatpush3.bf16.msra.mxu0 %v6647_v16 }
0x15a7   :  { %6378 = vmatprep.subr.bf16.mxu0 %v6966_v1 }
0x15aa   :  { %6379 = vmatpush3.bf16.msra.mxu0 %v6648_v9 }
0x15ab   :  { %6380 = vmatprep.subr.bf16.mxu0 %v6966_v1 }
0x15ae   :  { %6381 = vmatpush3.bf16.msra.mxu0 %v6649_v52 }
0x15af   :  { %6382 = vmatprep.subr.bf16.mxu0 %v6966_v1 }
0x15b2   :  { %6383 = vmatpush3.bf16.msra.mxu0 %v6650_v41 }
0x15b3   :  { %6384 = vmatprep.subr.bf16.mxu0 %v6966_v1 }
0x1653   :  { %v8116_v7 = vpop.f32.mrb[88].mxu0  ;;  %v4801_v0 = vpop.f32.mrb[88].mxu1 }
0x1654   :  { %v6326_v44 = vpop.f32.mrb[89].mxu0  ;;  %v6332_v2 = vpop.f32.mrb[89].mxu1  ;;  %v4808_v19 = vmax.f32 %v4801_v0, 1e-20 }
0x1655   :  { %v8118_v3 = vpop.f32.mrb[90].mxu0  ;;  %v4804_v31 = vpop.f32.mrb[90].mxu1  ;;  %v6651_v44 = vld [vmem:[%s8229_s19 + $0x38] sm:$0xff]  }
0x1656   :  { %v6327_v22 = vpop.f32.mrb[91].mxu0  ;;  %v6333_v26 = vpop.f32.mrb[91].mxu1  ;;  %v4809_v18 = vmax.f32 %v4804_v31, 1e-20  ;;  %6385 = vmatpush3.bf16.msra.mxu0 %v6651_v44 }
0x165b   :  { %v8120_v51 = vpop.f32.mrb[92].mxu0  ;;  %v4920_v63 = vpop.f32.mrb[92].mxu1 }
0x165c   :  { %v4927_v36 = vmax.f32 %v4920_v63, 1e-20  ;;  %v6338_v56 = vpop.f32.mrb[93].mxu0  ;;  %v6344_v6 = vpop.f32.mrb[93].mxu1 }
0x165d   :  { %v8122_v46 = vpop.f32.mrb[94].mxu0  ;;  %v4923_v47 = vpop.f32.mrb[94].mxu1 }
0x165e   :  { %6877 = vrcp.f32 %v4927_v36  ;;  %v4928_v33 = vmax.f32 %v4923_v47, 1e-20  ;;  %v6339_v49 = vpop.f32.mrb[95].mxu0  ;;  %v6345_v14 = vpop.f32.mrb[95].mxu1 }
0x1660   :  { %6879 = vrcp.f32 %v4928_v33 }
0x1663   :  { %v8124_v48 = vpop.f32.mrb[96].mxu0  ;;  %v5039_v53 = vpop.f32.mrb[96].mxu1 }
0x1664   :  { %v5046_v54 = vmax.f32 %v5039_v53, 1e-20  ;;  %v6350_v57 = vpop.f32.mrb[97].mxu0  ;;  %v6356_v60 = vpop.f32.mrb[97].mxu1 }
0x1665   :  { %v8126_v55 = vpop.f32.mrb[98].mxu0  ;;  %v5042_v59 = vpop.f32.mrb[98].mxu1 }
0x1666   :  { %6881 = vrcp.f32 %v5046_v54  ;;  %v5047_v45 = vmax.f32 %v5042_v59, 1e-20  ;;  %v6351_v61 = vpop.f32.mrb[99].mxu0  ;;  %v6357_v62 = vpop.f32.mrb[99].mxu1 }
0x1667   :  { %v6653_v62 = vld [vmem:[%s8231_s24 + $0x8] sm:$0xff]  }
0x1668   :  { %v6878_v4 = vpop.eup %6877  ;;  %6883 = vrcp.f32 %v5047_v45 }
0x1669   :  { %4933 = vperm.xlu0 %6569, %v6878_v4  }
0x166a   :  { %v6880_v8 = vpop.eup %6879 }
0x166b   :  { %4938 = vperm.xlu1 %6570, %v6880_v8   ;;  %v8128_v58 = vpop.f32.mrb[100].mxu0  ;;  %v5158_v10 = vpop.f32.mrb[100].mxu1 }
0x166c   :  { %v5165_v11 = vmax.f32 %v5158_v10, 1e-20  ;;  %v6362_v12 = vpop.f32.mrb[101].mxu0  ;;  %v6368_v32 = vpop.f32.mrb[101].mxu1 }
0x166d   :  { %v5120_v15 = vpop.f32.mrb[102].mxu0  ;;  %v5161_v5 = vpop.f32.mrb[102].mxu1 }
0x166e   :  { %6885 = vrcp.f32 %v5165_v11  ;;  %v5166_v20 = vmax.f32 %v5161_v5, 1e-20  ;;  %v6363_v25 = vpop.f32.mrb[103].mxu0  ;;  %v6369_v23 = vpop.f32.mrb[103].mxu1 }
0x1670   :  { %v6882_v24 = vpop.eup %6881  ;;  %6887 = vrcp.f32 %v5166_v20 }
0x1671   :  { %5052 = vperm.xlu1 %6570, %v6882_v24   ;;  %6889 = vrcp.f32 %v4808_v19 }
0x1672   :  { %v6884_v17 = vpop.eup %6883  ;;  %6891 = vrcp.f32 %v4809_v18 }
0x1673   :  { %5057 = vperm.xlu0 %6569, %v6884_v17  }
0x1678   :  { %v6886_v34 = vpop.eup %6885 }
0x1679   :  { %5171 = vperm.xlu1 %6570, %v6886_v34  }
0x167a   :  { %v6888_v35 = vpop.eup %6887 }
0x167b   :  { %5176 = vperm.xlu0 %6569, %v6888_v35   ;;  %v6890_v21 = vpop.eup %6889 }
0x167c   :  { %v6892_v27 = vpop.eup %6891 }
0x167d   :  { %4814 = vperm.xlu1 %6570, %v6890_v21  }
0x167f   :  { %4819 = vperm.xlu0 %6569, %v6892_v27  }
0x16e8   :  { %v4934_v50 = vpop.permute.xlu0 %4933 }
0x16e9   :  { %v4941_v37 = vmul.f32 %v4934_v50, %v8120_v51 }
0x16ea   :  { %v4939_v38 = vpop.permute.xlu1 %4938 }
0x16eb   :  { %v4942_v39 = vmul.f32 %v4939_v38, %v8122_v46  ;;  %5183 = vrot.lane.b32.xlu1 %v4941_v37, %s6973_s13 }
0x16ed   :  { %5185 = vrot.lane.b32.xlu0 %v4942_v39, %s6973_s13  ;;  %s8230_s13 = sld [smem:[#allocation16_spill]] }
0x16f0   :  { %v5053_v42 = vpop.permute.xlu1 %5052 }
0x16f1   :  { %v5060_v40 = vmul.f32 %v5053_v42, %v8124_v48 }
0x16f2   :  { %v5058_v43 = vpop.permute.xlu0 %5057 }
0x16f3   :  { %v5061_v0 = vmul.f32 %v5058_v43, %v8126_v55  ;;  %5191 = vrot.lane.b32.xlu1 %v5060_v40, %s6970_s0  ;;  %v5811_v54 = vld [vmem:[%s8230_s13] ss:$0 sm:$0xff] }
0x16f5   :  { %5193 = vrot.lane.b32.xlu0 %v5061_v0, %s6970_s0  ;;  %s8232_s0 = sld [smem:[#allocation20_spill]] }
0x16f8   :  { %v5172_v2 = vpop.permute.xlu1 %5171 }
0x16f9   :  { %v5179_v31 = vmul.f32 %v5172_v2, %v8128_v58 }
0x16fa   :  { %v5177_v22 = vpop.permute.xlu0 %5176 }
0x16fb   :  { %v5180_v26 = vmul.f32 %v5177_v22, %v5120_v15  ;;  %5199 = vrot.lane.b32.xlu1 %v5179_v31, %s6971_s5 }
0x16fc   :  { %v4815_v51 = vpop.permute.xlu1 %4814 }
0x16fd   :  { %5201 = vrot.lane.b32.xlu0 %v5180_v26, %s6971_s5  ;;  %v4822_v46 = vmul.f32 %v4815_v51, %v8116_v7  ;;  %s8233_s5 = sld [smem:[#allocation19_spill]] }
0x16fe   :  { %v4820_v63 = vpop.permute.xlu0 %4819 }
0x16ff   :  { %v4823_v33 = vmul.f32 %v4820_v63, %v8118_v3  ;;  %v6652_v3 = vld [vmem:[%s8231_s24] sm:$0xff]  }
0x1700   :  { %6391 = vmatpush3.bf16.msra.mxu1 %v6652_v3 }
0x1701   :  { %6392 = vmatprep.subr.bf16.mxu1 %v6966_v1 }
0x1704   :  { %6393 = vmatpush3.bf16.msra.mxu1 %v6653_v62 }
0x1705   :  { %6398 = vmatprep.subr.bf16.mxu1 %v6966_v1 }
0x175d   :  { %v5184_v36 = vpop.permute.xlu1 %5183 }
0x175e   :  { %v5205_v49 = vsel %vm210_vm2, %v4822_v46, %v5184_v36 }
0x175f   :  { %v5186_v56 = vpop.permute.xlu0 %5185 }
0x1760   :  { %v5206_v53 = vsel %vm210_vm2, %v4823_v33, %v5186_v56 }
0x1765   :  { %v5192_v6 = vpop.permute.xlu1 %5191 }
0x1766   :  { %v5207_v14 = vsel %vm1635_vm8, %v5205_v49, %v5192_v6 }
0x1767   :  { %v5194_v47 = vpop.permute.xlu0 %5193 }
0x1768   :  { %v5208_v60 = vsel %vm1635_vm8, %v5206_v53, %v5194_v47 }
0x176d   :  { %v5200_v48 = vpop.permute.xlu1 %5199 }
0x176e   :  { %v5209_v57 = vsel %vm1638_vm9, %v5207_v14, %v5200_v48 }
0x176f   :  { %v5202_v55 = vpop.permute.xlu0 %5201  ;;  %v5218_v59 = vadd.f32 %v5811_v54, %v5209_v57 }
0x1770   :  { %v5210_v7 = vsel %vm1638_vm9, %v5208_v60, %v5202_v55  ;;  %v6654_v55 = vld [vmem:[%s8232_s0] sm:$0xff]  }
0x1771   :  { %v5219_v45 = vadd.f32 %v5811_v54, %v5210_v7  ;;  %v6655_v7 = vld [vmem:[%s8232_s0 + $0x8] sm:$0xff]  }
0x1773   :  { %v5236_v61 = vpack.c.bf16 %v5219_v45, %v5218_v59  ;;  %v5820_v59 = vld [vmem:[%s8233_s5] ss:$0 sm:$0xff] }
0x1775   :  { %6387 = vmatmul.mubr.bf16.vlgmr.msra.gmra.mrb[104].mxu0 %v5236_v61 }
0x1848   :  { %v5319_v4 = vpop.f32.mrb[104].mxu0 }
0x1849   :  { %v5328_v8 = vmul.f32 0.70710677, %v5319_v4  ;;  %v6388_v58 = vpop.f32.mrb[105].mxu0  ;;  %v5326_v14 = vmul.f32 0.5, %v5319_v4 }
0x184a   :  { %v5322_v10 = vpop.f32.mrb[106].mxu0 }
0x184b   :  { %v5334_v11 = vand.u32 2147483647, %v5328_v8  ;;  %v5329_v12 = vmul.f32 0.70710677, %v5322_v10  ;;  %v6389_v32 = vpop.f32.mrb[107].mxu0  ;;  %vm5330_vm8 = vcmp.ge.f32.partialorder %v5328_v8, 0.0 }
0x184c   :  { %v5332_v36 = vsel %vm5330_vm8, 1.0, %v6975_v13  ;;  %v5327_v48 = vmul.f32 0.5, %v5322_v10 }
0x184d   :  { %v5336_v15 = vmul.f32 0.3275911, %v5334_v11  ;;  %v5335_v5 = vand.u32 2147483647, %v5329_v12  ;;  %v5362_v23 = vsub.f32 0.0, %v5334_v11  ;;  %vm5331_vm9 = vcmp.ge.f32.partialorder %v5329_v12, 0.0 }
0x184e   :  { %v5333_v47 = vsel %vm5331_vm9, 1.0, %v6975_v13 }
0x184f   :  { %v5338_v19 = vadd.f32 1.0, %v5336_v15  ;;  %v5337_v20 = vmul.f32 0.3275911, %v5335_v5  ;;  %v5363_v24 = vsub.f32 0.0, %v5335_v5  ;;  %v5364_v17 = vmul.f32 %v5362_v23, %v5334_v11 }
0x1851   :  { %6893 = vrcp.f32 %v5338_v19  ;;  %v5339_v25 = vadd.f32 1.0, %v5337_v20  ;;  %v5365_v27 = vmul.f32 %v5363_v24, %v5335_v5  ;;  %v5366_v29 = vmul.f32 1.442695, %v5364_v17 }
0x1853   :  { %6895 = vrcp.f32 %v5339_v25  ;;  %v5368_v50 = vmul.f32 1.442695, %v5365_v27 }
0x1854   :  { %6897 = vpow2.f32 %v5366_v29 }
0x1855   :  { %6899 = vpow2.f32 %v5368_v50 }
0x185b   :  { %v6894_v18 = vpop.eup %6893 }
0x185c   :  { %v5344_v34 = vmul.f32 1.0614054, %v6894_v18 }
0x185d   :  { %v6896_v35 = vpop.eup %6895 }
0x185e   :  { %v5346_v21 = vadd.f32 -1.4531521, %v5344_v34  ;;  %v5345_v28 = vmul.f32 1.0614054, %v6896_v35  ;;  %v6898_v2 = vpop.eup %6897 }
0x185f   :  { %v6900_v51 = vpop.eup %6899 }
0x1860   :  { %v5348_v30 = vmul.f32 %v6894_v18, %v5346_v21  ;;  %v5347_v16 = vadd.f32 -1.4531521, %v5345_v28 }
0x1862   :  { %v5350_v9 = vadd.f32 1.4214138, %v5348_v30  ;;  %v5349_v52 = vmul.f32 %v6896_v35, %v5347_v16 }
0x1864   :  { %v5352_v37 = vmul.f32 %v6894_v18, %v5350_v9  ;;  %v5351_v38 = vadd.f32 1.4214138, %v5349_v52 }
0x1866   :  { %v5354_v39 = vadd.f32 -0.28449672, %v5352_v37  ;;  %v5353_v41 = vmul.f32 %v6896_v35, %v5351_v38 }
0x1868   :  { %v5356_v42 = vmul.f32 %v6894_v18, %v5354_v39  ;;  %v5355_v40 = vadd.f32 -0.28449672, %v5353_v41 }
0x186a   :  { %v5358_v43 = vadd.f32 0.2548296, %v5356_v42  ;;  %v5357_v0 = vmul.f32 %v6896_v35, %v5355_v40 }
0x186c   :  { %v5360_v44 = vmul.f32 %v6894_v18, %v5358_v43  ;;  %v5359_v31 = vadd.f32 0.2548296, %v5357_v0 }
0x186e   :  { %v5370_v22 = vmul.f32 %v6898_v2, %v5360_v44  ;;  %v5361_v26 = vmul.f32 %v6896_v35, %v5359_v31 }
0x1870   :  { %v5372_v63 = vsub.f32 1.0, %v5370_v22  ;;  %v5371_v56 = vmul.f32 %v6900_v51, %v5361_v26 }
0x1872   :  { %v5374_v6 = vmul.f32 %v5372_v63, %v5332_v36  ;;  %v5373_v46 = vsub.f32 1.0, %v5371_v56 }
0x1874   :  { %v5376_v33 = vadd.f32 1.0, %v5374_v6  ;;  %v5375_v49 = vmul.f32 %v5373_v46, %v5333_v47 }
0x1876   :  { %v5377_v53 = vadd.f32 1.0, %v5375_v49  ;;  %v5378_v54 = vmul.f32 %v5376_v33, %v5326_v14 }
0x1878   :  { %v5379_v57 = vmul.f32 %v5377_v53, %v5327_v48 }
0x187a   :  { %v5384_v60 = vpack.c.bf16 %v5379_v57, %v5378_v54  ;;  %v6656_v57 = vld [vmem:[%s7142_s6] sm:$0xff]   ;;  %s6909_s6 = scalar_lea.vmem %s5638_s20, 256 }
0x187b   :  { %p6910_p0 = scmp.ne.s32.totalorder %s5638_s20, %s6909_s6  ;;  %p6915_p2 = scmp.lt.s32.totalorder %s6909_s6, %s6909_s6 }
0x187c   :  { %6395 = vmatmul.mubr.msk.bf16.vlgmr.msra.gmra.mrb[104].mxu1 %vm210_vm2, %v5384_v60  ;;  %v5824_v60 = vld [vmem:[%s7137_s12] ss:$0 sm:$0xff] }
0x187d   :  { %6402 = vmatprep.mubr.msk.bf16.mxu1 %vm6967_vm0, %v6966_v1  ;;  %6399 = vmatpush3.bf16.msra.mxu1 %v6654_v55  ;;  %p6916_p3 = por %p6915_p2, %p6914_p1 }
0x187e   :  { %6400 = vmatprep.subr.bf16.mxu1 %v6966_v1 }
0x187f   :  { %p6917_p4 = pnand %p6916_p3, %p6910_p0 }
0x1881   :  { %6401 = vmatpush3.bf16.msra.mxu1 %v6655_v7 }
0x1882   :  { %6406 = vmatprep.subr.bf16.mxu1 %v6966_v1 }
0x194f   :  { %v5441_v45 = vpop.f32.mrb[104].mxu1 }
0x1950   :  { %v5442_v61 = vadd.f32 %v5820_v59, %v5441_v45  ;;  %v6396_v3 = vpop.f32.mrb[105].mxu1 }
0x1951   :  { %v5444_v62 = vpop.f32.mrb[106].mxu1 }
0x1952   :  { %v5450_v4 = vmul.f32 0.70710677, %v5442_v61  ;;  %v5445_v8 = vadd.f32 %v5820_v59, %v5444_v62  ;;  %v6397_v58 = vpop.f32.mrb[107].mxu1  ;;  %v5448_v33 = vmul.f32 0.5, %v5442_v61  ;;  %v5828_v62 = vld [vmem:[%s7147_s27] ss:$0 sm:$0xff] }
0x1954   :  { %v5456_v10 = vand.u32 2147483647, %v5450_v4  ;;  %v5451_v11 = vmul.f32 0.70710677, %v5445_v8  ;;  %vm5452_vm6 = vcmp.ge.f32.partialorder %v5450_v4, 0.0  ;;  %v5449_v49 = vmul.f32 0.5, %v5445_v8 }
0x1955   :  { %v5454_v51 = vsel %vm5452_vm6, 1.0, %v6975_v13 }
0x1956   :  { %v5458_v12 = vmul.f32 0.3275911, %v5456_v10  ;;  %v5457_v32 = vand.u32 2147483647, %v5451_v11  ;;  %v5484_v20 = vsub.f32 0.0, %v5456_v10  ;;  %vm5453_vm7 = vcmp.ge.f32.partialorder %v5451_v11, 0.0 }
0x1957   :  { %v5455_v6 = vsel %vm5453_vm7, 1.0, %v6975_v13 }
0x1958   :  { %v5460_v15 = vadd.f32 1.0, %v5458_v12  ;;  %v5459_v5 = vmul.f32 0.3275911, %v5457_v32  ;;  %v5485_v25 = vsub.f32 0.0, %v5457_v32  ;;  %v5486_v24 = vmul.f32 %v5484_v20, %v5456_v10 }
0x195a   :  { %6901 = vrcp.f32 %v5460_v15  ;;  %v5461_v19 = vadd.f32 1.0, %v5459_v5  ;;  %v5487_v35 = vmul.f32 %v5485_v25, %v5457_v32  ;;  %v5488_v21 = vmul.f32 1.442695, %v5486_v24 }
0x195c   :  { %6903 = vrcp.f32 %v5461_v19  ;;  %v5490_v16 = vmul.f32 1.442695, %v5487_v35 }
0x195d   :  { %6905 = vpow2.f32 %v5488_v21 }
0x195e   :  { %6907 = vpow2.f32 %v5490_v16 }
0x1964   :  { %v6902_v23 = vpop.eup %6901 }
0x1965   :  { %v5466_v18 = vmul.f32 1.0614054, %v6902_v23 }
0x1966   :  { %v6904_v17 = vpop.eup %6903 }
0x1967   :  { %v5468_v34 = vadd.f32 -1.4531521, %v5466_v18  ;;  %v5467_v27 = vmul.f32 1.0614054, %v6904_v17  ;;  %v6906_v0 = vpop.eup %6905 }
0x1968   :  { %v6908_v22 = vpop.eup %6907 }
0x1969   :  { %v5470_v29 = vmul.f32 %v6902_v23, %v5468_v34  ;;  %v5469_v28 = vadd.f32 -1.4531521, %v5467_v27 }
0x196b   :  { %v5472_v30 = vadd.f32 1.4214138, %v5470_v29  ;;  %v5471_v9 = vmul.f32 %v6904_v17, %v5469_v28 }
0x196d   :  { %v5474_v50 = vmul.f32 %v6902_v23, %v5472_v30  ;;  %v5473_v52 = vadd.f32 1.4214138, %v5471_v9 }
0x196f   :  { %v5476_v37 = vadd.f32 -0.28449672, %v5474_v50  ;;  %v5475_v38 = vmul.f32 %v6904_v17, %v5473_v52 }
0x1971   :  { %v5478_v39 = vmul.f32 %v6902_v23, %v5476_v37  ;;  %v5477_v41 = vadd.f32 -0.28449672, %v5475_v38 }
0x1973   :  { %v5480_v42 = vadd.f32 0.2548296, %v5478_v39  ;;  %v5479_v40 = vmul.f32 %v6904_v17, %v5477_v41 }
0x1975   :  { %v5482_v43 = vmul.f32 %v6902_v23, %v5480_v42  ;;  %v5481_v44 = vadd.f32 0.2548296, %v5479_v40 }
0x1977   :  { %v5492_v2 = vmul.f32 %v6906_v0, %v5482_v43  ;;  %v5483_v31 = vmul.f32 %v6904_v17, %v5481_v44 }
0x1979   :  { %v5494_v26 = vsub.f32 1.0, %v5492_v2  ;;  %v5493_v63 = vmul.f32 %v6908_v22, %v5483_v31 }
0x197b   :  { %v5496_v36 = vmul.f32 %v5494_v26, %v5454_v51  ;;  %v5495_v56 = vsub.f32 1.0, %v5493_v63 }
0x197d   :  { %v5498_v46 = vadd.f32 1.0, %v5496_v36  ;;  %v5497_v47 = vmul.f32 %v5495_v56, %v5455_v6 }
0x197f   :  { %v5499_v14 = vadd.f32 1.0, %v5497_v47  ;;  %v5500_v48 = vmul.f32 %v5498_v46, %v5448_v33 }
0x1981   :  { %v5501_v53 = vmul.f32 %v5499_v14, %v5449_v49 }
0x1983   :  { %v5506_v54 = vpack.c.bf16 %v5501_v53, %v5500_v48 }
0x1985   :  { %6403 = vmatmul.mubr.msk.bf16.vlgmr.msra.gmra.mrb[108].mxu1 %vm210_vm2, %v5506_v54 }
0x1986   :  { %6408 = vmatprep.mubr.msk.bf16.mxu1 %vm6967_vm0, %v6966_v1  ;;  %6407 = vmatpush3.bf16.msra.mxu1 %v6656_v57 }
0x1a58   :  { %v5563_v55 = vpop.f32.mrb[108].mxu1 }
0x1a59   :  { %v6404_v7 = vpop.f32.mrb[109].mxu1  ;;  %v5564_v59 = vadd.f32 %v5824_v60, %v5563_v55 }
0x1a5a   :  { %v5566_v13 = vpop.f32.mrb[110].mxu1 }
0x1a5b   :  { %v5567_v45 = vadd.f32 %v5824_v60, %v5566_v13  ;;  %v6405_v61 = vpop.f32.mrb[111].mxu1 }
0x1a5d   :  { %v5572_v3 = vpack.c.bf16 %v5567_v45, %v5564_v59 }
0x1a5f   :  { %6409 = vmatmul.mubr.msk.bf16.vlgmr.msra.gmra.mrb[112].mxu1 %vm163_vm1, %v5572_v3 }
0x1b32   :  { %v5623_v4 = vpop.f32.mrb[112].mxu1 }
0x1b33   :  { %v5624_v8 = vadd.f32 %v5828_v62, %v5623_v4  ;;  %v6410_v58 = vpop.f32.mrb[113].mxu1 }
0x1b34   :  { %v5626_v10 = vpop.f32.mrb[114].mxu1 }
0x1b35   :  { %5630 = vst [vmem:[#allocation2] sm:$0xff] %v5624_v8  ;;  %v5627_v1 = vadd.f32 %v5828_v62, %v5626_v10  ;;  %v6411_v11 = vpop.f32.mrb[115].mxu1 }
0x1b37   :  { %5631 = vst [vmem:[#allocation2 + $0x8] sm:$0xff] %v5627_v1 }
0x1b38   :  { %6920 = shalt.err (!%p6917_p4)
}
0x1b39   :  { %s6921_s12 = scalar_lea.hbm %s7152_s4, 256 }
0x1b3a   :  { %p6922_p5 = scmp.ne.s32.totalorder %s7152_s4, %s6921_s12  ;;  %p6925_p6 = scmp.lt.u32.totalorder %s6921_s12, %s7152_s4 }
0x1b3c   :  { %p6927_p7 = pnand %p6925_p6, %p6922_p5 }
0x1b3e   :  { %6930 = shalt.err (!%p6927_p7)
}
0x1b3f   :  { %s6977_s27 = smov 128   ;;  %s6978_s15 = smov 8  }
0x1b40   :  { %5643 = dma.vmem_to_hbm [thread:$0]  %s5638_s20, 256, %s7152_s4, [#allocation3], %s6977_s27, %s6977_s27, %s6978_s15  }
0x1b41   :  { %6931 = dma.done.wait [#allocation3], 256  }
0x1b42   :  { %6932 = vsyncadd [#allocation3], 4294967040 }
0x1b43   :  { %5647 = vsyncpa [#allocation3], 1 }

</bundles_post_ra>
